<compile_context>
chip_gen: v5e
topology: v5e:2x2
jax: 0.10.0
libtpu: 0.0.40
codegen_flags: <defaults>
</compile_context>

<pallas_src>
import jax
import jax.numpy as jnp
from jax.experimental import pallas as pl
from jax.experimental.pallas import tpu as pltpu


def _pointnet_kernel(x_ref,
                     w1_ref, b1_ref, w2_ref, b2_ref, w3_ref, b3_ref,
                     w4_ref, b4_ref, w5_ref, b5_ref,
                     pf_ref, cf_ref,
                     mx_ref):
    nt = pl.program_id(1)
    n_tiles = pl.num_programs(1)

    def layer(h, w_ref, b_ref):
        # (C_out, C_in) @ (C_in, TN) on the MXU: bf16 inputs, f32 accumulation.
        y = jnp.dot(w_ref[...], h.astype(jnp.bfloat16),
                    preferred_element_type=jnp.float32)
        return jnp.maximum(y + b_ref[...], 0.0)      # bias + ReLU in f32

    x = x_ref[0]                                     # (C_in, TN) f32

    # point_features: C_in -> 64 -> 64 -> 64
    # (first layer has tiny K = C_in; kept on the MXU, negligible cost share)
    h = layer(x, w1_ref, b1_ref)
    h = layer(h, w2_ref, b2_ref)
    h = layer(h, w3_ref, b3_ref)
    pf_ref[0] = h.astype(pf_ref.dtype)               # lane-dense (64, TN) store

    # cloud_features: 64 -> 128 -> 1024
    c = layer(h, w4_ref, b4_ref)                     # (128, TN)

    # Layer 5 matmul WITHOUT bias/ReLU (deferred to the (1024, 1) epilogue;
    # exact because float add / ReLU are monotone and b5 is constant over N).
    y5 = jnp.dot(w5_ref[...], c.astype(jnp.bfloat16),
                 preferred_element_type=jnp.float32)  # (1024, TN) f32

    # Lane-fold the tile max down to LW lanes with elementwise (VPU) maxima of
    # lane-aligned slices; keep the XLU cross-lane reduce for the epilogue.
    lw = mx_ref.shape[1]
    tn = y5.shape[1]
    m = y5[:, :lw]
    for k in range(1, tn // lw):                     # static, small trip count
        m = jnp.maximum(m, y5[:, k * lw:(k + 1) * lw])

    @pl.when(nt == 0)
    def _():
        mx_ref[...] = m                              # reset accumulator per batch

    @pl.when(nt > 0)
    def _():
        mx_ref[...] = jnp.maximum(mx_ref[...], m)

    # Epilogue (once per batch): XLU reduce + deferred bias/ReLU + store.
    @pl.when(nt == n_tiles - 1)
    def _():
        full_max = jnp.max(mx_ref[...], axis=-1, keepdims=True)   # (1024, 1)
        cf_ref[0] = jnp.maximum(full_max + b5_ref[...], 0.0).astype(cf_ref.dtype)


def _pick_tile(n):
    # TN <= 512 keeps the (1024, TN) intermediate ~2 MiB (safe for v7x VMEM).
    for t in (512, 256, 128):
        if n % t == 0:
            return t
    return n   # small / odd N: single full-width tile


def pointnet_simple_generator(x_bcn, params):
    """x_bcn: (B, C_in, N) float32, PyTorch NCW layout.
    Returns (cloud_feat, point_feat) with shapes (B, 1024, 1) and (B, 64, N)."""
    B, C_in, N = x_bcn.shape
    TN = _pick_tile(N)
    NT = N // TN
    LW = 128 if TN % 128 == 0 else TN    # lane width of the max accumulator

    # bf16 weights for the MXU (cast once, halves weight VMEM); f32 biases.
    (w1, b1), (w2, b2), (w3, b3), (w4, b4), (w5, b5) = [
        (w.astype(jnp.bfloat16), b) for (w, b) in params]

    def full(a):
        nd = a.ndim
        return pl.BlockSpec(a.shape, lambda b, nt, _nd=nd: (0,) * _nd)

    point_feat, cloud_feat = pl.pallas_call(
        _pointnet_kernel,
        out_shape=(
            jax.ShapeDtypeStruct((B, 64, N), jnp.float32),
            jax.ShapeDtypeStruct((B, 1024, 1), jnp.float32),
        ),
        grid_spec=pltpu.PrefetchScalarGridSpec(
            num_scalar_prefetch=0,
            grid=(B, NT),
            in_specs=[
                pl.BlockSpec((1, C_in, TN), lambda b, nt: (b, 0, nt)),
                full(w1), full(b1),
                full(w2), full(b2),
                full(w3), full(b3),
                full(w4), full(b4),
                full(w5), full(b5),
            ],
            out_specs=[
                pl.BlockSpec((1, 64, TN), lambda b, nt: (b, 0, nt)),
                pl.BlockSpec((1, 1024, 1), lambda b, nt: (b, 0, 0)),
            ],
            scratch_shapes=[pltpu.VMEM((1024, LW), jnp.float32)],
        ),
        compiler_params=pltpu.CompilerParams(
            dimension_semantics=("parallel", "arbitrary"),
            vmem_limit_bytes=32 * 1024 * 1024),
    )(x_bcn, w1, b1, w2, b2, w3, b3, w4, b4, w5, b5)

    return cloud_feat, point_feat


def make_params(key, in_channels):
    """Deterministic Conv1d(k=1)+BN(eval) params, BN folded into the conv.
    Returns list of (W, b) with W: (C_out, C_in) and b: (C_out, 1)."""
    dims = [(in_channels, 64), (64, 64), (64, 64), (64, 128), (128, 1024)]
    params = []
    eps = 1e-5
    for (ci, co) in dims:
        key, kw, kb, kg, kbeta, km, kv = jax.random.split(key, 7)
        w = jax.random.normal(kw, (co, ci), jnp.float32) * 0.05          # conv weight
        b = jax.random.normal(kb, (co,), jnp.float32) * 0.05             # conv bias
        gamma = 1.0 + 0.1 * jax.random.normal(kg, (co,), jnp.float32)    # BN weight
        beta = 0.1 * jax.random.normal(kbeta, (co,), jnp.float32)        # BN bias
        mean = 0.1 * jax.random.normal(km, (co,), jnp.float32)           # running mean
        var = 1.0 + 0.1 * jax.random.uniform(kv, (co,), jnp.float32)     # running var
        scale = gamma / jnp.sqrt(var + eps)
        w_eff = w * scale[:, None]                                       # (C_out, C_in)
        b_eff = (scale * (b - mean) + beta)[:, None]                     # (C_out, 1)
        params.append((w_eff, b_eff))
    return params


def _reference(x_bcn, params):
    # Plain-JAX f32 reference of the folded forward pass (channels-first).
    h = x_bcn
    pf = None
    for i, (w, b) in enumerate(params):
        h = jnp.maximum(jnp.einsum('oc,bcn->bon', w, h) + b[None], 0.0)
        if i == 2:
            pf = h
    cf = jnp.max(h, axis=-1, keepdims=True)
    return cf, pf


if __name__ == "__main__":
    # Small pointnet-style shapes; N=1024 tiles as 2x512 so the fused
    # max-accumulation path across N-tiles is exercised.
    B, C_IN, N = 2, 4, 1024
    key = jax.random.PRNGKey(0)
    kx, kp = jax.random.split(key)
    x = jax.random.normal(kx, (B, C_IN, N), jnp.float32)                 # PyTorch NCW
    params = make_params(kp, C_IN)

    cloud_feat, point_feat = pointnet_simple_generator(x, params)
    cloud_feat = jax.block_until_ready(cloud_feat)
    point_feat = jax.block_until_ready(point_feat)

    assert cloud_feat.shape == (B, 1024, 1)
    assert point_feat.shape == (B, 64, N)

    cf_ref, pf_ref = _reference(x, params)
    # bf16 matmul inputs with f32 accumulation -> relaxed tolerance vs f32 ref.
    assert jnp.allclose(cloud_feat, cf_ref, atol=2e-2, rtol=2e-2), \
        float(jnp.max(jnp.abs(cloud_feat - cf_ref)))
    assert jnp.allclose(point_feat, pf_ref, atol=2e-2, rtol=2e-2), \
        float(jnp.max(jnp.abs(point_feat - pf_ref)))

    print("KERNEL_OK")
</pallas_src>

<mosaic_0001>
module attributes {stable_mosaic.version = 11 : i64} {
  func.func @_pointnet_kernel(%arg0: i32, %arg1: i32, %arg2: memref<1x4x512xf32, #tpu.memory_space<vmem>>, %arg3: memref<64x4xbf16, #tpu.memory_space<vmem>>, %arg4: memref<64x1xf32, #tpu.memory_space<vmem>>, %arg5: memref<64x64xbf16, #tpu.memory_space<vmem>>, %arg6: memref<64x1xf32, #tpu.memory_space<vmem>>, %arg7: memref<64x64xbf16, #tpu.memory_space<vmem>>, %arg8: memref<64x1xf32, #tpu.memory_space<vmem>>, %arg9: memref<128x64xbf16, #tpu.memory_space<vmem>>, %arg10: memref<128x1xf32, #tpu.memory_space<vmem>>, %arg11: memref<1024x128xbf16, #tpu.memory_space<vmem>>, %arg12: memref<1024x1xf32, #tpu.memory_space<vmem>>, %arg13: memref<1x64x512xf32, #tpu.memory_space<vmem>>, %arg14: memref<1x1024x1xf32, #tpu.memory_space<vmem>>, %arg15: memref<1024x128xf32, #tpu.memory_space<vmem>>) attributes {dimension_semantics = [#tpu.dimension_semantics<parallel>, #tpu.dimension_semantics<arbitrary>], iteration_bounds = array<i64: 2, 2>, scalar_prefetch = 0 : i64, scratch_operands = 1 : i64, tpu.core_type = #tpu.core_type<tc>, window_params = [{transform_indices = @transform_0, window_bounds = array<i64: 1, 4, 512>}, {pipeline_mode = #tpu.pipeline_mode<synchronous>, transform_indices = @transform_1, window_bounds = array<i64: 64, 4>}, {pipeline_mode = #tpu.pipeline_mode<synchronous>, transform_indices = @transform_2, window_bounds = array<i64: 64, 1>}, {pipeline_mode = #tpu.pipeline_mode<synchronous>, transform_indices = @transform_3, window_bounds = array<i64: 64, 64>}, {pipeline_mode = #tpu.pipeline_mode<synchronous>, transform_indices = @transform_4, window_bounds = array<i64: 64, 1>}, {pipeline_mode = #tpu.pipeline_mode<synchronous>, transform_indices = @transform_5, window_bounds = array<i64: 64, 64>}, {pipeline_mode = #tpu.pipeline_mode<synchronous>, transform_indices = @transform_6, window_bounds = array<i64: 64, 1>}, {pipeline_mode = #tpu.pipeline_mode<synchronous>, transform_indices = @transform_7, window_bounds = array<i64: 128, 64>}, {pipeline_mode = #tpu.pipeline_mode<synchronous>, transform_indices = @transform_8, window_bounds = array<i64: 128, 1>}, {pipeline_mode = #tpu.pipeline_mode<synchronous>, transform_indices = @transform_9, window_bounds = array<i64: 1024, 128>}, {pipeline_mode = #tpu.pipeline_mode<synchronous>, transform_indices = @transform_10, window_bounds = array<i64: 1024, 1>}, {transform_indices = @transform_11, window_bounds = array<i64: 1, 64, 512>}, {transform_indices = @transform_12, window_bounds = array<i64: 1, 1024, 1>}]} {
    %c0 = arith.constant 0 : index
    %c0_0 = arith.constant 0 : index
    %c0_1 = arith.constant 0 : index
    %0 = vector.load %arg2[%c0, %c0_0, %c0_1] : memref<1x4x512xf32, #tpu.memory_space<vmem>>, vector<1x4x512xf32>
    %1 = vector.shape_cast %0 : vector<1x4x512xf32> to vector<4x512xf32>
    %c0_2 = arith.constant 0 : index
    %c0_3 = arith.constant 0 : index
    %2 = vector.load %arg3[%c0_2, %c0_3] : memref<64x4xbf16, #tpu.memory_space<vmem>>, vector<64x4xbf16>
    %3 = arith.truncf %1 : vector<4x512xf32> to vector<4x512xbf16>
    %cst = arith.constant dense<0.000000e+00> : vector<64x512xf32>
    %4 = tpu.matmul %2, %3, %cst {dimension_numbers = #tpu.dot_dimension_numbers<[1], [0], [0], [1], [0, 0, 1, 1], [], []>} : vector<64x4xbf16>, vector<4x512xbf16>, vector<64x512xf32> -> vector<64x512xf32>
    %c0_4 = arith.constant 0 : index
    %c0_5 = arith.constant 0 : index
    %5 = vector.load %arg4[%c0_4, %c0_5] : memref<64x1xf32, #tpu.memory_space<vmem>>, vector<64x1xf32>
    %6 = vector.broadcast %5 : vector<64x1xf32> to vector<64x512xf32>
    %7 = arith.addf %4, %6 : vector<64x512xf32>
    %cst_6 = arith.constant 0.000000e+00 : f32
    %8 = vector.broadcast %cst_6 : f32 to vector<64x512xf32>
    %9 = arith.maximumf %7, %8 : vector<64x512xf32>
    %c0_7 = arith.constant 0 : index
    %c0_8 = arith.constant 0 : index
    %10 = vector.load %arg5[%c0_7, %c0_8] : memref<64x64xbf16, #tpu.memory_space<vmem>>, vector<64x64xbf16>
    %11 = arith.truncf %9 : vector<64x512xf32> to vector<64x512xbf16>
    %cst_9 = arith.constant dense<0.000000e+00> : vector<64x512xf32>
    %12 = tpu.matmul %10, %11, %cst_9 {dimension_numbers = #tpu.dot_dimension_numbers<[1], [0], [0], [1], [0, 0, 1, 1], [], []>} : vector<64x64xbf16>, vector<64x512xbf16>, vector<64x512xf32> -> vector<64x512xf32>
    %c0_10 = arith.constant 0 : index
    %c0_11 = arith.constant 0 : index
    %13 = vector.load %arg6[%c0_10, %c0_11] : memref<64x1xf32, #tpu.memory_space<vmem>>, vector<64x1xf32>
    %14 = vector.broadcast %13 : vector<64x1xf32> to vector<64x512xf32>
    %15 = arith.addf %12, %14 : vector<64x512xf32>
    %cst_12 = arith.constant 0.000000e+00 : f32
    %16 = vector.broadcast %cst_12 : f32 to vector<64x512xf32>
    %17 = arith.maximumf %15, %16 : vector<64x512xf32>
    %c0_13 = arith.constant 0 : index
    %c0_14 = arith.constant 0 : index
    %18 = vector.load %arg7[%c0_13, %c0_14] : memref<64x64xbf16, #tpu.memory_space<vmem>>, vector<64x64xbf16>
    %19 = arith.truncf %17 : vector<64x512xf32> to vector<64x512xbf16>
    %cst_15 = arith.constant dense<0.000000e+00> : vector<64x512xf32>
    %20 = tpu.matmul %18, %19, %cst_15 {dimension_numbers = #tpu.dot_dimension_numbers<[1], [0], [0], [1], [0, 0, 1, 1], [], []>} : vector<64x64xbf16>, vector<64x512xbf16>, vector<64x512xf32> -> vector<64x512xf32>
    %c0_16 = arith.constant 0 : index
    %c0_17 = arith.constant 0 : index
    %21 = vector.load %arg8[%c0_16, %c0_17] : memref<64x1xf32, #tpu.memory_space<vmem>>, vector<64x1xf32>
    %22 = vector.broadcast %21 : vector<64x1xf32> to vector<64x512xf32>
    %23 = arith.addf %20, %22 : vector<64x512xf32>
    %cst_18 = arith.constant 0.000000e+00 : f32
    %24 = vector.broadcast %cst_18 : f32 to vector<64x512xf32>
    %25 = arith.maximumf %23, %24 : vector<64x512xf32>
    %c0_19 = arith.constant 0 : index
    %c0_20 = arith.constant 0 : index
    %c0_21 = arith.constant 0 : index
    %26 = vector.load %arg13[%c0_19, %c0_20, %c0_21] : memref<1x64x512xf32, #tpu.memory_space<vmem>>, vector<1x64x512xf32>
    %27 = vector.shape_cast %26 : vector<1x64x512xf32> to vector<64x512xf32>
    %28 = vector.shape_cast %25 : vector<64x512xf32> to vector<1x64x512xf32>
    tpu.vector_store %arg13[%c0_19, %c0_20, %c0_21], %28 {strides = array<i32>} : memref<1x64x512xf32, #tpu.memory_space<vmem>>, vector<1x64x512xf32>,
    %c0_22 = arith.constant 0 : index
    %c0_23 = arith.constant 0 : index
    %29 = vector.load %arg9[%c0_22, %c0_23] : memref<128x64xbf16, #tpu.memory_space<vmem>>, vector<128x64xbf16>
    %30 = arith.truncf %25 : vector<64x512xf32> to vector<64x512xbf16>
    %cst_24 = arith.constant dense<0.000000e+00> : vector<128x512xf32>
    %31 = tpu.matmul %29, %30, %cst_24 {dimension_numbers = #tpu.dot_dimension_numbers<[1], [0], [0], [1], [0, 0, 1, 1], [], []>} : vector<128x64xbf16>, vector<64x512xbf16>, vector<128x512xf32> -> vector<128x512xf32>
    %c0_25 = arith.constant 0 : index
    %c0_26 = arith.constant 0 : index
    %32 = vector.load %arg10[%c0_25, %c0_26] : memref<128x1xf32, #tpu.memory_space<vmem>>, vector<128x1xf32>
    %33 = vector.broadcast %32 : vector<128x1xf32> to vector<128x512xf32>
    %34 = arith.addf %31, %33 : vector<128x512xf32>
    %cst_27 = arith.constant 0.000000e+00 : f32
    %35 = vector.broadcast %cst_27 : f32 to vector<128x512xf32>
    %36 = arith.maximumf %34, %35 : vector<128x512xf32>
    %c0_28 = arith.constant 0 : index
    %c0_29 = arith.constant 0 : index
    %37 = vector.load %arg11[%c0_28, %c0_29] : memref<1024x128xbf16, #tpu.memory_space<vmem>>, vector<1024x128xbf16>
    %38 = arith.truncf %36 : vector<128x512xf32> to vector<128x512xbf16>
    %cst_30 = arith.constant dense<0.000000e+00> : vector<1024x512xf32>
    %39 = tpu.matmul %37, %38, %cst_30 {dimension_numbers = #tpu.dot_dimension_numbers<[1], [0], [0], [1], [0, 0, 1, 1], [], []>} : vector<1024x128xbf16>, vector<128x512xbf16>, vector<1024x512xf32> -> vector<1024x512xf32>
    %40 = vector.extract_strided_slice %39 {offsets = [0, 0], sizes = [1024, 128], strides = [1, 1]} : vector<1024x512xf32> to vector<1024x128xf32>
    %41 = vector.extract_strided_slice %39 {offsets = [0, 128], sizes = [1024, 128], strides = [1, 1]} : vector<1024x512xf32> to vector<1024x128xf32>
    %42 = arith.maximumf %40, %41 : vector<1024x128xf32>
    %43 = vector.extract_strided_slice %39 {offsets = [0, 256], sizes = [1024, 128], strides = [1, 1]} : vector<1024x512xf32> to vector<1024x128xf32>
    %44 = arith.maximumf %42, %43 : vector<1024x128xf32>
    %45 = vector.extract_strided_slice %39 {offsets = [0, 384], sizes = [1024, 128], strides = [1, 1]} : vector<1024x512xf32> to vector<1024x128xf32>
    %46 = arith.maximumf %44, %45 : vector<1024x128xf32>
    %c0_i32 = arith.constant 0 : i32
    %47 = arith.cmpi eq, %arg1, %c0_i32 : i32
    %48 = arith.extui %47 : i1 to i32
    %c0_i32_31 = arith.constant 0 : i32
    %49 = arith.cmpi ne, %48, %c0_i32_31 : i32
    scf.if %49 {
      %c0_35 = arith.constant 0 : index
      %c0_36 = arith.constant 0 : index
      %56 = vector.load %arg15[%c0_35, %c0_36] : memref<1024x128xf32, #tpu.memory_space<vmem>>, vector<1024x128xf32>
      tpu.vector_store %arg15[%c0_35, %c0_36], %46 {strides = array<i32>} : memref<1024x128xf32, #tpu.memory_space<vmem>>, vector<1024x128xf32>,
    } else {
    }
    %c0_i32_32 = arith.constant 0 : i32
    %50 = arith.cmpi sgt, %arg1, %c0_i32_32 : i32
    %51 = arith.extui %50 : i1 to i32
    %c0_i32_33 = arith.constant 0 : i32
    %52 = arith.cmpi ne, %51, %c0_i32_33 : i32
    scf.if %52 {
      %c0_35 = arith.constant 0 : index
      %c0_36 = arith.constant 0 : index
      %56 = vector.load %arg15[%c0_35, %c0_36] : memref<1024x128xf32, #tpu.memory_space<vmem>>, vector<1024x128xf32>
      %57 = arith.maximumf %56, %46 : vector<1024x128xf32>
      %c0_37 = arith.constant 0 : index
      %c0_38 = arith.constant 0 : index
      %58 = vector.load %arg15[%c0_37, %c0_38] : memref<1024x128xf32, #tpu.memory_space<vmem>>, vector<1024x128xf32>
      tpu.vector_store %arg15[%c0_37, %c0_38], %57 {strides = array<i32>} : memref<1024x128xf32, #tpu.memory_space<vmem>>, vector<1024x128xf32>,
    } else {
    }
    %c1_i32 = arith.constant 1 : i32
    %53 = arith.cmpi eq, %arg1, %c1_i32 : i32
    %54 = arith.extui %53 : i1 to i32
    %c0_i32_34 = arith.constant 0 : i32
    %55 = arith.cmpi ne, %54, %c0_i32_34 : i32
    scf.if %55 {
      %c0_35 = arith.constant 0 : index
      %c0_36 = arith.constant 0 : index
      %56 = vector.load %arg15[%c0_35, %c0_36] : memref<1024x128xf32, #tpu.memory_space<vmem>>, vector<1024x128xf32>
      %cst_37 = arith.constant dense<0xFF800000> : vector<1024xf32>
      %57 = vector.multi_reduction <maximumf>, %56, %cst_37 [1] : vector<1024x128xf32> to vector<1024xf32>
      %58 = vector.shape_cast %57 : vector<1024xf32> to vector<1024x1xf32>
      %c0_38 = arith.constant 0 : index
      %c0_39 = arith.constant 0 : index
      %59 = vector.load %arg12[%c0_38, %c0_39] : memref<1024x1xf32, #tpu.memory_space<vmem>>, vector<1024x1xf32>
      %60 = arith.addf %58, %59 : vector<1024x1xf32>
      %cst_40 = arith.constant 0.000000e+00 : f32
      %61 = vector.broadcast %cst_40 : f32 to vector<1024x1xf32>
      %62 = arith.maximumf %60, %61 : vector<1024x1xf32>
      %c0_41 = arith.constant 0 : index
      %c0_42 = arith.constant 0 : index
      %c0_43 = arith.constant 0 : index
      %63 = vector.load %arg14[%c0_41, %c0_42, %c0_43] : memref<1x1024x1xf32, #tpu.memory_space<vmem>>, vector<1x1024x1xf32>
      %64 = vector.shape_cast %63 : vector<1x1024x1xf32> to vector<1024x1xf32>
      %65 = vector.shape_cast %62 : vector<1024x1xf32> to vector<1x1024x1xf32>
      tpu.vector_store %arg14[%c0_41, %c0_42, %c0_43], %65 {strides = array<i32>} : memref<1x1024x1xf32, #tpu.memory_space<vmem>>, vector<1x1024x1xf32>,
    } else {
    }
    return
  }
  func.func @transform_0(%arg0: i32, %arg1: i32) -> (i32, i32, i32) {
    %c0_i32 = arith.constant 0 : i32
    %c0_i32_0 = arith.constant 0 : i32
    return %arg0, %c0_i32, %arg1 : i32, i32, i32
  }
  func.func @transform_1(%arg0: i32, %arg1: i32) -> (i32, i32) {
    %c0_i32 = arith.constant 0 : i32
    %c0_i32_0 = arith.constant 0 : i32
    %c0_i32_1 = arith.constant 0 : i32
    return %c0_i32, %c0_i32_0 : i32, i32
  }
  func.func @transform_2(%arg0: i32, %arg1: i32) -> (i32, i32) {
    %c0_i32 = arith.constant 0 : i32
    %c0_i32_0 = arith.constant 0 : i32
    %c0_i32_1 = arith.constant 0 : i32
    return %c0_i32, %c0_i32_0 : i32, i32
  }
  func.func @transform_3(%arg0: i32, %arg1: i32) -> (i32, i32) {
    %c0_i32 = arith.constant 0 : i32
    %c0_i32_0 = arith.constant 0 : i32
    %c0_i32_1 = arith.constant 0 : i32
    return %c0_i32, %c0_i32_0 : i32, i32
  }
  func.func @transform_4(%arg0: i32, %arg1: i32) -> (i32, i32) {
    %c0_i32 = arith.constant 0 : i32
    %c0_i32_0 = arith.constant 0 : i32
    %c0_i32_1 = arith.constant 0 : i32
    return %c0_i32, %c0_i32_0 : i32, i32
  }
  func.func @transform_5(%arg0: i32, %arg1: i32) -> (i32, i32) {
    %c0_i32 = arith.constant 0 : i32
    %c0_i32_0 = arith.constant 0 : i32
    %c0_i32_1 = arith.constant 0 : i32
    return %c0_i32, %c0_i32_0 : i32, i32
  }
  func.func @transform_6(%arg0: i32, %arg1: i32) -> (i32, i32) {
    %c0_i32 = arith.constant 0 : i32
    %c0_i32_0 = arith.constant 0 : i32
    %c0_i32_1 = arith.constant 0 : i32
    return %c0_i32, %c0_i32_0 : i32, i32
  }
  func.func @transform_7(%arg0: i32, %arg1: i32) -> (i32, i32) {
    %c0_i32 = arith.constant 0 : i32
    %c0_i32_0 = arith.constant 0 : i32
    %c0_i32_1 = arith.constant 0 : i32
    return %c0_i32, %c0_i32_0 : i32, i32
  }
  func.func @transform_8(%arg0: i32, %arg1: i32) -> (i32, i32) {
    %c0_i32 = arith.constant 0 : i32
    %c0_i32_0 = arith.constant 0 : i32
    %c0_i32_1 = arith.constant 0 : i32
    return %c0_i32, %c0_i32_0 : i32, i32
  }
  func.func @transform_9(%arg0: i32, %arg1: i32) -> (i32, i32) {
    %c0_i32 = arith.constant 0 : i32
    %c0_i32_0 = arith.constant 0 : i32
    %c0_i32_1 = arith.constant 0 : i32
    return %c0_i32, %c0_i32_0 : i32, i32
  }
  func.func @transform_10(%arg0: i32, %arg1: i32) -> (i32, i32) {
    %c0_i32 = arith.constant 0 : i32
    %c0_i32_0 = arith.constant 0 : i32
    %c0_i32_1 = arith.constant 0 : i32
    return %c0_i32, %c0_i32_0 : i32, i32
  }
  func.func @transform_11(%arg0: i32, %arg1: i32) -> (i32, i32, i32) {
    %c0_i32 = arith.constant 0 : i32
    %c0_i32_0 = arith.constant 0 : i32
    return %arg0, %c0_i32, %arg1 : i32, i32, i32
  }
  func.func @transform_12(%arg0: i32, %arg1: i32) -> (i32, i32, i32) {
    %c0_i32 = arith.constant 0 : i32
    %c0_i32_0 = arith.constant 0 : i32
    %c0_i32_1 = arith.constant 0 : i32
    return %arg0, %c0_i32, %c0_i32_0 : i32, i32, i32
  }
}

</mosaic_0001>

<bundles_post_ra>
// kernel: tpu_custom_call.1
= control target key start
LH: loop header
LB: loop body
LE: loop exit
PB: predicated region body
PF: predicated region fallthrough
CT: control target
= control target key end

     0   :  { %s8567_s0 = inlined_call_operand.vmem [shape: f32[2,4,1024], index: 0, kind: input, shape index: {}]   ;;  %s8568_s1 = inlined_call_operand.vmem [shape: bf16[64,4], index: 1, kind: input, shape index: {}]   ;;  %s8569_s2 = inlined_call_operand.vmem [shape: f32[64,1], index: 2, kind: input, shape index: {}]   ;;  %s8570_s3 = inlined_call_operand.vmem [shape: bf16[64,64], index: 3, kind: input, shape index: {}]   ;;  %s8571_s4 = inlined_call_operand.vmem [shape: f32[64,1], index: 4, kind: input, shape index: {}]   ;;  %s8572_s5 = inlined_call_operand.vmem [shape: bf16[64,64], index: 5, kind: input, shape index: {}]   ;;  %s8573_s6 = inlined_call_operand.vmem [shape: f32[64,1], index: 6, kind: input, shape index: {}]   ;;  %s8574_s7 = inlined_call_operand.vmem [shape: bf16[128,64], index: 7, kind: input, shape index: {}]   ;;  %s8575_s8 = inlined_call_operand.vmem [shape: f32[128,1], index: 8, kind: input, shape index: {}]   ;;  %s8576_s9 = inlined_call_operand.vmem [shape: bf16[1024,128], index: 9, kind: input, shape index: {}]   ;;  %s8577_s10 = inlined_call_operand.vmem [shape: f32[1024,1], index: 10, kind: input, shape index: {}]   ;;  %s8578_s11 = inlined_call_operand.hbm [shape: f32[2,64,1024], index: 11, kind: output, shape index: {0}]   ;;  %s8579_s12 = inlined_call_operand.vmem [shape: f32[2,1024,1], index: 12, kind: output, shape index: {1}]  }
   0x1   :  { %8592 = sst [smem:[#allocation98_spill]] %s8578_s11 }
   0x2   :  { %18 = vsyncpa [#allocation4], 0 }
   0x3   :  { %20 = vsyncpa [#allocation4 + $0x1], 0  ;;  %s6277_s21 = smov 0   ;;  %s6279_s22 = smov 0  }
   0x4   :  { %s6281_s23 = smov 0   ;;  %s6283_s24 = smov 0  }
   0x5   :  { %s6285_s25 = smov 0   ;;  %s6287_s26 = smov 0  }
   0x6   :  { %s6289_s27 = smov 0   ;;  %s6291_s28 = smov 0  }
   0x7 LB: > { %8593 = sst [smem:[#allocation6_spill]] %s6178_s21  ;;  %s5513_s29 = sadd.s32 4294967295, %s6206_s28   ;;  %s6206_s28 = sphi %s6291_s28, %s26_s28   ;;  %s6202_s27 = sphi %s6289_s27, %s8899_s27   ;;  %s6198_s26 = sphi %s6287_s26, %s8898_s26   ;;  %s6194_s25 = sphi %s6285_s25, %s8897_s25   ;;  %s6190_s24 = sphi %s6283_s24, %s8896_s24   ;;  %s6186_s23 = sphi %s6281_s23, %s8895_s23   ;;  %s6182_s22 = sphi %s6279_s22, %s8901_s22   ;;  %s6178_s21 = sphi %s6277_s21, %s8900_s21  }
   0x8   : > { %8594 = sst [smem:[#allocation7_spill]] %s6186_s23  ;;  %s5514_s30 = sadd.s32 4294967294, %s6206_s28  }
   0x9   : > { %8595 = sst [smem:[#allocation8_spill]] %s6198_s26  ;;  %s35_s13 = sadd.s32 1, %s6198_s26 }
   0xa   : > { %8596 = sst [smem:[#allocation9_spill]] %s6202_s27  ;;  %p36_p0 = scmp.ge.s32.totalorder %s35_s13, 2 }
   0xb   : > { %8597 = sst [smem:[#allocation10_spill]] %s6206_s28  ;;  %s38_s14 = sadd.s32 1, %s6202_s27 }
   0xc   : > { %p295_p1 = scmp.ne.s32.totalorder %s6186_s23, %s6182_s22  ;;  %p296_p2 = scmp.eq.s32.totalorder %s5513_s29, 3 }
   0xd   : > { %s8903_s13 = smov (%p36_p0, %s35_s13), 0  ;;  %s8905_s14 = smov (!%p36_p0, %s38_s14), %s6202_s27 }
   0xe   : > { %8598 = sst [smem:[#allocation11_spill]] %s8903_s13  ;;  %s281_s15 = ssub.s32 %s6198_s26, %s8903_s13 }
   0xf   : > { %p6328_p3 = por %p296_p2, %p295_p1  ;;  %p40_p4 = scmp.ge.s32.totalorder %s8905_s14, 2 }
  0x10   : > { %p301_p5 = scmp.ne.s32.totalorder %s6182_s22, %s6178_s21  ;;  %p302_p6 = scmp.eq.s32.totalorder %s5514_s30, 3 }
  0x11   : > { %s8599_s16 = scalar_select %p6328_p3, 1, 0 }
  0x12   : > { %p5517_p7 = scmp.ge.s32.totalorder %s6206_s28, 1  ;;  %s8907_s14 = smov (%p40_p4, %s8905_s14), 0 }
  0x13   : > { %8600 = sst [smem:[#allocation12_spill]] %s8599_s16  ;;  %p6337_p8 = por %p302_p6, %p301_p5 }
  0x14   : > { %8601 = sst [smem:[#allocation13_spill]] %s8907_s14  ;;  %p389_p9 = scmp.lt.s32.totalorder %s6206_s28, 5 }
  0x15   : > { %s8602_s17 = scalar_select %p6337_p8, 1, 0 }
  0x16   : > { %s280_s18 = ssub.s32 %s6202_s27, %s8907_s14  ;;  %s285_s19 = sadd.s32 1, %s6186_s23 }
  0x17   : > { %8603 = sst [smem:[#allocation14_spill]] %s8602_s17  ;;  %s282_s20 = sor.u32 %s281_s15, %s280_s18 }
  0x18   : > { %p390_p10 = pnand %p5517_p7, %p389_p9  ;;  %p283_p11 = scmp.eq.s32.totalorder %s282_s20, 0 }
  0x1a   : > { %s6346_s29 = scalar_select %p283_p11, %s6186_s23, %s285_s19  }
  0x1b   : > { %393 = sbr.rel (%p390_p10) target bundleno = 2880 (0xb40), region = 64 }
  0x1c   : > { %8604 = sst [smem:[#allocation15_spill]] %s6346_s29 }
  0x20   : > { %v490_v0 = vld [vmem:[%s8569_s2 + $0x30] sm:$0xff]  ;;  %v488_v1 = vld [vmem:[%s8569_s2 + $0x20] sm:$0xff]  ;;  %s6355_s17 = sshll.u32 %s6190_s24, 2  ;;  %p441_p12 = scmp.lt.s32.totalorder %s6194_s25, 1  ;;  %v6208_v2 = vmov 0   ;;  %v491_v4 = vld [vmem:[%s8569_s2 + $0x38] sm:$0xff] }
  0x21   : > { %6110 = vset.pattern.permute.xlu1 %v6208_v2  ;;  %6109 = vset.pattern.permute.xlu0 %v6208_v2  ;;  %p443_p13 = scmp.lt.s32.totalorder %s6355_s17, 7  ;;  %v486_v3 = vld [vmem:[%s8569_s2 + $0x10] sm:$0xff]  ;;  %v489_v5 = vld [vmem:[%s8569_s2 + $0x28] sm:$0xff]  ;;  %v487_v8 = vld [vmem:[%s8569_s2 + $0x18] sm:$0xff]  ;;  %vm565_vm0 = vcmask 1041408   ;;  %vm552_vm1 = vcmask 31744  }
  0x22   : > { %524 = vperm.xlu0 %6109, %v490_v0   ;;  %514 = vperm.xlu1 %6110, %v488_v1   ;;  %s442_s26 = scalar_select %p441_p12, %s6194_s25, 1  ;;  %v485_v9 = vld [vmem:[%s8569_s2 + $0x8] sm:$0xff]  ;;  %v484_v10 = vld [vmem:[%s8569_s2] sm:$0xff]  ;;  %v756_v22 = vld [vmem:[%s8571_s4 + $0x30] sm:$0xff]  ;;  %vm818_vm2 = vcmask 523264  }
  0x23   : > { %s444_s18 = scalar_select %p443_p13, %s6355_s17, 7  ;;  %6111 = vset.pattern.permute.xlu2 %v6208_v2  ;;  %v5950_v21 = vld [vmem:[%s8568_s1] sm:$0xff]  ;;  %v757_v26 = vld [vmem:[%s8571_s4 + $0x38] sm:$0xff]  ;;  %v755_v27 = vld [vmem:[%s8571_s4 + $0x28] sm:$0xff] }
  0x24   : > { %s5520_s21 = sshll.u32 %s442_s26, 3  ;;  %s5949_s19 = sshll.u32 %s442_s26, 10  ;;  %504 = vperm.xlu2 %6111, %v486_v3   ;;  %v754_v25 = vld [vmem:[%s8571_s4 + $0x20] sm:$0xff]  ;;  %v753_v28 = vld [vmem:[%s8571_s4 + $0x18] sm:$0xff]  ;;  %v752_v29 = vld [vmem:[%s8571_s4 + $0x10] sm:$0xff] }
  0x25   : > { %s446_s20 = sadd.s32 %s5520_s21, %s444_s18  ;;  %s6367_s27 = scalar_lea.vmem %s8579_s12, %s5949_s19  ;;  %v5951_v30 = vld [vmem:[%s8568_s1 + $0x8] sm:$0xff]  ;;  %v750_v31 = vld [vmem:[%s8571_s4] sm:$0xff]  ;;  %v1009_v32 = vld [vmem:[%s8573_s6 + $0x30] sm:$0xff] }
  0x26   : > { %s5521_s29 = sshll.u32 %s446_s20, 2  ;;  %v751_v33 = vld [vmem:[%s8571_s4 + $0x8] sm:$0xff]  ;;  %v1010_v34 = vld [vmem:[%s8573_s6 + $0x38] sm:$0xff]  ;;  %v1007_v36 = vld [vmem:[%s8573_s6 + $0x20] sm:$0xff]  ;;  %s430_s30 = sand.u32 1, %s6182_s22  }
  0x27   : > { %s448_s26 = scalar_lea.vmem %s8567_s0, %s5521_s29  ;;  %v1008_v35 = vld [vmem:[%s8573_s6 + $0x28] sm:$0xff]  ;;  %v5952_v37 = vld [vmem:[%s8568_s1 + $0x10] sm:$0xff]  ;;  %v1003_v39 = vld [vmem:[%s8573_s6] sm:$0xff]  ;;  %s5518_s13 = sshll.u32 %s430_s30, 8 }
  0x28   : > { %v457_v6 = vld [vmem:[%s448_s26] sm:$0xff]  ;;  %v458_v7 = vld [vmem:[%s448_s26 + $0x8] sm:$0xff]  ;;  %v1005_v38 = vld [vmem:[%s8573_s6 + $0x10] sm:$0xff]  ;;  %s6690_s15 = scalar_lea.vmem [#allocation3], %s5518_s13  ;;  %p5940_p0 = scmp.ne.s32.totalorder %s6190_s24, 0 }
  0x29   : > { %469 = vst [vmem:[#allocation1] ss:$2 sm:$0xff] %v457_v6  ;;  %v1006_v40 = vld [vmem:[%s8573_s6 + $0x18] sm:$0xff]  ;;  %v1004_v41 = vld [vmem:[%s8573_s6 + $0x8] sm:$0xff]  ;;  %v1309_v43 = vld [vmem:[%s8575_s8 + $0x70] sm:$0xff] }
  0x2a   : > { %529 = vperm.xlu0 %6109, %v491_v4   ;;  %519 = vperm.xlu1 %6110, %v489_v5   ;;  %471 = vst [vmem:[#allocation1 + $0x10] ss:$2 sm:$0xff] %v458_v7  ;;  %v1310_v42 = vld [vmem:[%s8575_s8 + $0x78] sm:$0xff]  ;;  %v1307_v45 = vld [vmem:[%s8575_s8 + $0x60] sm:$0xff]  ;;  %v1305_v46 = vld [vmem:[%s8575_s8 + $0x50] sm:$0xff] }
  0x2b   : > { %v5953_v44 = vld [vmem:[%s8568_s1 + $0x18] sm:$0xff]  ;;  %v1308_v47 = vld [vmem:[%s8575_s8 + $0x68] sm:$0xff]  ;;  %v1303_v50 = vld [vmem:[%s8575_s8 + $0x40] sm:$0xff] }
  0x2c   : > { %509 = vperm.xlu2 %6111, %v487_v8   ;;  %v1306_v48 = vld [vmem:[%s8575_s8 + $0x58] sm:$0xff]  ;;  %v1304_v49 = vld [vmem:[%s8575_s8 + $0x48] sm:$0xff]  ;;  %v1301_v51 = vld [vmem:[%s8575_s8 + $0x30] sm:$0xff] }
  0x2d   : > { %v1299_v52 = vld [vmem:[%s8575_s8 + $0x20] sm:$0xff]  ;;  %v1302_v53 = vld [vmem:[%s8575_s8 + $0x38] sm:$0xff]  ;;  %v1300_v54 = vld [vmem:[%s8575_s8 + $0x28] sm:$0xff] }
  0x2e   : > { %v1298_v55 = vld [vmem:[%s8575_s8 + $0x18] sm:$0xff]  ;;  %v1297_v56 = vld [vmem:[%s8575_s8 + $0x10] sm:$0xff]  ;;  %v1295_v57 = vld [vmem:[%s8575_s8] sm:$0xff] }
  0x2f   : > { %v1296_v58 = vld [vmem:[%s8575_s8 + $0x8] sm:$0xff] }
  0x30   : > { %v472_v11 = vld.sshfl [vmem:[#allocation1] sm:$0xff pattern:$0x75316420]  ;;  %v473_v12 = vld.sshfl [vmem:[#allocation1 + $0x8] sm:$0xff pattern:$0x75316420] }
  0x31   : > { %v480_v13 = vpack.c.bf16 %v472_v11, %v472_v11  ;;  %v481_v14 = vpack.c.bf16 %v473_v12, %v473_v12  ;;  %v474_v15 = vld.sshfl [vmem:[#allocation1 + $0x10] sm:$0xff pattern:$0x75316420]  ;;  %v475_v16 = vld.sshfl [vmem:[#allocation1 + $0x18] sm:$0xff pattern:$0x75316420] }
  0x32   : > { %499 = vperm.xlu1 %6110, %v485_v9   ;;  %494 = vperm.xlu0 %6109, %v484_v10   ;;  %v482_v17 = vpack.c.bf16 %v474_v15, %v474_v15  ;;  %v483_v18 = vpack.c.bf16 %v475_v16, %v475_v16 }
  0x33   : > { %v567_v19 = vsel %vm565_vm0, %v480_v13, 0  ;;  %v570_v20 = vsel %vm565_vm0, %v481_v14, 0 }
  0x34   : > { %585 = vmatpush.bf16.msra.mxu0 %v567_v19  ;;  %614 = vmatpush.bf16.msra.mxu1 %v570_v20  ;;  %v573_v23 = vsel %vm565_vm0, %v482_v17, 0  ;;  %v576_v24 = vsel %vm565_vm0, %v483_v18, 0 }
  0x35   : > { %643 = vmatpush.bf16.msra.mxu2 %v573_v23  ;;  %672 = vmatpush.bf16.msra.mxu3 %v576_v24 }
  0x36   : > { %790 = vperm.xlu2 %6111, %v756_v22  }
  0x37   : > { %5540 = vmatmul.msk.bf16.vlgmr.msra.gmra.mxu0 %vm552_vm1, %v5950_v21  ;;  %5544 = vmatmul.msk.bf16.vlgmr.msra.gmra.mxu1 %vm552_vm1, %v5950_v21 }
  0x38   : > { %5548 = vmatmul.msk.bf16.vlgmr.msra.gmra.mxu2 %vm552_vm1, %v5950_v21  ;;  %5552 = vmatmul.msk.bf16.vlgmr.msra.gmra.mxu3 %vm552_vm1, %v5950_v21 }
  0x3a   : > { %780 = vperm.xlu1 %6110, %v754_v25   ;;  %795 = vperm.xlu0 %6109, %v757_v26  }
  0x3e   : > { %785 = vperm.xlu2 %6111, %v755_v27  }
  0x42   : > { %775 = vperm.xlu1 %6110, %v753_v28   ;;  %770 = vperm.xlu0 %6109, %v752_v29  }
  0x46   : > { %760 = vperm.xlu2 %6111, %v750_v31  }
  0x47   : > { %5541 = vmatmul.msk.bf16.gmra.mxu0 %vm552_vm1, %v5951_v30  ;;  %5545 = vmatmul.msk.bf16.gmra.mxu1 %vm552_vm1, %v5951_v30 }
  0x48   : > { %5549 = vmatmul.msk.bf16.gmra.mxu2 %vm552_vm1, %v5951_v30  ;;  %5553 = vmatmul.msk.bf16.gmra.mxu3 %vm552_vm1, %v5951_v30 }
  0x4a   : > { %1043 = vperm.xlu1 %6110, %v1009_v32   ;;  %765 = vperm.xlu0 %6109, %v751_v33  }
  0x4e   : > { %1048 = vperm.xlu2 %6111, %v1010_v34  }
  0x52   : > { %1038 = vperm.xlu1 %6110, %v1008_v35   ;;  %1033 = vperm.xlu0 %6109, %v1007_v36  }
  0x56   : > { %1023 = vperm.xlu2 %6111, %v1005_v38  }
  0x57   : > { %5542 = vmatmul.msk.bf16.gmra.mxu0 %vm552_vm1, %v5952_v37  ;;  %5546 = vmatmul.msk.bf16.gmra.mxu1 %vm552_vm1, %v5952_v37 }
  0x58   : > { %5550 = vmatmul.msk.bf16.gmra.mxu2 %vm552_vm1, %v5952_v37  ;;  %5554 = vmatmul.msk.bf16.gmra.mxu3 %vm552_vm1, %v5952_v37 }
  0x5a   : > { %1013 = vperm.xlu1 %6110, %v1003_v39   ;;  %1028 = vperm.xlu0 %6109, %v1006_v40  }
  0x5e   : > { %1018 = vperm.xlu2 %6111, %v1004_v41  }
  0x62   : > { %1388 = vperm.xlu1 %6110, %v1310_v42   ;;  %1383 = vperm.xlu0 %6109, %v1309_v43  }
  0x66   : > { %1373 = vperm.xlu2 %6111, %v1307_v45  }
  0x67   : > { %5543 = vmatmul.msk.bf16.gmra.mxu0 %vm552_vm1, %v5953_v44  ;;  %5547 = vmatmul.msk.bf16.gmra.mxu1 %vm552_vm1, %v5953_v44 }
  0x68   : > { %5551 = vmatmul.msk.bf16.gmra.mxu2 %vm552_vm1, %v5953_v44  ;;  %5555 = vmatmul.msk.bf16.gmra.mxu3 %vm552_vm1, %v5953_v44 }
  0x6a   : > { %1363 = vperm.xlu1 %6110, %v1305_v46   ;;  %1378 = vperm.xlu0 %6109, %v1308_v47  }
  0x6e   : > { %1368 = vperm.xlu2 %6111, %v1306_v48  }
  0x72   : > { %1358 = vperm.xlu1 %6110, %v1304_v49   ;;  %1353 = vperm.xlu0 %6109, %v1303_v50  }
  0x76   : > { %1343 = vperm.xlu2 %6111, %v1301_v51  }
  0x7a   : > { %1333 = vperm.xlu1 %6110, %v1299_v52   ;;  %1348 = vperm.xlu0 %6109, %v1302_v53  }
  0x7e   : > { %1338 = vperm.xlu2 %6111, %v1300_v54   ;;  %v6531_v23 = vpop.permute.xlu2 %504 }
  0x82   : > { %1328 = vperm.xlu1 %6110, %v1298_v55   ;;  %1323 = vperm.xlu0 %6109, %v1297_v56  }
  0x86   : > { %1313 = vperm.xlu2 %6111, %v1295_v57   ;;  %v510_v40 = vpop.permute.xlu2 %509 }
  0x8a   : > { %1318 = vperm.xlu0 %6109, %v1296_v58  }
  0x94   : > { %v525_v13 = vpop.permute.xlu0 %524  ;;  %v515_v14 = vpop.permute.xlu1 %514 }
  0x9c   : > { %v530_v19 = vpop.permute.xlu0 %529  ;;  %v520_v20 = vpop.permute.xlu1 %519 }
  0xa4   : > { %v6533_v26 = vpop.permute.xlu0 %494  ;;  %v6535_v29 = vpop.permute.xlu1 %499 }
  0xb4   : > { %v587_v59 = vpop.f32.mrf.mxu0  ;;  %v616_v60 = vpop.f32.mrf.mxu1 }
  0xb5   : > { %v6538_v30 = vadd.f32 %v587_v59, %v6533_v26  ;;  %v6541_v31 = vadd.f32 %v616_v60, %v6533_v26 }
  0xbb   : > { %v6515_v61 = vpop.f32.mrf.mxu2  ;;  %v6517_v62 = vpop.f32.mrf.mxu3 }
  0xbc   : > { %v589_v63 = vpop.f32.mrf.mxu0  ;;  %v618_v0 = vpop.f32.mrf.mxu1 }
  0xbd   : > { %v6544_v41 = vadd.f32 %v589_v63, %v6535_v29  ;;  %v6547_v42 = vadd.f32 %v618_v0, %v6535_v29 }
  0xc3   : > { %v6519_v1 = vpop.f32.mrf.mxu2  ;;  %v6521_v2 = vpop.f32.mrf.mxu3 }
  0xc4   : > { %v592_v3 = vpop.f32.mrf.mxu0  ;;  %v621_v4 = vpop.f32.mrf.mxu1 }
  0xc5   : > { %v593_v45 = vadd.f32 %v592_v3, %v6531_v23  ;;  %v622_v46 = vadd.f32 %v621_v4, %v6531_v23 }
  0xc7   : > { %v702_v63 = vmax.f32 %v593_v45, 0.0  ;;  %v703_v0 = vmax.f32 %v622_v46, 0.0 }
  0xcb   : > { %v6523_v5 = vpop.f32.mrf.mxu2  ;;  %v6525_v6 = vpop.f32.mrf.mxu3 }
  0xcc   : > { %v594_v7 = vpop.f32.mrf.mxu0  ;;  %v623_v8 = vpop.f32.mrf.mxu1 }
  0xcd   : > { %v595_v47 = vadd.f32 %v594_v7, %v510_v40  ;;  %v624_v48 = vadd.f32 %v623_v8, %v510_v40 }
  0xcf   : > { %v707_v7 = vmax.f32 %v624_v48, 0.0 }
  0xd3   : > { %v6527_v9 = vpop.f32.mrf.mxu2  ;;  %v6529_v10 = vpop.f32.mrf.mxu3 }
  0xd4   : > { %v597_v11 = vpop.f32.mrf.mxu0  ;;  %v626_v12 = vpop.f32.mrf.mxu1 }
  0xd5   : > { %v598_v34 = vadd.f32 %v597_v11, %v515_v14  ;;  %v627_v35 = vadd.f32 %v626_v12, %v515_v14  ;;  %v706_v11 = vmax.f32 %v595_v47, 0.0 }
  0xd7   : > { %v710_v53 = vmax.f32 %v598_v34, 0.0  ;;  %v711_v54 = vmax.f32 %v627_v35, 0.0  ;;  %v694_v35 = vmax.f32 %v6538_v30, 0.0  ;;  %v680_v30 = vadd.f32 %v6525_v6, %v6531_v23 }
  0xd8   : > { %v646_v6 = vadd.f32 %v6515_v61, %v6533_v26 }
  0xd9   : > { %v705_v46 = vmax.f32 %v680_v30, 0.0 }
  0xda   : > { %v696_v61 = vmax.f32 %v646_v6, 0.0 }
  0xdb   : > { %v655_v15 = vpop.f32.mrf.mxu2  ;;  %v684_v16 = vpop.f32.mrf.mxu3 }
  0xdc   : > { %v599_v17 = vpop.f32.mrf.mxu0  ;;  %v628_v18 = vpop.f32.mrf.mxu1 }
  0xdd   : > { %v600_v36 = vadd.f32 %v599_v17, %v520_v20  ;;  %v629_v37 = vadd.f32 %v628_v18, %v520_v20 }
  0xdf   : > { %v714_v55 = vmax.f32 %v600_v36, 0.0  ;;  %v715_v56 = vmax.f32 %v629_v37, 0.0  ;;  %v653_v36 = vadd.f32 %v6527_v9, %v510_v40  ;;  %v699_v37 = vmax.f32 %v6547_v42, 0.0 }
  0xe3   : > { %v657_v21 = vpop.f32.mrf.mxu2  ;;  %v686_v22 = vpop.f32.mrf.mxu3 }
  0xe4   : > { %v602_v24 = vpop.f32.mrf.mxu0  ;;  %v631_v25 = vpop.f32.mrf.mxu1  ;;  %v658_v3 = vadd.f32 %v657_v21, %v520_v20  ;;  %v687_v8 = vadd.f32 %v686_v22, %v520_v20  ;;  %v695_v21 = vmax.f32 %v6541_v31, 0.0  ;;  %v682_v20 = vadd.f32 %v6529_v10, %v510_v40 }
  0xe5   : > { %v603_v32 = vadd.f32 %v602_v24, %v525_v13  ;;  %v632_v33 = vadd.f32 %v631_v25, %v525_v13  ;;  %v656_v24 = vadd.f32 %v655_v15, %v515_v14  ;;  %v685_v25 = vadd.f32 %v684_v16, %v515_v14 }
  0xe6   : > { %v716_v22 = vmax.f32 %v658_v3, 0.0  ;;  %v698_v16 = vmax.f32 %v6544_v41, 0.0  ;;  %v738_v10 = vpack.c.bf16 %v706_v11, %v702_v63  ;;  %v648_v40 = vadd.f32 %v6519_v1, %v6535_v29 }
  0xe7   : > { %v718_v49 = vmax.f32 %v603_v32, 0.0  ;;  %v719_v50 = vmax.f32 %v632_v33, 0.0  ;;  %v742_v32 = vpack.c.bf16 %v714_v55, %v710_v53  ;;  %v743_v33 = vpack.c.bf16 %v715_v56, %v711_v54  ;;  %v5956_v53 = vld [vmem:[%s8570_s3 + $0x10] sm:$0xff]  ;;  %v5957_v54 = vld [vmem:[%s8570_s3 + $0x18] sm:$0xff] }
  0xe8   : > { %v712_v31 = vmax.f32 %v656_v24, 0.0  ;;  %v713_v9 = vmax.f32 %v685_v25, 0.0  ;;  %v677_v41 = vadd.f32 %v6521_v2, %v6535_v29  ;;  %v709_v42 = vmax.f32 %v682_v20, 0.0  ;;  %v5954_v2 = vld [vmem:[%s8570_s3] sm:$0xff] }
  0xe9   : > { %v734_v1 = vpack.c.bf16 %v698_v16, %v694_v35  ;;  %v735_v47 = vpack.c.bf16 %v699_v37, %v695_v21  ;;  %v700_v48 = vmax.f32 %v648_v40, 0.0 }
  0xea   : > { %v701_v29 = vmax.f32 %v677_v41, 0.0 }
  0xeb   : > { %v660_v27 = vpop.f32.mrf.mxu2  ;;  %v689_v28 = vpop.f32.mrf.mxu3 }
  0xec   : > { %v604_v38 = vpop.f32.mrf.mxu0  ;;  %v633_v39 = vpop.f32.mrf.mxu1  ;;  %v661_v57 = vadd.f32 %v660_v27, %v525_v13  ;;  %v690_v58 = vadd.f32 %v689_v28, %v525_v13 }
  0xed   : > { %v605_v43 = vadd.f32 %v604_v38, %v530_v19  ;;  %v634_v44 = vadd.f32 %v633_v39, %v530_v19  ;;  %v651_v38 = vadd.f32 %v6523_v5, %v6531_v23  ;;  %v739_v39 = vpack.c.bf16 %v707_v7, %v703_v0 }
  0xee   : > { %v720_v27 = vmax.f32 %v661_v57, 0.0  ;;  %v721_v13 = vmax.f32 %v690_v58, 0.0  ;;  %v744_v5 = vpack.c.bf16 %v716_v22, %v712_v31  ;;  %v675_v23 = vadd.f32 %v6517_v62, %v6533_v26 }
  0xef   : > { %v722_v51 = vmax.f32 %v605_v43, 0.0  ;;  %v723_v52 = vmax.f32 %v634_v44, 0.0  ;;  %v708_v43 = vmax.f32 %v653_v36, 0.0  ;;  %v704_v45 = vmax.f32 %v651_v38, 0.0  ;;  %v6621_v36 = vpop.permute.xlu1 %780 }
  0xf0   : > { %v736_v62 = vpack.c.bf16 %v700_v48, %v696_v61 }
  0xf1   : > { %v746_v59 = vpack.c.bf16 %v722_v51, %v718_v49  ;;  %v747_v60 = vpack.c.bf16 %v723_v52, %v719_v50  ;;  %v740_v49 = vpack.c.bf16 %v708_v43, %v704_v45  ;;  %v741_v50 = vpack.c.bf16 %v709_v42, %v705_v46  ;;  %v5955_v52 = vld [vmem:[%s8570_s3 + $0x8] sm:$0xff] }
  0xf2   : > { %v697_v51 = vmax.f32 %v675_v23, 0.0 }
  0xf3   : > { %v662_v12 = vpop.f32.mrf.mxu2  ;;  %v691_v4 = vpop.f32.mrf.mxu3  ;;  %835 = vmatpush.bf16.msrb.mxu0 %v746_v59  ;;  %864 = vmatpush.bf16.msrb.mxu1 %v747_v60 }
  0xf4   : > { %v663_v17 = vadd.f32 %v662_v12, %v530_v19  ;;  %v692_v18 = vadd.f32 %v691_v4, %v530_v19  ;;  %v717_v19 = vmax.f32 %v687_v8, 0.0  ;;  %v737_v26 = vpack.c.bf16 %v701_v29, %v697_v51 }
  0xf6   : > { %v724_v28 = vmax.f32 %v663_v17, 0.0  ;;  %v725_v34 = vmax.f32 %v692_v18, 0.0  ;;  %v745_v44 = vpack.c.bf16 %v717_v19, %v713_v9 }
  0xf7   : > { %836 = vmatpush.bf16.msrb.mxu0 %v742_v32  ;;  %865 = vmatpush.bf16.msrb.mxu1 %v743_v33  ;;  %v776_v41 = vpop.permute.xlu1 %775 }
  0xf8   : > { %v748_v15 = vpack.c.bf16 %v724_v28, %v720_v27  ;;  %v749_v14 = vpack.c.bf16 %v725_v34, %v721_v13  ;;  %v796_v27 = vpop.permute.xlu0 %795  ;;  %v791_v34 = vpop.permute.xlu2 %790 }
  0xfa   : > { %893 = vmatpush.bf16.msrb.mxu2 %v748_v15  ;;  %922 = vmatpush.bf16.msrb.mxu3 %v749_v14 }
  0xfb   : > { %837 = vmatpush.bf16.msrb.mxu0 %v738_v10  ;;  %866 = vmatpush.bf16.msrb.mxu1 %v739_v39 }
  0xfe   : > { %894 = vmatpush.bf16.msrb.mxu2 %v744_v5  ;;  %923 = vmatpush.bf16.msrb.mxu3 %v745_v44 }
  0xff   : > { %838 = vmatpush.bf16.msrb.mxu0 %v734_v1  ;;  %867 = vmatpush.bf16.msrb.mxu1 %v735_v47 }
 0x100   : > { %v6623_v19 = vpop.permute.xlu0 %770  ;;  %v786_v15 = vpop.permute.xlu2 %785 }
 0x102   : > { %895 = vmatpush.bf16.msrb.mxu2 %v740_v49  ;;  %924 = vmatpush.bf16.msrb.mxu3 %v741_v50 }
 0x103   : > { %5572 = vmatmul.msk.bf16.vlgmr.msrb.gmra.mxu0 %vm818_vm2, %v5954_v2  ;;  %5576 = vmatmul.msk.bf16.vlgmr.msrb.gmra.mxu1 %vm818_vm2, %v5954_v2 }
 0x106   : > { %896 = vmatpush.bf16.msrb.mxu2 %v736_v62  ;;  %925 = vmatpush.bf16.msrb.mxu3 %v737_v26 }
 0x108   : > { %v766_v29 = vpop.permute.xlu0 %765 }
 0x109   : > { %5580 = vmatmul.msk.bf16.vlgmr.msrb.gmra.mxu2 %vm818_vm2, %v5954_v2  ;;  %5584 = vmatmul.msk.bf16.vlgmr.msrb.gmra.mxu3 %vm818_vm2, %v5954_v2 }
 0x113   : > { %5573 = vmatmul.msk.bf16.gmra.mxu0 %vm818_vm2, %v5955_v52  ;;  %5577 = vmatmul.msk.bf16.gmra.mxu1 %vm818_vm2, %v5955_v52 }
 0x119   : > { %5581 = vmatmul.msk.bf16.gmra.mxu2 %vm818_vm2, %v5955_v52  ;;  %5585 = vmatmul.msk.bf16.gmra.mxu3 %vm818_vm2, %v5955_v52  ;;  %v761_v52 = vpop.permute.xlu2 %760 }
 0x123   : > { %5574 = vmatmul.msk.bf16.gmra.mxu0 %vm818_vm2, %v5956_v53  ;;  %5578 = vmatmul.msk.bf16.gmra.mxu1 %vm818_vm2, %v5956_v53 }
 0x129   : > { %5582 = vmatmul.msk.bf16.gmra.mxu2 %vm818_vm2, %v5956_v53  ;;  %5586 = vmatmul.msk.bf16.gmra.mxu3 %vm818_vm2, %v5956_v53 }
 0x133   : > { %5575 = vmatmul.msk.bf16.gmra.mxu0 %vm818_vm2, %v5957_v54  ;;  %5579 = vmatmul.msk.bf16.gmra.mxu1 %vm818_vm2, %v5957_v54 }
 0x139   : > { %5583 = vmatmul.msk.bf16.gmra.mxu2 %vm818_vm2, %v5957_v54  ;;  %5587 = vmatmul.msk.bf16.gmra.mxu3 %vm818_vm2, %v5957_v54 }
 0x180   : > { %v6597_v55 = vpop.f32.mrf.mxu0  ;;  %v6599_v56 = vpop.f32.mrf.mxu1 }
 0x188   : > { %v842_v57 = vpop.f32.mrf.mxu0  ;;  %v871_v58 = vpop.f32.mrf.mxu1 }
 0x189   : > { %v843_v62 = vadd.f32 %v842_v57, %v766_v29  ;;  %v872_v26 = vadd.f32 %v871_v58, %v766_v29 }
 0x18c   : > { %v6601_v59 = vpop.f32.mrf.mxu2  ;;  %v6603_v60 = vpop.f32.mrf.mxu3 }
 0x190   : > { %v845_v63 = vpop.f32.mrf.mxu0  ;;  %v874_v0 = vpop.f32.mrf.mxu1 }
 0x191   : > { %v846_v49 = vadd.f32 %v845_v63, %v6623_v19  ;;  %v875_v50 = vadd.f32 %v874_v0, %v6623_v19  ;;  %v951_v0 = vmax.f32 %v843_v62, 0.0  ;;  %v5961_v62 = vld [vmem:[%s8572_s5 + $0x18] sm:$0xff] }
 0x194   : > { %v6605_v11 = vpop.f32.mrf.mxu2  ;;  %v6607_v3 = vpop.f32.mrf.mxu3 }
 0x198   : > { %v847_v12 = vpop.f32.mrf.mxu0  ;;  %v876_v4 = vpop.f32.mrf.mxu1 }
 0x199   : > { %v848_v6 = vadd.f32 %v847_v12, %v776_v41  ;;  %v877_v23 = vadd.f32 %v876_v4, %v776_v41 }
 0x19b   : > { %v959_v53 = vmax.f32 %v848_v6, 0.0  ;;  %v960_v54 = vmax.f32 %v877_v23, 0.0  ;;  %v5958_v23 = vld [vmem:[%s8572_s5] sm:$0xff] }
 0x19c   : > { %v6609_v7 = vpop.f32.mrf.mxu2  ;;  %v6611_v8 = vpop.f32.mrf.mxu3 }
 0x1a0   : > { %v850_v17 = vpop.f32.mrf.mxu0  ;;  %v879_v18 = vpop.f32.mrf.mxu1 }
 0x1a1   : > { %v851_v39 = vadd.f32 %v850_v17, %v6621_v36  ;;  %v880_v40 = vadd.f32 %v879_v18, %v6621_v36  ;;  %v841_v17 = vadd.f32 %v6597_v55, %v761_v52  ;;  %v870_v18 = vadd.f32 %v6599_v56, %v761_v52 }
 0x1a3   : > { %v963_v61 = vmax.f32 %v851_v39, 0.0  ;;  %v964_v51 = vmax.f32 %v880_v40, 0.0 }
 0x1a4   : > { %v6613_v24 = vpop.f32.mrf.mxu2  ;;  %v6615_v25 = vpop.f32.mrf.mxu3 }
 0x1a5   : > { %v906_v6 = vadd.f32 %v6613_v24, %v776_v41  ;;  %v901_v24 = vadd.f32 %v6605_v11, %v766_v29 }
 0x1a8   : > { %v852_v32 = vpop.f32.mrf.mxu0  ;;  %v881_v33 = vpop.f32.mrf.mxu1 }
 0x1a9   : > { %v853_v30 = vadd.f32 %v852_v32, %v786_v15  ;;  %v882_v31 = vadd.f32 %v881_v33, %v786_v15  ;;  %v955_v32 = vmax.f32 %v846_v49, 0.0  ;;  %v956_v33 = vmax.f32 %v875_v50, 0.0 }
 0x1ab   : > { %v967_v1 = vmax.f32 %v853_v30, 0.0  ;;  %v968_v47 = vmax.f32 %v882_v31, 0.0  ;;  %v947_v30 = vmax.f32 %v841_v17, 0.0  ;;  %v948_v31 = vmax.f32 %v870_v18, 0.0 }
 0x1ac   : > { %v6617_v13 = vpop.f32.mrf.mxu2  ;;  %v6619_v28 = vpop.f32.mrf.mxu3 }
 0x1ad   : > { %v995_v12 = vpack.c.bf16 %v967_v1, %v963_v61  ;;  %v996_v4 = vpack.c.bf16 %v968_v47, %v964_v51 }
 0x1b0   : > { %v855_v35 = vpop.f32.mrf.mxu0  ;;  %v884_v21 = vpop.f32.mrf.mxu1 }
 0x1b1   : > { %v856_v14 = vadd.f32 %v855_v35, %v791_v34  ;;  %v885_v16 = vadd.f32 %v884_v21, %v791_v34  ;;  %v952_v21 = vmax.f32 %v872_v26, 0.0  ;;  %v6673_v26 = vpop.permute.xlu1 %1043 }
 0x1b3   : > { %v971_v43 = vmax.f32 %v856_v14, 0.0  ;;  %v972_v42 = vmax.f32 %v885_v16, 0.0 }
 0x1b4   : > { %v910_v20 = vpop.f32.mrf.mxu2  ;;  %v939_v22 = vpop.f32.mrf.mxu3 }
 0x1b5   : > { %v940_v55 = vadd.f32 %v939_v22, %v786_v15 }
 0x1b8   : > { %v857_v37 = vpop.f32.mrf.mxu0  ;;  %v886_v38 = vpop.f32.mrf.mxu1 }
 0x1b9   : > { %v858_v9 = vadd.f32 %v857_v37, %v796_v27  ;;  %v887_v10 = vadd.f32 %v886_v38, %v796_v27  ;;  %v991_v37 = vpack.c.bf16 %v959_v53, %v955_v32  ;;  %v992_v38 = vpack.c.bf16 %v960_v54, %v956_v33  ;;  %v6677_v53 = vpop.permute.xlu1 %1038 }
 0x1bb   : > { %v975_v5 = vmax.f32 %v858_v9, 0.0  ;;  %v976_v44 = vmax.f32 %v887_v10, 0.0  ;;  %v911_v9 = vadd.f32 %v910_v20, %v786_v15  ;;  %v935_v20 = vadd.f32 %v6615_v25, %v776_v41 }
 0x1bc   : > { %v913_v45 = vpop.f32.mrf.mxu2  ;;  %v942_v46 = vpop.f32.mrf.mxu3  ;;  %v970_v15 = vmax.f32 %v940_v55, 0.0  ;;  %v930_v25 = vadd.f32 %v6607_v3, %v766_v29  ;;  %v961_v41 = vmax.f32 %v906_v6, 0.0 }
 0x1bd   : > { %v999_v48 = vpack.c.bf16 %v975_v5, %v971_v43  ;;  %v1000_v2 = vpack.c.bf16 %v976_v44, %v972_v42  ;;  %v914_v63 = vadd.f32 %v913_v45, %v791_v34  ;;  %v943_v35 = vadd.f32 %v942_v46, %v791_v34 }
 0x1be   : > { %v909_v34 = vadd.f32 %v6617_v13, %v6621_v36  ;;  %v938_v43 = vadd.f32 %v6619_v28, %v6621_v36  ;;  %v987_v5 = vpack.c.bf16 %v951_v0, %v947_v30  ;;  %v988_v44 = vpack.c.bf16 %v952_v21, %v948_v31 }
 0x1bf   : > { %1087 = vmatpush.bf16.msra.mxu0 %v999_v48  ;;  %1116 = vmatpush.bf16.msra.mxu1 %v1000_v2  ;;  %v973_v10 = vmax.f32 %v914_v63, 0.0  ;;  %v974_v56 = vmax.f32 %v943_v35, 0.0  ;;  %v969_v22 = vmax.f32 %v911_v9, 0.0  ;;  %v904_v13 = vadd.f32 %v6609_v7, %v6623_v19 }
 0x1c0   : > { %v933_v28 = vadd.f32 %v6611_v8, %v6623_v19  ;;  %v965_v36 = vmax.f32 %v909_v34, 0.0  ;;  %v966_v45 = vmax.f32 %v938_v43, 0.0  ;;  %v962_v46 = vmax.f32 %v935_v20, 0.0 }
 0x1c1   : > { %v899_v7 = vadd.f32 %v6601_v59, %v761_v52  ;;  %v928_v8 = vadd.f32 %v6603_v60, %v761_v52  ;;  %v957_v19 = vmax.f32 %v904_v13, 0.0  ;;  %v953_v2 = vmax.f32 %v901_v24, 0.0  ;;  %v5959_v59 = vld [vmem:[%s8572_s5 + $0x8] sm:$0xff]  ;;  %v5960_v60 = vld [vmem:[%s8572_s5 + $0x10] sm:$0xff]  ;;  %v6675_v52 = vpop.permute.xlu2 %1048 }
 0x1c2   : > { %v997_v1 = vpack.c.bf16 %v969_v22, %v965_v36  ;;  %v998_v47 = vpack.c.bf16 %v970_v15, %v966_v45  ;;  %v958_v48 = vmax.f32 %v933_v28, 0.0  ;;  %v954_v11 = vmax.f32 %v930_v25, 0.0 }
 0x1c3   : > { %1088 = vmatpush.bf16.msra.mxu0 %v995_v12  ;;  %1117 = vmatpush.bf16.msra.mxu1 %v996_v4  ;;  %v993_v49 = vpack.c.bf16 %v961_v41, %v957_v19  ;;  %v949_v29 = vmax.f32 %v899_v7, 0.0  ;;  %v950_v50 = vmax.f32 %v928_v8, 0.0  ;;  %v1014_v12 = vpop.permute.xlu1 %1013 }
 0x1c4   : > { %v915_v14 = vpop.f32.mrf.mxu2  ;;  %v944_v57 = vpop.f32.mrf.mxu3  ;;  %v994_v3 = vpack.c.bf16 %v962_v46, %v958_v48 }
 0x1c5   : > { %v916_v58 = vadd.f32 %v915_v14, %v796_v27  ;;  %v945_v16 = vadd.f32 %v944_v57, %v796_v27  ;;  %v989_v61 = vpack.c.bf16 %v953_v2, %v949_v29  ;;  %v990_v51 = vpack.c.bf16 %v954_v11, %v950_v50 }
 0x1c7   : > { %v977_v39 = vmax.f32 %v916_v58, 0.0  ;;  %v978_v40 = vmax.f32 %v945_v16, 0.0  ;;  %1089 = vmatpush.bf16.msra.mxu0 %v991_v37  ;;  %1118 = vmatpush.bf16.msra.mxu1 %v992_v38  ;;  %v6704_v37 = vpop.permute.xlu0 %1033 }
 0x1c9   : > { %v1001_v42 = vpack.c.bf16 %v977_v39, %v973_v10  ;;  %v1002_v27 = vpack.c.bf16 %v978_v40, %v974_v56  ;;  %v6680_v54 = vpop.permute.xlu2 %1023 }
 0x1cb   : > { %1090 = vmatpush.bf16.msra.mxu0 %v987_v5  ;;  %1119 = vmatpush.bf16.msra.mxu1 %v988_v44 }
 0x1cc   : > { %1145 = vmatpush.bf16.msra.mxu2 %v1001_v42  ;;  %1174 = vmatpush.bf16.msra.mxu3 %v1002_v27 }
 0x1ce   : > { %5604 = vmatmul.msk.bf16.vlgmr.msra.gmra.mxu0 %vm818_vm2, %v5958_v23  ;;  %5608 = vmatmul.msk.bf16.vlgmr.msra.gmra.mxu1 %vm818_vm2, %v5958_v23 }
 0x1cf   : > { %v1029_v27 = vpop.permute.xlu0 %1028 }
 0x1d0   : > { %1146 = vmatpush.bf16.msra.mxu2 %v997_v1  ;;  %1175 = vmatpush.bf16.msra.mxu3 %v998_v47 }
 0x1d1   : > { %v1019_v35 = vpop.permute.xlu2 %1018 }
 0x1d4   : > { %1147 = vmatpush.bf16.msra.mxu2 %v993_v49  ;;  %1176 = vmatpush.bf16.msra.mxu3 %v994_v3 }
 0x1d8   : > { %1148 = vmatpush.bf16.msra.mxu2 %v989_v61  ;;  %1177 = vmatpush.bf16.msra.mxu3 %v990_v51 }
 0x1db   : > { %5612 = vmatmul.msk.bf16.vlgmr.msra.gmra.mxu2 %vm818_vm2, %v5958_v23  ;;  %5616 = vmatmul.msk.bf16.vlgmr.msra.gmra.mxu3 %vm818_vm2, %v5958_v23 }
 0x1de   : > { %5605 = vmatmul.msk.bf16.gmra.mxu0 %vm818_vm2, %v5959_v59  ;;  %5609 = vmatmul.msk.bf16.gmra.mxu1 %vm818_vm2, %v5959_v59 }
 0x1eb   : > { %5613 = vmatmul.msk.bf16.gmra.mxu2 %vm818_vm2, %v5959_v59  ;;  %5617 = vmatmul.msk.bf16.gmra.mxu3 %vm818_vm2, %v5959_v59 }
 0x1ee   : > { %5606 = vmatmul.msk.bf16.gmra.mxu0 %vm818_vm2, %v5960_v60  ;;  %5610 = vmatmul.msk.bf16.gmra.mxu1 %vm818_vm2, %v5960_v60 }
 0x1fb   : > { %5614 = vmatmul.msk.bf16.gmra.mxu2 %vm818_vm2, %v5960_v60  ;;  %5618 = vmatmul.msk.bf16.gmra.mxu3 %vm818_vm2, %v5960_v60 }
 0x1fe   : > { %5607 = vmatmul.msk.bf16.gmra.mxu0 %vm818_vm2, %v5961_v62  ;;  %5611 = vmatmul.msk.bf16.gmra.mxu1 %vm818_vm2, %v5961_v62 }
 0x20b   : > { %5615 = vmatmul.msk.bf16.gmra.mxu2 %vm818_vm2, %v5961_v62  ;;  %5619 = vmatmul.msk.bf16.gmra.mxu3 %vm818_vm2, %v5961_v62 }
 0x24b   : > { %v1092_v4 = vpop.f32.mrf.mxu0  ;;  %v1121_v17 = vpop.f32.mrf.mxu1 }
 0x24c   : > { %v6684_v18 = vadd.f32 %v1092_v4, %v1014_v12  ;;  %v6686_v32 = vadd.f32 %v1121_v17, %v1014_v12 }
 0x24e   : > { %v1199_v33 = vmax.f32 %v6684_v18, 0.0  ;;  %v1200_v63 = vmax.f32 %v6686_v32, 0.0 }
 0x250   : > { %1231 = vst [vmem:[%s6690_s15] sm:$0xff] %v1199_v33 }
 0x251   : > { %1232 = vst [vmem:[%s6690_s15 + $0x8] sm:$0xff] %v1200_v63 }
 0x253   : > { %v1094_v0 = vpop.f32.mrf.mxu0  ;;  %v1123_v21 = vpop.f32.mrf.mxu1 }
 0x254   : > { %v6698_v14 = vadd.f32 %v1094_v0, %v1019_v35  ;;  %v6700_v57 = vadd.f32 %v1123_v21, %v1019_v35 }
 0x256   : > { %v1203_v58 = vmax.f32 %v6698_v14, 0.0  ;;  %v1204_v16 = vmax.f32 %v6700_v57, 0.0 }
 0x258   : > { %1235 = vst [vmem:[%s6690_s15 + $0x20] sm:$0xff] %v1203_v58 }
 0x259   : > { %1236 = vst [vmem:[%s6690_s15 + $0x28] sm:$0xff] %v1204_v16 }
 0x25b   : > { %v1097_v38 = vpop.f32.mrf.mxu0  ;;  %v1126_v30 = vpop.f32.mrf.mxu1 }
 0x25c   : > { %v6713_v31 = vadd.f32 %v1097_v38, %v6680_v54  ;;  %v6716_v9 = vadd.f32 %v1126_v30, %v6680_v54 }
 0x25e   : > { %v1207_v55 = vmax.f32 %v6713_v31, 0.0  ;;  %v1208_v10 = vmax.f32 %v6716_v9, 0.0  ;;  %v1150_v56 = vpop.f32.mrf.mxu2  ;;  %v1179_v39 = vpop.f32.mrf.mxu3  ;;  %v1280_v31 = vpack.c.bf16 %v1204_v16, %v1200_v63  ;;  %v5962_v9 = vld [vmem:[%s8574_s7] sm:$0xff] }
 0x25f   : > { %v6720_v40 = vadd.f32 %v1150_v56, %v1014_v12  ;;  %v6722_v34 = vadd.f32 %v1179_v39, %v1014_v12 }
 0x260   : > { %1239 = vst [vmem:[%s6690_s15 + $0x40] sm:$0xff] %v1207_v55 }
 0x261   : > { %1240 = vst [vmem:[%s6690_s15 + $0x48] sm:$0xff] %v1208_v10  ;;  %v1201_v43 = vmax.f32 %v6720_v40, 0.0  ;;  %v1202_v42 = vmax.f32 %v6722_v34, 0.0  ;;  %v5964_v40 = vld [vmem:[%s8574_s7 + $0x10] sm:$0xff]  ;;  %v5965_v34 = vld [vmem:[%s8574_s7 + $0x18] sm:$0xff] }
 0x263   : > { %1233 = vst [vmem:[%s6690_s15 + $0x10] sm:$0xff] %v1201_v43  ;;  %v1099_v5 = vpop.f32.mrf.mxu0  ;;  %v1128_v44 = vpop.f32.mrf.mxu1 }
 0x264   : > { %1234 = vst [vmem:[%s6690_s15 + $0x18] sm:$0xff] %v1202_v42  ;;  %v6738_v6 = vadd.f32 %v1099_v5, %v1029_v27  ;;  %v6740_v20 = vadd.f32 %v1128_v44, %v1029_v27 }
 0x266   : > { %v1211_v22 = vmax.f32 %v6738_v6, 0.0  ;;  %v1212_v15 = vmax.f32 %v6740_v20, 0.0  ;;  %v1152_v23 = vpop.f32.mrf.mxu2  ;;  %v1181_v13 = vpop.f32.mrf.mxu3  ;;  %v5963_v20 = vld [vmem:[%s8574_s7 + $0x8] sm:$0xff] }
 0x267   : > { %v6744_v28 = vadd.f32 %v1152_v23, %v1019_v35  ;;  %v6746_v36 = vadd.f32 %v1181_v13, %v1019_v35 }
 0x268   : > { %1243 = vst [vmem:[%s6690_s15 + $0x60] sm:$0xff] %v1211_v22 }
 0x269   : > { %1244 = vst [vmem:[%s6690_s15 + $0x68] sm:$0xff] %v1212_v15  ;;  %v1205_v45 = vmax.f32 %v6744_v28, 0.0  ;;  %v1206_v24 = vmax.f32 %v6746_v36, 0.0  ;;  %v5968_v28 = vld [vmem:[%s8574_s7 + $0x30] sm:$0xff]  ;;  %v5969_v36 = vld [vmem:[%s8574_s7 + $0x38] sm:$0xff] }
 0x26b   : > { %1237 = vst [vmem:[%s6690_s15 + $0x30] sm:$0xff] %v1205_v45  ;;  %v1102_v25 = vpop.f32.mrf.mxu0  ;;  %v1131_v41 = vpop.f32.mrf.mxu1 }
 0x26c   : > { %1238 = vst [vmem:[%s6690_s15 + $0x38] sm:$0xff] %v1206_v24  ;;  %v6763_v46 = vadd.f32 %v1102_v25, %v6704_v37  ;;  %v6766_v1 = vadd.f32 %v1131_v41, %v6704_v37 }
 0x26e   : > { %v1215_v47 = vmax.f32 %v6763_v46, 0.0  ;;  %v1216_v7 = vmax.f32 %v6766_v1, 0.0  ;;  %v1155_v8 = vpop.f32.mrf.mxu2  ;;  %v1184_v19 = vpop.f32.mrf.mxu3  ;;  %v1284_v46 = vpack.c.bf16 %v1212_v15, %v1208_v10  ;;  %v1282_v15 = vpack.c.bf16 %v1206_v24, %v1202_v42  ;;  %v5967_v42 = vld [vmem:[%s8574_s7 + $0x28] sm:$0xff] }
 0x26f   : > { %v6771_v48 = vadd.f32 %v1155_v8, %v6680_v54  ;;  %v6774_v2 = vadd.f32 %v1184_v19, %v6680_v54 }
 0x270   : > { %1247 = vst [vmem:[%s6690_s15 + $0x80] sm:$0xff] %v1215_v47 }
 0x271   : > { %1248 = vst [vmem:[%s6690_s15 + $0x88] sm:$0xff] %v1216_v7  ;;  %v1209_v11 = vmax.f32 %v6771_v48, 0.0  ;;  %v1210_v49 = vmax.f32 %v6774_v2, 0.0 }
 0x273   : > { %1241 = vst [vmem:[%s6690_s15 + $0x50] sm:$0xff] %v1209_v11  ;;  %v1104_v3 = vpop.f32.mrf.mxu0  ;;  %v1133_v29 = vpop.f32.mrf.mxu1 }
 0x274   : > { %1242 = vst [vmem:[%s6690_s15 + $0x58] sm:$0xff] %v1210_v49  ;;  %v1105_v50 = vadd.f32 %v1104_v3, %v6677_v53  ;;  %v1134_v61 = vadd.f32 %v1133_v29, %v6677_v53 }
 0x276   : > { %v1219_v51 = vmax.f32 %v1105_v50, 0.0  ;;  %v1220_v59 = vmax.f32 %v1134_v61, 0.0  ;;  %v1157_v60 = vpop.f32.mrf.mxu2  ;;  %v1186_v62 = vpop.f32.mrf.mxu3 }
 0x277   : > { %v6792_v54 = vadd.f32 %v1157_v60, %v1029_v27  ;;  %v6794_v12 = vadd.f32 %v1186_v62, %v1029_v27 }
 0x278   : > { %1251 = vst [vmem:[%s6690_s15 + $0xa0] sm:$0xff] %v1219_v51 }
 0x279   : > { %1252 = vst [vmem:[%s6690_s15 + $0xa8] sm:$0xff] %v1220_v59  ;;  %v1213_v4 = vmax.f32 %v6792_v54, 0.0  ;;  %v1214_v17 = vmax.f32 %v6794_v12, 0.0 }
 0x27b   : > { %1245 = vst [vmem:[%s6690_s15 + $0x70] sm:$0xff] %v1213_v4  ;;  %v1107_v35 = vpop.f32.mrf.mxu0  ;;  %v1136_v0 = vpop.f32.mrf.mxu1  ;;  %v1286_v16 = vpack.c.bf16 %v1214_v17, %v1210_v49 }
 0x27c   : > { %1246 = vst [vmem:[%s6690_s15 + $0x78] sm:$0xff] %v1214_v17  ;;  %v1108_v21 = vadd.f32 %v1107_v35, %v6673_v26  ;;  %v1137_v38 = vadd.f32 %v1136_v0, %v6673_v26 }
 0x27e   : > { %v1223_v30 = vmax.f32 %v1108_v21, 0.0  ;;  %v1224_v56 = vmax.f32 %v1137_v38, 0.0  ;;  %v1160_v39 = vpop.f32.mrf.mxu2  ;;  %v1189_v27 = vpop.f32.mrf.mxu3  ;;  %v1287_v38 = vpack.c.bf16 %v1219_v51, %v1215_v47 }
 0x27f   : > { %v6809_v5 = vadd.f32 %v1160_v39, %v6704_v37  ;;  %v6812_v44 = vadd.f32 %v1189_v27, %v6704_v37  ;;  %v1288_v39 = vpack.c.bf16 %v1220_v59, %v1216_v7 }
 0x280   : > { %1255 = vst [vmem:[%s6690_s15 + $0xc0] sm:$0xff] %v1223_v30 }
 0x281   : > { %1256 = vst [vmem:[%s6690_s15 + $0xc8] sm:$0xff] %v1224_v56  ;;  %v1217_v23 = vmax.f32 %v6809_v5, 0.0  ;;  %v1218_v13 = vmax.f32 %v6812_v44, 0.0  ;;  %v1283_v5 = vpack.c.bf16 %v1211_v22, %v1207_v55  ;;  %v1281_v22 = vpack.c.bf16 %v1205_v45, %v1201_v43  ;;  %v5966_v43 = vld [vmem:[%s8574_s7 + $0x20] sm:$0xff] }
 0x283   : > { %1249 = vst [vmem:[%s6690_s15 + $0x90] sm:$0xff] %v1217_v23  ;;  %v1109_v25 = vpop.f32.mrf.mxu0  ;;  %v1138_v41 = vpop.f32.mrf.mxu1 }
 0x284   : > { %1250 = vst [vmem:[%s6690_s15 + $0x98] sm:$0xff] %v1218_v13  ;;  %v1110_v8 = vadd.f32 %v1109_v25, %v6675_v52  ;;  %v1139_v19 = vadd.f32 %v1138_v41, %v6675_v52 }
 0x286   : > { %v1227_v37 = vmax.f32 %v1110_v8, 0.0  ;;  %v1228_v3 = vmax.f32 %v1139_v19, 0.0  ;;  %v1162_v29 = vpop.f32.mrf.mxu2  ;;  %v1191_v50 = vpop.f32.mrf.mxu3 }
 0x287   : > { %v1163_v61 = vadd.f32 %v1162_v29, %v6677_v53  ;;  %v1192_v60 = vadd.f32 %v1191_v50, %v6677_v53 }
 0x288   : > { %1259 = vst [vmem:[%s6690_s15 + $0xe0] sm:$0xff] %v1227_v37  ;;  %v1291_v62 = vpack.c.bf16 %v1227_v37, %v1223_v30  ;;  %v1292_v35 = vpack.c.bf16 %v1228_v3, %v1224_v56 }
 0x289   : > { %1260 = vst [vmem:[%s6690_s15 + $0xe8] sm:$0xff] %v1228_v3  ;;  %v1221_v0 = vmax.f32 %v1163_v61, 0.0  ;;  %v1222_v21 = vmax.f32 %v1192_v60, 0.0 }
 0x28a   : > { %1459 = vmatpush.bf16.msrb.mxu0 %v1291_v62  ;;  %1508 = vmatpush.bf16.msrb.mxu1 %v1292_v35 }
 0x28b   : > { %1253 = vst [vmem:[%s6690_s15 + $0xb0] sm:$0xff] %v1221_v0  ;;  %v1289_v57 = vpack.c.bf16 %v1221_v0, %v1217_v23 }
 0x28c   : > { %1254 = vst [vmem:[%s6690_s15 + $0xb8] sm:$0xff] %v1222_v21 }
 0x28e   : > { %v1165_v27 = vpop.f32.mrf.mxu2  ;;  %v1194_v53 = vpop.f32.mrf.mxu3  ;;  %1460 = vmatpush.bf16.msrb.mxu0 %v1287_v38  ;;  %1509 = vmatpush.bf16.msrb.mxu1 %v1288_v39 }
 0x28f   : > { %v1166_v30 = vadd.f32 %v1165_v27, %v6673_v26  ;;  %v1195_v56 = vadd.f32 %v1194_v53, %v6673_v26  ;;  %v1279_v26 = vpack.c.bf16 %v1203_v58, %v1199_v33  ;;  %v1290_v58 = vpack.c.bf16 %v1222_v21, %v1218_v13 }
 0x291   : > { %v1225_v1 = vmax.f32 %v1166_v30, 0.0  ;;  %v1226_v47 = vmax.f32 %v1195_v56, 0.0 }
 0x292   : > { %1461 = vmatpush.bf16.msrb.mxu0 %v1283_v5  ;;  %1510 = vmatpush.bf16.msrb.mxu1 %v1284_v46 }
 0x293   : > { %1257 = vst [vmem:[%s6690_s15 + $0xd0] sm:$0xff] %v1225_v1 }
 0x294   : > { %1258 = vst [vmem:[%s6690_s15 + $0xd8] sm:$0xff] %v1226_v47 }
 0x296   : > { %v1167_v55 = vpop.f32.mrf.mxu2  ;;  %v1196_v10 = vpop.f32.mrf.mxu3  ;;  %1462 = vmatpush.bf16.msrb.mxu0 %v1279_v26  ;;  %1511 = vmatpush.bf16.msrb.mxu1 %v1280_v31 }
 0x297   : > { %v1168_v6 = vadd.f32 %v1167_v55, %v6675_v52  ;;  %v1197_v18 = vadd.f32 %v1196_v10, %v6675_v52  ;;  %v1285_v52 = vpack.c.bf16 %v1213_v4, %v1209_v11 }
 0x299   : > { %v1229_v14 = vmax.f32 %v1168_v6, 0.0  ;;  %v1230_v33 = vmax.f32 %v1197_v18, 0.0  ;;  %5652 = vmatmul.msk.bf16.vlgmr.msrb.gmra.mxu0 %vm818_vm2, %v5962_v9  ;;  %5660 = vmatmul.msk.bf16.vlgmr.msrb.gmra.mxu1 %vm818_vm2, %v5962_v9 }
 0x29b   : > { %1261 = vst [vmem:[%s6690_s15 + $0xf0] sm:$0xff] %v1229_v14  ;;  %v1293_v32 = vpack.c.bf16 %v1229_v14, %v1225_v1  ;;  %v1294_v63 = vpack.c.bf16 %v1230_v33, %v1226_v47  ;;  %v7000_v1 = vpop.permute.xlu0 %1383  ;;  %v7010_v14 = vpop.permute.xlu1 %1388 }
 0x29c   : > { %1262 = vst [vmem:[%s6690_s15 + $0xf8] sm:$0xff] %v1230_v33 }
 0x29d   : > { %1557 = vmatpush.bf16.msrb.mxu2 %v1293_v32  ;;  %1606 = vmatpush.bf16.msrb.mxu3 %v1294_v63  ;;  %v7014_v32 = vpop.permute.xlu2 %1373 }
 0x2a1   : > { %1558 = vmatpush.bf16.msrb.mxu2 %v1289_v57  ;;  %1607 = vmatpush.bf16.msrb.mxu3 %v1290_v58 }
 0x2a3   : > { %v7012_v33 = vpop.permute.xlu0 %1378 }
 0x2a5   : > { %1559 = vmatpush.bf16.msrb.mxu2 %v1285_v52  ;;  %1608 = vmatpush.bf16.msrb.mxu3 %v1286_v16  ;;  %v7020_v16 = vpop.permute.xlu1 %1363 }
 0x2a9   : > { %1560 = vmatpush.bf16.msrb.mxu2 %v1281_v22  ;;  %1609 = vmatpush.bf16.msrb.mxu3 %v1282_v15  ;;  %v7024_v22 = vpop.permute.xlu2 %1368 }
 0x2aa   : > { %5653 = vmatmul.msk.bf16.gmra.mxu0 %vm818_vm2, %v5963_v20  ;;  %5661 = vmatmul.msk.bf16.gmra.mxu1 %vm818_vm2, %v5963_v20 }
 0x2ac   : > { %5668 = vmatmul.msk.bf16.vlgmr.msrb.gmra.mxu2 %vm818_vm2, %v5962_v9  ;;  %5676 = vmatmul.msk.bf16.vlgmr.msrb.gmra.mxu3 %vm818_vm2, %v5962_v9 }
 0x2ba   : > { %5654 = vmatmul.msk.bf16.gmra.mxu0 %vm818_vm2, %v5964_v40  ;;  %5662 = vmatmul.msk.bf16.gmra.mxu1 %vm818_vm2, %v5964_v40 }
 0x2bc   : > { %5669 = vmatmul.msk.bf16.gmra.mxu2 %vm818_vm2, %v5963_v20  ;;  %5677 = vmatmul.msk.bf16.gmra.mxu3 %vm818_vm2, %v5963_v20  ;;  %v7022_v20 = vpop.permute.xlu0 %1353 }
 0x2ca   : > { %5655 = vmatmul.msk.bf16.gmra.mxu0 %vm818_vm2, %v5965_v34  ;;  %5663 = vmatmul.msk.bf16.gmra.mxu1 %vm818_vm2, %v5965_v34 }
 0x2cc   : > { %5670 = vmatmul.msk.bf16.gmra.mxu2 %vm818_vm2, %v5964_v40  ;;  %5678 = vmatmul.msk.bf16.gmra.mxu3 %vm818_vm2, %v5964_v40 }
 0x2da   : > { %5656 = vmatmul.msk.bf16.gmra.mxu0 %vm818_vm2, %v5966_v43  ;;  %5664 = vmatmul.msk.bf16.gmra.mxu1 %vm818_vm2, %v5966_v43 }
 0x2dc   : > { %5671 = vmatmul.msk.bf16.gmra.mxu2 %vm818_vm2, %v5965_v34  ;;  %5679 = vmatmul.msk.bf16.gmra.mxu3 %vm818_vm2, %v5965_v34 }
 0x2ea   : > { %5657 = vmatmul.msk.bf16.gmra.mxu0 %vm818_vm2, %v5967_v42  ;;  %5665 = vmatmul.msk.bf16.gmra.mxu1 %vm818_vm2, %v5967_v42 }
 0x2ec   : > { %5672 = vmatmul.msk.bf16.gmra.mxu2 %vm818_vm2, %v5966_v43  ;;  %5680 = vmatmul.msk.bf16.gmra.mxu3 %vm818_vm2, %v5966_v43 }
 0x2fa   : > { %5658 = vmatmul.msk.bf16.gmra.mxu0 %vm818_vm2, %v5968_v28  ;;  %5666 = vmatmul.msk.bf16.gmra.mxu1 %vm818_vm2, %v5968_v28 }
 0x2fc   : > { %5673 = vmatmul.msk.bf16.gmra.mxu2 %vm818_vm2, %v5967_v42  ;;  %5681 = vmatmul.msk.bf16.gmra.mxu3 %vm818_vm2, %v5967_v42  ;;  %v7030_v42 = vpop.permute.xlu1 %1358 }
 0x30a   : > { %5659 = vmatmul.msk.bf16.gmra.mxu0 %vm818_vm2, %v5969_v36  ;;  %5667 = vmatmul.msk.bf16.gmra.mxu1 %vm818_vm2, %v5969_v36 }
 0x30c   : > { %5674 = vmatmul.msk.bf16.gmra.mxu2 %vm818_vm2, %v5968_v28  ;;  %5682 = vmatmul.msk.bf16.gmra.mxu3 %vm818_vm2, %v5968_v28  ;;  %v7032_v28 = vpop.permute.xlu0 %1348 }
 0x316   : > { %v6926_v45 = vpop.f32.mrf.mxu0  ;;  %v6928_v24 = vpop.f32.mrf.mxu1 }
 0x31c   : > { %5675 = vmatmul.msk.bf16.gmra.mxu2 %vm818_vm2, %v5969_v36  ;;  %5683 = vmatmul.msk.bf16.gmra.mxu3 %vm818_vm2, %v5969_v36  ;;  %v7034_v36 = vpop.permute.xlu2 %1343 }
 0x31e   : > { %v6932_v7 = vpop.f32.mrf.mxu0  ;;  %v6934_v48 = vpop.f32.mrf.mxu1 }
 0x327   : > { %v6936_v2 = vpop.f32.mrf.mxu0  ;;  %v6938_v11 = vpop.f32.mrf.mxu1 }
 0x32f   : > { %v6940_v49 = vpop.f32.mrf.mxu0  ;;  %v6942_v51 = vpop.f32.mrf.mxu1 }
 0x330   : > { %v6944_v59 = vpop.f32.mrf.mxu2  ;;  %v6946_v54 = vpop.f32.mrf.mxu3 }
 0x331   : > { %8605 = vst [vmem:[#allocation16_spill] sm:$0xff] %v6944_v59 }
 0x332   : > { %8606 = vst [vmem:[#allocation17_spill] sm:$0xff] %v6946_v54 }
 0x337   : > { %v6948_v12 = vpop.f32.mrf.mxu0  ;;  %v6950_v4 = vpop.f32.mrf.mxu1 }
 0x338   : > { %v6952_v17 = vpop.f32.mrf.mxu2  ;;  %v6954_v44 = vpop.f32.mrf.mxu3 }
 0x339   : > { %8607 = vst [vmem:[#allocation18_spill] sm:$0xff] %v6952_v17 }
 0x33a   : > { %8608 = vst [vmem:[#allocation19_spill] sm:$0xff] %v6954_v44 }
 0x33f   : > { %v6956_v23 = vpop.f32.mrf.mxu0  ;;  %v6958_v13 = vpop.f32.mrf.mxu1 }
 0x340   : > { %v6960_v25 = vpop.f32.mrf.mxu2  ;;  %v6962_v41 = vpop.f32.mrf.mxu3 }
 0x341   : > { %8609 = vst [vmem:[#allocation20_spill] sm:$0xff] %v6960_v25 }
 0x342   : > { %8610 = vst [vmem:[#allocation21_spill] sm:$0xff] %v6962_v41 }
 0x347   : > { %v6964_v8 = vpop.f32.mrf.mxu0  ;;  %v6966_v19 = vpop.f32.mrf.mxu1 }
 0x348   : > { %v6968_v37 = vpop.f32.mrf.mxu2  ;;  %v6970_v3 = vpop.f32.mrf.mxu3 }
 0x349   : > { %8611 = vst [vmem:[#allocation22_spill] sm:$0xff] %v6968_v37 }
 0x34a   : > { %8612 = vst [vmem:[#allocation23_spill] sm:$0xff] %v6970_v3 }
 0x34f   : > { %v6972_v29 = vpop.f32.mrf.mxu0  ;;  %v6974_v50 = vpop.f32.mrf.mxu1 }
 0x350   : > { %v6976_v61 = vpop.f32.mrf.mxu2  ;;  %v6978_v60 = vpop.f32.mrf.mxu3 }
 0x351   : > { %8613 = vst [vmem:[#allocation24_spill] sm:$0xff] %v6976_v61 }
 0x352   : > { %8614 = vst [vmem:[#allocation25_spill] sm:$0xff] %v6978_v60 }
 0x357   : > { %v6980_v62 = vpop.f32.mrf.mxu0  ;;  %v6982_v35 = vpop.f32.mrf.mxu1 }
 0x358   : > { %v6984_v0 = vpop.f32.mrf.mxu2  ;;  %v6986_v21 = vpop.f32.mrf.mxu3 }
 0x359   : > { %8615 = vst [vmem:[#allocation26_spill] sm:$0xff] %v6984_v0 }
 0x35a   : > { %8616 = vst [vmem:[#allocation27_spill] sm:$0xff] %v6986_v21 }
 0x35f   : > { %v6988_v38 = vpop.f32.mrf.mxu0  ;;  %v6990_v39 = vpop.f32.mrf.mxu1 }
 0x360   : > { %v6992_v27 = vpop.f32.mrf.mxu2  ;;  %v6994_v53 = vpop.f32.mrf.mxu3 }
 0x361   : > { %8617 = vst [vmem:[#allocation28_spill] sm:$0xff] %v6992_v27 }
 0x362   : > { %8618 = vst [vmem:[#allocation29_spill] sm:$0xff] %v6994_v53 }
 0x367   : > { %v1489_v30 = vpop.f32.mrf.mxu0  ;;  %v1538_v56 = vpop.f32.mrf.mxu1 }
 0x368   : > { %v6996_v5 = vpop.f32.mrf.mxu2  ;;  %v6998_v46 = vpop.f32.mrf.mxu3 }
 0x369   : > { %8619 = vst [vmem:[#allocation30_spill] sm:$0xff] %v6996_v5 }
 0x36a   : > { %8620 = vst [vmem:[#allocation31_spill] sm:$0xff] %v6998_v46 }
 0x36f   : > { %v1491_v47 = vpop.f32.mrf.mxu0  ;;  %v1540_v26 = vpop.f32.mrf.mxu1 }
 0x370   : > { %v7002_v31 = vpop.f32.mrf.mxu2  ;;  %v7004_v9 = vpop.f32.mrf.mxu3 }
 0x371   : > { %8621 = vst [vmem:[#allocation32_spill] sm:$0xff] %v7002_v31  ;;  %v1539_v31 = vadd.f32 %v1538_v56, %v7020_v16  ;;  %v1485_v56 = vadd.f32 %v6980_v62, %v7022_v20  ;;  %v1480_v62 = vadd.f32 %v6964_v8, %v7034_v36 }
 0x372   : > { %8622 = vst [vmem:[#allocation33_spill] sm:$0xff] %v7004_v9  ;;  %v1490_v9 = vadd.f32 %v1489_v30, %v7020_v16  ;;  %v7064_v30 = vpop.permute.xlu2 %1338 }
 0x377   : > { %v1494_v55 = vpop.f32.mrf.mxu0  ;;  %v1543_v10 = vpop.f32.mrf.mxu1 }
 0x378   : > { %v7006_v6 = vpop.f32.mrf.mxu2  ;;  %v7008_v18 = vpop.f32.mrf.mxu3  ;;  %v1495_v21 = vadd.f32 %v1494_v55, %v7014_v32 }
 0x379   : > { %8623 = vst [vmem:[#allocation34_spill] sm:$0xff] %v7008_v18 }
 0x37a   : > { %v1699_v18 = vmax.f32 %v1495_v21, 0.0 }
 0x37f   : > { %v1496_v63 = vpop.f32.mrf.mxu0  ;;  %v1545_v57 = vpop.f32.mrf.mxu1 }
 0x380   : > { %v7016_v58 = vpop.f32.mrf.mxu2  ;;  %v7018_v52 = vpop.f32.mrf.mxu3  ;;  %v1497_v41 = vadd.f32 %v1496_v63, %v7012_v33  ;;  %v1546_v25 = vadd.f32 %v1545_v57, %v7012_v33  ;;  %v1492_v63 = vadd.f32 %v1491_v47, %v7024_v22  ;;  %v1541_v57 = vadd.f32 %v1540_v26, %v7024_v22 }
 0x381   : > { %v1692_v47 = vmax.f32 %v1539_v31, 0.0  ;;  %v1531_v26 = vadd.f32 %v6974_v50, %v7032_v28  ;;  %v1526_v50 = vadd.f32 %v6958_v13, %v7064_v30 }
 0x382   : > { %v1703_v46 = vmax.f32 %v1497_v41, 0.0  ;;  %v1695_v41 = vmax.f32 %v1492_v63, 0.0 }
 0x383   : > { %v1680_v63 = vmax.f32 %v1531_v26, 0.0 }
 0x384   : > { %v1867_v21 = vpack.c.bf16 %v1703_v46, %v1699_v18 }
 0x387   : > { %v1499_v15 = vpop.f32.mrf.mxu0  ;;  %v1548_v40 = vpop.f32.mrf.mxu1 }
 0x388   : > { %v7026_v34 = vpop.f32.mrf.mxu2  ;;  %v7028_v43 = vpop.f32.mrf.mxu3  ;;  %v1500_v54 = vadd.f32 %v1499_v15, %v7000_v1  ;;  %v1549_v59 = vadd.f32 %v1548_v40, %v7000_v1  ;;  %v1544_v15 = vadd.f32 %v1543_v10, %v7014_v32 }
 0x38a   : > { %v1707_v0 = vmax.f32 %v1500_v54, 0.0  ;;  %v1708_v40 = vmax.f32 %v1549_v59, 0.0  ;;  %v1700_v55 = vmax.f32 %v1544_v15, 0.0  ;;  %v7052_v54 = vpop.permute.xlu1 %1333  ;;  %v7054_v59 = vpop.permute.xlu0 %1323 }
 0x38f   : > { %v1501_v44 = vpop.f32.mrf.mxu0  ;;  %v1550_v17 = vpop.f32.mrf.mxu1 }
 0x390   : > { %v1502_v3 = vadd.f32 %v1501_v44, %v7010_v14  ;;  %v1551_v37 = vadd.f32 %v1550_v17, %v7010_v14  ;;  %v7042_v60 = vpop.f32.mrf.mxu2  ;;  %v7044_v61 = vpop.f32.mrf.mxu3  ;;  %v1704_v44 = vmax.f32 %v1546_v25, 0.0  ;;  %v1536_v25 = vadd.f32 %v6990_v39, %v7030_v42 }
 0x391   : > { %v1482_v39 = vadd.f32 %v6972_v29, %v7032_v28  ;;  %v1477_v29 = vadd.f32 %v6956_v23, %v7064_v30  ;;  %v1675_v23 = vmax.f32 %v1480_v62, 0.0 }
 0x392   : > { %v1711_v53 = vmax.f32 %v1502_v3, 0.0  ;;  %v1712_v27 = vmax.f32 %v1551_v37, 0.0  ;;  %v1487_v37 = vadd.f32 %v6988_v38, %v7030_v42  ;;  %v1696_v3 = vmax.f32 %v1541_v57, 0.0  ;;  %v7082_v8 = vpop.permute.xlu1 %1328 }
 0x393   : > { %v1691_v38 = vmax.f32 %v1490_v9, 0.0  ;;  %v1688_v10 = vmax.f32 %v1536_v25, 0.0  ;;  %v1683_v9 = vmax.f32 %v1485_v56, 0.0  ;;  %v1524_v25 = vadd.f32 %v6950_v4, %v7052_v54 }
 0x394   : > { %v1871_v5 = vpack.c.bf16 %v1711_v53, %v1707_v0  ;;  %v1872_v17 = vpack.c.bf16 %v1712_v27, %v1708_v40  ;;  %v1868_v53 = vpack.c.bf16 %v1704_v44, %v1700_v55  ;;  %v1687_v46 = vmax.f32 %v1487_v37, 0.0  ;;  %v7084_v37 = vpop.permute.xlu0 %1318 }
 0x395   : > { %v1863_v18 = vpack.c.bf16 %v1695_v41, %v1691_v38  ;;  %v1864_v15 = vpack.c.bf16 %v1696_v3, %v1692_v47  ;;  %v1679_v40 = vmax.f32 %v1482_v39, 0.0  ;;  %v1467_v13 = vadd.f32 %v6932_v7, %v7084_v37 }
 0x396   : > { %2259 = vmatpush.bf16.msra.mxu0 %v1871_v5  ;;  %2588 = vmatpush.bf16.msra.mxu1 %v1872_v17  ;;  %v1534_v5 = vadd.f32 %v6982_v35, %v7022_v20  ;;  %v1529_v35 = vadd.f32 %v6966_v19, %v7034_v36  ;;  %v1859_v17 = vpack.c.bf16 %v1687_v46, %v1683_v9  ;;  %v1671_v56 = vmax.f32 %v1477_v29, 0.0 }
 0x397   : > { %v1475_v19 = vadd.f32 %v6948_v12, %v7052_v54  ;;  %v1516_v3 = vadd.f32 %v6934_v48, %v7084_v37  ;;  %v7098_v12 = vpop.permute.xlu2 %1313  ;;  %v1672_v4 = vmax.f32 %v1526_v50, 0.0  ;;  %v1470_v48 = vadd.f32 %v6936_v2, %v7054_v59 }
 0x398   : > { %v7060_v0 = vpop.f32.mrf.mxu2  ;;  %v7062_v27 = vpop.f32.mrf.mxu3  ;;  %v1684_v31 = vmax.f32 %v1534_v5, 0.0  ;;  %v1676_v41 = vmax.f32 %v1529_v35, 0.0  ;;  %v1855_v5 = vpack.c.bf16 %v1679_v40, %v1675_v23  ;;  %v1465_v47 = vadd.f32 %v6926_v45, %v7098_v12 }
 0x399   : > { %v1514_v7 = vadd.f32 %v6928_v24, %v7098_v12  ;;  %v1667_v39 = vmax.f32 %v1475_v19, 0.0  ;;  %v1655_v26 = vmax.f32 %v1467_v13, 0.0  ;;  %v1656_v46 = vmax.f32 %v1516_v3, 0.0 }
 0x39a   : > { %2260 = vmatpush.bf16.msra.mxu0 %v1867_v21  ;;  %2589 = vmatpush.bf16.msra.mxu1 %v1868_v53  ;;  %v1860_v55 = vpack.c.bf16 %v1688_v10, %v1684_v31  ;;  %v1472_v21 = vadd.f32 %v6940_v49, %v7082_v8  ;;  %v1521_v53 = vadd.f32 %v6942_v51, %v7082_v8  ;;  %v1668_v51 = vmax.f32 %v1524_v25, 0.0 }
 0x39b   : > { %v1856_v38 = vpack.c.bf16 %v1680_v63, %v1676_v41  ;;  %v1519_v49 = vadd.f32 %v6938_v11, %v7054_v59  ;;  %v1851_v35 = vpack.c.bf16 %v1671_v56, %v1667_v39  ;;  %v1595_v2 = vadd.f32 %v7060_v0, %v7012_v33 }
 0x39c   : > { %v1663_v45 = vmax.f32 %v1472_v21, 0.0  ;;  %v1852_v9 = vpack.c.bf16 %v1672_v4, %v1668_v51  ;;  %v1644_v11 = vadd.f32 %v7062_v27, %v7012_v33  ;;  %v1659_v50 = vmax.f32 %v1470_v48, 0.0  ;;  %v8628_v51 = vld [vmem:[#allocation31_spill] sm:$0xff] }
 0x39d   : > { %v1660_v40 = vmax.f32 %v1519_v49, 0.0  ;;  %v1642_v63 = vadd.f32 %v7044_v61, %v7014_v32  ;;  %v1590_v33 = vadd.f32 %v7026_v34, %v7024_v22  ;;  %v1705_v19 = vmax.f32 %v1595_v2, 0.0  ;;  %v8627_v49 = vld [vmem:[#allocation30_spill] sm:$0xff] }
 0x39e   : > { %2261 = vmatpush.bf16.msra.mxu0 %v1863_v18  ;;  %2590 = vmatpush.bf16.msra.mxu1 %v1864_v15  ;;  %v1664_v15 = vmax.f32 %v1521_v53, 0.0  ;;  %v1847_v27 = vpack.c.bf16 %v1663_v45, %v1659_v50  ;;  %v1706_v25 = vmax.f32 %v1644_v11, 0.0  ;;  %v1651_v41 = vmax.f32 %v1465_v47, 0.0  ;;  %v8632_v11 = vld [vmem:[#allocation27_spill] sm:$0xff] }
 0x39f   : > { %v1652_v61 = vmax.f32 %v1514_v7, 0.0  ;;  %v1637_v13 = vadd.f32 %v7018_v52, %v7020_v16  ;;  %v1702_v3 = vmax.f32 %v1642_v63, 0.0  ;;  %v1697_v4 = vmax.f32 %v1590_v33, 0.0  ;;  %v8625_v52 = vld [vmem:[#allocation32_spill] sm:$0xff]  ;;  %v8635_v33 = vld [vmem:[#allocation22_spill] sm:$0xff] }
 0x3a0   : > { %v1597_v57 = vpop.f32.mrf.mxu2  ;;  %v1646_v44 = vpop.f32.mrf.mxu3  ;;  %v1843_v53 = vpack.c.bf16 %v1655_v26, %v1651_v41  ;;  %v1580_v39 = vadd.f32 %v8627_v49, %v7032_v28  ;;  %v1629_v26 = vadd.f32 %v8628_v51, %v7032_v28  ;;  %v8631_v28 = vld [vmem:[#allocation26_spill] sm:$0xff]  ;;  %v8633_v63 = vld [vmem:[#allocation24_spill] sm:$0xff] }
 0x3a1   : > { %v1598_v10 = vadd.f32 %v1597_v57, %v7000_v1  ;;  %v1647_v18 = vadd.f32 %v1646_v44, %v7000_v1  ;;  %v1593_v1 = vadd.f32 %v7042_v60, %v7014_v32  ;;  %v1588_v32 = vadd.f32 %v7016_v58, %v7020_v16  ;;  %v7135_v58 = vld [vmem:[%s8576_s9] sm:$0xff] }
 0x3a2   : > { %2262 = vmatpush.bf16.msra.mxu0 %v1859_v17  ;;  %2591 = vmatpush.bf16.msra.mxu1 %v1860_v55  ;;  %v1848_v55 = vpack.c.bf16 %v1664_v15, %v1660_v40  ;;  %v1844_v56 = vpack.c.bf16 %v1656_v46, %v1652_v61  ;;  %v1870_v47 = vpack.c.bf16 %v1706_v25, %v1702_v3  ;;  %v1694_v48 = vmax.f32 %v1637_v13, 0.0  ;;  %v8638_v61 = vld [vmem:[#allocation21_spill] sm:$0xff] }
 0x3a3   : > { %v1709_v57 = vmax.f32 %v1598_v10, 0.0  ;;  %v1710_v44 = vmax.f32 %v1647_v18, 0.0  ;;  %v1701_v34 = vmax.f32 %v1593_v1, 0.0  ;;  %v1583_v16 = vadd.f32 %v8625_v52, %v7022_v20 }
 0x3a4   : > { %v1575_v2 = vadd.f32 %v8631_v28, %v7064_v30  ;;  %v1682_v50 = vmax.f32 %v1629_v26, 0.0  ;;  %v5973_v26 = vld [vmem:[%s8576_s9 + $0x18] sm:$0xff]  ;;  %v5979_v28 = vld [vmem:[%s8576_s9 + $0x48] sm:$0xff] }
 0x3a6   : > { %2263 = vmatpush.bf16.msra.mxu0 %v1855_v5  ;;  %2592 = vmatpush.bf16.msra.mxu1 %v1856_v38  ;;  %v1869_v38 = vpack.c.bf16 %v1705_v19, %v1701_v34  ;;  %v8639_v34 = vld [vmem:[#allocation18_spill] sm:$0xff] }
 0x3a7   : > { %v1565_v3 = vadd.f32 %v8639_v34, %v7084_v37 }
 0x3a8   : > { %v1599_v62 = vpop.f32.mrf.mxu2  ;;  %v1648_v24 = vpop.f32.mrf.mxu3 }
 0x3a9   : > { %v1600_v31 = vadd.f32 %v1599_v62, %v7010_v14  ;;  %v1649_v29 = vadd.f32 %v1648_v24, %v7010_v14  ;;  %v1639_v14 = vadd.f32 %v7028_v43, %v7024_v22  ;;  %v1585_v22 = vadd.f32 %v7006_v6, %v7030_v42  ;;  %v8624_v43 = vld [vmem:[#allocation34_spill] sm:$0xff]  ;;  %v8626_v6 = vld [vmem:[#allocation33_spill] sm:$0xff] }
 0x3aa   : > { %2264 = vmatpush.bf16.msra.mxu0 %v1851_v35  ;;  %2593 = vmatpush.bf16.msra.mxu1 %v1852_v9  ;;  %v1634_v21 = vadd.f32 %v8624_v43, %v7030_v42  ;;  %v1632_v7 = vadd.f32 %v8626_v6, %v7022_v20  ;;  %v1693_v42 = vmax.f32 %v1588_v32, 0.0  ;;  %v8629_v20 = vld [vmem:[#allocation28_spill] sm:$0xff]  ;;  %v8630_v62 = vld [vmem:[#allocation29_spill] sm:$0xff]  ;;  %v1685_v35 = vmax.f32 %v1583_v16, 0.0 }
 0x3ab   : > { %v1713_v0 = vmax.f32 %v1600_v31, 0.0  ;;  %v1714_v17 = vmax.f32 %v1649_v29, 0.0  ;;  %v1698_v5 = vmax.f32 %v1639_v14, 0.0  ;;  %v1689_v46 = vmax.f32 %v1585_v22, 0.0  ;;  %v8640_v22 = vld [vmem:[#allocation19_spill] sm:$0xff] }
 0x3ac   : > { %v1690_v10 = vmax.f32 %v1634_v21, 0.0  ;;  %v1865_v18 = vpack.c.bf16 %v1697_v4, %v1693_v42  ;;  %v1578_v15 = vadd.f32 %v8629_v20, %v7034_v36  ;;  %v1627_v24 = vadd.f32 %v8630_v62, %v7034_v36  ;;  %v5971_v4 = vld [vmem:[%s8576_s9 + $0x8] sm:$0xff] }
 0x3ad   : > { %v1873_v60 = vpack.c.bf16 %v1713_v0, %v1709_v57  ;;  %v1874_v23 = vpack.c.bf16 %v1714_v17, %v1710_v44  ;;  %v1866_v45 = vpack.c.bf16 %v1698_v5, %v1694_v48  ;;  %v1686_v9 = vmax.f32 %v1632_v7, 0.0  ;;  %v8634_v44 = vld [vmem:[#allocation25_spill] sm:$0xff] }
 0x3ae   : > { %2265 = vmatpush.bf16.msra.mxu0 %v1847_v27  ;;  %2594 = vmatpush.bf16.msra.mxu1 %v1848_v55  ;;  %v1624_v31 = vadd.f32 %v8632_v11, %v7064_v30  ;;  %v1681_v29 = vmax.f32 %v1580_v39, 0.0  ;;  %v1861_v40 = vpack.c.bf16 %v1689_v46, %v1685_v35  ;;  %v1573_v57 = vadd.f32 %v8633_v63, %v7052_v54  ;;  %v8636_v27 = vld [vmem:[#allocation23_spill] sm:$0xff]  ;;  %v5975_v46 = vld [vmem:[%s8576_s9 + $0x28] sm:$0xff] }
 0x3af   : > { %2917 = vmatpush.bf16.msra.mxu2 %v1873_v60  ;;  %3246 = vmatpush.bf16.msra.mxu3 %v1874_v23  ;;  %v1862_v1 = vpack.c.bf16 %v1690_v10, %v1686_v9  ;;  %v1622_v36 = vadd.f32 %v8634_v44, %v7052_v54  ;;  %v1677_v0 = vmax.f32 %v1578_v15, 0.0  ;;  %v1678_v17 = vmax.f32 %v1627_v24, 0.0  ;;  %v8637_v23 = vld [vmem:[#allocation20_spill] sm:$0xff]  ;;  %v5976_v10 = vld [vmem:[%s8576_s9 + $0x30] sm:$0xff] }
 0x3b0   : > { %v1570_v14 = vadd.f32 %v8635_v33, %v7082_v8  ;;  %v1619_v30 = vadd.f32 %v8636_v27, %v7082_v8  ;;  %v1673_v55 = vmax.f32 %v1575_v2, 0.0  ;;  %v1674_v19 = vmax.f32 %v1624_v31, 0.0 }
 0x3b1   : > { %v1857_v25 = vpack.c.bf16 %v1681_v29, %v1677_v0  ;;  %v1858_v60 = vpack.c.bf16 %v1682_v50, %v1678_v17  ;;  %v1568_v41 = vadd.f32 %v8637_v23, %v7054_v59  ;;  %v1617_v54 = vadd.f32 %v8638_v61, %v7054_v59  ;;  %v8641_v59 = vld [vmem:[#allocation16_spill] sm:$0xff]  ;;  %v5981_v61 = vld [vmem:[%s8576_s9 + $0x58] sm:$0xff] }
 0x3b2   : > { %2266 = vmatpush.bf16.msra.mxu0 %v1843_v53  ;;  %2595 = vmatpush.bf16.msra.mxu1 %v1844_v56  ;;  %v1669_v32 = vmax.f32 %v1573_v57, 0.0  ;;  %v1670_v13 = vmax.f32 %v1622_v36, 0.0  ;;  %v1614_v8 = vadd.f32 %v8640_v22, %v7084_v37  ;;  %v1665_v43 = vmax.f32 %v1570_v14, 0.0  ;;  %v5980_v57 = vld [vmem:[%s8576_s9 + $0x50] sm:$0xff] }
 0x3b3   : > { %2918 = vmatpush.bf16.msra.mxu2 %v1869_v38  ;;  %3247 = vmatpush.bf16.msra.mxu3 %v1870_v47  ;;  %v1666_v21 = vmax.f32 %v1619_v30, 0.0  ;;  %v1563_v5 = vadd.f32 %v8641_v59, %v7098_v12  ;;  %v8642_v38 = vld [vmem:[#allocation17_spill] sm:$0xff]  ;;  %v1661_v52 = vmax.f32 %v1568_v41, 0.0  ;;  %v1662_v16 = vmax.f32 %v1617_v54, 0.0 }
 0x3b4   : > { %v1853_v53 = vpack.c.bf16 %v1673_v55, %v1669_v32  ;;  %v1854_v56 = vpack.c.bf16 %v1674_v19, %v1670_v13  ;;  %v1612_v47 = vadd.f32 %v8642_v38, %v7098_v12  ;;  %v1657_v6 = vmax.f32 %v1565_v3, 0.0  ;;  %v5972_v12 = vld [vmem:[%s8576_s9 + $0x10] sm:$0xff]  ;;  %v5982_v38 = vld [vmem:[%s8576_s9 + $0x60] sm:$0xff] }
 0x3b5   : > { %2267 = vmatmul.bf16.vlgmr.msra.gmra.mxu0 %v7135_v58  ;;  %2596 = vmatmul.bf16.vlgmr.msra.gmra.mxu1 %v7135_v58  ;;  %v1658_v37 = vmax.f32 %v1614_v8, 0.0  ;;  %v1849_v7 = vpack.c.bf16 %v1665_v43, %v1661_v52  ;;  %v1850_v42 = vpack.c.bf16 %v1666_v21, %v1662_v16  ;;  %v1653_v48 = vmax.f32 %v1563_v5, 0.0 }
 0x3b6   : > { %v1654_v49 = vmax.f32 %v1612_v47, 0.0 }
 0x3b7   : > { %2919 = vmatpush.bf16.msra.mxu2 %v1865_v18  ;;  %3248 = vmatpush.bf16.msra.mxu3 %v1866_v45  ;;  %v1845_v39 = vpack.c.bf16 %v1657_v6, %v1653_v48  ;;  %v5977_v18 = vld [vmem:[%s8576_s9 + $0x38] sm:$0xff]  ;;  %v5978_v45 = vld [vmem:[%s8576_s9 + $0x40] sm:$0xff] }
 0x3b8   : > { %v1846_v51 = vpack.c.bf16 %v1658_v37, %v1654_v49 }
 0x3bb   : > { %2920 = vmatpush.bf16.msra.mxu2 %v1861_v40  ;;  %3249 = vmatpush.bf16.msra.mxu3 %v1862_v1 }
 0x3bf   : > { %2921 = vmatpush.bf16.msra.mxu2 %v1857_v25  ;;  %3250 = vmatpush.bf16.msra.mxu3 %v1858_v60 }
 0x3c3   : > { %2922 = vmatpush.bf16.msra.mxu2 %v1853_v53  ;;  %3251 = vmatpush.bf16.msra.mxu3 %v1854_v56 }
 0x3c5   : > { %2272 = vmatmul.bf16.gmra.mxu0 %v5971_v4  ;;  %2601 = vmatmul.bf16.gmra.mxu1 %v5971_v4 }
 0x3c7   : > { %2923 = vmatpush.bf16.msra.mxu2 %v1849_v7  ;;  %3252 = vmatpush.bf16.msra.mxu3 %v1850_v42 }
 0x3cb   : > { %2924 = vmatpush.bf16.msra.mxu2 %v1845_v39  ;;  %3253 = vmatpush.bf16.msra.mxu3 %v1846_v51 }
 0x3ce   : > { %2925 = vmatmul.bf16.vlgmr.msra.gmra.mxu2 %v7135_v58  ;;  %3254 = vmatmul.bf16.vlgmr.msra.gmra.mxu3 %v7135_v58  ;;  %v5974_v58 = vld [vmem:[%s8576_s9 + $0x20] sm:$0xff] }
 0x3d5   : > { %2277 = vmatmul.bf16.gmra.mxu0 %v5972_v12  ;;  %2606 = vmatmul.bf16.gmra.mxu1 %v5972_v12 }
 0x3de   : > { %2930 = vmatmul.bf16.gmra.mxu2 %v5971_v4  ;;  %3259 = vmatmul.bf16.gmra.mxu3 %v5971_v4 }
 0x3e5   : > { %2282 = vmatmul.bf16.gmra.mxu0 %v5973_v26  ;;  %2611 = vmatmul.bf16.gmra.mxu1 %v5973_v26 }
 0x3ee   : > { %2935 = vmatmul.bf16.gmra.mxu2 %v5972_v12  ;;  %3264 = vmatmul.bf16.gmra.mxu3 %v5972_v12 }
 0x3f5   : > { %2287 = vmatmul.bf16.gmra.mxu0 %v5974_v58  ;;  %2616 = vmatmul.bf16.gmra.mxu1 %v5974_v58 }
 0x3fe   : > { %2940 = vmatmul.bf16.gmra.mxu2 %v5973_v26  ;;  %3269 = vmatmul.bf16.gmra.mxu3 %v5973_v26 }
 0x405   : > { %2292 = vmatmul.bf16.gmra.mxu0 %v5975_v46  ;;  %2621 = vmatmul.bf16.gmra.mxu1 %v5975_v46 }
 0x40e   : > { %2945 = vmatmul.bf16.gmra.mxu2 %v5974_v58  ;;  %3274 = vmatmul.bf16.gmra.mxu3 %v5974_v58 }
 0x415   : > { %2297 = vmatmul.bf16.gmra.mxu0 %v5976_v10  ;;  %2626 = vmatmul.bf16.gmra.mxu1 %v5976_v10 }
 0x41e   : > { %2950 = vmatmul.bf16.gmra.mxu2 %v5975_v46  ;;  %3279 = vmatmul.bf16.gmra.mxu3 %v5975_v46  ;;  %v5983_v46 = vld [vmem:[%s8576_s9 + $0x68] sm:$0xff] }
 0x425   : > { %2302 = vmatmul.bf16.gmra.mxu0 %v5977_v18  ;;  %2631 = vmatmul.bf16.gmra.mxu1 %v5977_v18 }
 0x42e   : > { %2955 = vmatmul.bf16.gmra.mxu2 %v5976_v10  ;;  %3284 = vmatmul.bf16.gmra.mxu3 %v5976_v10 }
 0x432   : > { %v2268_v20 = vpop.f32.mrf.mxu0  ;;  %v2597_v15 = vpop.f32.mrf.mxu1 }
 0x433   : > { %v3575_v62 = vmax.f32 %v2268_v20, %v2597_v15 }
 0x435   : > { %2307 = vmatmul.bf16.gmra.mxu0 %v5978_v45  ;;  %2636 = vmatmul.bf16.gmra.mxu1 %v5978_v45 }
 0x43a   : > { %v2270_v24 = vpop.f32.mrf.mxu0  ;;  %v2599_v35 = vpop.f32.mrf.mxu1 }
 0x43b   : > { %v3576_v9 = vmax.f32 %v2270_v24, %v2599_v35 }
 0x43e   : > { %2960 = vmatmul.bf16.gmra.mxu2 %v5977_v18  ;;  %3289 = vmatmul.bf16.gmra.mxu3 %v5977_v18 }
 0x442   : > { %v2273_v2 = vpop.f32.mrf.mxu0  ;;  %v2602_v11 = vpop.f32.mrf.mxu1 }
 0x443   : > { %v3577_v31 = vmax.f32 %v2273_v2, %v2602_v11 }
 0x445   : > { %2312 = vmatmul.bf16.gmra.mxu0 %v5979_v28  ;;  %2641 = vmatmul.bf16.gmra.mxu1 %v5979_v28 }
 0x44a   : > { %v2275_v29 = vpop.f32.mrf.mxu0  ;;  %v2604_v50 = vpop.f32.mrf.mxu1 }
 0x44b   : > { %v3578_v40 = vmax.f32 %v2275_v29, %v2604_v50  ;;  %v5984_v50 = vld [vmem:[%s8576_s9 + $0x70] sm:$0xff] }
 0x44e   : > { %2965 = vmatmul.bf16.gmra.mxu2 %v5978_v45  ;;  %3294 = vmatmul.bf16.gmra.mxu3 %v5978_v45 }
 0x451   : > { %v2926_v1 = vpop.f32.mrf.mxu2  ;;  %v3255_v63 = vpop.f32.mrf.mxu3 }
 0x452   : > { %v3703_v44 = vmax.f32 %v3575_v62, %v2926_v1  ;;  %v2278_v36 = vpop.f32.mrf.mxu0  ;;  %v2607_v0 = vpop.f32.mrf.mxu1 }
 0x453   : > { %v3579_v17 = vmax.f32 %v2278_v36, %v2607_v0 }
 0x454   : > { %v7207_v33 = vmax.f32 %v3703_v44, %v3255_v63 }
 0x455   : > { %2317 = vmatmul.bf16.gmra.mxu0 %v5980_v57  ;;  %2646 = vmatmul.bf16.gmra.mxu1 %v5980_v57 }
 0x459   : > { %v2928_v14 = vpop.f32.mrf.mxu2  ;;  %v3257_v27 = vpop.f32.mrf.mxu3 }
 0x45a   : > { %v3704_v30 = vmax.f32 %v3576_v9, %v2928_v14  ;;  %v2280_v55 = vpop.f32.mrf.mxu0  ;;  %v2609_v19 = vpop.f32.mrf.mxu1 }
 0x45b   : > { %v3580_v25 = vmax.f32 %v2280_v55, %v2609_v19 }
 0x45c   : > { %v7209_v60 = vmax.f32 %v3704_v30, %v3257_v27 }
 0x45e   : > { %2970 = vmatmul.bf16.gmra.mxu2 %v5979_v28  ;;  %3299 = vmatmul.bf16.gmra.mxu3 %v5979_v28 }
 0x461   : > { %v2931_v23 = vpop.f32.mrf.mxu2  ;;  %v3260_v41 = vpop.f32.mrf.mxu3 }
 0x462   : > { %v3705_v54 = vmax.f32 %v3577_v31, %v2931_v23  ;;  %v2283_v32 = vpop.f32.mrf.mxu0  ;;  %v2612_v13 = vpop.f32.mrf.mxu1  ;;  %v5985_v23 = vld [vmem:[%s8576_s9 + $0x78] sm:$0xff] }
 0x463   : > { %v3581_v34 = vmax.f32 %v2283_v32, %v2612_v13 }
 0x464   : > { %v7214_v3 = vmax.f32 %v3705_v54, %v3260_v41 }
 0x465   : > { %2322 = vmatmul.bf16.gmra.mxu0 %v5981_v61  ;;  %2651 = vmatmul.bf16.gmra.mxu1 %v5981_v61 }
 0x469   : > { %v2933_v22 = vpop.f32.mrf.mxu2  ;;  %v3262_v8 = vpop.f32.mrf.mxu3 }
 0x46a   : > { %v3706_v43 = vmax.f32 %v3578_v40, %v2933_v22  ;;  %v2285_v21 = vpop.f32.mrf.mxu0  ;;  %v2614_v53 = vpop.f32.mrf.mxu1 }
 0x46b   : > { %v3582_v56 = vmax.f32 %v2285_v21, %v2614_v53 }
 0x46c   : > { %v7216_v4 = vmax.f32 %v3706_v43, %v3262_v8 }
 0x46e   : > { %2975 = vmatmul.bf16.gmra.mxu2 %v5980_v57  ;;  %3304 = vmatmul.bf16.gmra.mxu3 %v5980_v57 }
 0x471   : > { %v2936_v59 = vpop.f32.mrf.mxu2  ;;  %v3265_v5 = vpop.f32.mrf.mxu3 }
 0x472   : > { %v3707_v47 = vmax.f32 %v3579_v17, %v2936_v59  ;;  %v2288_v52 = vpop.f32.mrf.mxu0  ;;  %v2617_v16 = vpop.f32.mrf.mxu1 }
 0x473   : > { %v3583_v6 = vmax.f32 %v2288_v52, %v2617_v16 }
 0x474   : > { %v7221_v37 = vmax.f32 %v3707_v47, %v3265_v5 }
 0x475   : > { %2327 = vmatmul.bf16.gmra.mxu0 %v5982_v38  ;;  %2656 = vmatmul.bf16.gmra.mxu1 %v5982_v38 }
 0x479   : > { %v2938_v7 = vpop.f32.mrf.mxu2  ;;  %v3267_v42 = vpop.f32.mrf.mxu3 }
 0x47a   : > { %v3708_v48 = vmax.f32 %v3580_v25, %v2938_v7  ;;  %v2290_v49 = vpop.f32.mrf.mxu0  ;;  %v2619_v39 = vpop.f32.mrf.mxu1 }
 0x47b   : > { %v3584_v51 = vmax.f32 %v2290_v49, %v2619_v39 }
 0x47c   : > { %v7223_v12 = vmax.f32 %v3708_v48, %v3267_v42 }
 0x47e   : > { %2980 = vmatmul.bf16.gmra.mxu2 %v5981_v61  ;;  %3309 = vmatmul.bf16.gmra.mxu3 %v5981_v61 }
 0x481   : > { %v2941_v26 = vpop.f32.mrf.mxu2  ;;  %v3270_v58 = vpop.f32.mrf.mxu3 }
 0x482   : > { %v3709_v10 = vmax.f32 %v3581_v34, %v2941_v26  ;;  %v2293_v18 = vpop.f32.mrf.mxu0  ;;  %v2622_v45 = vpop.f32.mrf.mxu1 }
 0x483   : > { %v3585_v20 = vmax.f32 %v2293_v18, %v2622_v45  ;;  %v5987_v18 = vld [vmem:[%s8576_s9 + $0x88] sm:$0xff] }
 0x484   : > { %v7228_v15 = vmax.f32 %v3709_v10, %v3270_v58 }
 0x485   : > { %2332 = vmatmul.bf16.gmra.mxu0 %v5983_v46  ;;  %2661 = vmatmul.bf16.gmra.mxu1 %v5983_v46 }
 0x489   : > { %v2943_v62 = vpop.f32.mrf.mxu2  ;;  %v3272_v24 = vpop.f32.mrf.mxu3 }
 0x48a   : > { %v3710_v35 = vmax.f32 %v3582_v56, %v2943_v62  ;;  %v2295_v9 = vpop.f32.mrf.mxu0  ;;  %v2624_v28 = vpop.f32.mrf.mxu1 }
 0x48b   : > { %v3586_v2 = vmax.f32 %v2295_v9, %v2624_v28 }
 0x48c   : > { %v7230_v11 = vmax.f32 %v3710_v35, %v3272_v24 }
 0x48e   : > { %2985 = vmatmul.bf16.gmra.mxu2 %v5982_v38  ;;  %3314 = vmatmul.bf16.gmra.mxu3 %v5982_v38  ;;  %v5986_v38 = vld [vmem:[%s8576_s9 + $0x80] sm:$0xff] }
 0x491   : > { %v2946_v31 = vpop.f32.mrf.mxu2  ;;  %v3275_v29 = vpop.f32.mrf.mxu3 }
 0x492   : > { %v3711_v40 = vmax.f32 %v3583_v6, %v2946_v31  ;;  %v2298_v1 = vpop.f32.mrf.mxu0  ;;  %v2627_v63 = vpop.f32.mrf.mxu1 }
 0x493   : > { %v3587_v57 = vmax.f32 %v2298_v1, %v2627_v63 }
 0x494   : > { %v7235_v44 = vmax.f32 %v3711_v40, %v3275_v29 }
 0x495   : > { %2337 = vmatmul.bf16.gmra.mxu0 %v5984_v50  ;;  %2666 = vmatmul.bf16.gmra.mxu1 %v5984_v50 }
 0x499   : > { %v2948_v36 = vpop.f32.mrf.mxu2  ;;  %v3277_v0 = vpop.f32.mrf.mxu3 }
 0x49a   : > { %v3712_v17 = vmax.f32 %v3584_v51, %v2948_v36  ;;  %v2300_v14 = vpop.f32.mrf.mxu0  ;;  %v2629_v27 = vpop.f32.mrf.mxu1 }
 0x49b   : > { %v3588_v30 = vmax.f32 %v2300_v14, %v2629_v27 }
 0x49c   : > { %v7237_v55 = vmax.f32 %v3712_v17, %v3277_v0 }
 0x49e   : > { %2990 = vmatmul.bf16.gmra.mxu2 %v5983_v46  ;;  %3319 = vmatmul.bf16.gmra.mxu3 %v5983_v46 }
 0x4a1   : > { %v2951_v19 = vpop.f32.mrf.mxu2  ;;  %v3280_v25 = vpop.f32.mrf.mxu3 }
 0x4a2   : > { %v3713_v41 = vmax.f32 %v3585_v20, %v2951_v19  ;;  %v2303_v61 = vpop.f32.mrf.mxu0  ;;  %v2632_v54 = vpop.f32.mrf.mxu1 }
 0x4a3   : > { %v3589_v32 = vmax.f32 %v2303_v61, %v2632_v54 }
 0x4a4   : > { %v7242_v13 = vmax.f32 %v3713_v41, %v3280_v25 }
 0x4a5   : > { %2342 = vmatmul.bf16.gmra.mxu0 %v5985_v23  ;;  %2671 = vmatmul.bf16.gmra.mxu1 %v5985_v23 }
 0x4a9   : > { %v2953_v34 = vpop.f32.mrf.mxu2  ;;  %v3282_v22 = vpop.f32.mrf.mxu3 }
 0x4aa   : > { %v3714_v8 = vmax.f32 %v3586_v2, %v2953_v34  ;;  %v2305_v43 = vpop.f32.mrf.mxu0  ;;  %v2634_v21 = vpop.f32.mrf.mxu1 }
 0x4ab   : > { %v3590_v53 = vmax.f32 %v2305_v43, %v2634_v21 }
 0x4ac   : > { %v7244_v56 = vmax.f32 %v3714_v8, %v3282_v22  ;;  %v5989_v22 = vld [vmem:[%s8576_s9 + $0x98] sm:$0xff] }
 0x4ae   : > { %2995 = vmatmul.bf16.gmra.mxu2 %v5984_v50  ;;  %3324 = vmatmul.bf16.gmra.mxu3 %v5984_v50 }
 0x4b1   : > { %v2956_v59 = vpop.f32.mrf.mxu2  ;;  %v3285_v5 = vpop.f32.mrf.mxu3 }
 0x4b2   : > { %v3715_v47 = vmax.f32 %v3587_v57, %v2956_v59  ;;  %v2308_v52 = vpop.f32.mrf.mxu0  ;;  %v2637_v16 = vpop.f32.mrf.mxu1  ;;  %v5988_v57 = vld [vmem:[%s8576_s9 + $0x90] sm:$0xff] }
 0x4b3   : > { %v3591_v6 = vmax.f32 %v2308_v52, %v2637_v16 }
 0x4b4   : > { %v7249_v7 = vmax.f32 %v3715_v47, %v3285_v5 }
 0x4b5   : > { %2347 = vmatmul.bf16.gmra.mxu0 %v5986_v38  ;;  %2676 = vmatmul.bf16.gmra.mxu1 %v5986_v38 }
 0x4b9   : > { %v2958_v42 = vpop.f32.mrf.mxu2  ;;  %v3287_v48 = vpop.f32.mrf.mxu3 }
 0x4ba   : > { %v3716_v49 = vmax.f32 %v3588_v30, %v2958_v42  ;;  %v2310_v39 = vpop.f32.mrf.mxu0  ;;  %v2639_v51 = vpop.f32.mrf.mxu1 }
 0x4bb   : > { %v3592_v26 = vmax.f32 %v2310_v39, %v2639_v51  ;;  %v5990_v39 = vld [vmem:[%s8576_s9 + $0xa0] sm:$0xff] }
 0x4bc   : > { %v7251_v58 = vmax.f32 %v3716_v49, %v3287_v48 }
 0x4be   : > { %3000 = vmatmul.bf16.gmra.mxu2 %v5985_v23  ;;  %3329 = vmatmul.bf16.gmra.mxu3 %v5985_v23 }
 0x4c1   : > { %v2961_v46 = vpop.f32.mrf.mxu2  ;;  %v3290_v10 = vpop.f32.mrf.mxu3 }
 0x4c2   : > { %v3717_v45 = vmax.f32 %v3589_v32, %v2961_v46  ;;  %v2313_v20 = vpop.f32.mrf.mxu0  ;;  %v2642_v62 = vpop.f32.mrf.mxu1 }
 0x4c3   : > { %v3593_v24 = vmax.f32 %v2313_v20, %v2642_v62 }
 0x4c4   : > { %v7256_v35 = vmax.f32 %v3717_v45, %v3290_v10 }
 0x4c5   : > { %2352 = vmatmul.bf16.gmra.mxu0 %v5987_v18  ;;  %2681 = vmatmul.bf16.gmra.mxu1 %v5987_v18 }
 0x4c9   : > { %v2963_v9 = vpop.f32.mrf.mxu2  ;;  %v3292_v28 = vpop.f32.mrf.mxu3 }
 0x4ca   : > { %v3718_v2 = vmax.f32 %v3590_v53, %v2963_v9  ;;  %v2315_v31 = vpop.f32.mrf.mxu0  ;;  %v2644_v29 = vpop.f32.mrf.mxu1 }
 0x4cb   : > { %v3594_v50 = vmax.f32 %v2315_v31, %v2644_v29 }
 0x4cc   : > { %v7258_v40 = vmax.f32 %v3718_v2, %v3292_v28 }
 0x4ce   : > { %3005 = vmatmul.bf16.gmra.mxu2 %v5986_v38  ;;  %3334 = vmatmul.bf16.gmra.mxu3 %v5986_v38 }
 0x4d1   : > { %v2966_v1 = vpop.f32.mrf.mxu2  ;;  %v3295_v63 = vpop.f32.mrf.mxu3 }
 0x4d2   : > { %v3719_v36 = vmax.f32 %v3591_v6, %v2966_v1  ;;  %v2318_v0 = vpop.f32.mrf.mxu0  ;;  %v2647_v17 = vpop.f32.mrf.mxu1 }
 0x4d3   : > { %v3595_v14 = vmax.f32 %v2318_v0, %v2647_v17 }
 0x4d4   : > { %v7263_v27 = vmax.f32 %v3719_v36, %v3295_v63 }
 0x4d5   : > { %2357 = vmatmul.bf16.gmra.mxu0 %v5988_v57  ;;  %2686 = vmatmul.bf16.gmra.mxu1 %v5988_v57 }
 0x4d9   : > { %v2968_v30 = vpop.f32.mrf.mxu2  ;;  %v3297_v19 = vpop.f32.mrf.mxu3 }
 0x4da   : > { %v3720_v25 = vmax.f32 %v3592_v26, %v2968_v30  ;;  %v2320_v23 = vpop.f32.mrf.mxu0  ;;  %v2649_v41 = vpop.f32.mrf.mxu1 }
 0x4db   : > { %v3596_v61 = vmax.f32 %v2320_v23, %v2649_v41 }
 0x4dc   : > { %v7265_v54 = vmax.f32 %v3720_v25, %v3297_v19 }
 0x4de   : > { %3010 = vmatmul.bf16.gmra.mxu2 %v5987_v18  ;;  %3339 = vmatmul.bf16.gmra.mxu3 %v5987_v18 }
 0x4e1   : > { %v2971_v32 = vpop.f32.mrf.mxu2  ;;  %v3300_v34 = vpop.f32.mrf.mxu3 }
 0x4e2   : > { %v3721_v8 = vmax.f32 %v3593_v24, %v2971_v32  ;;  %v2323_v43 = vpop.f32.mrf.mxu0  ;;  %v2652_v21 = vpop.f32.mrf.mxu1 }
 0x4e3   : > { %v3597_v53 = vmax.f32 %v2323_v43, %v2652_v21 }
 0x4e4   : > { %v7270_v59 = vmax.f32 %v3721_v8, %v3300_v34  ;;  %v5992_v34 = vld [vmem:[%s8576_s9 + $0xb0] sm:$0xff] }
 0x4e5   : > { %2362 = vmatmul.bf16.gmra.mxu0 %v5989_v22  ;;  %2691 = vmatmul.bf16.gmra.mxu1 %v5989_v22 }
 0x4e9   : > { %v2973_v5 = vpop.f32.mrf.mxu2  ;;  %v3302_v38 = vpop.f32.mrf.mxu3 }
 0x4ea   : > { %v3722_v47 = vmax.f32 %v3594_v50, %v2973_v5  ;;  %v2325_v52 = vpop.f32.mrf.mxu0  ;;  %v2654_v16 = vpop.f32.mrf.mxu1  ;;  %v5991_v50 = vld [vmem:[%s8576_s9 + $0xa8] sm:$0xff] }
 0x4eb   : > { %v3598_v6 = vmax.f32 %v2325_v52, %v2654_v16 }
 0x4ec   : > { %v7272_v42 = vmax.f32 %v3722_v47, %v3302_v38 }
 0x4ee   : > { %3015 = vmatmul.bf16.gmra.mxu2 %v5988_v57  ;;  %3344 = vmatmul.bf16.gmra.mxu3 %v5988_v57 }
 0x4f1   : > { %v2976_v48 = vpop.f32.mrf.mxu2  ;;  %v3305_v49 = vpop.f32.mrf.mxu3 }
 0x4f2   : > { %v3723_v51 = vmax.f32 %v3595_v14, %v2976_v48  ;;  %v2328_v26 = vpop.f32.mrf.mxu0  ;;  %v2657_v46 = vpop.f32.mrf.mxu1 }
 0x4f3   : > { %v3599_v10 = vmax.f32 %v2328_v26, %v2657_v46 }
 0x4f4   : > { %v7277_v18 = vmax.f32 %v3723_v51, %v3305_v49  ;;  %v5993_v51 = vld [vmem:[%s8576_s9 + $0xb8] sm:$0xff] }
 0x4f5   : > { %2367 = vmatmul.bf16.gmra.mxu0 %v5990_v39  ;;  %2696 = vmatmul.bf16.gmra.mxu1 %v5990_v39 }
 0x4f9   : > { %v2978_v45 = vpop.f32.mrf.mxu2  ;;  %v3307_v20 = vpop.f32.mrf.mxu3 }
 0x4fa   : > { %v3724_v62 = vmax.f32 %v3596_v61, %v2978_v45  ;;  %v2330_v24 = vpop.f32.mrf.mxu0  ;;  %v2659_v9 = vpop.f32.mrf.mxu1 }
 0x4fb   : > { %v3600_v28 = vmax.f32 %v2330_v24, %v2659_v9 }
 0x4fc   : > { %v7279_v2 = vmax.f32 %v3724_v62, %v3307_v20 }
 0x4fe   : > { %3020 = vmatmul.bf16.gmra.mxu2 %v5989_v22  ;;  %3349 = vmatmul.bf16.gmra.mxu3 %v5989_v22 }
 0x501   : > { %v2981_v31 = vpop.f32.mrf.mxu2  ;;  %v3310_v29 = vpop.f32.mrf.mxu3 }
 0x502   : > { %v3725_v1 = vmax.f32 %v3597_v53, %v2981_v31  ;;  %v2333_v63 = vpop.f32.mrf.mxu0  ;;  %v2662_v57 = vpop.f32.mrf.mxu1 }
 0x503   : > { %v3601_v36 = vmax.f32 %v2333_v63, %v2662_v57  ;;  %v5994_v57 = vld [vmem:[%s8576_s9 + $0xc0] sm:$0xff] }
 0x504   : > { %v7284_v0 = vmax.f32 %v3725_v1, %v3310_v29 }
 0x505   : > { %2372 = vmatmul.bf16.gmra.mxu0 %v5991_v50  ;;  %2701 = vmatmul.bf16.gmra.mxu1 %v5991_v50 }
 0x509   : > { %v2983_v17 = vpop.f32.mrf.mxu2  ;;  %v3312_v14 = vpop.f32.mrf.mxu3 }
 0x50a   : > { %v3726_v30 = vmax.f32 %v3598_v6, %v2983_v17  ;;  %v2335_v19 = vpop.f32.mrf.mxu0  ;;  %v2664_v25 = vpop.f32.mrf.mxu1 }
 0x50b   : > { %v3602_v23 = vmax.f32 %v2335_v19, %v2664_v25 }
 0x50c   : > { %v7286_v41 = vmax.f32 %v3726_v30, %v3312_v14 }
 0x50e   : > { %3025 = vmatmul.bf16.gmra.mxu2 %v5990_v39  ;;  %3354 = vmatmul.bf16.gmra.mxu3 %v5990_v39 }
 0x511   : > { %v2986_v61 = vpop.f32.mrf.mxu2  ;;  %v3315_v32 = vpop.f32.mrf.mxu3 }
 0x512   : > { %v3727_v22 = vmax.f32 %v3599_v10, %v2986_v61  ;;  %v2338_v8 = vpop.f32.mrf.mxu0  ;;  %v2667_v43 = vpop.f32.mrf.mxu1 }
 0x513   : > { %v3603_v21 = vmax.f32 %v2338_v8, %v2667_v43 }
 0x514   : > { %v7291_v53 = vmax.f32 %v3727_v22, %v3315_v32 }
 0x515   : > { %2377 = vmatmul.bf16.gmra.mxu0 %v5992_v34  ;;  %2706 = vmatmul.bf16.gmra.mxu1 %v5992_v34 }
 0x519   : > { %v2988_v5 = vpop.f32.mrf.mxu2  ;;  %v3317_v38 = vpop.f32.mrf.mxu3 }
 0x51a   : > { %v3728_v47 = vmax.f32 %v3600_v28, %v2988_v5  ;;  %v2340_v52 = vpop.f32.mrf.mxu0  ;;  %v2669_v16 = vpop.f32.mrf.mxu1 }
 0x51b   : > { %v3604_v6 = vmax.f32 %v2340_v52, %v2669_v16 }
 0x51c   : > { %v7293_v48 = vmax.f32 %v3728_v47, %v3317_v38 }
 0x51e   : > { %3030 = vmatmul.bf16.gmra.mxu2 %v5991_v50  ;;  %3359 = vmatmul.bf16.gmra.mxu3 %v5991_v50 }
 0x521   : > { %v2991_v49 = vpop.f32.mrf.mxu2  ;;  %v3320_v39 = vpop.f32.mrf.mxu3 }
 0x522   : > { %v3729_v26 = vmax.f32 %v3601_v36, %v2991_v49  ;;  %v2343_v46 = vpop.f32.mrf.mxu0  ;;  %v2672_v10 = vpop.f32.mrf.mxu1 }
 0x523   : > { %v3605_v45 = vmax.f32 %v2343_v46, %v2672_v10 }
 0x524   : > { %v7298_v20 = vmax.f32 %v3729_v26, %v3320_v39 }
 0x525   : > { %2382 = vmatmul.bf16.gmra.mxu0 %v5993_v51  ;;  %2711 = vmatmul.bf16.gmra.mxu1 %v5993_v51 }
 0x529   : > { %v2993_v62 = vpop.f32.mrf.mxu2  ;;  %v3322_v24 = vpop.f32.mrf.mxu3 }
 0x52a   : > { %v3730_v9 = vmax.f32 %v3602_v23, %v2993_v62  ;;  %v2345_v28 = vpop.f32.mrf.mxu0  ;;  %v2674_v31 = vpop.f32.mrf.mxu1 }
 0x52b   : > { %v3606_v29 = vmax.f32 %v2345_v28, %v2674_v31 }
 0x52c   : > { %v7300_v50 = vmax.f32 %v3730_v9, %v3322_v24 }
 0x52e   : > { %3035 = vmatmul.bf16.gmra.mxu2 %v5992_v34  ;;  %3364 = vmatmul.bf16.gmra.mxu3 %v5992_v34 }
 0x531   : > { %v2996_v1 = vpop.f32.mrf.mxu2  ;;  %v3325_v63 = vpop.f32.mrf.mxu3 }
 0x532   : > { %v3731_v36 = vmax.f32 %v3603_v21, %v2996_v1  ;;  %v2348_v17 = vpop.f32.mrf.mxu0  ;;  %v2677_v14 = vpop.f32.mrf.mxu1  ;;  %v5995_v21 = vld [vmem:[%s8576_s9 + $0xc8] sm:$0xff] }
 0x533   : > { %v3607_v30 = vmax.f32 %v2348_v17, %v2677_v14 }
 0x534   : > { %v7305_v19 = vmax.f32 %v3731_v36, %v3325_v63 }
 0x535   : > { %2387 = vmatmul.bf16.gmra.mxu0 %v5994_v57  ;;  %2716 = vmatmul.bf16.gmra.mxu1 %v5994_v57 }
 0x539   : > { %v2998_v25 = vpop.f32.mrf.mxu2  ;;  %v3327_v23 = vpop.f32.mrf.mxu3 }
 0x53a   : > { %v3732_v61 = vmax.f32 %v3604_v6, %v2998_v25  ;;  %v2350_v32 = vpop.f32.mrf.mxu0  ;;  %v2679_v22 = vpop.f32.mrf.mxu1 }
 0x53b   : > { %v3608_v34 = vmax.f32 %v2350_v32, %v2679_v22 }
 0x53c   : > { %v7307_v8 = vmax.f32 %v3732_v61, %v3327_v23 }
 0x53e   : > { %3040 = vmatmul.bf16.gmra.mxu2 %v5993_v51  ;;  %3369 = vmatmul.bf16.gmra.mxu3 %v5993_v51 }
 0x541   : > { %v3001_v43 = vpop.f32.mrf.mxu2  ;;  %v3330_v5 = vpop.f32.mrf.mxu3 }
 0x542   : > { %v3733_v38 = vmax.f32 %v3605_v45, %v3001_v43  ;;  %v2353_v47 = vpop.f32.mrf.mxu0  ;;  %v2682_v52 = vpop.f32.mrf.mxu1  ;;  %v5996_v45 = vld [vmem:[%s8576_s9 + $0xd0] sm:$0xff] }
 0x543   : > { %v3609_v16 = vmax.f32 %v2353_v47, %v2682_v52 }
 0x544   : > { %v7312_v49 = vmax.f32 %v3733_v38, %v3330_v5 }
 0x545   : > { %2392 = vmatmul.bf16.gmra.mxu0 %v5995_v21  ;;  %2721 = vmatmul.bf16.gmra.mxu1 %v5995_v21 }
 0x549   : > { %v3003_v6 = vpop.f32.mrf.mxu2  ;;  %v3332_v39 = vpop.f32.mrf.mxu3 }
 0x54a   : > { %v3734_v26 = vmax.f32 %v3606_v29, %v3003_v6  ;;  %v2355_v46 = vpop.f32.mrf.mxu0  ;;  %v2684_v10 = vpop.f32.mrf.mxu1 }
 0x54b   : > { %v3610_v51 = vmax.f32 %v2355_v46, %v2684_v10 }
 0x54c   : > { %v7314_v62 = vmax.f32 %v3734_v26, %v3332_v39 }
 0x54e   : > { %3045 = vmatmul.bf16.gmra.mxu2 %v5994_v57  ;;  %3374 = vmatmul.bf16.gmra.mxu3 %v5994_v57 }
 0x551   : > { %v3006_v24 = vpop.f32.mrf.mxu2  ;;  %v3335_v9 = vpop.f32.mrf.mxu3 }
 0x552   : > { %v3735_v28 = vmax.f32 %v3607_v30, %v3006_v24  ;;  %v2358_v31 = vpop.f32.mrf.mxu0  ;;  %v2687_v1 = vpop.f32.mrf.mxu1  ;;  %v5997_v30 = vld [vmem:[%s8576_s9 + $0xd8] sm:$0xff] }
 0x553   : > { %v3611_v63 = vmax.f32 %v2358_v31, %v2687_v1 }
 0x554   : > { %v7319_v36 = vmax.f32 %v3735_v28, %v3335_v9 }
 0x555   : > { %2397 = vmatmul.bf16.gmra.mxu0 %v5996_v45  ;;  %2726 = vmatmul.bf16.gmra.mxu1 %v5996_v45 }
 0x559   : > { %v3008_v29 = vpop.f32.mrf.mxu2  ;;  %v3337_v17 = vpop.f32.mrf.mxu3 }
 0x55a   : > { %v3736_v14 = vmax.f32 %v3608_v34, %v3008_v29  ;;  %v2360_v25 = vpop.f32.mrf.mxu0  ;;  %v2689_v23 = vpop.f32.mrf.mxu1 }
 0x55b   : > { %v3612_v57 = vmax.f32 %v2360_v25, %v2689_v23 }
 0x55c   : > { %v7321_v61 = vmax.f32 %v3736_v14, %v3337_v17 }
 0x55e   : > { %3050 = vmatmul.bf16.gmra.mxu2 %v5995_v21  ;;  %3379 = vmatmul.bf16.gmra.mxu3 %v5995_v21 }
 0x561   : > { %v3011_v32 = vpop.f32.mrf.mxu2  ;;  %v3340_v22 = vpop.f32.mrf.mxu3 }
 0x562   : > { %v3737_v43 = vmax.f32 %v3609_v16, %v3011_v32  ;;  %v2363_v5 = vpop.f32.mrf.mxu0  ;;  %v2692_v38 = vpop.f32.mrf.mxu1  ;;  %v5998_v16 = vld [vmem:[%s8576_s9 + $0xe0] sm:$0xff] }
 0x563   : > { %v3613_v47 = vmax.f32 %v2363_v5, %v2692_v38 }
 0x564   : > { %v7326_v52 = vmax.f32 %v3737_v43, %v3340_v22 }
 0x565   : > { %2402 = vmatmul.bf16.gmra.mxu0 %v5997_v30  ;;  %2731 = vmatmul.bf16.gmra.mxu1 %v5997_v30 }
 0x569   : > { %v3013_v34 = vpop.f32.mrf.mxu2  ;;  %v3342_v6 = vpop.f32.mrf.mxu3 }
 0x56a   : > { %v3738_v39 = vmax.f32 %v3610_v51, %v3013_v34  ;;  %v2365_v26 = vpop.f32.mrf.mxu0  ;;  %v2694_v46 = vpop.f32.mrf.mxu1 }
 0x56b   : > { %v3614_v21 = vmax.f32 %v2365_v26, %v2694_v46 }
 0x56c   : > { %v7328_v10 = vmax.f32 %v3738_v39, %v3342_v6 }
 0x56e   : > { %3055 = vmatmul.bf16.gmra.mxu2 %v5996_v45  ;;  %3384 = vmatmul.bf16.gmra.mxu3 %v5996_v45 }
 0x571   : > { %v3016_v24 = vpop.f32.mrf.mxu2  ;;  %v3345_v9 = vpop.f32.mrf.mxu3 }
 0x572   : > { %v3739_v28 = vmax.f32 %v3611_v63, %v3016_v24  ;;  %v2368_v31 = vpop.f32.mrf.mxu0  ;;  %v2697_v1 = vpop.f32.mrf.mxu1  ;;  %v5999_v63 = vld [vmem:[%s8576_s9 + $0xe8] sm:$0xff] }
 0x573   : > { %v3615_v29 = vmax.f32 %v2368_v31, %v2697_v1 }
 0x574   : > { %v7333_v17 = vmax.f32 %v3739_v28, %v3345_v9 }
 0x575   : > { %2407 = vmatmul.bf16.gmra.mxu0 %v5998_v16  ;;  %2736 = vmatmul.bf16.gmra.mxu1 %v5998_v16 }
 0x579   : > { %v3018_v51 = vpop.f32.mrf.mxu2  ;;  %v3347_v14 = vpop.f32.mrf.mxu3 }
 0x57a   : > { %v3740_v25 = vmax.f32 %v3612_v57, %v3018_v51  ;;  %v2370_v23 = vpop.f32.mrf.mxu0  ;;  %v2699_v32 = vpop.f32.mrf.mxu1 }
 0x57b   : > { %v3616_v45 = vmax.f32 %v2370_v23, %v2699_v32 }
 0x57c   : > { %v7335_v22 = vmax.f32 %v3740_v25, %v3347_v14 }
 0x57e   : > { %3060 = vmatmul.bf16.gmra.mxu2 %v5997_v30  ;;  %3389 = vmatmul.bf16.gmra.mxu3 %v5997_v30 }
 0x581   : > { %v3021_v43 = vpop.f32.mrf.mxu2  ;;  %v3350_v5 = vpop.f32.mrf.mxu3 }
 0x582   : > { %v3741_v38 = vmax.f32 %v3613_v47, %v3021_v43  ;;  %v2373_v34 = vpop.f32.mrf.mxu0  ;;  %v2702_v6 = vpop.f32.mrf.mxu1  ;;  %v6000_v47 = vld [vmem:[%s8576_s9 + $0xf0] sm:$0xff] }
 0x583   : > { %v3617_v39 = vmax.f32 %v2373_v34, %v2702_v6 }
 0x584   : > { %v7340_v26 = vmax.f32 %v3741_v38, %v3350_v5 }
 0x585   : > { %2412 = vmatmul.bf16.gmra.mxu0 %v5999_v63  ;;  %2741 = vmatmul.bf16.gmra.mxu1 %v5999_v63 }
 0x589   : > { %v3023_v57 = vpop.f32.mrf.mxu2  ;;  %v3352_v46 = vpop.f32.mrf.mxu3 }
 0x58a   : > { %v3742_v24 = vmax.f32 %v3614_v21, %v3023_v57  ;;  %v2375_v9 = vpop.f32.mrf.mxu0  ;;  %v2704_v28 = vpop.f32.mrf.mxu1 }
 0x58b   : > { %v3618_v30 = vmax.f32 %v2375_v9, %v2704_v28 }
 0x58c   : > { %v7342_v31 = vmax.f32 %v3742_v24, %v3352_v46 }
 0x58e   : > { %8643 = vst [vmem:[#allocation34_spill] sm:$0xff] %v7342_v31  ;;  %3065 = vmatmul.bf16.gmra.mxu2 %v5998_v16  ;;  %3394 = vmatmul.bf16.gmra.mxu3 %v5998_v16 }
 0x591   : > { %v3026_v1 = vpop.f32.mrf.mxu2  ;;  %v3355_v51 = vpop.f32.mrf.mxu3 }
 0x592   : > { %v3743_v14 = vmax.f32 %v3615_v29, %v3026_v1  ;;  %v2378_v25 = vpop.f32.mrf.mxu0  ;;  %v2707_v23 = vpop.f32.mrf.mxu1  ;;  %v6001_v29 = vld [vmem:[%s8576_s9 + $0xf8] sm:$0xff] }
 0x593   : > { %v3619_v32 = vmax.f32 %v2378_v25, %v2707_v23 }
 0x594   : > { %v7347_v43 = vmax.f32 %v3743_v14, %v3355_v51 }
 0x595   : > { %2417 = vmatmul.bf16.gmra.mxu0 %v6000_v47  ;;  %2746 = vmatmul.bf16.gmra.mxu1 %v6000_v47 }
 0x596   : > { %8644 = vst [vmem:[#allocation32_spill] sm:$0xff] %v7347_v43 }
 0x599   : > { %v3028_v21 = vpop.f32.mrf.mxu2  ;;  %v3357_v5 = vpop.f32.mrf.mxu3 }
 0x59a   : > { %v3744_v38 = vmax.f32 %v3616_v45, %v3028_v21  ;;  %v2380_v34 = vpop.f32.mrf.mxu0  ;;  %v2709_v6 = vpop.f32.mrf.mxu1 }
 0x59b   : > { %v3620_v16 = vmax.f32 %v2380_v34, %v2709_v6 }
 0x59c   : > { %v7349_v57 = vmax.f32 %v3744_v38, %v3357_v5 }
 0x59e   : > { %8645 = vst [vmem:[#allocation33_spill] sm:$0xff] %v7349_v57  ;;  %3070 = vmatmul.bf16.gmra.mxu2 %v5999_v63  ;;  %3399 = vmatmul.bf16.gmra.mxu3 %v5999_v63 }
 0x5a1   : > { %v3031_v46 = vpop.f32.mrf.mxu2  ;;  %v3360_v24 = vpop.f32.mrf.mxu3 }
 0x5a2   : > { %v3745_v9 = vmax.f32 %v3617_v39, %v3031_v46  ;;  %v2383_v28 = vpop.f32.mrf.mxu0  ;;  %v2712_v1 = vpop.f32.mrf.mxu1  ;;  %v6002_v39 = vld [vmem:[%s8576_s9 + $0x100] sm:$0xff] }
 0x5a3   : > { %v3621_v51 = vmax.f32 %v2383_v28, %v2712_v1 }
 0x5a4   : > { %v7354_v14 = vmax.f32 %v3745_v9, %v3360_v24 }
 0x5a5   : > { %2422 = vmatmul.bf16.gmra.mxu0 %v6001_v29  ;;  %2751 = vmatmul.bf16.gmra.mxu1 %v6001_v29 }
 0x5a6   : > { %8646 = vst [vmem:[#allocation30_spill] sm:$0xff] %v7354_v14 }
 0x5a9   : > { %v3033_v45 = vpop.f32.mrf.mxu2  ;;  %v3362_v25 = vpop.f32.mrf.mxu3 }
 0x5aa   : > { %v3746_v23 = vmax.f32 %v3618_v30, %v3033_v45  ;;  %v2385_v21 = vpop.f32.mrf.mxu0  ;;  %v2714_v5 = vpop.f32.mrf.mxu1 }
 0x5ab   : > { %v3622_v63 = vmax.f32 %v2385_v21, %v2714_v5 }
 0x5ac   : > { %v7356_v38 = vmax.f32 %v3746_v23, %v3362_v25 }
 0x5ae   : > { %8647 = vst [vmem:[#allocation31_spill] sm:$0xff] %v7356_v38  ;;  %3075 = vmatmul.bf16.gmra.mxu2 %v6000_v47  ;;  %3404 = vmatmul.bf16.gmra.mxu3 %v6000_v47 }
 0x5b1   : > { %v3036_v34 = vpop.f32.mrf.mxu2  ;;  %v3365_v6 = vpop.f32.mrf.mxu3 }
 0x5b2   : > { %v3747_v46 = vmax.f32 %v3619_v32, %v3036_v34  ;;  %v2388_v24 = vpop.f32.mrf.mxu0  ;;  %v2717_v9 = vpop.f32.mrf.mxu1  ;;  %v6003_v32 = vld [vmem:[%s8576_s9 + $0x108] sm:$0xff] }
 0x5b3   : > { %v3623_v28 = vmax.f32 %v2388_v24, %v2717_v9 }
 0x5b4   : > { %v7361_v1 = vmax.f32 %v3747_v46, %v3365_v6 }
 0x5b5   : > { %2427 = vmatmul.bf16.gmra.mxu0 %v6002_v39  ;;  %2756 = vmatmul.bf16.gmra.mxu1 %v6002_v39 }
 0x5b6   : > { %8648 = vst [vmem:[#allocation28_spill] sm:$0xff] %v7361_v1 }
 0x5b9   : > { %v3038_v30 = vpop.f32.mrf.mxu2  ;;  %v3367_v45 = vpop.f32.mrf.mxu3 }
 0x5ba   : > { %v3748_v25 = vmax.f32 %v3620_v16, %v3038_v30  ;;  %v2390_v23 = vpop.f32.mrf.mxu0  ;;  %v2719_v21 = vpop.f32.mrf.mxu1 }
 0x5bb   : > { %v3624_v47 = vmax.f32 %v2390_v23, %v2719_v21 }
 0x5bc   : > { %v7363_v5 = vmax.f32 %v3748_v25, %v3367_v45 }
 0x5be   : > { %8649 = vst [vmem:[#allocation29_spill] sm:$0xff] %v7363_v5  ;;  %3080 = vmatmul.bf16.gmra.mxu2 %v6001_v29  ;;  %3409 = vmatmul.bf16.gmra.mxu3 %v6001_v29 }
 0x5c1   : > { %v3041_v38 = vpop.f32.mrf.mxu2  ;;  %v3370_v14 = vpop.f32.mrf.mxu3 }
 0x5c2   : > { %v3749_v34 = vmax.f32 %v3621_v51, %v3041_v38  ;;  %v2393_v6 = vpop.f32.mrf.mxu0  ;;  %v2722_v46 = vpop.f32.mrf.mxu1  ;;  %v6004_v51 = vld [vmem:[%s8576_s9 + $0x110] sm:$0xff] }
 0x5c3   : > { %v3625_v24 = vmax.f32 %v2393_v6, %v2722_v46 }
 0x5c4   : > { %v7368_v9 = vmax.f32 %v3749_v34, %v3370_v14 }
 0x5c5   : > { %2432 = vmatmul.bf16.gmra.mxu0 %v6003_v32  ;;  %2761 = vmatmul.bf16.gmra.mxu1 %v6003_v32 }
 0x5c6   : > { %8650 = vst [vmem:[#allocation26_spill] sm:$0xff] %v7368_v9 }
 0x5c9   : > { %v3043_v16 = vpop.f32.mrf.mxu2  ;;  %v3372_v30 = vpop.f32.mrf.mxu3 }
 0x5ca   : > { %v3750_v45 = vmax.f32 %v3622_v63, %v3043_v16  ;;  %v2395_v25 = vpop.f32.mrf.mxu0  ;;  %v2724_v23 = vpop.f32.mrf.mxu1 }
 0x5cb   : > { %v3626_v29 = vmax.f32 %v2395_v25, %v2724_v23 }
 0x5cc   : > { %v7370_v21 = vmax.f32 %v3750_v45, %v3372_v30 }
 0x5ce   : > { %8651 = vst [vmem:[#allocation27_spill] sm:$0xff] %v7370_v21  ;;  %3085 = vmatmul.bf16.gmra.mxu2 %v6002_v39  ;;  %3414 = vmatmul.bf16.gmra.mxu3 %v6002_v39 }
 0x5d1   : > { %v3046_v5 = vpop.f32.mrf.mxu2  ;;  %v3375_v1 = vpop.f32.mrf.mxu3 }
 0x5d2   : > { %v3751_v14 = vmax.f32 %v3623_v28, %v3046_v5  ;;  %v2398_v38 = vpop.f32.mrf.mxu0  ;;  %v2727_v34 = vpop.f32.mrf.mxu1  ;;  %v6005_v28 = vld [vmem:[%s8576_s9 + $0x118] sm:$0xff] }
 0x5d3   : > { %v3627_v6 = vmax.f32 %v2398_v38, %v2727_v34 }
 0x5d4   : > { %v7375_v46 = vmax.f32 %v3751_v14, %v3375_v1 }
 0x5d5   : > { %2437 = vmatmul.bf16.gmra.mxu0 %v6004_v51  ;;  %2766 = vmatmul.bf16.gmra.mxu1 %v6004_v51 }
 0x5d6   : > { %8652 = vst [vmem:[#allocation24_spill] sm:$0xff] %v7375_v46 }
 0x5d9   : > { %v3048_v63 = vpop.f32.mrf.mxu2  ;;  %v3377_v16 = vpop.f32.mrf.mxu3 }
 0x5da   : > { %v3752_v30 = vmax.f32 %v3624_v47, %v3048_v63  ;;  %v2400_v45 = vpop.f32.mrf.mxu0  ;;  %v2729_v25 = vpop.f32.mrf.mxu1 }
 0x5db   : > { %v3628_v39 = vmax.f32 %v2400_v45, %v2729_v25 }
 0x5dc   : > { %v7377_v23 = vmax.f32 %v3752_v30, %v3377_v16 }
 0x5de   : > { %8653 = vst [vmem:[#allocation25_spill] sm:$0xff] %v7377_v23  ;;  %3090 = vmatmul.bf16.gmra.mxu2 %v6003_v32  ;;  %3419 = vmatmul.bf16.gmra.mxu3 %v6003_v32 }
 0x5e1   : > { %v3051_v21 = vpop.f32.mrf.mxu2  ;;  %v3380_v9 = vpop.f32.mrf.mxu3 }
 0x5e2   : > { %v3753_v1 = vmax.f32 %v3625_v24, %v3051_v21  ;;  %v2403_v5 = vpop.f32.mrf.mxu0  ;;  %v2732_v14 = vpop.f32.mrf.mxu1  ;;  %v6006_v24 = vld [vmem:[%s8576_s9 + $0x120] sm:$0xff] }
 0x5e3   : > { %v3629_v38 = vmax.f32 %v2403_v5, %v2732_v14 }
 0x5e4   : > { %v7382_v34 = vmax.f32 %v3753_v1, %v3380_v9 }
 0x5e5   : > { %2442 = vmatmul.bf16.gmra.mxu0 %v6005_v28  ;;  %2771 = vmatmul.bf16.gmra.mxu1 %v6005_v28 }
 0x5e6   : > { %8654 = vst [vmem:[#allocation22_spill] sm:$0xff] %v7382_v34 }
 0x5e9   : > { %v3053_v47 = vpop.f32.mrf.mxu2  ;;  %v3382_v63 = vpop.f32.mrf.mxu3 }
 0x5ea   : > { %v3754_v16 = vmax.f32 %v3626_v29, %v3053_v47  ;;  %v2405_v30 = vpop.f32.mrf.mxu0  ;;  %v2734_v45 = vpop.f32.mrf.mxu1 }
 0x5eb   : > { %v3630_v32 = vmax.f32 %v2405_v30, %v2734_v45 }
 0x5ec   : > { %v7384_v25 = vmax.f32 %v3754_v16, %v3382_v63 }
 0x5ee   : > { %8655 = vst [vmem:[#allocation23_spill] sm:$0xff] %v7384_v25  ;;  %3095 = vmatmul.bf16.gmra.mxu2 %v6004_v51  ;;  %3424 = vmatmul.bf16.gmra.mxu3 %v6004_v51 }
 0x5f1   : > { %v3056_v23 = vpop.f32.mrf.mxu2  ;;  %v3385_v46 = vpop.f32.mrf.mxu3 }
 0x5f2   : > { %v3755_v9 = vmax.f32 %v3627_v6, %v3056_v23  ;;  %v2408_v21 = vpop.f32.mrf.mxu0  ;;  %v2737_v1 = vpop.f32.mrf.mxu1  ;;  %v6007_v6 = vld [vmem:[%s8576_s9 + $0x128] sm:$0xff] }
 0x5f3   : > { %v3631_v5 = vmax.f32 %v2408_v21, %v2737_v1 }
 0x5f4   : > { %v7389_v14 = vmax.f32 %v3755_v9, %v3385_v46 }
 0x5f5   : > { %2447 = vmatmul.bf16.gmra.mxu0 %v6006_v24  ;;  %2776 = vmatmul.bf16.gmra.mxu1 %v6006_v24 }
 0x5f6   : > { %8656 = vst [vmem:[#allocation20_spill] sm:$0xff] %v7389_v14 }
 0x5f9   : > { %v3058_v29 = vpop.f32.mrf.mxu2  ;;  %v3387_v47 = vpop.f32.mrf.mxu3 }
 0x5fa   : > { %v3756_v63 = vmax.f32 %v3628_v39, %v3058_v29  ;;  %v2410_v16 = vpop.f32.mrf.mxu0  ;;  %v2739_v30 = vpop.f32.mrf.mxu1 }
 0x5fb   : > { %v3632_v51 = vmax.f32 %v2410_v16, %v2739_v30 }
 0x5fc   : > { %v7391_v45 = vmax.f32 %v3756_v63, %v3387_v47 }
 0x5fe   : > { %8657 = vst [vmem:[#allocation21_spill] sm:$0xff] %v7391_v45  ;;  %3100 = vmatmul.bf16.gmra.mxu2 %v6005_v28  ;;  %3429 = vmatmul.bf16.gmra.mxu3 %v6005_v28 }
 0x601   : > { %v3061_v25 = vpop.f32.mrf.mxu2  ;;  %v3390_v34 = vpop.f32.mrf.mxu3 }
 0x602   : > { %v3757_v46 = vmax.f32 %v3629_v38, %v3061_v25  ;;  %v2413_v23 = vpop.f32.mrf.mxu0  ;;  %v2742_v9 = vpop.f32.mrf.mxu1  ;;  %v6008_v38 = vld [vmem:[%s8576_s9 + $0x130] sm:$0xff] }
 0x603   : > { %v3633_v21 = vmax.f32 %v2413_v23, %v2742_v9 }
 0x604   : > { %v7396_v1 = vmax.f32 %v3757_v46, %v3390_v34 }
 0x605   : > { %2452 = vmatmul.bf16.gmra.mxu0 %v6007_v6  ;;  %2781 = vmatmul.bf16.gmra.mxu1 %v6007_v6 }
 0x606   : > { %8658 = vst [vmem:[#allocation18_spill] sm:$0xff] %v7396_v1 }
 0x609   : > { %v3063_v39 = vpop.f32.mrf.mxu2  ;;  %v3392_v29 = vpop.f32.mrf.mxu3 }
 0x60a   : > { %v3758_v47 = vmax.f32 %v3630_v32, %v3063_v39  ;;  %v2415_v63 = vpop.f32.mrf.mxu0  ;;  %v2744_v16 = vpop.f32.mrf.mxu1 }
 0x60b   : > { %v3634_v28 = vmax.f32 %v2415_v63, %v2744_v16 }
 0x60c   : > { %v7398_v30 = vmax.f32 %v3758_v47, %v3392_v29 }
 0x60e   : > { %8659 = vst [vmem:[#allocation19_spill] sm:$0xff] %v7398_v30  ;;  %3105 = vmatmul.bf16.gmra.mxu2 %v6006_v24  ;;  %3434 = vmatmul.bf16.gmra.mxu3 %v6006_v24 }
 0x611   : > { %v3066_v45 = vpop.f32.mrf.mxu2  ;;  %v3395_v14 = vpop.f32.mrf.mxu3 }
 0x612   : > { %v3759_v34 = vmax.f32 %v3631_v5, %v3066_v45  ;;  %v2418_v25 = vpop.f32.mrf.mxu0  ;;  %v2747_v46 = vpop.f32.mrf.mxu1  ;;  %v6009_v5 = vld [vmem:[%s8576_s9 + $0x138] sm:$0xff] }
 0x613   : > { %v3635_v23 = vmax.f32 %v2418_v25, %v2747_v46 }
 0x614   : > { %v7403_v9 = vmax.f32 %v3759_v34, %v3395_v14 }
 0x615   : > { %2457 = vmatmul.bf16.gmra.mxu0 %v6008_v38  ;;  %2786 = vmatmul.bf16.gmra.mxu1 %v6008_v38 }
 0x616   : > { %8660 = vst [vmem:[#allocation16_spill] sm:$0xff] %v7403_v9 }
 0x619   : > { %v3068_v32 = vpop.f32.mrf.mxu2  ;;  %v3397_v39 = vpop.f32.mrf.mxu3 }
 0x61a   : > { %v3760_v29 = vmax.f32 %v3632_v51, %v3068_v32  ;;  %v2420_v47 = vpop.f32.mrf.mxu0  ;;  %v2749_v63 = vpop.f32.mrf.mxu1 }
 0x61b   : > { %v3636_v24 = vmax.f32 %v2420_v47, %v2749_v63 }
 0x61c   : > { %v7405_v16 = vmax.f32 %v3760_v29, %v3397_v39 }
 0x61e   : > { %8661 = vst [vmem:[#allocation17_spill] sm:$0xff] %v7405_v16  ;;  %3110 = vmatmul.bf16.gmra.mxu2 %v6007_v6  ;;  %3439 = vmatmul.bf16.gmra.mxu3 %v6007_v6 }
 0x621   : > { %v3071_v30 = vpop.f32.mrf.mxu2  ;;  %v3400_v1 = vpop.f32.mrf.mxu3 }
 0x622   : > { %v3761_v14 = vmax.f32 %v3633_v21, %v3071_v30  ;;  %v2423_v45 = vpop.f32.mrf.mxu0  ;;  %v2752_v34 = vpop.f32.mrf.mxu1  ;;  %v6010_v21 = vld [vmem:[%s8576_s9 + $0x140] sm:$0xff] }
 0x623   : > { %v3637_v25 = vmax.f32 %v2423_v45, %v2752_v34 }
 0x624   : > { %v7410_v46 = vmax.f32 %v3761_v14, %v3400_v1 }
 0x625   : > { %2462 = vmatmul.bf16.gmra.mxu0 %v6009_v5  ;;  %2791 = vmatmul.bf16.gmra.mxu1 %v6009_v5 }
 0x626   : > { %8662 = vst [vmem:[#allocation35_spill] sm:$0xff] %v7410_v46 }
 0x629   : > { %v3073_v51 = vpop.f32.mrf.mxu2  ;;  %v3402_v32 = vpop.f32.mrf.mxu3 }
 0x62a   : > { %v3762_v39 = vmax.f32 %v3634_v28, %v3073_v51  ;;  %v2425_v29 = vpop.f32.mrf.mxu0  ;;  %v2754_v47 = vpop.f32.mrf.mxu1 }
 0x62b   : > { %v3638_v6 = vmax.f32 %v2425_v29, %v2754_v47 }
 0x62c   : > { %v7412_v63 = vmax.f32 %v3762_v39, %v3402_v32 }
 0x62e   : > { %8663 = vst [vmem:[#allocation36_spill] sm:$0xff] %v7412_v63  ;;  %3115 = vmatmul.bf16.gmra.mxu2 %v6008_v38  ;;  %3444 = vmatmul.bf16.gmra.mxu3 %v6008_v38 }
 0x631   : > { %v3076_v16 = vpop.f32.mrf.mxu2  ;;  %v3405_v9 = vpop.f32.mrf.mxu3 }
 0x632   : > { %v3763_v1 = vmax.f32 %v3635_v23, %v3076_v16  ;;  %v2428_v30 = vpop.f32.mrf.mxu0  ;;  %v2757_v14 = vpop.f32.mrf.mxu1  ;;  %v6011_v23 = vld [vmem:[%s8576_s9 + $0x148] sm:$0xff] }
 0x633   : > { %v3639_v45 = vmax.f32 %v2428_v30, %v2757_v14 }
 0x634   : > { %v7417_v34 = vmax.f32 %v3763_v1, %v3405_v9 }
 0x635   : > { %2467 = vmatmul.bf16.gmra.mxu0 %v6010_v21  ;;  %2796 = vmatmul.bf16.gmra.mxu1 %v6010_v21 }
 0x636   : > { %8664 = vst [vmem:[#allocation37_spill] sm:$0xff] %v7417_v34 }
 0x639   : > { %v3078_v28 = vpop.f32.mrf.mxu2  ;;  %v3407_v51 = vpop.f32.mrf.mxu3 }
 0x63a   : > { %v3764_v32 = vmax.f32 %v3636_v24, %v3078_v28  ;;  %v2430_v39 = vpop.f32.mrf.mxu0  ;;  %v2759_v29 = vpop.f32.mrf.mxu1 }
 0x63b   : > { %v3640_v38 = vmax.f32 %v2430_v39, %v2759_v29 }
 0x63c   : > { %v7419_v47 = vmax.f32 %v3764_v32, %v3407_v51 }
 0x63e   : > { %8665 = vst [vmem:[#allocation38_spill] sm:$0xff] %v7419_v47  ;;  %3120 = vmatmul.bf16.gmra.mxu2 %v6009_v5  ;;  %3449 = vmatmul.bf16.gmra.mxu3 %v6009_v5 }
 0x641   : > { %v3081_v63 = vpop.f32.mrf.mxu2  ;;  %v3410_v46 = vpop.f32.mrf.mxu3 }
 0x642   : > { %v3765_v9 = vmax.f32 %v3637_v25, %v3081_v63  ;;  %v2433_v16 = vpop.f32.mrf.mxu0  ;;  %v2762_v1 = vpop.f32.mrf.mxu1  ;;  %v6012_v25 = vld [vmem:[%s8576_s9 + $0x150] sm:$0xff] }
 0x643   : > { %v3641_v30 = vmax.f32 %v2433_v16, %v2762_v1 }
 0x644   : > { %v7424_v14 = vmax.f32 %v3765_v9, %v3410_v46 }
 0x645   : > { %2472 = vmatmul.bf16.gmra.mxu0 %v6011_v23  ;;  %2801 = vmatmul.bf16.gmra.mxu1 %v6011_v23 }
 0x646   : > { %8666 = vst [vmem:[#allocation39_spill] sm:$0xff] %v7424_v14 }
 0x649   : > { %v3083_v24 = vpop.f32.mrf.mxu2  ;;  %v3412_v28 = vpop.f32.mrf.mxu3 }
 0x64a   : > { %v3766_v51 = vmax.f32 %v3638_v6, %v3083_v24  ;;  %v2435_v32 = vpop.f32.mrf.mxu0  ;;  %v2764_v39 = vpop.f32.mrf.mxu1 }
 0x64b   : > { %v3642_v5 = vmax.f32 %v2435_v32, %v2764_v39 }
 0x64c   : > { %v7426_v29 = vmax.f32 %v3766_v51, %v3412_v28 }
 0x64e   : > { %8667 = vst [vmem:[#allocation40_spill] sm:$0xff] %v7426_v29  ;;  %3125 = vmatmul.bf16.gmra.mxu2 %v6010_v21  ;;  %3454 = vmatmul.bf16.gmra.mxu3 %v6010_v21 }
 0x651   : > { %v3086_v47 = vpop.f32.mrf.mxu2  ;;  %v3415_v34 = vpop.f32.mrf.mxu3 }
 0x652   : > { %v3767_v46 = vmax.f32 %v3639_v45, %v3086_v47  ;;  %v2438_v63 = vpop.f32.mrf.mxu0  ;;  %v2767_v9 = vpop.f32.mrf.mxu1  ;;  %v6013_v45 = vld [vmem:[%s8576_s9 + $0x158] sm:$0xff] }
 0x653   : > { %v3643_v16 = vmax.f32 %v2438_v63, %v2767_v9 }
 0x654   : > { %v7431_v1 = vmax.f32 %v3767_v46, %v3415_v34 }
 0x655   : > { %2477 = vmatmul.bf16.gmra.mxu0 %v6012_v25  ;;  %2806 = vmatmul.bf16.gmra.mxu1 %v6012_v25 }
 0x656   : > { %8668 = vst [vmem:[#allocation41_spill] sm:$0xff] %v7431_v1 }
 0x659   : > { %v3088_v6 = vpop.f32.mrf.mxu2  ;;  %v3417_v24 = vpop.f32.mrf.mxu3 }
 0x65a   : > { %v3768_v28 = vmax.f32 %v3640_v38, %v3088_v6  ;;  %v2440_v51 = vpop.f32.mrf.mxu0  ;;  %v2769_v32 = vpop.f32.mrf.mxu1 }
 0x65b   : > { %v3644_v21 = vmax.f32 %v2440_v51, %v2769_v32 }
 0x65c   : > { %v7433_v39 = vmax.f32 %v3768_v28, %v3417_v24 }
 0x65e   : > { %8669 = vst [vmem:[#allocation42_spill] sm:$0xff] %v7433_v39  ;;  %3130 = vmatmul.bf16.gmra.mxu2 %v6011_v23  ;;  %3459 = vmatmul.bf16.gmra.mxu3 %v6011_v23 }
 0x661   : > { %v3091_v29 = vpop.f32.mrf.mxu2  ;;  %v3420_v14 = vpop.f32.mrf.mxu3 }
 0x662   : > { %v3769_v34 = vmax.f32 %v3641_v30, %v3091_v29  ;;  %v2443_v47 = vpop.f32.mrf.mxu0  ;;  %v2772_v46 = vpop.f32.mrf.mxu1  ;;  %v6014_v30 = vld [vmem:[%s8576_s9 + $0x160] sm:$0xff] }
 0x663   : > { %v3645_v63 = vmax.f32 %v2443_v47, %v2772_v46 }
 0x664   : > { %v7438_v9 = vmax.f32 %v3769_v34, %v3420_v14 }
 0x665   : > { %2482 = vmatmul.bf16.gmra.mxu0 %v6013_v45  ;;  %2811 = vmatmul.bf16.gmra.mxu1 %v6013_v45 }
 0x666   : > { %8670 = vst [vmem:[#allocation43_spill] sm:$0xff] %v7438_v9 }
 0x669   : > { %v3093_v38 = vpop.f32.mrf.mxu2  ;;  %v3422_v6 = vpop.f32.mrf.mxu3 }
 0x66a   : > { %v3770_v24 = vmax.f32 %v3642_v5, %v3093_v38  ;;  %v2445_v28 = vpop.f32.mrf.mxu0  ;;  %v2774_v51 = vpop.f32.mrf.mxu1 }
 0x66b   : > { %v3646_v23 = vmax.f32 %v2445_v28, %v2774_v51 }
 0x66c   : > { %v7440_v32 = vmax.f32 %v3770_v24, %v3422_v6 }
 0x66e   : > { %8671 = vst [vmem:[#allocation44_spill] sm:$0xff] %v7440_v32  ;;  %3135 = vmatmul.bf16.gmra.mxu2 %v6012_v25  ;;  %3464 = vmatmul.bf16.gmra.mxu3 %v6012_v25 }
 0x671   : > { %v3096_v39 = vpop.f32.mrf.mxu2  ;;  %v3425_v1 = vpop.f32.mrf.mxu3 }
 0x672   : > { %v3771_v14 = vmax.f32 %v3643_v16, %v3096_v39  ;;  %v2448_v29 = vpop.f32.mrf.mxu0  ;;  %v2777_v34 = vpop.f32.mrf.mxu1  ;;  %v6015_v16 = vld [vmem:[%s8576_s9 + $0x168] sm:$0xff] }
 0x673   : > { %v3647_v47 = vmax.f32 %v2448_v29, %v2777_v34 }
 0x674   : > { %v7445_v46 = vmax.f32 %v3771_v14, %v3425_v1 }
 0x675   : > { %2487 = vmatmul.bf16.gmra.mxu0 %v6014_v30  ;;  %2816 = vmatmul.bf16.gmra.mxu1 %v6014_v30 }
 0x676   : > { %8672 = vst [vmem:[#allocation45_spill] sm:$0xff] %v7445_v46 }
 0x679   : > { %v3098_v5 = vpop.f32.mrf.mxu2  ;;  %v3427_v38 = vpop.f32.mrf.mxu3 }
 0x67a   : > { %v3772_v6 = vmax.f32 %v3644_v21, %v3098_v5  ;;  %v2450_v24 = vpop.f32.mrf.mxu0  ;;  %v2779_v28 = vpop.f32.mrf.mxu1 }
 0x67b   : > { %v3648_v25 = vmax.f32 %v2450_v24, %v2779_v28 }
 0x67c   : > { %v7447_v51 = vmax.f32 %v3772_v6, %v3427_v38 }
 0x67e   : > { %8673 = vst [vmem:[#allocation46_spill] sm:$0xff] %v7447_v51  ;;  %3140 = vmatmul.bf16.gmra.mxu2 %v6013_v45  ;;  %3469 = vmatmul.bf16.gmra.mxu3 %v6013_v45 }
 0x681   : > { %v3101_v32 = vpop.f32.mrf.mxu2  ;;  %v3430_v9 = vpop.f32.mrf.mxu3 }
 0x682   : > { %v3773_v1 = vmax.f32 %v3645_v63, %v3101_v32  ;;  %v2453_v39 = vpop.f32.mrf.mxu0  ;;  %v2782_v14 = vpop.f32.mrf.mxu1  ;;  %v6016_v63 = vld [vmem:[%s8576_s9 + $0x170] sm:$0xff] }
 0x683   : > { %v3649_v29 = vmax.f32 %v2453_v39, %v2782_v14 }
 0x684   : > { %v7452_v34 = vmax.f32 %v3773_v1, %v3430_v9 }
 0x685   : > { %2492 = vmatmul.bf16.gmra.mxu0 %v6015_v16  ;;  %2821 = vmatmul.bf16.gmra.mxu1 %v6015_v16 }
 0x686   : > { %8674 = vst [vmem:[#allocation47_spill] sm:$0xff] %v7452_v34 }
 0x689   : > { %v3103_v21 = vpop.f32.mrf.mxu2  ;;  %v3432_v5 = vpop.f32.mrf.mxu3 }
 0x68a   : > { %v3774_v38 = vmax.f32 %v3646_v23, %v3103_v21  ;;  %v2455_v6 = vpop.f32.mrf.mxu0  ;;  %v2784_v24 = vpop.f32.mrf.mxu1 }
 0x68b   : > { %v3650_v45 = vmax.f32 %v2455_v6, %v2784_v24 }
 0x68c   : > { %v7454_v28 = vmax.f32 %v3774_v38, %v3432_v5 }
 0x68e   : > { %8675 = vst [vmem:[#allocation48_spill] sm:$0xff] %v7454_v28  ;;  %3145 = vmatmul.bf16.gmra.mxu2 %v6014_v30  ;;  %3474 = vmatmul.bf16.gmra.mxu3 %v6014_v30 }
 0x691   : > { %v3106_v51 = vpop.f32.mrf.mxu2  ;;  %v3435_v46 = vpop.f32.mrf.mxu3 }
 0x692   : > { %v3775_v9 = vmax.f32 %v3647_v47, %v3106_v51  ;;  %v2458_v32 = vpop.f32.mrf.mxu0  ;;  %v2787_v1 = vpop.f32.mrf.mxu1  ;;  %v6017_v47 = vld [vmem:[%s8576_s9 + $0x178] sm:$0xff] }
 0x693   : > { %v3651_v39 = vmax.f32 %v2458_v32, %v2787_v1 }
 0x694   : > { %v7459_v14 = vmax.f32 %v3775_v9, %v3435_v46 }
 0x695   : > { %2497 = vmatmul.bf16.gmra.mxu0 %v6016_v63  ;;  %2826 = vmatmul.bf16.gmra.mxu1 %v6016_v63 }
 0x696   : > { %8676 = vst [vmem:[#allocation49_spill] sm:$0xff] %v7459_v14 }
 0x699   : > { %v3108_v23 = vpop.f32.mrf.mxu2  ;;  %v3437_v21 = vpop.f32.mrf.mxu3 }
 0x69a   : > { %v3776_v5 = vmax.f32 %v3648_v25, %v3108_v23  ;;  %v2460_v38 = vpop.f32.mrf.mxu0  ;;  %v2789_v6 = vpop.f32.mrf.mxu1 }
 0x69b   : > { %v3652_v30 = vmax.f32 %v2460_v38, %v2789_v6 }
 0x69c   : > { %v7461_v24 = vmax.f32 %v3776_v5, %v3437_v21 }
 0x69e   : > { %8677 = vst [vmem:[#allocation50_spill] sm:$0xff] %v7461_v24  ;;  %3150 = vmatmul.bf16.gmra.mxu2 %v6015_v16  ;;  %3479 = vmatmul.bf16.gmra.mxu3 %v6015_v16 }
 0x6a1   : > { %v3111_v28 = vpop.f32.mrf.mxu2  ;;  %v3440_v34 = vpop.f32.mrf.mxu3 }
 0x6a2   : > { %v3777_v46 = vmax.f32 %v3649_v29, %v3111_v28  ;;  %v2463_v51 = vpop.f32.mrf.mxu0  ;;  %v2792_v9 = vpop.f32.mrf.mxu1  ;;  %v6018_v29 = vld [vmem:[%s8576_s9 + $0x180] sm:$0xff] }
 0x6a3   : > { %v3653_v32 = vmax.f32 %v2463_v51, %v2792_v9 }
 0x6a4   : > { %v7466_v1 = vmax.f32 %v3777_v46, %v3440_v34 }
 0x6a5   : > { %2502 = vmatmul.bf16.gmra.mxu0 %v6017_v47  ;;  %2831 = vmatmul.bf16.gmra.mxu1 %v6017_v47 }
 0x6a6   : > { %8678 = vst [vmem:[#allocation51_spill] sm:$0xff] %v7466_v1 }
 0x6a9   : > { %v3113_v25 = vpop.f32.mrf.mxu2  ;;  %v3442_v23 = vpop.f32.mrf.mxu3 }
 0x6aa   : > { %v3778_v21 = vmax.f32 %v3650_v45, %v3113_v25  ;;  %v2465_v5 = vpop.f32.mrf.mxu0  ;;  %v2794_v38 = vpop.f32.mrf.mxu1 }
 0x6ab   : > { %v3654_v16 = vmax.f32 %v2465_v5, %v2794_v38 }
 0x6ac   : > { %v7468_v6 = vmax.f32 %v3778_v21, %v3442_v23 }
 0x6ae   : > { %8679 = vst [vmem:[#allocation52_spill] sm:$0xff] %v7468_v6  ;;  %3155 = vmatmul.bf16.gmra.mxu2 %v6016_v63  ;;  %3484 = vmatmul.bf16.gmra.mxu3 %v6016_v63 }
 0x6b1   : > { %v3116_v24 = vpop.f32.mrf.mxu2  ;;  %v3445_v14 = vpop.f32.mrf.mxu3 }
 0x6b2   : > { %v3779_v34 = vmax.f32 %v3651_v39, %v3116_v24  ;;  %v2468_v28 = vpop.f32.mrf.mxu0  ;;  %v2797_v46 = vpop.f32.mrf.mxu1  ;;  %v6019_v39 = vld [vmem:[%s8576_s9 + $0x188] sm:$0xff] }
 0x6b3   : > { %v3655_v51 = vmax.f32 %v2468_v28, %v2797_v46 }
 0x6b4   : > { %v7473_v9 = vmax.f32 %v3779_v34, %v3445_v14 }
 0x6b5   : > { %2507 = vmatmul.bf16.gmra.mxu0 %v6018_v29  ;;  %2836 = vmatmul.bf16.gmra.mxu1 %v6018_v29 }
 0x6b6   : > { %8680 = vst [vmem:[#allocation53_spill] sm:$0xff] %v7473_v9 }
 0x6b9   : > { %v3118_v45 = vpop.f32.mrf.mxu2  ;;  %v3447_v25 = vpop.f32.mrf.mxu3 }
 0x6ba   : > { %v3780_v23 = vmax.f32 %v3652_v30, %v3118_v45  ;;  %v2470_v21 = vpop.f32.mrf.mxu0  ;;  %v2799_v5 = vpop.f32.mrf.mxu1 }
 0x6bb   : > { %v3656_v63 = vmax.f32 %v2470_v21, %v2799_v5 }
 0x6bc   : > { %v7475_v38 = vmax.f32 %v3780_v23, %v3447_v25 }
 0x6be   : > { %8681 = vst [vmem:[#allocation54_spill] sm:$0xff] %v7475_v38  ;;  %3160 = vmatmul.bf16.gmra.mxu2 %v6017_v47  ;;  %3489 = vmatmul.bf16.gmra.mxu3 %v6017_v47 }
 0x6c1   : > { %v3121_v6 = vpop.f32.mrf.mxu2  ;;  %v3450_v1 = vpop.f32.mrf.mxu3 }
 0x6c2   : > { %v3781_v14 = vmax.f32 %v3653_v32, %v3121_v6  ;;  %v2473_v24 = vpop.f32.mrf.mxu0  ;;  %v2802_v34 = vpop.f32.mrf.mxu1  ;;  %v6020_v32 = vld [vmem:[%s8576_s9 + $0x190] sm:$0xff] }
 0x6c3   : > { %v3657_v28 = vmax.f32 %v2473_v24, %v2802_v34 }
 0x6c4   : > { %v7480_v46 = vmax.f32 %v3781_v14, %v3450_v1 }
 0x6c5   : > { %2512 = vmatmul.bf16.gmra.mxu0 %v6019_v39  ;;  %2841 = vmatmul.bf16.gmra.mxu1 %v6019_v39 }
 0x6c6   : > { %8682 = vst [vmem:[#allocation55_spill] sm:$0xff] %v7480_v46 }
 0x6c9   : > { %v3123_v30 = vpop.f32.mrf.mxu2  ;;  %v3452_v45 = vpop.f32.mrf.mxu3 }
 0x6ca   : > { %v3782_v25 = vmax.f32 %v3654_v16, %v3123_v30  ;;  %v2475_v23 = vpop.f32.mrf.mxu0  ;;  %v2804_v21 = vpop.f32.mrf.mxu1 }
 0x6cb   : > { %v3658_v47 = vmax.f32 %v2475_v23, %v2804_v21 }
 0x6cc   : > { %v7482_v5 = vmax.f32 %v3782_v25, %v3452_v45 }
 0x6ce   : > { %8683 = vst [vmem:[#allocation56_spill] sm:$0xff] %v7482_v5  ;;  %3165 = vmatmul.bf16.gmra.mxu2 %v6018_v29  ;;  %3494 = vmatmul.bf16.gmra.mxu3 %v6018_v29 }
 0x6d1   : > { %v3126_v38 = vpop.f32.mrf.mxu2  ;;  %v3455_v9 = vpop.f32.mrf.mxu3 }
 0x6d2   : > { %v3783_v1 = vmax.f32 %v3655_v51, %v3126_v38  ;;  %v2478_v6 = vpop.f32.mrf.mxu0  ;;  %v2807_v14 = vpop.f32.mrf.mxu1  ;;  %v6021_v51 = vld [vmem:[%s8576_s9 + $0x198] sm:$0xff] }
 0x6d3   : > { %v3659_v24 = vmax.f32 %v2478_v6, %v2807_v14 }
 0x6d4   : > { %v7487_v34 = vmax.f32 %v3783_v1, %v3455_v9 }
 0x6d5   : > { %2517 = vmatmul.bf16.gmra.mxu0 %v6020_v32  ;;  %2846 = vmatmul.bf16.gmra.mxu1 %v6020_v32 }
 0x6d6   : > { %8684 = vst [vmem:[#allocation57_spill] sm:$0xff] %v7487_v34 }
 0x6d9   : > { %v3128_v16 = vpop.f32.mrf.mxu2  ;;  %v3457_v30 = vpop.f32.mrf.mxu3 }
 0x6da   : > { %v3784_v45 = vmax.f32 %v3656_v63, %v3128_v16  ;;  %v2480_v25 = vpop.f32.mrf.mxu0  ;;  %v2809_v23 = vpop.f32.mrf.mxu1 }
 0x6db   : > { %v3660_v29 = vmax.f32 %v2480_v25, %v2809_v23 }
 0x6dc   : > { %v7489_v21 = vmax.f32 %v3784_v45, %v3457_v30 }
 0x6de   : > { %8685 = vst [vmem:[#allocation58_spill] sm:$0xff] %v7489_v21  ;;  %3170 = vmatmul.bf16.gmra.mxu2 %v6019_v39  ;;  %3499 = vmatmul.bf16.gmra.mxu3 %v6019_v39 }
 0x6e1   : > { %v3131_v5 = vpop.f32.mrf.mxu2  ;;  %v3460_v46 = vpop.f32.mrf.mxu3 }
 0x6e2   : > { %v3785_v9 = vmax.f32 %v3657_v28, %v3131_v5  ;;  %v2483_v38 = vpop.f32.mrf.mxu0  ;;  %v2812_v1 = vpop.f32.mrf.mxu1  ;;  %v6022_v28 = vld [vmem:[%s8576_s9 + $0x1a0] sm:$0xff] }
 0x6e3   : > { %v3661_v6 = vmax.f32 %v2483_v38, %v2812_v1 }
 0x6e4   : > { %v7494_v14 = vmax.f32 %v3785_v9, %v3460_v46 }
 0x6e5   : > { %2522 = vmatmul.bf16.gmra.mxu0 %v6021_v51  ;;  %2851 = vmatmul.bf16.gmra.mxu1 %v6021_v51 }
 0x6e6   : > { %8686 = vst [vmem:[#allocation59_spill] sm:$0xff] %v7494_v14 }
 0x6e9   : > { %v3133_v63 = vpop.f32.mrf.mxu2  ;;  %v3462_v16 = vpop.f32.mrf.mxu3 }
 0x6ea   : > { %v3786_v30 = vmax.f32 %v3658_v47, %v3133_v63  ;;  %v2485_v45 = vpop.f32.mrf.mxu0  ;;  %v2814_v25 = vpop.f32.mrf.mxu1 }
 0x6eb   : > { %v3662_v39 = vmax.f32 %v2485_v45, %v2814_v25 }
 0x6ec   : > { %v7496_v23 = vmax.f32 %v3786_v30, %v3462_v16 }
 0x6ee   : > { %8687 = vst [vmem:[#allocation60_spill] sm:$0xff] %v7496_v23  ;;  %3175 = vmatmul.bf16.gmra.mxu2 %v6020_v32  ;;  %3504 = vmatmul.bf16.gmra.mxu3 %v6020_v32 }
 0x6f1   : > { %v3136_v21 = vpop.f32.mrf.mxu2  ;;  %v3465_v34 = vpop.f32.mrf.mxu3 }
 0x6f2   : > { %v3787_v46 = vmax.f32 %v3659_v24, %v3136_v21  ;;  %v2488_v5 = vpop.f32.mrf.mxu0  ;;  %v2817_v9 = vpop.f32.mrf.mxu1  ;;  %v6023_v24 = vld [vmem:[%s8576_s9 + $0x1a8] sm:$0xff] }
 0x6f3   : > { %v3663_v38 = vmax.f32 %v2488_v5, %v2817_v9 }
 0x6f4   : > { %v7501_v1 = vmax.f32 %v3787_v46, %v3465_v34 }
 0x6f5   : > { %2527 = vmatmul.bf16.gmra.mxu0 %v6022_v28  ;;  %2856 = vmatmul.bf16.gmra.mxu1 %v6022_v28 }
 0x6f6   : > { %8688 = vst [vmem:[#allocation61_spill] sm:$0xff] %v7501_v1 }
 0x6f9   : > { %v3138_v47 = vpop.f32.mrf.mxu2  ;;  %v3467_v63 = vpop.f32.mrf.mxu3 }
 0x6fa   : > { %v3788_v16 = vmax.f32 %v3660_v29, %v3138_v47  ;;  %v2490_v30 = vpop.f32.mrf.mxu0  ;;  %v2819_v45 = vpop.f32.mrf.mxu1 }
 0x6fb   : > { %v3664_v32 = vmax.f32 %v2490_v30, %v2819_v45 }
 0x6fc   : > { %v7503_v25 = vmax.f32 %v3788_v16, %v3467_v63 }
 0x6fe   : > { %8689 = vst [vmem:[#allocation62_spill] sm:$0xff] %v7503_v25  ;;  %3180 = vmatmul.bf16.gmra.mxu2 %v6021_v51  ;;  %3509 = vmatmul.bf16.gmra.mxu3 %v6021_v51 }
 0x701   : > { %v3141_v23 = vpop.f32.mrf.mxu2  ;;  %v3470_v14 = vpop.f32.mrf.mxu3 }
 0x702   : > { %v3789_v34 = vmax.f32 %v3661_v6, %v3141_v23  ;;  %v2493_v21 = vpop.f32.mrf.mxu0  ;;  %v2822_v46 = vpop.f32.mrf.mxu1  ;;  %v6024_v6 = vld [vmem:[%s8576_s9 + $0x1b0] sm:$0xff] }
 0x703   : > { %v3665_v5 = vmax.f32 %v2493_v21, %v2822_v46 }
 0x704   : > { %v7508_v9 = vmax.f32 %v3789_v34, %v3470_v14 }
 0x705   : > { %2532 = vmatmul.bf16.gmra.mxu0 %v6023_v24  ;;  %2861 = vmatmul.bf16.gmra.mxu1 %v6023_v24 }
 0x706   : > { %8690 = vst [vmem:[#allocation63_spill] sm:$0xff] %v7508_v9 }
 0x709   : > { %v3143_v29 = vpop.f32.mrf.mxu2  ;;  %v3472_v47 = vpop.f32.mrf.mxu3 }
 0x70a   : > { %v3790_v63 = vmax.f32 %v3662_v39, %v3143_v29  ;;  %v2495_v16 = vpop.f32.mrf.mxu0  ;;  %v2824_v30 = vpop.f32.mrf.mxu1 }
 0x70b   : > { %v3666_v51 = vmax.f32 %v2495_v16, %v2824_v30 }
 0x70c   : > { %v7510_v45 = vmax.f32 %v3790_v63, %v3472_v47 }
 0x70e   : > { %8691 = vst [vmem:[#allocation64_spill] sm:$0xff] %v7510_v45  ;;  %3185 = vmatmul.bf16.gmra.mxu2 %v6022_v28  ;;  %3514 = vmatmul.bf16.gmra.mxu3 %v6022_v28 }
 0x711   : > { %v3146_v25 = vpop.f32.mrf.mxu2  ;;  %v3475_v1 = vpop.f32.mrf.mxu3 }
 0x712   : > { %v3791_v14 = vmax.f32 %v3663_v38, %v3146_v25  ;;  %v2498_v23 = vpop.f32.mrf.mxu0  ;;  %v2827_v34 = vpop.f32.mrf.mxu1  ;;  %v6025_v38 = vld [vmem:[%s8576_s9 + $0x1b8] sm:$0xff] }
 0x713   : > { %v3667_v21 = vmax.f32 %v2498_v23, %v2827_v34 }
 0x714   : > { %v7515_v46 = vmax.f32 %v3791_v14, %v3475_v1 }
 0x715   : > { %2537 = vmatmul.bf16.gmra.mxu0 %v6024_v6  ;;  %2866 = vmatmul.bf16.gmra.mxu1 %v6024_v6 }
 0x716   : > { %8692 = vst [vmem:[#allocation65_spill] sm:$0xff] %v7515_v46 }
 0x719   : > { %v3148_v39 = vpop.f32.mrf.mxu2  ;;  %v3477_v29 = vpop.f32.mrf.mxu3 }
 0x71a   : > { %v3792_v47 = vmax.f32 %v3664_v32, %v3148_v39  ;;  %v2500_v63 = vpop.f32.mrf.mxu0  ;;  %v2829_v16 = vpop.f32.mrf.mxu1 }
 0x71b   : > { %v3668_v28 = vmax.f32 %v2500_v63, %v2829_v16 }
 0x71c   : > { %v7517_v30 = vmax.f32 %v3792_v47, %v3477_v29 }
 0x71e   : > { %8693 = vst [vmem:[#allocation66_spill] sm:$0xff] %v7517_v30  ;;  %3190 = vmatmul.bf16.gmra.mxu2 %v6023_v24  ;;  %3519 = vmatmul.bf16.gmra.mxu3 %v6023_v24 }
 0x721   : > { %v3151_v45 = vpop.f32.mrf.mxu2  ;;  %v3480_v9 = vpop.f32.mrf.mxu3 }
 0x722   : > { %v3793_v1 = vmax.f32 %v3665_v5, %v3151_v45  ;;  %v2503_v25 = vpop.f32.mrf.mxu0  ;;  %v2832_v14 = vpop.f32.mrf.mxu1  ;;  %v6026_v5 = vld [vmem:[%s8576_s9 + $0x1c0] sm:$0xff] }
 0x723   : > { %v3669_v23 = vmax.f32 %v2503_v25, %v2832_v14 }
 0x724   : > { %v7522_v34 = vmax.f32 %v3793_v1, %v3480_v9 }
 0x725   : > { %2542 = vmatmul.bf16.gmra.mxu0 %v6025_v38  ;;  %2871 = vmatmul.bf16.gmra.mxu1 %v6025_v38 }
 0x726   : > { %8694 = vst [vmem:[#allocation67_spill] sm:$0xff] %v7522_v34 }
 0x729   : > { %v3153_v32 = vpop.f32.mrf.mxu2  ;;  %v3482_v39 = vpop.f32.mrf.mxu3 }
 0x72a   : > { %v3794_v29 = vmax.f32 %v3666_v51, %v3153_v32  ;;  %v2505_v47 = vpop.f32.mrf.mxu0  ;;  %v2834_v63 = vpop.f32.mrf.mxu1 }
 0x72b   : > { %v3670_v24 = vmax.f32 %v2505_v47, %v2834_v63 }
 0x72c   : > { %v7524_v16 = vmax.f32 %v3794_v29, %v3482_v39 }
 0x72e   : > { %8695 = vst [vmem:[#allocation68_spill] sm:$0xff] %v7524_v16  ;;  %3195 = vmatmul.bf16.gmra.mxu2 %v6024_v6  ;;  %3524 = vmatmul.bf16.gmra.mxu3 %v6024_v6 }
 0x731   : > { %v3156_v30 = vpop.f32.mrf.mxu2  ;;  %v3485_v46 = vpop.f32.mrf.mxu3 }
 0x732   : > { %v3795_v9 = vmax.f32 %v3667_v21, %v3156_v30  ;;  %v2508_v45 = vpop.f32.mrf.mxu0  ;;  %v2837_v1 = vpop.f32.mrf.mxu1  ;;  %v6027_v21 = vld [vmem:[%s8576_s9 + $0x1c8] sm:$0xff] }
 0x733   : > { %v3671_v25 = vmax.f32 %v2508_v45, %v2837_v1 }
 0x734   : > { %v7529_v14 = vmax.f32 %v3795_v9, %v3485_v46 }
 0x735   : > { %2547 = vmatmul.bf16.gmra.mxu0 %v6026_v5  ;;  %2876 = vmatmul.bf16.gmra.mxu1 %v6026_v5 }
 0x736   : > { %8696 = vst [vmem:[#allocation69_spill] sm:$0xff] %v7529_v14 }
 0x739   : > { %v3158_v51 = vpop.f32.mrf.mxu2  ;;  %v3487_v32 = vpop.f32.mrf.mxu3 }
 0x73a   : > { %v3796_v39 = vmax.f32 %v3668_v28, %v3158_v51  ;;  %v2510_v29 = vpop.f32.mrf.mxu0  ;;  %v2839_v47 = vpop.f32.mrf.mxu1 }
 0x73b   : > { %v3672_v6 = vmax.f32 %v2510_v29, %v2839_v47 }
 0x73c   : > { %v7531_v63 = vmax.f32 %v3796_v39, %v3487_v32 }
 0x73e   : > { %8697 = vst [vmem:[#allocation70_spill] sm:$0xff] %v7531_v63  ;;  %3200 = vmatmul.bf16.gmra.mxu2 %v6025_v38  ;;  %3529 = vmatmul.bf16.gmra.mxu3 %v6025_v38 }
 0x741   : > { %v3161_v16 = vpop.f32.mrf.mxu2  ;;  %v3490_v34 = vpop.f32.mrf.mxu3 }
 0x742   : > { %v3797_v46 = vmax.f32 %v3669_v23, %v3161_v16  ;;  %v2513_v30 = vpop.f32.mrf.mxu0  ;;  %v2842_v9 = vpop.f32.mrf.mxu1  ;;  %v6028_v23 = vld [vmem:[%s8576_s9 + $0x1d0] sm:$0xff] }
 0x743   : > { %v3673_v45 = vmax.f32 %v2513_v30, %v2842_v9 }
 0x744   : > { %v7536_v1 = vmax.f32 %v3797_v46, %v3490_v34 }
 0x745   : > { %2552 = vmatmul.bf16.gmra.mxu0 %v6027_v21  ;;  %2881 = vmatmul.bf16.gmra.mxu1 %v6027_v21 }
 0x746   : > { %8698 = vst [vmem:[#allocation71_spill] sm:$0xff] %v7536_v1 }
 0x749   : > { %v3163_v28 = vpop.f32.mrf.mxu2  ;;  %v3492_v51 = vpop.f32.mrf.mxu3 }
 0x74a   : > { %v3798_v32 = vmax.f32 %v3670_v24, %v3163_v28  ;;  %v2515_v39 = vpop.f32.mrf.mxu0  ;;  %v2844_v29 = vpop.f32.mrf.mxu1 }
 0x74b   : > { %v3674_v38 = vmax.f32 %v2515_v39, %v2844_v29 }
 0x74c   : > { %v7538_v47 = vmax.f32 %v3798_v32, %v3492_v51 }
 0x74e   : > { %8699 = vst [vmem:[#allocation72_spill] sm:$0xff] %v7538_v47  ;;  %3205 = vmatmul.bf16.gmra.mxu2 %v6026_v5  ;;  %3534 = vmatmul.bf16.gmra.mxu3 %v6026_v5 }
 0x751   : > { %v3166_v63 = vpop.f32.mrf.mxu2  ;;  %v3495_v14 = vpop.f32.mrf.mxu3 }
 0x752   : > { %v3799_v34 = vmax.f32 %v3671_v25, %v3166_v63  ;;  %v2518_v16 = vpop.f32.mrf.mxu0  ;;  %v2847_v46 = vpop.f32.mrf.mxu1  ;;  %v6029_v25 = vld [vmem:[%s8576_s9 + $0x1d8] sm:$0xff] }
 0x753   : > { %v3675_v30 = vmax.f32 %v2518_v16, %v2847_v46 }
 0x754   : > { %v7543_v9 = vmax.f32 %v3799_v34, %v3495_v14 }
 0x755   : > { %2557 = vmatmul.bf16.gmra.mxu0 %v6028_v23  ;;  %2886 = vmatmul.bf16.gmra.mxu1 %v6028_v23 }
 0x756   : > { %8700 = vst [vmem:[#allocation73_spill] sm:$0xff] %v7543_v9 }
 0x759   : > { %v3168_v24 = vpop.f32.mrf.mxu2  ;;  %v3497_v28 = vpop.f32.mrf.mxu3 }
 0x75a   : > { %v3800_v51 = vmax.f32 %v3672_v6, %v3168_v24  ;;  %v2520_v32 = vpop.f32.mrf.mxu0  ;;  %v2849_v39 = vpop.f32.mrf.mxu1 }
 0x75b   : > { %v3676_v5 = vmax.f32 %v2520_v32, %v2849_v39 }
 0x75c   : > { %v7545_v29 = vmax.f32 %v3800_v51, %v3497_v28 }
 0x75e   : > { %8701 = vst [vmem:[#allocation74_spill] sm:$0xff] %v7545_v29  ;;  %3210 = vmatmul.bf16.gmra.mxu2 %v6027_v21  ;;  %3539 = vmatmul.bf16.gmra.mxu3 %v6027_v21 }
 0x761   : > { %v3171_v47 = vpop.f32.mrf.mxu2  ;;  %v3500_v1 = vpop.f32.mrf.mxu3 }
 0x762   : > { %v3801_v14 = vmax.f32 %v3673_v45, %v3171_v47  ;;  %v2523_v63 = vpop.f32.mrf.mxu0  ;;  %v2852_v34 = vpop.f32.mrf.mxu1  ;;  %v6030_v45 = vld [vmem:[%s8576_s9 + $0x1e0] sm:$0xff] }
 0x763   : > { %v3677_v16 = vmax.f32 %v2523_v63, %v2852_v34 }
 0x764   : > { %v7550_v46 = vmax.f32 %v3801_v14, %v3500_v1 }
 0x765   : > { %2562 = vmatmul.bf16.gmra.mxu0 %v6029_v25  ;;  %2891 = vmatmul.bf16.gmra.mxu1 %v6029_v25 }
 0x766   : > { %8702 = vst [vmem:[#allocation75_spill] sm:$0xff] %v7550_v46 }
 0x769   : > { %v3173_v6 = vpop.f32.mrf.mxu2  ;;  %v3502_v24 = vpop.f32.mrf.mxu3 }
 0x76a   : > { %v3802_v28 = vmax.f32 %v3674_v38, %v3173_v6  ;;  %v2525_v51 = vpop.f32.mrf.mxu0  ;;  %v2854_v32 = vpop.f32.mrf.mxu1 }
 0x76b   : > { %v3678_v21 = vmax.f32 %v2525_v51, %v2854_v32 }
 0x76c   : > { %v7552_v39 = vmax.f32 %v3802_v28, %v3502_v24 }
 0x76e   : > { %8703 = vst [vmem:[#allocation76_spill] sm:$0xff] %v7552_v39  ;;  %3215 = vmatmul.bf16.gmra.mxu2 %v6028_v23  ;;  %3544 = vmatmul.bf16.gmra.mxu3 %v6028_v23 }
 0x771   : > { %v3176_v29 = vpop.f32.mrf.mxu2  ;;  %v3505_v9 = vpop.f32.mrf.mxu3 }
 0x772   : > { %v3803_v1 = vmax.f32 %v3675_v30, %v3176_v29  ;;  %v2528_v47 = vpop.f32.mrf.mxu0  ;;  %v2857_v14 = vpop.f32.mrf.mxu1  ;;  %v6031_v30 = vld [vmem:[%s8576_s9 + $0x1e8] sm:$0xff] }
 0x773   : > { %v3679_v63 = vmax.f32 %v2528_v47, %v2857_v14 }
 0x774   : > { %v7557_v34 = vmax.f32 %v3803_v1, %v3505_v9 }
 0x775   : > { %2567 = vmatmul.bf16.gmra.mxu0 %v6030_v45  ;;  %2896 = vmatmul.bf16.gmra.mxu1 %v6030_v45 }
 0x776   : > { %8704 = vst [vmem:[#allocation77_spill] sm:$0xff] %v7557_v34 }
 0x779   : > { %v3178_v38 = vpop.f32.mrf.mxu2  ;;  %v3507_v6 = vpop.f32.mrf.mxu3 }
 0x77a   : > { %v3804_v24 = vmax.f32 %v3676_v5, %v3178_v38  ;;  %v2530_v28 = vpop.f32.mrf.mxu0  ;;  %v2859_v51 = vpop.f32.mrf.mxu1 }
 0x77b   : > { %v3680_v23 = vmax.f32 %v2530_v28, %v2859_v51 }
 0x77c   : > { %v7559_v32 = vmax.f32 %v3804_v24, %v3507_v6 }
 0x77e   : > { %8705 = vst [vmem:[#allocation78_spill] sm:$0xff] %v7559_v32  ;;  %3220 = vmatmul.bf16.gmra.mxu2 %v6029_v25  ;;  %3549 = vmatmul.bf16.gmra.mxu3 %v6029_v25 }
 0x781   : > { %v3181_v39 = vpop.f32.mrf.mxu2  ;;  %v3510_v46 = vpop.f32.mrf.mxu3 }
 0x782   : > { %v3805_v9 = vmax.f32 %v3677_v16, %v3181_v39  ;;  %v2533_v29 = vpop.f32.mrf.mxu0  ;;  %v2862_v1 = vpop.f32.mrf.mxu1  ;;  %v6032_v16 = vld [vmem:[%s8576_s9 + $0x1f0] sm:$0xff] }
 0x783   : > { %v3681_v47 = vmax.f32 %v2533_v29, %v2862_v1 }
 0x784   : > { %v7564_v14 = vmax.f32 %v3805_v9, %v3510_v46 }
 0x785   : > { %2572 = vmatmul.bf16.gmra.mxu0 %v6031_v30  ;;  %2901 = vmatmul.bf16.gmra.mxu1 %v6031_v30 }
 0x786   : > { %8706 = vst [vmem:[#allocation79_spill] sm:$0xff] %v7564_v14 }
 0x789   : > { %v3183_v5 = vpop.f32.mrf.mxu2  ;;  %v3512_v38 = vpop.f32.mrf.mxu3 }
 0x78a   : > { %v3806_v6 = vmax.f32 %v3678_v21, %v3183_v5  ;;  %v2535_v24 = vpop.f32.mrf.mxu0  ;;  %v2864_v28 = vpop.f32.mrf.mxu1 }
 0x78b   : > { %v3682_v25 = vmax.f32 %v2535_v24, %v2864_v28 }
 0x78c   : > { %v7566_v51 = vmax.f32 %v3806_v6, %v3512_v38 }
 0x78e   : > { %8707 = vst [vmem:[#allocation80_spill] sm:$0xff] %v7566_v51  ;;  %3225 = vmatmul.bf16.gmra.mxu2 %v6030_v45  ;;  %3554 = vmatmul.bf16.gmra.mxu3 %v6030_v45 }
 0x791   : > { %v3186_v32 = vpop.f32.mrf.mxu2  ;;  %v3515_v34 = vpop.f32.mrf.mxu3 }
 0x792   : > { %v3807_v46 = vmax.f32 %v3679_v63, %v3186_v32  ;;  %v2538_v39 = vpop.f32.mrf.mxu0  ;;  %v2867_v9 = vpop.f32.mrf.mxu1  ;;  %v6033_v63 = vld [vmem:[%s8576_s9 + $0x1f8] sm:$0xff] }
 0x793   : > { %v3683_v29 = vmax.f32 %v2538_v39, %v2867_v9 }
 0x794   : > { %v7571_v1 = vmax.f32 %v3807_v46, %v3515_v34 }
 0x795   : > { %2577 = vmatmul.bf16.gmra.mxu0 %v6032_v16  ;;  %2906 = vmatmul.bf16.gmra.mxu1 %v6032_v16 }
 0x796   : > { %8708 = vst [vmem:[#allocation81_spill] sm:$0xff] %v7571_v1 }
 0x799   : > { %v3188_v21 = vpop.f32.mrf.mxu2  ;;  %v3517_v5 = vpop.f32.mrf.mxu3 }
 0x79a   : > { %v3808_v38 = vmax.f32 %v3680_v23, %v3188_v21  ;;  %v2540_v6 = vpop.f32.mrf.mxu0  ;;  %v2869_v24 = vpop.f32.mrf.mxu1 }
 0x79b   : > { %v3684_v45 = vmax.f32 %v2540_v6, %v2869_v24 }
 0x79c   : > { %v7573_v28 = vmax.f32 %v3808_v38, %v3517_v5 }
 0x79e   : > { %8709 = vst [vmem:[#allocation82_spill] sm:$0xff] %v7573_v28  ;;  %3230 = vmatmul.bf16.gmra.mxu2 %v6031_v30  ;;  %3559 = vmatmul.bf16.gmra.mxu3 %v6031_v30 }
 0x7a1   : > { %v3191_v51 = vpop.f32.mrf.mxu2  ;;  %v3520_v14 = vpop.f32.mrf.mxu3 }
 0x7a2   : > { %v3809_v34 = vmax.f32 %v3681_v47, %v3191_v51  ;;  %v2543_v32 = vpop.f32.mrf.mxu0  ;;  %v2872_v46 = vpop.f32.mrf.mxu1 }
 0x7a3   : > { %v3685_v39 = vmax.f32 %v2543_v32, %v2872_v46 }
 0x7a4   : > { %v7578_v9 = vmax.f32 %v3809_v34, %v3520_v14 }
 0x7a5   : > { %2582 = vmatmul.bf16.gmra.mxu0 %v6033_v63  ;;  %2911 = vmatmul.bf16.gmra.mxu1 %v6033_v63 }
 0x7a6   : > { %8710 = vst [vmem:[#allocation83_spill] sm:$0xff] %v7578_v9 }
 0x7a9   : > { %v3193_v23 = vpop.f32.mrf.mxu2  ;;  %v3522_v21 = vpop.f32.mrf.mxu3 }
 0x7aa   : > { %v3810_v5 = vmax.f32 %v3682_v25, %v3193_v23  ;;  %v2545_v38 = vpop.f32.mrf.mxu0  ;;  %v2874_v6 = vpop.f32.mrf.mxu1 }
 0x7ab   : > { %v3686_v30 = vmax.f32 %v2545_v38, %v2874_v6 }
 0x7ac   : > { %v7580_v24 = vmax.f32 %v3810_v5, %v3522_v21 }
 0x7ae   : > { %3235 = vmatmul.bf16.gmra.mxu2 %v6032_v16  ;;  %3564 = vmatmul.bf16.gmra.mxu3 %v6032_v16 }
 0x7b1   : > { %v3196_v28 = vpop.f32.mrf.mxu2  ;;  %v3525_v1 = vpop.f32.mrf.mxu3 }
 0x7b2   : > { %v3811_v47 = vmax.f32 %v3683_v29, %v3196_v28  ;;  %v2548_v51 = vpop.f32.mrf.mxu0  ;;  %v2877_v57 = vpop.f32.mrf.mxu1 }
 0x7b3   : > { %v3687_v32 = vmax.f32 %v2548_v51, %v2877_v57 }
 0x7b4   : > { %v7582_v14 = vmax.f32 %v3811_v47, %v3525_v1 }
 0x7b6   : > { %8711 = vst [vmem:[#allocation84_spill] sm:$0xff] %v7582_v14 }
 0x7b9   : > { %v3198_v34 = vpop.f32.mrf.mxu2  ;;  %v3527_v46 = vpop.f32.mrf.mxu3 }
 0x7ba   : > { %v3812_v9 = vmax.f32 %v3684_v45, %v3198_v34  ;;  %v2550_v43 = vpop.f32.mrf.mxu0  ;;  %v2879_v25 = vpop.f32.mrf.mxu1 }
 0x7bb   : > { %v3688_v23 = vmax.f32 %v2550_v43, %v2879_v25 }
 0x7bc   : > { %v7584_v31 = vmax.f32 %v3812_v9, %v3527_v46 }
 0x7be   : > { %8712 = vst [vmem:[#allocation85_spill] sm:$0xff] %v7584_v31  ;;  %3240 = vmatmul.bf16.gmra.mxu2 %v6033_v63  ;;  %3569 = vmatmul.bf16.gmra.mxu3 %v6033_v63 }
 0x7c1   : > { %v3201_v21 = vpop.f32.mrf.mxu2  ;;  %v3530_v16 = vpop.f32.mrf.mxu3 }
 0x7c2   : > { %v3813_v5 = vmax.f32 %v3685_v39, %v3201_v21  ;;  %v2553_v38 = vpop.f32.mrf.mxu0  ;;  %v2882_v29 = vpop.f32.mrf.mxu1 }
 0x7c3   : > { %v3689_v28 = vmax.f32 %v2553_v38, %v2882_v29 }
 0x7c4   : > { %v7586_v6 = vmax.f32 %v3813_v5, %v3530_v16 }
 0x7c6   : > { %8713 = vst [vmem:[#allocation86_spill] sm:$0xff] %v7586_v6 }
 0x7c9   : > { %v3203_v57 = vpop.f32.mrf.mxu2  ;;  %v3532_v1 = vpop.f32.mrf.mxu3 }
 0x7ca   : > { %v3814_v47 = vmax.f32 %v3686_v30, %v3203_v57  ;;  %v2555_v51 = vpop.f32.mrf.mxu0  ;;  %v2884_v45 = vpop.f32.mrf.mxu1 }
 0x7cb   : > { %v3690_v34 = vmax.f32 %v2555_v51, %v2884_v45 }
 0x7cc   : > { %v7588_v14 = vmax.f32 %v3814_v47, %v3532_v1 }
 0x7ce   : > { %8714 = vst [vmem:[#allocation87_spill] sm:$0xff] %v7588_v14 }
 0x7d1   : > { %v3206_v43 = vpop.f32.mrf.mxu2  ;;  %v3535_v9 = vpop.f32.mrf.mxu3 }
 0x7d2   : > { %v3815_v46 = vmax.f32 %v3687_v32, %v3206_v43  ;;  %v2558_v63 = vpop.f32.mrf.mxu0  ;;  %v2887_v25 = vpop.f32.mrf.mxu1 }
 0x7d3   : > { %v3691_v31 = vmax.f32 %v2558_v63, %v2887_v25 }
 0x7d4   : > { %v7590_v39 = vmax.f32 %v3815_v46, %v3535_v9 }
 0x7d6   : > { %8715 = vst [vmem:[#allocation88_spill] sm:$0xff] %v7590_v39 }
 0x7d9   : > { %v3208_v21 = vpop.f32.mrf.mxu2  ;;  %v3537_v38 = vpop.f32.mrf.mxu3 }
 0x7da   : > { %v3816_v16 = vmax.f32 %v3688_v23, %v3208_v21  ;;  %v2560_v5 = vpop.f32.mrf.mxu0  ;;  %v2889_v29 = vpop.f32.mrf.mxu1 }
 0x7db   : > { %v3692_v6 = vmax.f32 %v2560_v5, %v2889_v29 }
 0x7dc   : > { %v7592_v30 = vmax.f32 %v3816_v16, %v3537_v38 }
 0x7de   : > { %8716 = vst [vmem:[#allocation89_spill] sm:$0xff] %v7592_v30 }
 0x7e1   : > { %v3211_v57 = vpop.f32.mrf.mxu2  ;;  %v3540_v51 = vpop.f32.mrf.mxu3 }
 0x7e2   : > { %v3817_v1 = vmax.f32 %v3689_v28, %v3211_v57  ;;  %v2563_v47 = vpop.f32.mrf.mxu0  ;;  %v2892_v45 = vpop.f32.mrf.mxu1 }
 0x7e3   : > { %v3693_v14 = vmax.f32 %v2563_v47, %v2892_v45 }
 0x7e4   : > { %v7594_v32 = vmax.f32 %v3817_v1, %v3540_v51 }
 0x7e6   : > { %8717 = vst [vmem:[#allocation90_spill] sm:$0xff] %v7594_v32 }
 0x7e9   : > { %v3213_v43 = vpop.f32.mrf.mxu2  ;;  %v3542_v63 = vpop.f32.mrf.mxu3 }
 0x7ea   : > { %v3818_v9 = vmax.f32 %v3690_v34, %v3213_v43  ;;  %v2565_v46 = vpop.f32.mrf.mxu0  ;;  %v2894_v25 = vpop.f32.mrf.mxu1 }
 0x7eb   : > { %v3694_v39 = vmax.f32 %v2565_v46, %v2894_v25 }
 0x7ec   : > { %v7596_v23 = vmax.f32 %v3818_v9, %v3542_v63 }
 0x7ee   : > { %8718 = vst [vmem:[#allocation91_spill] sm:$0xff] %v7596_v23 }
 0x7f1   : > { %v3216_v21 = vpop.f32.mrf.mxu2  ;;  %v3545_v5 = vpop.f32.mrf.mxu3 }
 0x7f2   : > { %v3819_v38 = vmax.f32 %v3691_v31, %v3216_v21  ;;  %v2568_v51 = vpop.f32.mrf.mxu0  ;;  %v2897_v1 = vpop.f32.mrf.mxu1 }
 0x7f3   : > { %v3695_v21 = vmax.f32 %v2568_v51, %v2897_v1 }
 0x7f4   : > { %v7598_v16 = vmax.f32 %v3819_v38, %v3545_v5 }
 0x7f6   : > { %8719 = vst [vmem:[#allocation92_spill] sm:$0xff] %v7598_v16 }
 0x7f9   : > { %v3218_v29 = vpop.f32.mrf.mxu2  ;;  %v3547_v28 = vpop.f32.mrf.mxu3 }
 0x7fa   : > { %v3820_v57 = vmax.f32 %v3692_v6, %v3218_v29  ;;  %v2570_v46 = vpop.f32.mrf.mxu0  ;;  %v2899_v63 = vpop.f32.mrf.mxu1 }
 0x7fc   : > { %v7600_v30 = vmax.f32 %v3820_v57, %v3547_v28 }
 0x7fe   : > { %8720 = vst [vmem:[#allocation93_spill] sm:$0xff] %v7600_v30  ;;  %v3696_v30 = vmax.f32 %v2570_v46, %v2899_v63 }
 0x801   : > { %v3221_v47 = vpop.f32.mrf.mxu2  ;;  %v3550_v45 = vpop.f32.mrf.mxu3 }
 0x802   : > { %v3821_v34 = vmax.f32 %v3693_v14, %v3221_v47  ;;  %v2573_v29 = vpop.f32.mrf.mxu0  ;;  %v2902_v28 = vpop.f32.mrf.mxu1 }
 0x803   : > { %v3697_v32 = vmax.f32 %v2573_v29, %v2902_v28 }
 0x804   : > { %v7602_v43 = vmax.f32 %v3821_v34, %v3550_v45 }
 0x806   : > { %8721 = vst [vmem:[#allocation94_spill] sm:$0xff] %v7602_v43 }
 0x809   : > { %v3223_v9 = vpop.f32.mrf.mxu2  ;;  %v3552_v25 = vpop.f32.mrf.mxu3 }
 0x80a   : > { %v3822_v23 = vmax.f32 %v3694_v39, %v3223_v9  ;;  %v2575_v34 = vpop.f32.mrf.mxu0  ;;  %v2904_v43 = vpop.f32.mrf.mxu1 }
 0x80c   : > { %v7604_v31 = vmax.f32 %v3822_v23, %v3552_v25 }
 0x811   : > { %v3226_v5 = vpop.f32.mrf.mxu2  ;;  %v3555_v38 = vpop.f32.mrf.mxu3 }
 0x812   : > { %v3823_v6 = vmax.f32 %v3695_v21, %v3226_v5  ;;  %v2578_v1 = vpop.f32.mrf.mxu0  ;;  %v2907_v25 = vpop.f32.mrf.mxu1  ;;  %v3698_v21 = vmax.f32 %v2575_v34, %v2904_v43 }
 0x813   : > { %v3699_v63 = vmax.f32 %v2578_v1, %v2907_v25 }
 0x814   : > { %v7606_v57 = vmax.f32 %v3823_v6, %v3555_v38 }
 0x819   : > { %v3228_v16 = vpop.f32.mrf.mxu2  ;;  %v3557_v14 = vpop.f32.mrf.mxu3 }
 0x81a   : > { %v3824_v47 = vmax.f32 %v3696_v30, %v3228_v16  ;;  %v2580_v30 = vpop.f32.mrf.mxu0  ;;  %v2909_v16 = vpop.f32.mrf.mxu1 }
 0x81b   : > { %v3700_v28 = vmax.f32 %v2580_v30, %v2909_v16 }
 0x81c   : > { %v7608_v45 = vmax.f32 %v3824_v47, %v3557_v14 }
 0x81e   : > { %8722 = vst [vmem:[#allocation95_spill] sm:$0xff] %v7608_v45 }
 0x821   : > { %v3231_v39 = vpop.f32.mrf.mxu2  ;;  %v3560_v23 = vpop.f32.mrf.mxu3 }
 0x822   : > { %v3825_v9 = vmax.f32 %v3697_v32, %v3231_v39 }
 0x824   : > { %v7610_v51 = vmax.f32 %v3825_v9, %v3560_v23  ;;  %v2583_v9 = vpop.f32.mrf.mxu0 }
 0x826   : > { %8723 = vst [vmem:[#allocation96_spill] sm:$0xff] %v7610_v51  ;;  %v2912_v51 = vpop.f32.mrf.mxu1 }
 0x827   : > { %v3701_v34 = vmax.f32 %v2583_v9, %v2912_v51 }
 0x829   : > { %v3233_v5 = vpop.f32.mrf.mxu2  ;;  %v3562_v38 = vpop.f32.mrf.mxu3 }
 0x82a   : > { %v3826_v6 = vmax.f32 %v3698_v21, %v3233_v5 }
 0x82c   : > { %v7612_v46 = vmax.f32 %v3826_v6, %v3562_v38  ;;  %v2585_v25 = vpop.f32.mrf.mxu0 }
 0x82e   : > { %8724 = vst [vmem:[#allocation97_spill] sm:$0xff] %v7612_v46  ;;  %v2914_v6 = vpop.f32.mrf.mxu1 }
 0x82f   : > { %v3702_v46 = vmax.f32 %v2585_v25, %v2914_v6 }
 0x831   : > { %v3236_v14 = vpop.f32.mrf.mxu2  ;;  %v3565_v47 = vpop.f32.mrf.mxu3 }
 0x832   : > { %v3827_v45 = vmax.f32 %v3699_v63, %v3236_v14 }
 0x834   : > { %v7614_v29 = vmax.f32 %v3827_v45, %v3565_v47 }
 0x839   : > { %v3238_v32 = vpop.f32.mrf.mxu2  ;;  %v3567_v39 = vpop.f32.mrf.mxu3 }
 0x83a   : > { %v3828_v23 = vmax.f32 %v3700_v28, %v3238_v32 }
 0x83c   : > { %v7616_v43 = vmax.f32 %v3828_v23, %v3567_v39 }
 0x841   : > { %v3241_v21 = vpop.f32.mrf.mxu2  ;;  %v3570_v5 = vpop.f32.mrf.mxu3 }
 0x842   : > { %v3829_v38 = vmax.f32 %v3701_v34, %v3241_v21 }
 0x844   : > { %v7618_v1 = vmax.f32 %v3829_v38, %v3570_v5 }
 0x848   : > { %3962 = sbr.rel (%p5940_p0) target bundleno = 2253 (0x8cd), region = 68 }
 0x849   : > { %v3243_v63 = vpop.f32.mrf.mxu2  ;;  %v3572_v14 = vpop.f32.mrf.mxu3 }
 0x84a   : > { %v3830_v45 = vmax.f32 %v3702_v46, %v3243_v63 }
 0x84c   : > { %v7620_v30 = vmax.f32 %v3830_v45, %v3572_v14 }
 0x84d   : > { %3963 = vst [vmem:[#allocation2 + $0x2b0] sm:$0xff] %v7207_v33  ;;  %v8725_v51 = vld [vmem:[#allocation34_spill] sm:$0xff]  ;;  %v8726_v46 = vld [vmem:[#allocation32_spill] sm:$0xff]  ;;  %v8727_v16 = vld [vmem:[#allocation33_spill] sm:$0xff] }
 0x84e   : > { %3964 = vst [vmem:[#allocation2 + $0x3b0] sm:$0xff] %v7209_v60  ;;  %v8728_v47 = vld [vmem:[#allocation30_spill] sm:$0xff]  ;;  %v8729_v28 = vld [vmem:[#allocation31_spill] sm:$0xff]  ;;  %v8730_v32 = vld [vmem:[#allocation28_spill] sm:$0xff] }
 0x84f   : > { %3965 = vst [vmem:[#allocation2 + $0xd8] sm:$0xff] %v7214_v3  ;;  %v8731_v39 = vld [vmem:[#allocation29_spill] sm:$0xff]  ;;  %v8732_v23 = vld [vmem:[#allocation26_spill] sm:$0xff]  ;;  %v8733_v9 = vld [vmem:[#allocation27_spill] sm:$0xff] }
 0x850   : > { %3966 = vst [vmem:[#allocation2 + $0x18] sm:$0xff] %v7216_v4  ;;  %v8734_v34 = vld [vmem:[#allocation24_spill] sm:$0xff]  ;;  %v8735_v21 = vld [vmem:[#allocation25_spill] sm:$0xff]  ;;  %v8736_v5 = vld [vmem:[#allocation22_spill] sm:$0xff] }
 0x851   : > { %3967 = vst [vmem:[#allocation2 + $0x50] sm:$0xff] %v7221_v37  ;;  %v8737_v38 = vld [vmem:[#allocation23_spill] sm:$0xff]  ;;  %v8738_v25 = vld [vmem:[#allocation20_spill] sm:$0xff]  ;;  %v8739_v6 = vld [vmem:[#allocation21_spill] sm:$0xff] }
 0x852   : > { %3968 = vst [vmem:[#allocation2 + $0x368] sm:$0xff] %v7223_v12  ;;  %v8740_v63 = vld [vmem:[#allocation18_spill] sm:$0xff]  ;;  %v8741_v45 = vld [vmem:[#allocation19_spill] sm:$0xff]  ;;  %v8742_v14 = vld [vmem:[#allocation16_spill] sm:$0xff] }
 0x853   : > { %3969 = vst [vmem:[#allocation2 + $0x330] sm:$0xff] %v7228_v15 }
 0x854   : > { %3970 = vst [vmem:[#allocation2 + $0x48] sm:$0xff] %v7230_v11 }
 0x855   : > { %3971 = vst [vmem:[#allocation2 + $0x380] sm:$0xff] %v7235_v44 }
 0x856   : > { %3972 = vst [vmem:[#allocation2 + $0x110] sm:$0xff] %v7237_v55 }
 0x857   : > { %3973 = vst [vmem:[#allocation2 + $0x118] sm:$0xff] %v7242_v13 }
 0x858   : > { %3974 = vst [vmem:[#allocation2 + $0x98] sm:$0xff] %v7244_v56 }
 0x859   : > { %3975 = vst [vmem:[#allocation2 + $0x320] sm:$0xff] %v7249_v7 }
 0x85a   : > { %3976 = vst [vmem:[#allocation2 + $0x150] sm:$0xff] %v7251_v58 }
 0x85b   : > { %3977 = vst [vmem:[#allocation2 + $0x108] sm:$0xff] %v7256_v35 }
 0x85c   : > { %3978 = vst [vmem:[#allocation2 + $0x60] sm:$0xff] %v7258_v40 }
 0x85d   : > { %3979 = vst [vmem:[#allocation2 + $0x2e0] sm:$0xff] %v7263_v27 }
 0x85e   : > { %3980 = vst [vmem:[#allocation2 + $0x388] sm:$0xff] %v7265_v54 }
 0x85f   : > { %3981 = vst [vmem:[#allocation2 + $0x338] sm:$0xff] %v7270_v59 }
 0x860   : > { %3982 = vst [vmem:[#allocation2 + $0x340] sm:$0xff] %v7272_v42 }
 0x861   : > { %3983 = vst [vmem:[#allocation2 + $0x80] sm:$0xff] %v7277_v18 }
 0x862   : > { %3984 = vst [vmem:[#allocation2 + $0x1a8] sm:$0xff] %v7279_v2 }
 0x863   : > { %3985 = vst [vmem:[#allocation2 + $0x1b8] sm:$0xff] %v7284_v0 }
 0x864   : > { %3986 = vst [vmem:[#allocation2 + $0x168] sm:$0xff] %v7286_v41 }
 0x865   : > { %3987 = vst [vmem:[#allocation2 + $0x3e8] sm:$0xff] %v7291_v53 }
 0x866   : > { %3988 = vst [vmem:[#allocation2 + $0x2f8] sm:$0xff] %v7293_v48 }
 0x867   : > { %3989 = vst [vmem:[#allocation2 + $0x290] sm:$0xff] %v7298_v20 }
 0x868   : > { %3990 = vst [vmem:[#allocation2 + $0x28] sm:$0xff] %v7300_v50 }
 0x869   : > { %3991 = vst [vmem:[#allocation2 + $0x138] sm:$0xff] %v7305_v19 }
 0x86a   : > { %3992 = vst [vmem:[#allocation2 + $0xc0] sm:$0xff] %v7307_v8 }
 0x86b   : > { %3993 = vst [vmem:[#allocation2 + $0x1c0] sm:$0xff] %v7312_v49 }
 0x86c   : > { %3994 = vst [vmem:[#allocation2 + $0x280] sm:$0xff] %v7314_v62 }
 0x86d   : > { %3995 = vst [vmem:[#allocation2 + $0x100] sm:$0xff] %v7319_v36 }
 0x86e   : > { %3996 = vst [vmem:[#allocation2 + $0x3c0] sm:$0xff] %v7321_v61 }
 0x86f   : > { %3997 = vst [vmem:[#allocation2 + $0x158] sm:$0xff] %v7326_v52 }
 0x870   : > { %3998 = vst [vmem:[#allocation2 + $0x3e0] sm:$0xff] %v7328_v10 }
 0x871   : > { %3999 = vst [vmem:[#allocation2 + $0x218] sm:$0xff] %v7333_v17 }
 0x872   : > { %4000 = vst [vmem:[#allocation2 + $0x3f8] sm:$0xff] %v7335_v22 }
 0x873   : > { %4001 = vst [vmem:[#allocation2 + $0x8] sm:$0xff] %v7340_v26 }
 0x874   : > { %4002 = vst [vmem:[#allocation2 + $0x128] sm:$0xff] %v8725_v51  ;;  %v8743_v51 = vld [vmem:[#allocation17_spill] sm:$0xff] }
 0x875   : > { %4003 = vst [vmem:[#allocation2 + $0x2a0] sm:$0xff] %v8726_v46  ;;  %v8744_v46 = vld [vmem:[#allocation35_spill] sm:$0xff] }
 0x876   : > { %4004 = vst [vmem:[#allocation2 + $0x3f0] sm:$0xff] %v8727_v16  ;;  %v8745_v16 = vld [vmem:[#allocation36_spill] sm:$0xff] }
 0x877   : > { %4005 = vst [vmem:[#allocation2 + $0xa0] sm:$0xff] %v8728_v47  ;;  %v8746_v47 = vld [vmem:[#allocation37_spill] sm:$0xff] }
 0x878   : > { %4006 = vst [vmem:[#allocation2 + $0x2c0] sm:$0xff] %v8729_v28  ;;  %v8747_v28 = vld [vmem:[#allocation38_spill] sm:$0xff] }
 0x879   : > { %4007 = vst [vmem:[#allocation2 + $0xb0] sm:$0xff] %v8730_v32  ;;  %v8748_v32 = vld [vmem:[#allocation39_spill] sm:$0xff] }
 0x87a   : > { %4008 = vst [vmem:[#allocation2 + $0x1e0] sm:$0xff] %v8731_v39  ;;  %v8749_v39 = vld [vmem:[#allocation40_spill] sm:$0xff] }
 0x87b   : > { %4009 = vst [vmem:[#allocation2 + $0x1f0] sm:$0xff] %v8732_v23  ;;  %v8750_v23 = vld [vmem:[#allocation41_spill] sm:$0xff] }
 0x87c   : > { %4010 = vst [vmem:[#allocation2 + $0x10] sm:$0xff] %v8733_v9  ;;  %v8751_v9 = vld [vmem:[#allocation42_spill] sm:$0xff] }
 0x87d   : > { %4011 = vst [vmem:[#allocation2 + $0x230] sm:$0xff] %v8734_v34  ;;  %v8752_v34 = vld [vmem:[#allocation43_spill] sm:$0xff] }
 0x87e   : > { %4012 = vst [vmem:[#allocation2 + $0x240] sm:$0xff] %v8735_v21  ;;  %v8753_v21 = vld [vmem:[#allocation44_spill] sm:$0xff] }
 0x87f   : > { %4013 = vst [vmem:[#allocation2 + $0x90] sm:$0xff] %v8736_v5  ;;  %v8754_v5 = vld [vmem:[#allocation45_spill] sm:$0xff] }
 0x880   : > { %4014 = vst [vmem:[#allocation2 + $0x3a0] sm:$0xff] %v8737_v38  ;;  %v8755_v38 = vld [vmem:[#allocation46_spill] sm:$0xff] }
 0x881   : > { %4015 = vst [vmem:[#allocation2 + $0x208] sm:$0xff] %v8738_v25  ;;  %v8756_v25 = vld [vmem:[#allocation47_spill] sm:$0xff] }
 0x882   : > { %4016 = vst [vmem:[#allocation2 + $0xd0] sm:$0xff] %v8739_v6  ;;  %v8757_v6 = vld [vmem:[#allocation48_spill] sm:$0xff] }
 0x883   : > { %4017 = vst [vmem:[#allocation2 + $0x88] sm:$0xff] %v8740_v63  ;;  %v8758_v63 = vld [vmem:[#allocation49_spill] sm:$0xff] }
 0x884   : > { %4018 = vst [vmem:[#allocation2 + $0x2f0] sm:$0xff] %v8741_v45  ;;  %v8759_v45 = vld [vmem:[#allocation50_spill] sm:$0xff] }
 0x885   : > { %4019 = vst [vmem:[#allocation2 + $0x358] sm:$0xff] %v8742_v14  ;;  %v8760_v14 = vld [vmem:[#allocation51_spill] sm:$0xff] }
 0x886   : > { %4020 = vst [vmem:[#allocation2 + $0x268] sm:$0xff] %v8743_v51  ;;  %v8761_v51 = vld [vmem:[#allocation52_spill] sm:$0xff] }
 0x887   : > { %4021 = vst [vmem:[#allocation2 + $0x350] sm:$0xff] %v8744_v46  ;;  %v8762_v46 = vld [vmem:[#allocation53_spill] sm:$0xff] }
 0x888   : > { %4022 = vst [vmem:[#allocation2 + $0x188] sm:$0xff] %v8745_v16  ;;  %v8763_v16 = vld [vmem:[#allocation54_spill] sm:$0xff] }
 0x889   : > { %4023 = vst [vmem:[#allocation2 + $0x1d8] sm:$0xff] %v8746_v47  ;;  %v8764_v47 = vld [vmem:[#allocation55_spill] sm:$0xff] }
 0x88a   : > { %4024 = vst [vmem:[#allocation2 + $0x30] sm:$0xff] %v8747_v28  ;;  %v8765_v28 = vld [vmem:[#allocation56_spill] sm:$0xff] }
 0x88b   : > { %4025 = vst [vmem:[#allocation2 + $0x140] sm:$0xff] %v8748_v32  ;;  %v8766_v32 = vld [vmem:[#allocation57_spill] sm:$0xff] }
 0x88c   : > { %4026 = vst [vmem:[#allocation2 + $0x2a8] sm:$0xff] %v8749_v39  ;;  %v8767_v39 = vld [vmem:[#allocation58_spill] sm:$0xff] }
 0x88d   : > { %4027 = vst [vmem:[#allocation2 + $0x130] sm:$0xff] %v8750_v23  ;;  %v8768_v23 = vld [vmem:[#allocation59_spill] sm:$0xff] }
 0x88e   : > { %4028 = vst [vmem:[#allocation2 + $0x200] sm:$0xff] %v8751_v9  ;;  %v8769_v9 = vld [vmem:[#allocation60_spill] sm:$0xff] }
 0x88f   : > { %4029 = vst [vmem:[#allocation2 + $0x318] sm:$0xff] %v8752_v34  ;;  %v8770_v34 = vld [vmem:[#allocation61_spill] sm:$0xff] }
 0x890   : > { %4030 = vst [vmem:[#allocation2 + $0x220] sm:$0xff] %v8753_v21  ;;  %v8771_v21 = vld [vmem:[#allocation62_spill] sm:$0xff] }
 0x891   : > { %4031 = vst [vmem:[#allocation2 + $0x70] sm:$0xff] %v8754_v5  ;;  %v8772_v5 = vld [vmem:[#allocation63_spill] sm:$0xff] }
 0x892   : > { %4032 = vst [vmem:[#allocation2 + $0x300] sm:$0xff] %v8755_v38  ;;  %v8773_v38 = vld [vmem:[#allocation64_spill] sm:$0xff] }
 0x893   : > { %4033 = vst [vmem:[#allocation2 + $0xe0] sm:$0xff] %v8756_v25  ;;  %v8774_v25 = vld [vmem:[#allocation65_spill] sm:$0xff] }
 0x894   : > { %4034 = vst [vmem:[#allocation2 + $0x178] sm:$0xff] %v8757_v6  ;;  %v8775_v6 = vld [vmem:[#allocation66_spill] sm:$0xff] }
 0x895   : > { %4035 = vst [vmem:[#allocation2 + $0x328] sm:$0xff] %v8758_v63  ;;  %v8776_v63 = vld [vmem:[#allocation67_spill] sm:$0xff] }
 0x896   : > { %4036 = vst [vmem:[#allocation2 + $0x260] sm:$0xff] %v8759_v45  ;;  %v8777_v45 = vld [vmem:[#allocation68_spill] sm:$0xff] }
 0x897   : > { %4037 = vst [vmem:[#allocation2 + $0x3b8] sm:$0xff] %v8760_v14  ;;  %v8778_v14 = vld [vmem:[#allocation69_spill] sm:$0xff] }
 0x898   : > { %4038 = vst [vmem:[#allocation2 + $0x2b8] sm:$0xff] %v8761_v51  ;;  %v8779_v51 = vld [vmem:[#allocation70_spill] sm:$0xff] }
 0x899   : > { %4039 = vst [vmem:[#allocation2 + $0x248] sm:$0xff] %v8762_v46  ;;  %v8780_v46 = vld [vmem:[#allocation71_spill] sm:$0xff] }
 0x89a   : > { %4040 = vst [vmem:[#allocation2 + $0x40] sm:$0xff] %v8763_v16  ;;  %v8781_v16 = vld [vmem:[#allocation72_spill] sm:$0xff] }
 0x89b   : > { %4041 = vst [vmem:[#allocation2 + $0x20] sm:$0xff] %v8764_v47  ;;  %v8782_v47 = vld [vmem:[#allocation73_spill] sm:$0xff] }
 0x89c   : > { %4042 = vst [vmem:[#allocation2 + $0xe8] sm:$0xff] %v8765_v28  ;;  %v8783_v28 = vld [vmem:[#allocation74_spill] sm:$0xff] }
 0x89d   : > { %4043 = vst [vmem:[#allocation2 + $0x288] sm:$0xff] %v8766_v32  ;;  %v8784_v32 = vld [vmem:[#allocation75_spill] sm:$0xff] }
 0x89e   : > { %4044 = vst [vmem:[#allocation2 + $0x3a8] sm:$0xff] %v8767_v39  ;;  %v8785_v39 = vld [vmem:[#allocation76_spill] sm:$0xff] }
 0x89f   : > { %4045 = vst [vmem:[#allocation2 + $0x3c8] sm:$0xff] %v8768_v23  ;;  %v8786_v23 = vld [vmem:[#allocation77_spill] sm:$0xff] }
 0x8a0   : > { %4046 = vst [vmem:[#allocation2 + $0x160] sm:$0xff] %v8769_v9  ;;  %v8787_v9 = vld [vmem:[#allocation78_spill] sm:$0xff] }
 0x8a1   : > { %4047 = vst [vmem:[#allocation2 + $0x2c8] sm:$0xff] %v8770_v34  ;;  %v8788_v34 = vld [vmem:[#allocation79_spill] sm:$0xff] }
 0x8a2   : > { %4048 = vst [vmem:[#allocation2 + $0x210] sm:$0xff] %v8771_v21  ;;  %v8789_v21 = vld [vmem:[#allocation80_spill] sm:$0xff] }
 0x8a3   : > { %4049 = vst [vmem:[#allocation2 + $0x3d8] sm:$0xff] %v8772_v5  ;;  %v8790_v5 = vld [vmem:[#allocation81_spill] sm:$0xff] }
 0x8a4   : > { %4050 = vst [vmem:[#allocation2 + $0x1e8] sm:$0xff] %v8773_v38  ;;  %v8791_v38 = vld [vmem:[#allocation82_spill] sm:$0xff] }
 0x8a5   : > { %4051 = vst [vmem:[#allocation2 + $0x1b0] sm:$0xff] %v8774_v25  ;;  %v8792_v25 = vld [vmem:[#allocation83_spill] sm:$0xff] }
 0x8a6   : > { %4052 = vst [vmem:[#allocation2 + $0x1c8] sm:$0xff] %v8775_v6  ;;  %v8793_v6 = vld [vmem:[#allocation84_spill] sm:$0xff] }
 0x8a7   : > { %4053 = vst [vmem:[#allocation2 + $0x2d0] sm:$0xff] %v8776_v63  ;;  %v8794_v63 = vld [vmem:[#allocation85_spill] sm:$0xff] }
 0x8a8   : > { %4054 = vst [vmem:[#allocation2 + $0x1d0] sm:$0xff] %v8777_v45  ;;  %v8795_v45 = vld [vmem:[#allocation86_spill] sm:$0xff] }
 0x8a9   : > { %4055 = vst [vmem:[#allocation2 + $0x58] sm:$0xff] %v8778_v14  ;;  %v8796_v14 = vld [vmem:[#allocation87_spill] sm:$0xff] }
 0x8aa   : > { %4056 = vst [vmem:[#allocation2 + $0x120] sm:$0xff] %v8779_v51  ;;  %v8797_v51 = vld [vmem:[#allocation88_spill] sm:$0xff] }
 0x8ab   : > { %4057 = vst [vmem:[#allocation2 + $0x198] sm:$0xff] %v8780_v46  ;;  %v8798_v46 = vld [vmem:[#allocation89_spill] sm:$0xff] }
 0x8ac   : > { %4058 = vst [vmem:[#allocation2 + $0x2e8] sm:$0xff] %v8781_v16  ;;  %v8799_v16 = vld [vmem:[#allocation90_spill] sm:$0xff] }
 0x8ad   : > { %4059 = vst [vmem:[#allocation2 + $0x1f8] sm:$0xff] %v8782_v47  ;;  %v8800_v47 = vld [vmem:[#allocation91_spill] sm:$0xff] }
 0x8ae   : > { %4060 = vst [vmem:[#allocation2 + $0x238] sm:$0xff] %v8783_v28  ;;  %v8801_v28 = vld [vmem:[#allocation92_spill] sm:$0xff] }
 0x8af   : > { %4061 = vst [vmem:[#allocation2 + $0x398] sm:$0xff] %v8784_v32  ;;  %v8802_v32 = vld [vmem:[#allocation93_spill] sm:$0xff] }
 0x8b0   : > { %4062 = vst [vmem:[#allocation2 + $0x390] sm:$0xff] %v8785_v39  ;;  %v8803_v39 = vld [vmem:[#allocation94_spill] sm:$0xff] }
 0x8b1   : > { %4063 = vst [vmem:[#allocation2 + $0x1a0] sm:$0xff] %v8786_v23  ;;  %v8804_v23 = vld [vmem:[#allocation95_spill] sm:$0xff] }
 0x8b2   : > { %4064 = vst [vmem:[#allocation2 + $0xa8] sm:$0xff] %v8787_v9  ;;  %v8805_v9 = vld [vmem:[#allocation96_spill] sm:$0xff] }
 0x8b3   : > { %4065 = vst [vmem:[#allocation2 + $0x258] sm:$0xff] %v8788_v34  ;;  %v8806_v34 = vld [vmem:[#allocation97_spill] sm:$0xff] }
 0x8b4   : > { %4066 = vst [vmem:[#allocation2 + $0x2d8] sm:$0xff] %v8789_v21 }
 0x8b5   : > { %4067 = vst [vmem:[#allocation2 + $0xf0] sm:$0xff] %v8790_v5 }
 0x8b6   : > { %4068 = vst [vmem:[#allocation2 + $0x180] sm:$0xff] %v8791_v38 }
 0x8b7   : > { %4069 = vst [vmem:[#allocation2 + $0x170] sm:$0xff] %v8792_v25 }
 0x8b8   : > { %4070 = vst [vmem:[#allocation2 + $0x3d0] sm:$0xff] %v7580_v24 }
 0x8b9   : > { %4071 = vst [vmem:[#allocation2 + $0x250] sm:$0xff] %v8793_v6 }
 0x8ba   : > { %4072 = vst [vmem:[#allocation2 + $0x378] sm:$0xff] %v8794_v63 }
 0x8bb   : > { %4073 = vst [vmem:[#allocation2 + $0xb8] sm:$0xff] %v8795_v45 }
 0x8bc   : > { %4074 = vst [vmem:[#allocation2 + $0x38] sm:$0xff] %v8796_v14 }
 0x8bd   : > { %4075 = vst [vmem:[#allocation2 + $0x78] sm:$0xff] %v8797_v51 }
 0x8be   : > { %4076 = vst [vmem:[#allocation2 + $0x308] sm:$0xff] %v8798_v46 }
 0x8bf   : > { %4077 = vst [vmem:[#allocation2 + $0x370] sm:$0xff] %v8799_v16 }
 0x8c0   : > { %4078 = vst [vmem:[#allocation2 + $0xc8] sm:$0xff] %v8800_v47 }
 0x8c1   : > { %4079 = vst [vmem:[#allocation2 + $0x278] sm:$0xff] %v8801_v28 }
 0x8c2   : > { %4080 = vst [vmem:[#allocation2 + $0x360] sm:$0xff] %v8802_v32 }
 0x8c3   : > { %4081 = vst [vmem:[#allocation2 + $0x228] sm:$0xff] %v8803_v39 }
 0x8c4   : > { %4082 = vst [vmem:[#allocation2 + $0x348] sm:$0xff] %v7604_v31 }
 0x8c5   : > { %4083 = vst [vmem:[#allocation2 + $0x148] sm:$0xff] %v7606_v57 }
 0x8c6   : > { %4084 = vst [vmem:[#allocation2 + $0xf8] sm:$0xff] %v8804_v23 }
 0x8c7   : > { %4085 = vst [vmem:[#allocation2 + $0x68] sm:$0xff] %v8805_v9 }
 0x8c8   : > { %4086 = vst [vmem:[#allocation2] sm:$0xff] %v8806_v34 }
 0x8c9   : > { %4087 = vst [vmem:[#allocation2 + $0x298] sm:$0xff] %v7614_v29 }
 0x8ca   : > { %4088 = vst [vmem:[#allocation2 + $0x270] sm:$0xff] %v7616_v43 }
 0x8cb   : > { %4089 = vst [vmem:[#allocation2 + $0x310] sm:$0xff] %v7618_v1 }
 0x8cc   : > { %4090 = vst [vmem:[#allocation2 + $0x190] sm:$0xff] %v7620_v30 }
 0x8cd PF: > { %p5941_p1 = scmp.le.s32.totalorder %s6190_s24, 0 }
 0x8cf   : > { %4094 = sbr.rel (%p5941_p1) target bundleno = 2391 (0x957), region = 72 }
 0x8d4   : > { %v4095_v21 = vld [vmem:[#allocation2 + $0x2b0] sm:$0xff]  ;;  %v4097_v38 = vld [vmem:[#allocation2 + $0xd8] sm:$0xff]  ;;  %v4100_v51 = vld [vmem:[#allocation2 + $0x368] sm:$0xff] }
 0x8d5   : > { %v4096_v5 = vld [vmem:[#allocation2 + $0x3b0] sm:$0xff]  ;;  %v4223_v25 = vmax.f32 %v4095_v21, %v7207_v33  ;;  %v4225_v63 = vmax.f32 %v4097_v38, %v7214_v3  ;;  %v4098_v45 = vld [vmem:[#allocation2 + $0x18] sm:$0xff]  ;;  %v4102_v28 = vld [vmem:[#allocation2 + $0x48] sm:$0xff]  ;;  %v4228_v32 = vmax.f32 %v4100_v51, %v7223_v12 }
 0x8d6   : > { %v4224_v6 = vmax.f32 %v4096_v5, %v7209_v60  ;;  %v4099_v14 = vld [vmem:[#allocation2 + $0x50] sm:$0xff]  ;;  %v4226_v46 = vmax.f32 %v4098_v45, %v7216_v4  ;;  %v4103_v39 = vld [vmem:[#allocation2 + $0x380] sm:$0xff]  ;;  %v4230_v3 = vmax.f32 %v4102_v28, %v7230_v11  ;;  %v4105_v23 = vld [vmem:[#allocation2 + $0x118] sm:$0xff] }
 0x8d7   : > { %v4101_v16 = vld [vmem:[#allocation2 + $0x330] sm:$0xff]  ;;  %4351 = vst [vmem:[#allocation2 + $0x2b0] sm:$0xff] %v4223_v25  ;;  %v4227_v47 = vmax.f32 %v4099_v14, %v7221_v37  ;;  %v4231_v4 = vmax.f32 %v4103_v39, %v7235_v44  ;;  %v4106_v9 = vld [vmem:[#allocation2 + $0x98] sm:$0xff]  ;;  %v4107_v34 = vld [vmem:[#allocation2 + $0x320] sm:$0xff]  ;;  %v4233_v12 = vmax.f32 %v4105_v23, %v7242_v13 }
 0x8d8   : > { %4352 = vst [vmem:[#allocation2 + $0x3b0] sm:$0xff] %v4224_v6  ;;  %v4229_v33 = vmax.f32 %v4101_v16, %v7228_v15  ;;  %v4104_v60 = vld [vmem:[#allocation2 + $0x110] sm:$0xff]  ;;  %v4234_v15 = vmax.f32 %v4106_v9, %v7244_v56  ;;  %v4109_v5 = vld [vmem:[#allocation2 + $0x108] sm:$0xff]  ;;  %v4235_v11 = vmax.f32 %v4107_v34, %v7249_v7  ;;  %v4110_v38 = vld [vmem:[#allocation2 + $0x60] sm:$0xff] }
 0x8d9   : > { %4353 = vst [vmem:[#allocation2 + $0xd8] sm:$0xff] %v4225_v63  ;;  %v4232_v37 = vmax.f32 %v4104_v60, %v7237_v55  ;;  %v4108_v21 = vld [vmem:[#allocation2 + $0x150] sm:$0xff]  ;;  %v4111_v25 = vld [vmem:[#allocation2 + $0x2e0] sm:$0xff]  ;;  %v4237_v55 = vmax.f32 %v4109_v5, %v7256_v35  ;;  %v4112_v6 = vld [vmem:[#allocation2 + $0x388] sm:$0xff]  ;;  %v4238_v13 = vmax.f32 %v4110_v38, %v7258_v40 }
 0x8da   : > { %4354 = vst [vmem:[#allocation2 + $0x18] sm:$0xff] %v4226_v46  ;;  %v4236_v44 = vmax.f32 %v4108_v21, %v7251_v58  ;;  %v4113_v63 = vld [vmem:[#allocation2 + $0x338] sm:$0xff]  ;;  %v4239_v56 = vmax.f32 %v4111_v25, %v7263_v27  ;;  %v4114_v45 = vld [vmem:[#allocation2 + $0x340] sm:$0xff]  ;;  %v4240_v7 = vmax.f32 %v4112_v6, %v7265_v54  ;;  %v4116_v51 = vld [vmem:[#allocation2 + $0x1a8] sm:$0xff] }
 0x8db   : > { %4355 = vst [vmem:[#allocation2 + $0x50] sm:$0xff] %v4227_v47  ;;  %v4115_v14 = vld [vmem:[#allocation2 + $0x80] sm:$0xff]  ;;  %v4241_v58 = vmax.f32 %v4113_v63, %v7270_v59  ;;  %v4242_v35 = vmax.f32 %v4114_v45, %v7272_v42  ;;  %v4117_v46 = vld [vmem:[#allocation2 + $0x1b8] sm:$0xff]  ;;  %v4118_v16 = vld [vmem:[#allocation2 + $0x168] sm:$0xff]  ;;  %v4244_v27 = vmax.f32 %v4116_v51, %v7279_v2 }
 0x8dc   : > { %4356 = vst [vmem:[#allocation2 + $0x368] sm:$0xff] %v4228_v32  ;;  %v4243_v40 = vmax.f32 %v4115_v14, %v7277_v18  ;;  %v4119_v47 = vld [vmem:[#allocation2 + $0x3e8] sm:$0xff]  ;;  %v4245_v54 = vmax.f32 %v4117_v46, %v7284_v0  ;;  %v4120_v28 = vld [vmem:[#allocation2 + $0x2f8] sm:$0xff]  ;;  %v4246_v59 = vmax.f32 %v4118_v16, %v7286_v41  ;;  %v4121_v32 = vld [vmem:[#allocation2 + $0x290] sm:$0xff] }
 0x8dd   : > { %4357 = vst [vmem:[#allocation2 + $0x330] sm:$0xff] %v4229_v33  ;;  %v4247_v42 = vmax.f32 %v4119_v47, %v7291_v53  ;;  %v4122_v39 = vld [vmem:[#allocation2 + $0x28] sm:$0xff]  ;;  %v4248_v18 = vmax.f32 %v4120_v28, %v7293_v48  ;;  %v4123_v33 = vld [vmem:[#allocation2 + $0x138] sm:$0xff]  ;;  %v4249_v2 = vmax.f32 %v4121_v32, %v7298_v20  ;;  %v4124_v60 = vld [vmem:[#allocation2 + $0xc0] sm:$0xff] }
 0x8de   : > { %4358 = vst [vmem:[#allocation2 + $0x48] sm:$0xff] %v4230_v3  ;;  %v4250_v0 = vmax.f32 %v4122_v39, %v7300_v50  ;;  %v4125_v3 = vld [vmem:[#allocation2 + $0x1c0] sm:$0xff]  ;;  %v4251_v41 = vmax.f32 %v4123_v33, %v7305_v19  ;;  %v4252_v53 = vmax.f32 %v4124_v60, %v7307_v8  ;;  %v4132_v21 = vld [vmem:[#allocation2 + $0x3f8] sm:$0xff]  ;;  %v4134_v5 = vld [vmem:[#allocation2 + $0x128] sm:$0xff] }
 0x8df   : > { %4359 = vst [vmem:[#allocation2 + $0x380] sm:$0xff] %v4231_v4  ;;  %v4126_v23 = vld [vmem:[#allocation2 + $0x280] sm:$0xff]  ;;  %v4253_v48 = vmax.f32 %v4125_v3, %v7312_v49  ;;  %v4136_v38 = vld [vmem:[#allocation2 + $0x3f0] sm:$0xff]  ;;  %v8813_v46 = vld [vmem:[#allocation29_spill] sm:$0xff] }
 0x8e0   : > { %4360 = vst [vmem:[#allocation2 + $0x110] sm:$0xff] %v4232_v37  ;;  %v4127_v4 = vld [vmem:[#allocation2 + $0x100] sm:$0xff]  ;;  %v4254_v20 = vmax.f32 %v4126_v23, %v7314_v62  ;;  %v4129_v37 = vld [vmem:[#allocation2 + $0x158] sm:$0xff]  ;;  %v4139_v63 = vld [vmem:[#allocation2 + $0xb0] sm:$0xff] }
 0x8e1   : > { %4361 = vst [vmem:[#allocation2 + $0x118] sm:$0xff] %v4233_v12  ;;  %v4128_v9 = vld [vmem:[#allocation2 + $0x3c0] sm:$0xff]  ;;  %v4255_v50 = vmax.f32 %v4127_v4, %v7319_v36  ;;  %v4131_v12 = vld [vmem:[#allocation2 + $0x218] sm:$0xff]  ;;  %v4257_v8 = vmax.f32 %v4129_v37, %v7326_v52  ;;  %v4260_v36 = vmax.f32 %v4132_v21, %v7335_v22  ;;  %v4141_v14 = vld [vmem:[#allocation2 + $0x1f0] sm:$0xff] }
 0x8e2   : > { %4362 = vst [vmem:[#allocation2 + $0x98] sm:$0xff] %v4234_v15  ;;  %v4130_v34 = vld [vmem:[#allocation2 + $0x3e0] sm:$0xff]  ;;  %v4256_v19 = vmax.f32 %v4128_v9, %v7321_v61  ;;  %v4133_v15 = vld [vmem:[#allocation2 + $0x8] sm:$0xff]  ;;  %v4259_v62 = vmax.f32 %v4131_v12, %v7333_v17  ;;  %v4143_v16 = vld [vmem:[#allocation2 + $0x230] sm:$0xff] }
 0x8e3   : > { %4363 = vst [vmem:[#allocation2 + $0x320] sm:$0xff] %v4235_v11  ;;  %v4258_v49 = vmax.f32 %v4130_v34, %v7328_v10  ;;  %v4135_v11 = vld [vmem:[#allocation2 + $0x2a0] sm:$0xff]  ;;  %v4261_v61 = vmax.f32 %v4133_v15, %v7340_v26  ;;  %v8815_v28 = vld [vmem:[#allocation27_spill] sm:$0xff]  ;;  %v4145_v32 = vld [vmem:[#allocation2 + $0x90] sm:$0xff] }
 0x8e4   : > { %4364 = vst [vmem:[#allocation2 + $0x150] sm:$0xff] %v4236_v44  ;;  %v8807_v44 = vld [vmem:[#allocation34_spill] sm:$0xff]  ;;  %v4137_v25 = vld [vmem:[#allocation2 + $0xa0] sm:$0xff]  ;;  %v8817_v33 = vld [vmem:[#allocation25_spill] sm:$0xff] }
 0x8e5   : > { %4365 = vst [vmem:[#allocation2 + $0x108] sm:$0xff] %v4237_v55  ;;  %v4262_v52 = vmax.f32 %v4134_v5, %v8807_v44  ;;  %v8808_v55 = vld [vmem:[#allocation32_spill] sm:$0xff]  ;;  %v4147_v60 = vld [vmem:[#allocation2 + $0x208] sm:$0xff]  ;;  %v8819_v23 = vld [vmem:[#allocation23_spill] sm:$0xff] }
 0x8e6   : > { %4366 = vst [vmem:[#allocation2 + $0x60] sm:$0xff] %v4238_v13  ;;  %v4263_v10 = vmax.f32 %v4135_v11, %v8808_v55  ;;  %v4138_v6 = vld [vmem:[#allocation2 + $0x2c0] sm:$0xff]  ;;  %v8809_v13 = vld [vmem:[#allocation33_spill] sm:$0xff]  ;;  %v4151_v34 = vld [vmem:[#allocation2 + $0x358] sm:$0xff] }
 0x8e7   : > { %4367 = vst [vmem:[#allocation2 + $0x2e0] sm:$0xff] %v4239_v56  ;;  %v4264_v17 = vmax.f32 %v4136_v38, %v8809_v13  ;;  %v8810_v56 = vld [vmem:[#allocation30_spill] sm:$0xff]  ;;  %v4140_v45 = vld [vmem:[#allocation2 + $0x1e0] sm:$0xff]  ;;  %v4149_v4 = vld [vmem:[#allocation2 + $0x88] sm:$0xff] }
 0x8e8   : > { %4368 = vst [vmem:[#allocation2 + $0x388] sm:$0xff] %v4240_v7  ;;  %v4265_v22 = vmax.f32 %v4137_v25, %v8810_v56  ;;  %v8811_v7 = vld [vmem:[#allocation31_spill] sm:$0xff]  ;;  %v8821_v37 = vld [vmem:[#allocation21_spill] sm:$0xff]  ;;  %v4153_v15 = vld [vmem:[#allocation2 + $0x350] sm:$0xff] }
 0x8e9   : > { %4369 = vst [vmem:[#allocation2 + $0x338] sm:$0xff] %v4241_v58  ;;  %v4266_v26 = vmax.f32 %v4138_v6, %v8811_v7  ;;  %v8812_v58 = vld [vmem:[#allocation28_spill] sm:$0xff]  ;;  %v8823_v21 = vld [vmem:[#allocation19_spill] sm:$0xff]  ;;  %v8825_v11 = vld [vmem:[#allocation17_spill] sm:$0xff] }
 0x8ea   : > { %4370 = vst [vmem:[#allocation2 + $0x340] sm:$0xff] %v4242_v35  ;;  %v4267_v51 = vmax.f32 %v4139_v63, %v8812_v58  ;;  %v4142_v35 = vld [vmem:[#allocation2 + $0x10] sm:$0xff]  ;;  %v4155_v38 = vld [vmem:[#allocation2 + $0x1d8] sm:$0xff]  ;;  %v8827_v55 = vld [vmem:[#allocation36_spill] sm:$0xff] }
 0x8eb   : > { %4371 = vst [vmem:[#allocation2 + $0x80] sm:$0xff] %v4243_v40  ;;  %v4268_v40 = vmax.f32 %v4140_v45, %v8813_v46  ;;  %v8826_v44 = vld [vmem:[#allocation35_spill] sm:$0xff]  ;;  %v4156_v25 = vld [vmem:[#allocation2 + $0x30] sm:$0xff]  ;;  %v4157_v6 = vld [vmem:[#allocation2 + $0x140] sm:$0xff] }
 0x8ec   : > { %4372 = vst [vmem:[#allocation2 + $0x1a8] sm:$0xff] %v4244_v27  ;;  %v8814_v27 = vld [vmem:[#allocation26_spill] sm:$0xff]  ;;  %v8828_v13 = vld [vmem:[#allocation37_spill] sm:$0xff]  ;;  %v8830_v7 = vld [vmem:[#allocation39_spill] sm:$0xff] }
 0x8ed   : > { %4373 = vst [vmem:[#allocation2 + $0x1b8] sm:$0xff] %v4245_v54  ;;  %v4269_v47 = vmax.f32 %v4141_v14, %v8814_v27  ;;  %v4144_v54 = vld [vmem:[#allocation2 + $0x240] sm:$0xff]  ;;  %v4158_v63 = vld [vmem:[#allocation2 + $0x2a8] sm:$0xff]  ;;  %v8829_v56 = vld [vmem:[#allocation38_spill] sm:$0xff] }
 0x8ee   : > { %4374 = vst [vmem:[#allocation2 + $0x168] sm:$0xff] %v4246_v59  ;;  %v4270_v59 = vmax.f32 %v4142_v35, %v8815_v28  ;;  %v4159_v45 = vld [vmem:[#allocation2 + $0x130] sm:$0xff]  ;;  %v4160_v14 = vld [vmem:[#allocation2 + $0x200] sm:$0xff]  ;;  %v4161_v35 = vld [vmem:[#allocation2 + $0x318] sm:$0xff] }
 0x8ef   : > { %4375 = vst [vmem:[#allocation2 + $0x3e8] sm:$0xff] %v4247_v42  ;;  %v8816_v42 = vld [vmem:[#allocation24_spill] sm:$0xff]  ;;  %v8832_v46 = vld [vmem:[#allocation41_spill] sm:$0xff]  ;;  %v8833_v27 = vld [vmem:[#allocation42_spill] sm:$0xff] }
 0x8f0   : > { %4376 = vst [vmem:[#allocation2 + $0x2f8] sm:$0xff] %v4248_v18  ;;  %v4271_v39 = vmax.f32 %v4143_v16, %v8816_v42  ;;  %v4146_v18 = vld [vmem:[#allocation2 + $0x3a0] sm:$0xff]  ;;  %v8834_v28 = vld [vmem:[#allocation43_spill] sm:$0xff] }
 0x8f1   : > { %4377 = vst [vmem:[#allocation2 + $0x290] sm:$0xff] %v4249_v2  ;;  %v4272_v2 = vmax.f32 %v4144_v54, %v8817_v33  ;;  %v8831_v58 = vld [vmem:[#allocation40_spill] sm:$0xff]  ;;  %v4163_v54 = vld [vmem:[#allocation2 + $0x70] sm:$0xff]  ;;  %v8836_v33 = vld [vmem:[#allocation45_spill] sm:$0xff] }
 0x8f2   : > { %4378 = vst [vmem:[#allocation2 + $0x28] sm:$0xff] %v4250_v0  ;;  %v8818_v0 = vld [vmem:[#allocation22_spill] sm:$0xff]  ;;  %v4162_v16 = vld [vmem:[#allocation2 + $0x220] sm:$0xff] }
 0x8f3   : > { %4379 = vst [vmem:[#allocation2 + $0x138] sm:$0xff] %v4251_v41  ;;  %v4273_v3 = vmax.f32 %v4145_v32, %v8818_v0  ;;  %v4148_v41 = vld [vmem:[#allocation2 + $0xd0] sm:$0xff]  ;;  %v4164_v32 = vld [vmem:[#allocation2 + $0x300] sm:$0xff] }
 0x8f4   : > { %4380 = vst [vmem:[#allocation2 + $0xc0] sm:$0xff] %v4252_v53  ;;  %v4274_v53 = vmax.f32 %v4146_v18, %v8819_v23  ;;  %v8835_v42 = vld [vmem:[#allocation44_spill] sm:$0xff]  ;;  %v8837_v0 = vld [vmem:[#allocation46_spill] sm:$0xff]  ;;  %v8838_v23 = vld [vmem:[#allocation47_spill] sm:$0xff] }
 0x8f5   : > { %4381 = vst [vmem:[#allocation2 + $0x1c0] sm:$0xff] %v4253_v48  ;;  %v8820_v48 = vld [vmem:[#allocation20_spill] sm:$0xff] }
 0x8f6   : > { %4382 = vst [vmem:[#allocation2 + $0x280] sm:$0xff] %v4254_v20  ;;  %v4275_v9 = vmax.f32 %v4147_v60, %v8820_v48  ;;  %v4150_v20 = vld [vmem:[#allocation2 + $0x2f0] sm:$0xff]  ;;  %v4165_v18 = vld [vmem:[#allocation2 + $0xe0] sm:$0xff]  ;;  %v4166_v60 = vld [vmem:[#allocation2 + $0x178] sm:$0xff] }
 0x8f7   : > { %4383 = vst [vmem:[#allocation2 + $0x100] sm:$0xff] %v4255_v50  ;;  %v4276_v50 = vmax.f32 %v4148_v41, %v8821_v37  ;;  %v4167_v41 = vld [vmem:[#allocation2 + $0x328] sm:$0xff]  ;;  %v8839_v48 = vld [vmem:[#allocation48_spill] sm:$0xff] }
 0x8f8   : > { %4384 = vst [vmem:[#allocation2 + $0x3c0] sm:$0xff] %v4256_v19  ;;  %v8822_v19 = vld [vmem:[#allocation18_spill] sm:$0xff]  ;;  %v8840_v37 = vld [vmem:[#allocation49_spill] sm:$0xff] }
 0x8f9   : > { %4385 = vst [vmem:[#allocation2 + $0x158] sm:$0xff] %v4257_v8  ;;  %v4277_v12 = vmax.f32 %v4149_v4, %v8822_v19  ;;  %v4152_v8 = vld [vmem:[#allocation2 + $0x268] sm:$0xff]  ;;  %v4168_v4 = vld [vmem:[#allocation2 + $0x260] sm:$0xff]  ;;  %v8841_v19 = vld [vmem:[#allocation50_spill] sm:$0xff] }
 0x8fa   : > { %4386 = vst [vmem:[#allocation2 + $0x3e0] sm:$0xff] %v4258_v49  ;;  %v4278_v49 = vmax.f32 %v4150_v20, %v8823_v21  ;;  %v4169_v20 = vld [vmem:[#allocation2 + $0x3b8] sm:$0xff] }
 0x8fb   : > { %4387 = vst [vmem:[#allocation2 + $0x218] sm:$0xff] %v4259_v62  ;;  %v8824_v62 = vld [vmem:[#allocation16_spill] sm:$0xff]  ;;  %v8842_v21 = vld [vmem:[#allocation51_spill] sm:$0xff] }
 0x8fc   : > { %4388 = vst [vmem:[#allocation2 + $0x3f8] sm:$0xff] %v4260_v36  ;;  %v4279_v5 = vmax.f32 %v4151_v34, %v8824_v62  ;;  %v4154_v36 = vld [vmem:[#allocation2 + $0x188] sm:$0xff]  ;;  %v4170_v34 = vld [vmem:[#allocation2 + $0x2b8] sm:$0xff]  ;;  %v8843_v62 = vld [vmem:[#allocation52_spill] sm:$0xff] }
 0x8fd   : > { %4389 = vst [vmem:[#allocation2 + $0x8] sm:$0xff] %v4261_v61  ;;  %v4280_v61 = vmax.f32 %v4152_v8, %v8825_v11  ;;  %v4171_v8 = vld [vmem:[#allocation2 + $0x248] sm:$0xff] }
 0x8fe   : > { %4390 = vst [vmem:[#allocation2 + $0x128] sm:$0xff] %v4262_v52  ;;  %v4281_v52 = vmax.f32 %v4153_v15, %v8826_v44  ;;  %v4172_v15 = vld [vmem:[#allocation2 + $0x40] sm:$0xff]  ;;  %v8844_v11 = vld [vmem:[#allocation53_spill] sm:$0xff]  ;;  %v8845_v44 = vld [vmem:[#allocation54_spill] sm:$0xff] }
 0x8ff   : > { %4391 = vst [vmem:[#allocation2 + $0x2a0] sm:$0xff] %v4263_v10  ;;  %v4282_v10 = vmax.f32 %v4154_v36, %v8827_v55  ;;  %v4173_v36 = vld [vmem:[#allocation2 + $0x20] sm:$0xff]  ;;  %v8846_v55 = vld [vmem:[#allocation55_spill] sm:$0xff] }
 0x900   : > { %4392 = vst [vmem:[#allocation2 + $0x3f0] sm:$0xff] %v4264_v17  ;;  %v4283_v17 = vmax.f32 %v4155_v38, %v8828_v13  ;;  %v4174_v38 = vld [vmem:[#allocation2 + $0xe8] sm:$0xff]  ;;  %v8847_v13 = vld [vmem:[#allocation56_spill] sm:$0xff] }
 0x901   : > { %4393 = vst [vmem:[#allocation2 + $0xa0] sm:$0xff] %v4265_v22  ;;  %v4284_v22 = vmax.f32 %v4156_v25, %v8829_v56  ;;  %v4175_v25 = vld [vmem:[#allocation2 + $0x288] sm:$0xff] }
 0x902   : > { %4394 = vst [vmem:[#allocation2 + $0x2c0] sm:$0xff] %v4266_v26  ;;  %v4285_v26 = vmax.f32 %v4157_v6, %v8830_v7  ;;  %v4176_v6 = vld [vmem:[#allocation2 + $0x3a8] sm:$0xff]  ;;  %v8849_v7 = vld [vmem:[#allocation58_spill] sm:$0xff] }
 0x903   : > { %4395 = vst [vmem:[#allocation2 + $0xb0] sm:$0xff] %v4267_v51  ;;  %v4286_v51 = vmax.f32 %v4158_v63, %v8831_v58  ;;  %v4177_v63 = vld [vmem:[#allocation2 + $0x3c8] sm:$0xff]  ;;  %v8850_v58 = vld [vmem:[#allocation59_spill] sm:$0xff] }
 0x904   : > { %4396 = vst [vmem:[#allocation2 + $0x1e0] sm:$0xff] %v4268_v40  ;;  %v4287_v40 = vmax.f32 %v4159_v45, %v8832_v46  ;;  %v8848_v56 = vld [vmem:[#allocation57_spill] sm:$0xff]  ;;  %v4178_v45 = vld [vmem:[#allocation2 + $0x160] sm:$0xff] }
 0x905   : > { %4397 = vst [vmem:[#allocation2 + $0x1f0] sm:$0xff] %v4269_v47  ;;  %v4288_v47 = vmax.f32 %v4160_v14, %v8833_v27  ;;  %v4179_v14 = vld [vmem:[#allocation2 + $0x2c8] sm:$0xff]  ;;  %v8851_v46 = vld [vmem:[#allocation60_spill] sm:$0xff] }
 0x906   : > { %4398 = vst [vmem:[#allocation2 + $0x10] sm:$0xff] %v4270_v59  ;;  %v4289_v59 = vmax.f32 %v4161_v35, %v8834_v28  ;;  %v4180_v35 = vld [vmem:[#allocation2 + $0x210] sm:$0xff]  ;;  %v8852_v27 = vld [vmem:[#allocation61_spill] sm:$0xff] }
 0x907   : > { %4399 = vst [vmem:[#allocation2 + $0x230] sm:$0xff] %v4271_v39  ;;  %v4290_v39 = vmax.f32 %v4162_v16, %v8835_v42  ;;  %v4181_v16 = vld [vmem:[#allocation2 + $0x3d8] sm:$0xff]  ;;  %v8853_v28 = vld [vmem:[#allocation62_spill] sm:$0xff] }
 0x908   : > { %4400 = vst [vmem:[#allocation2 + $0x240] sm:$0xff] %v4272_v2  ;;  %v4291_v2 = vmax.f32 %v4163_v54, %v8836_v33  ;;  %v4182_v54 = vld [vmem:[#allocation2 + $0x1e8] sm:$0xff]  ;;  %v8854_v42 = vld [vmem:[#allocation63_spill] sm:$0xff]  ;;  %v8855_v33 = vld [vmem:[#allocation64_spill] sm:$0xff] }
 0x909   : > { %4401 = vst [vmem:[#allocation2 + $0x90] sm:$0xff] %v4273_v3  ;;  %v4292_v3 = vmax.f32 %v4164_v32, %v8837_v0  ;;  %v4183_v32 = vld [vmem:[#allocation2 + $0x1b0] sm:$0xff]  ;;  %v8856_v0 = vld [vmem:[#allocation65_spill] sm:$0xff] }
 0x90a   : > { %4402 = vst [vmem:[#allocation2 + $0x3a0] sm:$0xff] %v4274_v53  ;;  %v4293_v53 = vmax.f32 %v4165_v18, %v8838_v23  ;;  %v4184_v18 = vld [vmem:[#allocation2 + $0x1c8] sm:$0xff]  ;;  %v8857_v23 = vld [vmem:[#allocation66_spill] sm:$0xff] }
 0x90b   : > { %4403 = vst [vmem:[#allocation2 + $0x208] sm:$0xff] %v4275_v9  ;;  %v4294_v9 = vmax.f32 %v4166_v60, %v8839_v48  ;;  %v4185_v60 = vld [vmem:[#allocation2 + $0x2d0] sm:$0xff]  ;;  %v8858_v48 = vld [vmem:[#allocation67_spill] sm:$0xff] }
 0x90c   : > { %4404 = vst [vmem:[#allocation2 + $0xd0] sm:$0xff] %v4276_v50  ;;  %v4295_v50 = vmax.f32 %v4167_v41, %v8840_v37  ;;  %v4186_v41 = vld [vmem:[#allocation2 + $0x1d0] sm:$0xff]  ;;  %v8859_v37 = vld [vmem:[#allocation68_spill] sm:$0xff] }
 0x90d   : > { %4405 = vst [vmem:[#allocation2 + $0x88] sm:$0xff] %v4277_v12  ;;  %v4296_v12 = vmax.f32 %v4168_v4, %v8841_v19  ;;  %v4187_v4 = vld [vmem:[#allocation2 + $0x58] sm:$0xff]  ;;  %v8860_v19 = vld [vmem:[#allocation69_spill] sm:$0xff] }
 0x90e   : > { %4406 = vst [vmem:[#allocation2 + $0x2f0] sm:$0xff] %v4278_v49  ;;  %v4297_v49 = vmax.f32 %v4169_v20, %v8842_v21  ;;  %v4188_v20 = vld [vmem:[#allocation2 + $0x120] sm:$0xff]  ;;  %v8861_v21 = vld [vmem:[#allocation70_spill] sm:$0xff] }
 0x90f   : > { %4407 = vst [vmem:[#allocation2 + $0x358] sm:$0xff] %v4279_v5  ;;  %v4298_v5 = vmax.f32 %v4170_v34, %v8843_v62  ;;  %v4189_v34 = vld [vmem:[#allocation2 + $0x198] sm:$0xff] }
 0x910   : > { %4408 = vst [vmem:[#allocation2 + $0x268] sm:$0xff] %v4280_v61  ;;  %v4299_v61 = vmax.f32 %v4171_v8, %v8844_v11  ;;  %v4190_v8 = vld [vmem:[#allocation2 + $0x2e8] sm:$0xff]  ;;  %v8862_v62 = vld [vmem:[#allocation71_spill] sm:$0xff]  ;;  %v8863_v11 = vld [vmem:[#allocation72_spill] sm:$0xff] }
 0x911   : > { %4409 = vst [vmem:[#allocation2 + $0x350] sm:$0xff] %v4281_v52  ;;  %v4300_v52 = vmax.f32 %v4172_v15, %v8845_v44  ;;  %v4191_v15 = vld [vmem:[#allocation2 + $0x1f8] sm:$0xff]  ;;  %v8864_v44 = vld [vmem:[#allocation73_spill] sm:$0xff] }
 0x912   : > { %4410 = vst [vmem:[#allocation2 + $0x188] sm:$0xff] %v4282_v10  ;;  %v4301_v10 = vmax.f32 %v4173_v36, %v8846_v55  ;;  %v4192_v36 = vld [vmem:[#allocation2 + $0x238] sm:$0xff]  ;;  %v8865_v55 = vld [vmem:[#allocation74_spill] sm:$0xff] }
 0x913   : > { %4411 = vst [vmem:[#allocation2 + $0x1d8] sm:$0xff] %v4283_v17  ;;  %v4302_v17 = vmax.f32 %v4174_v38, %v8847_v13  ;;  %v4193_v38 = vld [vmem:[#allocation2 + $0x398] sm:$0xff] }
 0x914   : > { %4412 = vst [vmem:[#allocation2 + $0x30] sm:$0xff] %v4284_v22  ;;  %v4303_v22 = vmax.f32 %v4175_v25, %v8848_v56  ;;  %v4194_v25 = vld [vmem:[#allocation2 + $0x390] sm:$0xff]  ;;  %v8866_v13 = vld [vmem:[#allocation75_spill] sm:$0xff]  ;;  %v8867_v56 = vld [vmem:[#allocation76_spill] sm:$0xff] }
 0x915   : > { %4413 = vst [vmem:[#allocation2 + $0x140] sm:$0xff] %v4285_v26  ;;  %v4304_v26 = vmax.f32 %v4176_v6, %v8849_v7  ;;  %v4195_v6 = vld [vmem:[#allocation2 + $0x1a0] sm:$0xff]  ;;  %v8868_v7 = vld [vmem:[#allocation77_spill] sm:$0xff] }
 0x916   : > { %4414 = vst [vmem:[#allocation2 + $0x2a8] sm:$0xff] %v4286_v51  ;;  %v4305_v51 = vmax.f32 %v4177_v63, %v8850_v58  ;;  %v4196_v63 = vld [vmem:[#allocation2 + $0xa8] sm:$0xff]  ;;  %v8869_v58 = vld [vmem:[#allocation78_spill] sm:$0xff] }
 0x917   : > { %4415 = vst [vmem:[#allocation2 + $0x130] sm:$0xff] %v4287_v40  ;;  %v4306_v40 = vmax.f32 %v4178_v45, %v8851_v46  ;;  %v4197_v45 = vld [vmem:[#allocation2 + $0x258] sm:$0xff] }
 0x918   : > { %4416 = vst [vmem:[#allocation2 + $0x200] sm:$0xff] %v4288_v47  ;;  %v4307_v47 = vmax.f32 %v4179_v14, %v8852_v27  ;;  %v4198_v14 = vld [vmem:[#allocation2 + $0x2d8] sm:$0xff]  ;;  %v8871_v27 = vld [vmem:[#allocation80_spill] sm:$0xff] }
 0x919   : > { %4417 = vst [vmem:[#allocation2 + $0x318] sm:$0xff] %v4289_v59  ;;  %v4308_v59 = vmax.f32 %v4180_v35, %v8853_v28  ;;  %v4199_v35 = vld [vmem:[#allocation2 + $0xf0] sm:$0xff]  ;;  %v8870_v46 = vld [vmem:[#allocation79_spill] sm:$0xff]  ;;  %v8872_v28 = vld [vmem:[#allocation81_spill] sm:$0xff] }
 0x91a   : > { %4418 = vst [vmem:[#allocation2 + $0x220] sm:$0xff] %v4290_v39  ;;  %v4309_v39 = vmax.f32 %v4181_v16, %v8854_v42  ;;  %v4200_v16 = vld [vmem:[#allocation2 + $0x180] sm:$0xff]  ;;  %v8873_v42 = vld [vmem:[#allocation82_spill] sm:$0xff] }
 0x91b   : > { %4419 = vst [vmem:[#allocation2 + $0x70] sm:$0xff] %v4291_v2  ;;  %v4310_v2 = vmax.f32 %v4182_v54, %v8855_v33  ;;  %v4201_v54 = vld [vmem:[#allocation2 + $0x170] sm:$0xff]  ;;  %v8874_v33 = vld [vmem:[#allocation83_spill] sm:$0xff] }
 0x91c   : > { %4420 = vst [vmem:[#allocation2 + $0x300] sm:$0xff] %v4292_v3  ;;  %v4311_v3 = vmax.f32 %v4183_v32, %v8856_v0  ;;  %v4202_v32 = vld [vmem:[#allocation2 + $0x3d0] sm:$0xff] }
 0x91d   : > { %4421 = vst [vmem:[#allocation2 + $0xe0] sm:$0xff] %v4293_v53  ;;  %v4312_v53 = vmax.f32 %v4184_v18, %v8857_v23  ;;  %v4203_v18 = vld [vmem:[#allocation2 + $0x250] sm:$0xff]  ;;  %v4330_v0 = vmax.f32 %v4202_v32, %v7580_v24 }
 0x91e   : > { %4422 = vst [vmem:[#allocation2 + $0x178] sm:$0xff] %v4294_v9  ;;  %v4313_v9 = vmax.f32 %v4185_v60, %v8858_v48  ;;  %v4204_v60 = vld [vmem:[#allocation2 + $0x378] sm:$0xff] }
 0x91f   : > { %4423 = vst [vmem:[#allocation2 + $0x328] sm:$0xff] %v4295_v50  ;;  %v4314_v50 = vmax.f32 %v4186_v41, %v8859_v37  ;;  %v8875_v41 = vld [vmem:[#allocation84_spill] sm:$0xff] }
 0x920   : > { %4424 = vst [vmem:[#allocation2 + $0x260] sm:$0xff] %v4296_v12  ;;  %v4315_v12 = vmax.f32 %v4187_v4, %v8860_v19  ;;  %v4331_v23 = vmax.f32 %v4203_v18, %v8875_v41  ;;  %v8876_v4 = vld [vmem:[#allocation85_spill] sm:$0xff] }
 0x921   : > { %4425 = vst [vmem:[#allocation2 + $0x3b8] sm:$0xff] %v4297_v49  ;;  %v4316_v49 = vmax.f32 %v4188_v20, %v8861_v21  ;;  %v4332_v48 = vmax.f32 %v4204_v60, %v8876_v4  ;;  %v8877_v20 = vld [vmem:[#allocation86_spill] sm:$0xff]  ;;  %v4210_v21 = vld [vmem:[#allocation2 + $0xc8] sm:$0xff] }
 0x922   : > { %4426 = vst [vmem:[#allocation2 + $0x2b8] sm:$0xff] %v4298_v5  ;;  %v4317_v5 = vmax.f32 %v4189_v34, %v8862_v62  ;;  %v8878_v34 = vld [vmem:[#allocation87_spill] sm:$0xff] }
 0x923   : > { %4427 = vst [vmem:[#allocation2 + $0x248] sm:$0xff] %v4299_v61  ;;  %v4318_v61 = vmax.f32 %v4190_v8, %v8863_v11  ;;  %v8879_v8 = vld [vmem:[#allocation88_spill] sm:$0xff]  ;;  %v4211_v62 = vld [vmem:[#allocation2 + $0x278] sm:$0xff] }
 0x924   : > { %4428 = vst [vmem:[#allocation2 + $0x40] sm:$0xff] %v4300_v52  ;;  %v4319_v52 = vmax.f32 %v4191_v15, %v8864_v44  ;;  %v4212_v11 = vld [vmem:[#allocation2 + $0x360] sm:$0xff]  ;;  %v4213_v44 = vld [vmem:[#allocation2 + $0x228] sm:$0xff] }
 0x925   : > { %4429 = vst [vmem:[#allocation2 + $0x20] sm:$0xff] %v4301_v10  ;;  %v4320_v10 = vmax.f32 %v4192_v36, %v8865_v55  ;;  %v4214_v55 = vld [vmem:[#allocation2 + $0x348] sm:$0xff] }
 0x926   : > { %4430 = vst [vmem:[#allocation2 + $0xe8] sm:$0xff] %v4302_v17  ;;  %v4321_v17 = vmax.f32 %v4193_v38, %v8866_v13  ;;  %v4215_v13 = vld [vmem:[#allocation2 + $0x148] sm:$0xff] }
 0x927   : > { %4431 = vst [vmem:[#allocation2 + $0x288] sm:$0xff] %v4303_v22  ;;  %v4322_v22 = vmax.f32 %v4194_v25, %v8867_v56  ;;  %v4216_v56 = vld [vmem:[#allocation2 + $0xf8] sm:$0xff] }
 0x928   : > { %4432 = vst [vmem:[#allocation2 + $0x3a8] sm:$0xff] %v4304_v26  ;;  %v4323_v26 = vmax.f32 %v4195_v6, %v8868_v7  ;;  %v4343_v7 = vmax.f32 %v4215_v13, %v7606_v57 }
 0x929   : > { %4433 = vst [vmem:[#allocation2 + $0x3c8] sm:$0xff] %v4305_v51  ;;  %v4324_v51 = vmax.f32 %v4196_v63, %v8869_v58 }
 0x92a   : > { %4434 = vst [vmem:[#allocation2 + $0x160] sm:$0xff] %v4306_v40  ;;  %v4325_v40 = vmax.f32 %v4197_v45, %v8870_v46  ;;  %v4217_v45 = vld [vmem:[#allocation2 + $0x68] sm:$0xff] }
 0x92b   : > { %4435 = vst [vmem:[#allocation2 + $0x2c8] sm:$0xff] %v4307_v47  ;;  %v4326_v47 = vmax.f32 %v4198_v14, %v8871_v27  ;;  %v8886_v14 = vld [vmem:[#allocation95_spill] sm:$0xff] }
 0x92c   : > { %4436 = vst [vmem:[#allocation2 + $0x210] sm:$0xff] %v4308_v59  ;;  %v4327_v59 = vmax.f32 %v4199_v35, %v8872_v28  ;;  %v4344_v58 = vmax.f32 %v4216_v56, %v8886_v14  ;;  %v8887_v35 = vld [vmem:[#allocation96_spill] sm:$0xff] }
 0x92d   : > { %4437 = vst [vmem:[#allocation2 + $0x3d8] sm:$0xff] %v4309_v39  ;;  %v4328_v39 = vmax.f32 %v4200_v16, %v8873_v42  ;;  %v4345_v46 = vmax.f32 %v4217_v45, %v8887_v35  ;;  %v8888_v16 = vld [vmem:[#allocation97_spill] sm:$0xff] }
 0x92e   : > { %4438 = vst [vmem:[#allocation2 + $0x1e8] sm:$0xff] %v4310_v2  ;;  %v4329_v2 = vmax.f32 %v4201_v54, %v8874_v33  ;;  %v4222_v54 = vld [vmem:[#allocation2 + $0x190] sm:$0xff] }
 0x92f   : > { %4439 = vst [vmem:[#allocation2 + $0x1b0] sm:$0xff] %v4311_v3  ;;  %v4205_v3 = vld [vmem:[#allocation2 + $0xb8] sm:$0xff] }
 0x930   : > { %4440 = vst [vmem:[#allocation2 + $0x1c8] sm:$0xff] %v4312_v53  ;;  %v4206_v53 = vld [vmem:[#allocation2 + $0x38] sm:$0xff]  ;;  %v4333_v37 = vmax.f32 %v4205_v3, %v8877_v20 }
 0x931   : > { %4441 = vst [vmem:[#allocation2 + $0x2d0] sm:$0xff] %v4313_v9  ;;  %v4207_v9 = vld [vmem:[#allocation2 + $0x78] sm:$0xff]  ;;  %v4334_v19 = vmax.f32 %v4206_v53, %v8878_v34 }
 0x932   : > { %4442 = vst [vmem:[#allocation2 + $0x1d0] sm:$0xff] %v4314_v50  ;;  %v4208_v50 = vld [vmem:[#allocation2 + $0x308] sm:$0xff]  ;;  %v4335_v24 = vmax.f32 %v4207_v9, %v8879_v8 }
 0x933   : > { %4443 = vst [vmem:[#allocation2 + $0x58] sm:$0xff] %v4315_v12  ;;  %v4209_v12 = vld [vmem:[#allocation2 + $0x370] sm:$0xff] }
 0x934   : > { %4444 = vst [vmem:[#allocation2 + $0x120] sm:$0xff] %v4316_v49  ;;  %v8880_v49 = vld [vmem:[#allocation89_spill] sm:$0xff] }
 0x935   : > { %4445 = vst [vmem:[#allocation2 + $0x198] sm:$0xff] %v4317_v5  ;;  %v4336_v15 = vmax.f32 %v4208_v50, %v8880_v49  ;;  %v8881_v5 = vld [vmem:[#allocation90_spill] sm:$0xff] }
 0x936   : > { %4446 = vst [vmem:[#allocation2 + $0x2e8] sm:$0xff] %v4318_v61  ;;  %v4337_v36 = vmax.f32 %v4209_v12, %v8881_v5  ;;  %v8882_v61 = vld [vmem:[#allocation91_spill] sm:$0xff] }
 0x937   : > { %4447 = vst [vmem:[#allocation2 + $0x1f8] sm:$0xff] %v4319_v52  ;;  %v4338_v38 = vmax.f32 %v4210_v21, %v8882_v61  ;;  %v8883_v52 = vld [vmem:[#allocation92_spill] sm:$0xff] }
 0x938   : > { %4448 = vst [vmem:[#allocation2 + $0x238] sm:$0xff] %v4320_v10  ;;  %v4339_v25 = vmax.f32 %v4211_v62, %v8883_v52  ;;  %v8884_v10 = vld [vmem:[#allocation93_spill] sm:$0xff] }
 0x939   : > { %4449 = vst [vmem:[#allocation2 + $0x398] sm:$0xff] %v4321_v17  ;;  %v4340_v6 = vmax.f32 %v4212_v11, %v8884_v10  ;;  %v8885_v17 = vld [vmem:[#allocation94_spill] sm:$0xff] }
 0x93a   : > { %4450 = vst [vmem:[#allocation2 + $0x390] sm:$0xff] %v4322_v22  ;;  %v4341_v63 = vmax.f32 %v4213_v44, %v8885_v17  ;;  %v4342_v22 = vmax.f32 %v4214_v55, %v7604_v31 }
 0x93b   : > { %4451 = vst [vmem:[#allocation2 + $0x1a0] sm:$0xff] %v4323_v26  ;;  %v4218_v26 = vld [vmem:[#allocation2] sm:$0xff] }
 0x93c   : > { %4452 = vst [vmem:[#allocation2 + $0xa8] sm:$0xff] %v4324_v51  ;;  %v4219_v51 = vld [vmem:[#allocation2 + $0x298] sm:$0xff]  ;;  %v4346_v27 = vmax.f32 %v4218_v26, %v8888_v16 }
 0x93d   : > { %4453 = vst [vmem:[#allocation2 + $0x258] sm:$0xff] %v4325_v40  ;;  %v4220_v40 = vld [vmem:[#allocation2 + $0x270] sm:$0xff]  ;;  %v4347_v31 = vmax.f32 %v4219_v51, %v7614_v29 }
 0x93e   : > { %4454 = vst [vmem:[#allocation2 + $0x2d8] sm:$0xff] %v4326_v47  ;;  %v4221_v47 = vld [vmem:[#allocation2 + $0x310] sm:$0xff]  ;;  %v4348_v57 = vmax.f32 %v4220_v40, %v7616_v43 }
 0x93f   : > { %4455 = vst [vmem:[#allocation2 + $0xf0] sm:$0xff] %v4327_v59  ;;  %v4349_v28 = vmax.f32 %v4221_v47, %v7618_v1  ;;  %v4350_v59 = vmax.f32 %v4222_v54, %v7620_v30 }
 0x940   : > { %4456 = vst [vmem:[#allocation2 + $0x180] sm:$0xff] %v4328_v39 }
 0x941   : > { %4457 = vst [vmem:[#allocation2 + $0x170] sm:$0xff] %v4329_v2 }
 0x942   : > { %4458 = vst [vmem:[#allocation2 + $0x3d0] sm:$0xff] %v4330_v0 }
 0x943   : > { %4459 = vst [vmem:[#allocation2 + $0x250] sm:$0xff] %v4331_v23 }
 0x944   : > { %4460 = vst [vmem:[#allocation2 + $0x378] sm:$0xff] %v4332_v48 }
 0x945   : > { %4461 = vst [vmem:[#allocation2 + $0xb8] sm:$0xff] %v4333_v37 }
 0x946   : > { %4462 = vst [vmem:[#allocation2 + $0x38] sm:$0xff] %v4334_v19 }
 0x947   : > { %4463 = vst [vmem:[#allocation2 + $0x78] sm:$0xff] %v4335_v24 }
 0x948   : > { %4464 = vst [vmem:[#allocation2 + $0x308] sm:$0xff] %v4336_v15 }
 0x949   : > { %4465 = vst [vmem:[#allocation2 + $0x370] sm:$0xff] %v4337_v36 }
 0x94a   : > { %4466 = vst [vmem:[#allocation2 + $0xc8] sm:$0xff] %v4338_v38 }
 0x94b   : > { %4467 = vst [vmem:[#allocation2 + $0x278] sm:$0xff] %v4339_v25 }
 0x94c   : > { %4468 = vst [vmem:[#allocation2 + $0x360] sm:$0xff] %v4340_v6 }
 0x94d   : > { %4469 = vst [vmem:[#allocation2 + $0x228] sm:$0xff] %v4341_v63 }
 0x94e   : > { %4470 = vst [vmem:[#allocation2 + $0x348] sm:$0xff] %v4342_v22 }
 0x94f   : > { %4471 = vst [vmem:[#allocation2 + $0x148] sm:$0xff] %v4343_v7 }
 0x950   : > { %4472 = vst [vmem:[#allocation2 + $0xf8] sm:$0xff] %v4344_v58 }
 0x951   : > { %4473 = vst [vmem:[#allocation2 + $0x68] sm:$0xff] %v4345_v46 }
 0x952   : > { %4474 = vst [vmem:[#allocation2] sm:$0xff] %v4346_v27 }
 0x953   : > { %4475 = vst [vmem:[#allocation2 + $0x298] sm:$0xff] %v4347_v31 }
 0x954   : > { %4476 = vst [vmem:[#allocation2 + $0x270] sm:$0xff] %v4348_v57 }
 0x955   : > { %4477 = vst [vmem:[#allocation2 + $0x310] sm:$0xff] %v4349_v28 }
 0x956   : > { %4478 = vst [vmem:[#allocation2 + $0x190] sm:$0xff] %v4350_v59 }
 0x957 PF: > { %p5942_p2 = scmp.ne.s32.totalorder %s6190_s24, 1 }
 0x959   : > { %4482 = sbr.rel (%p5942_p2) target bundleno = 2857 (0xb29), region = 76 }
 0x95e   : > { %v4485_v32 = vld [vmem:[#allocation2 + $0xd8] sm:$0xff]  ;;  %v4483_v29 = vld [vmem:[#allocation2 + $0x2b0] sm:$0xff]  ;;  %v4488_v1 = vld [vmem:[#allocation2 + $0x368] sm:$0xff]  ;;  %vm5251_vm3 = vcmask 7168  }
 0x95f   : > { %v4487_v42 = vld [vmem:[#allocation2 + $0x50] sm:$0xff]  ;;  %4615 = vmax.xlane.f32.xlu1 %v4485_v32  ;;  %4611 = vmax.xlane.f32.xlu0 %v4483_v29  ;;  %v4486_v43 = vld [vmem:[#allocation2 + $0x18] sm:$0xff]  ;;  %v4490_v30 = vld [vmem:[#allocation2 + $0x48] sm:$0xff] }
 0x960   : > { %4619 = vmax.xlane.f32.xlu2 %v4487_v42  ;;  %v4484_v39 = vld [vmem:[#allocation2 + $0x3b0] sm:$0xff]  ;;  %v4491_v33 = vld [vmem:[#allocation2 + $0x380] sm:$0xff]  ;;  %v4493_v2 = vld [vmem:[#allocation2 + $0x118] sm:$0xff] }
 0x961   : > { %v4489_v18 = vld [vmem:[#allocation2 + $0x330] sm:$0xff]  ;;  %v4494_v0 = vld [vmem:[#allocation2 + $0x98] sm:$0xff]  ;;  %v4495_v41 = vld [vmem:[#allocation2 + $0x320] sm:$0xff] }
 0x962   : > { %v4492_v60 = vld [vmem:[#allocation2 + $0x110] sm:$0xff]  ;;  %v4497_v23 = vld [vmem:[#allocation2 + $0x108] sm:$0xff]  ;;  %v4499_v53 = vld [vmem:[#allocation2 + $0x2e0] sm:$0xff] }
 0x963   : > { %v4496_v3 = vld [vmem:[#allocation2 + $0x150] sm:$0xff]  ;;  %v4498_v4 = vld [vmem:[#allocation2 + $0x60] sm:$0xff]  ;;  %v4500_v48 = vld [vmem:[#allocation2 + $0x388] sm:$0xff] }
 0x964   : > { %v4502_v9 = vld [vmem:[#allocation2 + $0x340] sm:$0xff]  ;;  %v4501_v20 = vld [vmem:[#allocation2 + $0x338] sm:$0xff]  ;;  %v4504_v34 = vld [vmem:[#allocation2 + $0x1a8] sm:$0xff] }
 0x965   : > { %v4503_v37 = vld [vmem:[#allocation2 + $0x80] sm:$0xff]  ;;  %v4505_v50 = vld [vmem:[#allocation2 + $0x1b8] sm:$0xff]  ;;  %v4506_v19 = vld [vmem:[#allocation2 + $0x168] sm:$0xff] }
 0x966   : > { %v4508_v12 = vld [vmem:[#allocation2 + $0x2f8] sm:$0xff]  ;;  %v4507_v8 = vld [vmem:[#allocation2 + $0x3e8] sm:$0xff]  ;;  %v4509_v24 = vld [vmem:[#allocation2 + $0x290] sm:$0xff] }
 0x967   : > { %4617 = vmax.xlane.f32.xlu1 %v4486_v43  ;;  %4613 = vmax.xlane.f32.xlu0 %v4484_v39  ;;  %v4511_v21 = vld [vmem:[#allocation2 + $0x138] sm:$0xff]  ;;  %v4510_v49 = vld [vmem:[#allocation2 + $0x28] sm:$0xff]  ;;  %v4512_v15 = vld [vmem:[#allocation2 + $0xc0] sm:$0xff] }
 0x968   : > { %4621 = vmax.xlane.f32.xlu2 %v4488_v1  ;;  %v4514_v62 = vld [vmem:[#allocation2 + $0x280] sm:$0xff]  ;;  %v4517_v11 = vld [vmem:[#allocation2 + $0x158] sm:$0xff]  ;;  %v4521_v25 = vld [vmem:[#allocation2 + $0x8] sm:$0xff] }
 0x969   : > { %v4513_v5 = vld [vmem:[#allocation2 + $0x1c0] sm:$0xff]  ;;  %v4520_v44 = vld [vmem:[#allocation2 + $0x3f8] sm:$0xff]  ;;  %v4522_v10 = vld [vmem:[#allocation2 + $0x128] sm:$0xff] }
 0x96a   : > { %v4515_v36 = vld [vmem:[#allocation2 + $0x100] sm:$0xff]  ;;  %v4519_v52 = vld [vmem:[#allocation2 + $0x218] sm:$0xff]  ;;  %v4524_v6 = vld [vmem:[#allocation2 + $0x3f0] sm:$0xff] }
 0x96b   : > { %v4516_v61 = vld [vmem:[#allocation2 + $0x3c0] sm:$0xff]  ;;  %v4527_v63 = vld [vmem:[#allocation2 + $0xb0] sm:$0xff]  ;;  %v4869_v56 = vld [vmem:[%s8577_s10 + $0x10] sm:$0xff] }
 0x96c   : > { %v4518_v38 = vld [vmem:[#allocation2 + $0x3e0] sm:$0xff]  ;;  %v4867_v22 = vld [vmem:[%s8577_s10] sm:$0xff]  ;;  %v4529_v35 = vld [vmem:[#allocation2 + $0x1f0] sm:$0xff] }
 0x96d   : > { %v4523_v55 = vld [vmem:[#allocation2 + $0x2a0] sm:$0xff]  ;;  %v4871_v45 = vld [vmem:[%s8577_s10 + $0x20] sm:$0xff]  ;;  %v4530_v47 = vld [vmem:[#allocation2 + $0x10] sm:$0xff] }
 0x96e   : > { %v4526_v13 = vld [vmem:[#allocation2 + $0x2c0] sm:$0xff]  ;;  %v4870_v54 = vld [vmem:[%s8577_s10 + $0x18] sm:$0xff] }
 0x96f   : > { %4625 = vmax.xlane.f32.xlu1 %v4490_v30  ;;  %4623 = vmax.xlane.f32.xlu0 %v4489_v18  ;;  %v4525_v17 = vld [vmem:[#allocation2 + $0xa0] sm:$0xff]  ;;  %v4531_v1 = vld [vmem:[#allocation2 + $0x230] sm:$0xff] }
 0x970   : > { %4627 = vmax.xlane.f32.xlu2 %v4491_v33  ;;  %v4528_v46 = vld [vmem:[#allocation2 + $0x1e0] sm:$0xff] }
 0x971   : > { %v4868_v57 = vld [vmem:[%s8577_s10 + $0x8] sm:$0xff] }
 0x972   : > { %v4872_v28 = vld [vmem:[%s8577_s10 + $0x28] sm:$0xff] }
 0x973   : > { %v4532_v39 = vld [vmem:[#allocation2 + $0x240] sm:$0xff] }
 0x977   : > { %4631 = vmax.xlane.f32.xlu1 %v4493_v2  ;;  %4629 = vmax.xlane.f32.xlu0 %v4492_v60  ;;  %v4533_v2 = vld [vmem:[#allocation2 + $0x90] sm:$0xff] }
 0x978   : > { %4633 = vmax.xlane.f32.xlu2 %v4494_v0  ;;  %v4874_v0 = vld [vmem:[%s8577_s10 + $0x38] sm:$0xff] }
 0x97f   : > { %4637 = vmax.xlane.f32.xlu1 %v4496_v3  ;;  %4635 = vmax.xlane.f32.xlu0 %v4495_v41  ;;  %v4873_v3 = vld [vmem:[%s8577_s10 + $0x30] sm:$0xff]  ;;  %v4875_v41 = vld [vmem:[%s8577_s10 + $0x40] sm:$0xff] }
 0x980   : > { %4639 = vmax.xlane.f32.xlu2 %v4497_v23 }
 0x987   : > { %4643 = vmax.xlane.f32.xlu1 %v4499_v53  ;;  %4641 = vmax.xlane.f32.xlu0 %v4498_v4 }
 0x988   : > { %4645 = vmax.xlane.f32.xlu2 %v4500_v48 }
 0x98f   : > { %4649 = vmax.xlane.f32.xlu1 %v4502_v9  ;;  %4647 = vmax.xlane.f32.xlu0 %v4501_v20  ;;  %v4535_v20 = vld [vmem:[#allocation2 + $0x208] sm:$0xff] }
 0x990   : > { %4651 = vmax.xlane.f32.xlu2 %v4503_v37  ;;  %v4534_v37 = vld [vmem:[#allocation2 + $0x3a0] sm:$0xff] }
 0x997   : > { %4655 = vmax.xlane.f32.xlu1 %v4505_v50  ;;  %4653 = vmax.xlane.f32.xlu0 %v4504_v34 }
 0x998   : > { %4657 = vmax.xlane.f32.xlu2 %v4506_v19 }
 0x99f   : > { %4661 = vmax.xlane.f32.xlu1 %v4508_v12  ;;  %4659 = vmax.xlane.f32.xlu0 %v4507_v8  ;;  %v4536_v12 = vld [vmem:[#allocation2 + $0xd0] sm:$0xff] }
 0x9a0   : > { %4663 = vmax.xlane.f32.xlu2 %v4509_v24  ;;  %v4877_v24 = vld [vmem:[%s8577_s10 + $0x50] sm:$0xff] }
 0x9a7   : > { %4667 = vmax.xlane.f32.xlu1 %v4511_v21  ;;  %4665 = vmax.xlane.f32.xlu0 %v4510_v49  ;;  %v4876_v21 = vld [vmem:[%s8577_s10 + $0x48] sm:$0xff]  ;;  %v4878_v49 = vld [vmem:[%s8577_s10 + $0x58] sm:$0xff] }
 0x9a8   : > { %4669 = vmax.xlane.f32.xlu2 %v4512_v15 }
 0x9af   : > { %4673 = vmax.xlane.f32.xlu1 %v4514_v62  ;;  %4671 = vmax.xlane.f32.xlu0 %v4513_v5 }
 0x9b0   : > { %4675 = vmax.xlane.f32.xlu2 %v4515_v36 }
 0x9b7   : > { %4679 = vmax.xlane.f32.xlu1 %v4517_v11  ;;  %4677 = vmax.xlane.f32.xlu0 %v4516_v61  ;;  %v4538_v61 = vld [vmem:[#allocation2 + $0x2f0] sm:$0xff] }
 0x9b8   : > { %4681 = vmax.xlane.f32.xlu2 %v4518_v38  ;;  %v4537_v38 = vld [vmem:[#allocation2 + $0x88] sm:$0xff] }
 0x9bf   : > { %4685 = vmax.xlane.f32.xlu1 %v4520_v44  ;;  %4683 = vmax.xlane.f32.xlu0 %v4519_v52 }
 0x9c0   : > { %4687 = vmax.xlane.f32.xlu2 %v4521_v25 }
 0x9c7   : > { %4691 = vmax.xlane.f32.xlu1 %v4523_v55  ;;  %4689 = vmax.xlane.f32.xlu0 %v4522_v10  ;;  %v4539_v55 = vld [vmem:[#allocation2 + $0x358] sm:$0xff] }
 0x9c8   : > { %4693 = vmax.xlane.f32.xlu2 %v4524_v6  ;;  %v4880_v6 = vld [vmem:[%s8577_s10 + $0x68] sm:$0xff] }
 0x9cf   : > { %4697 = vmax.xlane.f32.xlu1 %v4526_v13  ;;  %4695 = vmax.xlane.f32.xlu0 %v4525_v17  ;;  %v4879_v13 = vld [vmem:[%s8577_s10 + $0x60] sm:$0xff]  ;;  %v4881_v17 = vld [vmem:[%s8577_s10 + $0x70] sm:$0xff] }
 0x9d0   : > { %4699 = vmax.xlane.f32.xlu2 %v4527_v63 }
 0x9d2   : > { %v4616_v7 = vpop.xlane.xlu1 %4615  ;;  %v4612_v26 = vpop.xlane.xlu0 %4611 }
 0x9d3   : > { %v4997_v14 = vadd.f32 %v4869_v56, %v4616_v7  ;;  %v4995_v58 = vadd.f32 %v4867_v22, %v4612_v26  ;;  %v4620_v51 = vpop.xlane.xlu2 %4619  ;;  %v4541_v26 = vld [vmem:[#allocation2 + $0x350] sm:$0xff] }
 0x9d4   : > { %v4999_v40 = vadd.f32 %v4871_v45, %v4620_v51 }
 0x9d5   : > { %v5125_v16 = vmax.f32 %v4997_v14, 0.0  ;;  %v5123_v27 = vmax.f32 %v4995_v58, 0.0  ;;  %v4540_v14 = vld [vmem:[#allocation2 + $0x268] sm:$0xff] }
 0x9d6   : > { %v5127_v31 = vmax.f32 %v4999_v40, 0.0 }
 0x9d7   : > { %5254 = vst.msk [vmem:[%s6367_s27 + $0x10] sm:$0xff] %vm5251_vm3, %v5125_v16  ;;  %4703 = vmax.xlane.f32.xlu1 %v4529_v35  ;;  %4701 = vmax.xlane.f32.xlu0 %v4528_v46  ;;  %v4542_v46 = vld [vmem:[#allocation2 + $0x188] sm:$0xff]  ;;  %v4883_v16 = vld [vmem:[%s8577_s10 + $0x80] sm:$0xff] }
 0x9d8   : > { %5252 = vst.msk [vmem:[%s6367_s27] sm:$0xff] %vm5251_vm3, %v5123_v27  ;;  %4705 = vmax.xlane.f32.xlu2 %v4530_v47  ;;  %v4882_v27 = vld [vmem:[%s8577_s10 + $0x78] sm:$0xff]  ;;  %v4884_v47 = vld [vmem:[%s8577_s10 + $0x88] sm:$0xff] }
 0x9d9   : > { %5256 = vst.msk [vmem:[%s6367_s27 + $0x20] sm:$0xff] %vm5251_vm3, %v5127_v31 }
 0x9da   : > { %v4618_v59 = vpop.xlane.xlu1 %4617  ;;  %v4614_v32 = vpop.xlane.xlu0 %4613 }
 0x9db   : > { %v4998_v29 = vadd.f32 %v4870_v54, %v4618_v59  ;;  %v4996_v42 = vadd.f32 %v4868_v57, %v4614_v32  ;;  %v4622_v43 = vpop.xlane.xlu2 %4621  ;;  %v4544_v32 = vld [vmem:[#allocation2 + $0x30] sm:$0xff] }
 0x9dc   : > { %v5000_v30 = vadd.f32 %v4872_v28, %v4622_v43 }
 0x9dd   : > { %v5126_v18 = vmax.f32 %v4998_v29, 0.0  ;;  %v5124_v33 = vmax.f32 %v4996_v42, 0.0  ;;  %v4543_v29 = vld [vmem:[#allocation2 + $0x1d8] sm:$0xff] }
 0x9de   : > { %v5128_v60 = vmax.f32 %v5000_v30, 0.0 }
 0x9df   : > { %5255 = vst.msk [vmem:[%s6367_s27 + $0x18] sm:$0xff] %vm5251_vm3, %v5126_v18  ;;  %4709 = vmax.xlane.f32.xlu1 %v4532_v39  ;;  %4707 = vmax.xlane.f32.xlu0 %v4531_v1  ;;  %v4545_v1 = vld [vmem:[#allocation2 + $0x140] sm:$0xff]  ;;  %v4886_v18 = vld [vmem:[%s8577_s10 + $0x98] sm:$0xff] }
 0x9e0   : > { %5253 = vst.msk [vmem:[%s6367_s27 + $0x8] sm:$0xff] %vm5251_vm3, %v5124_v33  ;;  %4711 = vmax.xlane.f32.xlu2 %v4533_v2  ;;  %v4885_v33 = vld [vmem:[%s8577_s10 + $0x90] sm:$0xff]  ;;  %v4887_v2 = vld [vmem:[%s8577_s10 + $0xa0] sm:$0xff] }
 0x9e1   : > { %5257 = vst.msk [vmem:[%s6367_s27 + $0x28] sm:$0xff] %vm5251_vm3, %v5128_v60 }
 0x9e2   : > { %v4626_v23 = vpop.xlane.xlu1 %4625  ;;  %v4624_v53 = vpop.xlane.xlu0 %4623 }
 0x9e3   : > { %v5002_v4 = vadd.f32 %v4874_v0, %v4626_v23  ;;  %v5001_v48 = vadd.f32 %v4873_v3, %v4624_v53  ;;  %v4628_v9 = vpop.xlane.xlu2 %4627  ;;  %v4547_v53 = vld [vmem:[#allocation2 + $0x130] sm:$0xff] }
 0x9e4   : > { %v5003_v50 = vadd.f32 %v4875_v41, %v4628_v9 }
 0x9e5   : > { %v5130_v34 = vmax.f32 %v5002_v4, 0.0  ;;  %v5129_v19 = vmax.f32 %v5001_v48, 0.0  ;;  %v4546_v4 = vld [vmem:[#allocation2 + $0x2a8] sm:$0xff] }
 0x9e6   : > { %v5131_v8 = vmax.f32 %v5003_v50, 0.0 }
 0x9e7   : > { %5259 = vst.msk [vmem:[%s6367_s27 + $0x38] sm:$0xff] %vm5251_vm3, %v5130_v34  ;;  %4715 = vmax.xlane.f32.xlu1 %v4535_v20  ;;  %4713 = vmax.xlane.f32.xlu0 %v4534_v37  ;;  %v4548_v37 = vld [vmem:[#allocation2 + $0x200] sm:$0xff]  ;;  %v4889_v34 = vld [vmem:[%s8577_s10 + $0xb0] sm:$0xff] }
 0x9e8   : > { %5258 = vst.msk [vmem:[%s6367_s27 + $0x30] sm:$0xff] %vm5251_vm3, %v5129_v19  ;;  %4717 = vmax.xlane.f32.xlu2 %v4536_v12  ;;  %v4888_v19 = vld [vmem:[%s8577_s10 + $0xa8] sm:$0xff]  ;;  %v4890_v12 = vld [vmem:[%s8577_s10 + $0xb8] sm:$0xff] }
 0x9e9   : > { %5260 = vst.msk [vmem:[%s6367_s27 + $0x40] sm:$0xff] %vm5251_vm3, %v5131_v8 }
 0x9ea   : > { %v4632_v15 = vpop.xlane.xlu1 %4631  ;;  %v4630_v62 = vpop.xlane.xlu0 %4629 }
 0x9eb   : > { %v5005_v5 = vadd.f32 %v4877_v24, %v4632_v15  ;;  %v5004_v36 = vadd.f32 %v4876_v21, %v4630_v62  ;;  %v4634_v11 = vpop.xlane.xlu2 %4633  ;;  %v4550_v62 = vld [vmem:[#allocation2 + $0x220] sm:$0xff] }
 0x9ec   : > { %v5006_v44 = vadd.f32 %v4878_v49, %v4634_v11 }
 0x9ed   : > { %v5133_v52 = vmax.f32 %v5005_v5, 0.0  ;;  %v5132_v25 = vmax.f32 %v5004_v36, 0.0  ;;  %v4549_v5 = vld [vmem:[#allocation2 + $0x318] sm:$0xff] }
 0x9ee   : > { %v5134_v10 = vmax.f32 %v5006_v44, 0.0 }
 0x9ef   : > { %5262 = vst.msk [vmem:[%s6367_s27 + $0x50] sm:$0xff] %vm5251_vm3, %v5133_v52  ;;  %4721 = vmax.xlane.f32.xlu1 %v4538_v61  ;;  %4719 = vmax.xlane.f32.xlu0 %v4537_v38  ;;  %v4551_v38 = vld [vmem:[#allocation2 + $0x70] sm:$0xff]  ;;  %v4892_v52 = vld [vmem:[%s8577_s10 + $0xc8] sm:$0xff] }
 0x9f0   : > { %5261 = vst.msk [vmem:[%s6367_s27 + $0x48] sm:$0xff] %vm5251_vm3, %v5132_v25  ;;  %4723 = vmax.xlane.f32.xlu2 %v4539_v55  ;;  %v4891_v25 = vld [vmem:[%s8577_s10 + $0xc0] sm:$0xff]  ;;  %v4893_v55 = vld [vmem:[%s8577_s10 + $0xd0] sm:$0xff] }
 0x9f1   : > { %5263 = vst.msk [vmem:[%s6367_s27 + $0x58] sm:$0xff] %vm5251_vm3, %v5134_v10 }
 0x9f2   : > { %v4638_v63 = vpop.xlane.xlu1 %4637  ;;  %v4636_v56 = vpop.xlane.xlu0 %4635 }
 0x9f3   : > { %v5008_v22 = vadd.f32 %v4880_v6, %v4638_v63  ;;  %v5007_v45 = vadd.f32 %v4879_v13, %v4636_v56  ;;  %v4640_v7 = vpop.xlane.xlu2 %4639  ;;  %v4553_v56 = vld [vmem:[#allocation2 + $0xe0] sm:$0xff] }
 0x9f4   : > { %v5009_v58 = vadd.f32 %v4881_v17, %v4640_v7 }
 0x9f5   : > { %v5136_v51 = vmax.f32 %v5008_v22, 0.0  ;;  %v5135_v35 = vmax.f32 %v5007_v45, 0.0  ;;  %v4552_v22 = vld [vmem:[#allocation2 + $0x300] sm:$0xff] }
 0x9f6   : > { %v5137_v40 = vmax.f32 %v5009_v58, 0.0 }
 0x9f7   : > { %5265 = vst.msk [vmem:[%s6367_s27 + $0x68] sm:$0xff] %vm5251_vm3, %v5136_v51  ;;  %4727 = vmax.xlane.f32.xlu1 %v4541_v26  ;;  %4725 = vmax.xlane.f32.xlu0 %v4540_v14  ;;  %v4554_v14 = vld [vmem:[#allocation2 + $0x178] sm:$0xff] }
 0x9f8   : > { %5264 = vst.msk [vmem:[%s6367_s27 + $0x60] sm:$0xff] %vm5251_vm3, %v5135_v35  ;;  %4729 = vmax.xlane.f32.xlu2 %v4542_v46  ;;  %v4895_v51 = vld [vmem:[%s8577_s10 + $0xe0] sm:$0xff]  ;;  %v4894_v35 = vld [vmem:[%s8577_s10 + $0xd8] sm:$0xff]  ;;  %v4896_v46 = vld [vmem:[%s8577_s10 + $0xe8] sm:$0xff] }
 0x9f9   : > { %5266 = vst.msk [vmem:[%s6367_s27 + $0x70] sm:$0xff] %vm5251_vm3, %v5137_v40 }
 0x9fa   : > { %v4644_v31 = vpop.xlane.xlu1 %4643  ;;  %v4642_v54 = vpop.xlane.xlu0 %4641 }
 0x9fb   : > { %v5011_v57 = vadd.f32 %v4883_v16, %v4644_v31  ;;  %v5010_v28 = vadd.f32 %v4882_v27, %v4642_v54  ;;  %v4646_v59 = vpop.xlane.xlu2 %4645  ;;  %v4556_v54 = vld [vmem:[#allocation2 + $0x260] sm:$0xff] }
 0x9fc   : > { %v5012_v42 = vadd.f32 %v4884_v47, %v4646_v59 }
 0x9fd   : > { %v5139_v43 = vmax.f32 %v5011_v57, 0.0  ;;  %v5138_v39 = vmax.f32 %v5010_v28, 0.0  ;;  %v4555_v57 = vld [vmem:[#allocation2 + $0x328] sm:$0xff] }
 0x9fe   : > { %v5140_v30 = vmax.f32 %v5012_v42, 0.0 }
 0x9ff   : > { %5268 = vst.msk [vmem:[%s6367_s27 + $0x80] sm:$0xff] %vm5251_vm3, %v5139_v43  ;;  %4733 = vmax.xlane.f32.xlu1 %v4544_v32  ;;  %4731 = vmax.xlane.f32.xlu0 %v4543_v29  ;;  %v4557_v29 = vld [vmem:[#allocation2 + $0x3b8] sm:$0xff]  ;;  %v4898_v43 = vld [vmem:[%s8577_s10 + $0xf8] sm:$0xff] }
 0xa00   : > { %5267 = vst.msk [vmem:[%s6367_s27 + $0x78] sm:$0xff] %vm5251_vm3, %v5138_v39  ;;  %4735 = vmax.xlane.f32.xlu2 %v4545_v1  ;;  %v4897_v39 = vld [vmem:[%s8577_s10 + $0xf0] sm:$0xff]  ;;  %v4899_v1 = vld [vmem:[%s8577_s10 + $0x100] sm:$0xff] }
 0xa01   : > { %5269 = vst.msk [vmem:[%s6367_s27 + $0x88] sm:$0xff] %vm5251_vm3, %v5140_v30 }
 0xa02   : > { %v4650_v60 = vpop.xlane.xlu1 %4649  ;;  %v4648_v0 = vpop.xlane.xlu0 %4647 }
 0xa03   : > { %v5014_v3 = vadd.f32 %v4886_v18, %v4650_v60  ;;  %v5013_v41 = vadd.f32 %v4885_v33, %v4648_v0  ;;  %v4652_v23 = vpop.xlane.xlu2 %4651  ;;  %v4559_v0 = vld [vmem:[#allocation2 + $0x248] sm:$0xff] }
 0xa04   : > { %v5015_v48 = vadd.f32 %v4887_v2, %v4652_v23 }
 0xa05   : > { %v5142_v9 = vmax.f32 %v5014_v3, 0.0  ;;  %v5141_v20 = vmax.f32 %v5013_v41, 0.0  ;;  %v4558_v3 = vld [vmem:[#allocation2 + $0x2b8] sm:$0xff] }
 0xa06   : > { %v5143_v50 = vmax.f32 %v5015_v48, 0.0 }
 0xa07   : > { %5271 = vst.msk [vmem:[%s6367_s27 + $0x98] sm:$0xff] %vm5251_vm3, %v5142_v9  ;;  %4739 = vmax.xlane.f32.xlu1 %v4547_v53  ;;  %4737 = vmax.xlane.f32.xlu0 %v4546_v4  ;;  %v4560_v4 = vld [vmem:[#allocation2 + $0x40] sm:$0xff]  ;;  %v4901_v9 = vld [vmem:[%s8577_s10 + $0x110] sm:$0xff] }
 0xa08   : > { %5270 = vst.msk [vmem:[%s6367_s27 + $0x90] sm:$0xff] %vm5251_vm3, %v5141_v20  ;;  %4741 = vmax.xlane.f32.xlu2 %v4548_v37  ;;  %v4900_v20 = vld [vmem:[%s8577_s10 + $0x108] sm:$0xff]  ;;  %v4902_v37 = vld [vmem:[%s8577_s10 + $0x118] sm:$0xff] }
 0xa09   : > { %5272 = vst.msk [vmem:[%s6367_s27 + $0xa0] sm:$0xff] %vm5251_vm3, %v5143_v50 }
 0xa0a   : > { %v4656_v8 = vpop.xlane.xlu1 %4655  ;;  %v4654_v24 = vpop.xlane.xlu0 %4653 }
 0xa0b   : > { %v5017_v21 = vadd.f32 %v4889_v34, %v4656_v8  ;;  %v5016_v49 = vadd.f32 %v4888_v19, %v4654_v24  ;;  %v4658_v15 = vpop.xlane.xlu2 %4657  ;;  %v4562_v24 = vld [vmem:[#allocation2 + $0xe8] sm:$0xff] }
 0xa0c   : > { %v5018_v36 = vadd.f32 %v4890_v12, %v4658_v15 }
 0xa0d   : > { %v5145_v11 = vmax.f32 %v5017_v21, 0.0  ;;  %v5144_v61 = vmax.f32 %v5016_v49, 0.0  ;;  %v4561_v21 = vld [vmem:[#allocation2 + $0x20] sm:$0xff] }
 0xa0e   : > { %v5146_v44 = vmax.f32 %v5018_v36, 0.0 }
 0xa0f   : > { %5274 = vst.msk [vmem:[%s6367_s27 + $0xb0] sm:$0xff] %vm5251_vm3, %v5145_v11  ;;  %4745 = vmax.xlane.f32.xlu1 %v4550_v62  ;;  %4743 = vmax.xlane.f32.xlu0 %v4549_v5  ;;  %v4563_v5 = vld [vmem:[#allocation2 + $0x288] sm:$0xff]  ;;  %v4904_v11 = vld [vmem:[%s8577_s10 + $0x128] sm:$0xff] }
 0xa10   : > { %5273 = vst.msk [vmem:[%s6367_s27 + $0xa8] sm:$0xff] %vm5251_vm3, %v5144_v61  ;;  %4747 = vmax.xlane.f32.xlu2 %v4551_v38  ;;  %v4903_v61 = vld [vmem:[%s8577_s10 + $0x120] sm:$0xff]  ;;  %v4905_v38 = vld [vmem:[%s8577_s10 + $0x130] sm:$0xff] }
 0xa11   : > { %5275 = vst.msk [vmem:[%s6367_s27 + $0xb8] sm:$0xff] %vm5251_vm3, %v5146_v44 }
 0xa12   : > { %v4662_v10 = vpop.xlane.xlu1 %4661  ;;  %v4660_v6 = vpop.xlane.xlu0 %4659 }
 0xa13   : > { %v5020_v13 = vadd.f32 %v4892_v52, %v4662_v10  ;;  %v5019_v17 = vadd.f32 %v4891_v25, %v4660_v6  ;;  %v4664_v63 = vpop.xlane.xlu2 %4663  ;;  %v4565_v6 = vld [vmem:[#allocation2 + $0x3c8] sm:$0xff] }
 0xa14   : > { %v5021_v45 = vadd.f32 %v4893_v55, %v4664_v63 }
 0xa15   : > { %v5148_v7 = vmax.f32 %v5020_v13, 0.0  ;;  %v5147_v26 = vmax.f32 %v5019_v17, 0.0  ;;  %v4564_v13 = vld [vmem:[#allocation2 + $0x3a8] sm:$0xff] }
 0xa16   : > { %v5149_v58 = vmax.f32 %v5021_v45, 0.0 }
 0xa17   : > { %5277 = vst.msk [vmem:[%s6367_s27 + $0xc8] sm:$0xff] %vm5251_vm3, %v5148_v7  ;;  %4751 = vmax.xlane.f32.xlu1 %v4553_v56  ;;  %4749 = vmax.xlane.f32.xlu0 %v4552_v22  ;;  %v4566_v22 = vld [vmem:[#allocation2 + $0x160] sm:$0xff]  ;;  %v4907_v7 = vld [vmem:[%s8577_s10 + $0x140] sm:$0xff] }
 0xa18   : > { %5276 = vst.msk [vmem:[%s6367_s27 + $0xc0] sm:$0xff] %vm5251_vm3, %v5147_v26  ;;  %4753 = vmax.xlane.f32.xlu2 %v4554_v14  ;;  %v4906_v26 = vld [vmem:[%s8577_s10 + $0x138] sm:$0xff]  ;;  %v4908_v14 = vld [vmem:[%s8577_s10 + $0x148] sm:$0xff] }
 0xa19   : > { %5278 = vst.msk [vmem:[%s6367_s27 + $0xd0] sm:$0xff] %vm5251_vm3, %v5149_v58 }
 0xa1a   : > { %v4668_v40 = vpop.xlane.xlu1 %4667  ;;  %v4666_v16 = vpop.xlane.xlu0 %4665 }
 0xa1b   : > { %v5023_v27 = vadd.f32 %v4895_v51, %v4668_v40  ;;  %v5022_v47 = vadd.f32 %v4894_v35, %v4666_v16  ;;  %v4670_v31 = vpop.xlane.xlu2 %4669  ;;  %v4568_v16 = vld [vmem:[#allocation2 + $0x210] sm:$0xff] }
 0xa1c   : > { %v5024_v28 = vadd.f32 %v4896_v46, %v4670_v31 }
 0xa1d   : > { %v5151_v59 = vmax.f32 %v5023_v27, 0.0  ;;  %v5150_v32 = vmax.f32 %v5022_v47, 0.0  ;;  %v4567_v27 = vld [vmem:[#allocation2 + $0x2c8] sm:$0xff] }
 0xa1e   : > { %v5152_v42 = vmax.f32 %v5024_v28, 0.0 }
 0xa1f   : > { %5280 = vst.msk [vmem:[%s6367_s27 + $0xe0] sm:$0xff] %vm5251_vm3, %v5151_v59  ;;  %4757 = vmax.xlane.f32.xlu1 %v4556_v54  ;;  %4755 = vmax.xlane.f32.xlu0 %v4555_v57  ;;  %v4569_v57 = vld [vmem:[#allocation2 + $0x3d8] sm:$0xff]  ;;  %v4910_v59 = vld [vmem:[%s8577_s10 + $0x158] sm:$0xff] }
 0xa20   : > { %5279 = vst.msk [vmem:[%s6367_s27 + $0xd8] sm:$0xff] %vm5251_vm3, %v5150_v32  ;;  %4759 = vmax.xlane.f32.xlu2 %v4557_v29  ;;  %v4909_v32 = vld [vmem:[%s8577_s10 + $0x150] sm:$0xff]  ;;  %v4911_v29 = vld [vmem:[%s8577_s10 + $0x160] sm:$0xff] }
 0xa21   : > { %5281 = vst.msk [vmem:[%s6367_s27 + $0xe8] sm:$0xff] %vm5251_vm3, %v5152_v42 }
 0xa22   : > { %v4674_v30 = vpop.xlane.xlu1 %4673  ;;  %v4672_v18 = vpop.xlane.xlu0 %4671 }
 0xa23   : > { %v5026_v33 = vadd.f32 %v4898_v43, %v4674_v30  ;;  %v5025_v2 = vadd.f32 %v4897_v39, %v4672_v18  ;;  %v4676_v60 = vpop.xlane.xlu2 %4675  ;;  %v4571_v18 = vld [vmem:[#allocation2 + $0x1b0] sm:$0xff] }
 0xa24   : > { %v5027_v41 = vadd.f32 %v4899_v1, %v4676_v60 }
 0xa25   : > { %v5154_v23 = vmax.f32 %v5026_v33, 0.0  ;;  %v5153_v53 = vmax.f32 %v5025_v2, 0.0  ;;  %v4570_v33 = vld [vmem:[#allocation2 + $0x1e8] sm:$0xff] }
 0xa26   : > { %v5155_v48 = vmax.f32 %v5027_v41, 0.0 }
 0xa27   : > { %5283 = vst.msk [vmem:[%s6367_s27 + $0xf8] sm:$0xff] %vm5251_vm3, %v5154_v23  ;;  %4763 = vmax.xlane.f32.xlu1 %v4559_v0  ;;  %4761 = vmax.xlane.f32.xlu0 %v4558_v3  ;;  %v4572_v3 = vld [vmem:[#allocation2 + $0x1c8] sm:$0xff] }
 0xa28   : > { %5282 = vst.msk [vmem:[%s6367_s27 + $0xf0] sm:$0xff] %vm5251_vm3, %v5153_v53  ;;  %4765 = vmax.xlane.f32.xlu2 %v4560_v4  ;;  %v4913_v23 = vld [vmem:[%s8577_s10 + $0x170] sm:$0xff]  ;;  %v4912_v53 = vld [vmem:[%s8577_s10 + $0x168] sm:$0xff]  ;;  %v4914_v4 = vld [vmem:[%s8577_s10 + $0x178] sm:$0xff] }
 0xa29   : > { %5284 = vst.msk [vmem:[%s6367_s27 + $0x100] sm:$0xff] %vm5251_vm3, %v5155_v48 }
 0xa2a   : > { %v4680_v50 = vpop.xlane.xlu1 %4679  ;;  %v4678_v34 = vpop.xlane.xlu0 %4677 }
 0xa2b   : > { %v5029_v19 = vadd.f32 %v4901_v9, %v4680_v50  ;;  %v5028_v12 = vadd.f32 %v4900_v20, %v4678_v34  ;;  %v4682_v8 = vpop.xlane.xlu2 %4681  ;;  %v4574_v34 = vld [vmem:[#allocation2 + $0x1d0] sm:$0xff] }
 0xa2c   : > { %v5030_v49 = vadd.f32 %v4902_v37, %v4682_v8 }
 0xa2d   : > { %v5157_v15 = vmax.f32 %v5029_v19, 0.0  ;;  %v5156_v62 = vmax.f32 %v5028_v12, 0.0  ;;  %v4573_v19 = vld [vmem:[#allocation2 + $0x2d0] sm:$0xff] }
 0xa2e   : > { %v5158_v36 = vmax.f32 %v5030_v49, 0.0 }
 0xa2f   : > { %5286 = vst.msk [vmem:[%s6367_s27 + $0x110] sm:$0xff] %vm5251_vm3, %v5157_v15  ;;  %4769 = vmax.xlane.f32.xlu1 %v4562_v24  ;;  %4767 = vmax.xlane.f32.xlu0 %v4561_v21  ;;  %v4575_v21 = vld [vmem:[#allocation2 + $0x58] sm:$0xff]  ;;  %v4916_v15 = vld [vmem:[%s8577_s10 + $0x188] sm:$0xff] }
 0xa30   : > { %5285 = vst.msk [vmem:[%s6367_s27 + $0x108] sm:$0xff] %vm5251_vm3, %v5156_v62  ;;  %4771 = vmax.xlane.f32.xlu2 %v4563_v5  ;;  %v4915_v62 = vld [vmem:[%s8577_s10 + $0x180] sm:$0xff]  ;;  %v4917_v5 = vld [vmem:[%s8577_s10 + $0x190] sm:$0xff] }
 0xa31   : > { %5287 = vst.msk [vmem:[%s6367_s27 + $0x118] sm:$0xff] %vm5251_vm3, %v5158_v36 }
 0xa32   : > { %v4686_v44 = vpop.xlane.xlu1 %4685  ;;  %v4684_v52 = vpop.xlane.xlu0 %4683 }
 0xa33   : > { %v5032_v25 = vadd.f32 %v4904_v11, %v4686_v44  ;;  %v5031_v55 = vadd.f32 %v4903_v61, %v4684_v52  ;;  %v4688_v10 = vpop.xlane.xlu2 %4687  ;;  %v4577_v52 = vld [vmem:[#allocation2 + $0x198] sm:$0xff] }
 0xa34   : > { %v5033_v17 = vadd.f32 %v4905_v38, %v4688_v10 }
 0xa35   : > { %v5160_v63 = vmax.f32 %v5032_v25, 0.0  ;;  %v5159_v56 = vmax.f32 %v5031_v55, 0.0  ;;  %v4576_v25 = vld [vmem:[#allocation2 + $0x120] sm:$0xff] }
 0xa36   : > { %v5161_v45 = vmax.f32 %v5033_v17, 0.0 }
 0xa37   : > { %5289 = vst.msk [vmem:[%s6367_s27 + $0x128] sm:$0xff] %vm5251_vm3, %v5160_v63  ;;  %4775 = vmax.xlane.f32.xlu1 %v4565_v6  ;;  %4773 = vmax.xlane.f32.xlu0 %v4564_v13  ;;  %v4578_v13 = vld [vmem:[#allocation2 + $0x2e8] sm:$0xff]  ;;  %v4919_v63 = vld [vmem:[%s8577_s10 + $0x1a0] sm:$0xff] }
 0xa38   : > { %5288 = vst.msk [vmem:[%s6367_s27 + $0x120] sm:$0xff] %vm5251_vm3, %v5159_v56  ;;  %4777 = vmax.xlane.f32.xlu2 %v4566_v22  ;;  %v4918_v56 = vld [vmem:[%s8577_s10 + $0x198] sm:$0xff]  ;;  %v4920_v22 = vld [vmem:[%s8577_s10 + $0x1a8] sm:$0xff] }
 0xa39   : > { %5290 = vst.msk [vmem:[%s6367_s27 + $0x130] sm:$0xff] %vm5251_vm3, %v5161_v45 }
 0xa3a   : > { %v4692_v58 = vpop.xlane.xlu1 %4691  ;;  %v4690_v51 = vpop.xlane.xlu0 %4689 }
 0xa3b   : > { %v5035_v35 = vadd.f32 %v4907_v7, %v4692_v58  ;;  %v5034_v46 = vadd.f32 %v4906_v26, %v4690_v51  ;;  %v4694_v40 = vpop.xlane.xlu2 %4693  ;;  %v4580_v51 = vld [vmem:[#allocation2 + $0x238] sm:$0xff] }
 0xa3c   : > { %v5036_v47 = vadd.f32 %v4908_v14, %v4694_v40 }
 0xa3d   : > { %v5163_v31 = vmax.f32 %v5035_v35, 0.0  ;;  %v5162_v54 = vmax.f32 %v5034_v46, 0.0  ;;  %v4579_v35 = vld [vmem:[#allocation2 + $0x1f8] sm:$0xff] }
 0xa3e   : > { %v5164_v28 = vmax.f32 %v5036_v47, 0.0 }
 0xa3f   : > { %5292 = vst.msk [vmem:[%s6367_s27 + $0x140] sm:$0xff] %vm5251_vm3, %v5163_v31  ;;  %4781 = vmax.xlane.f32.xlu1 %v4568_v16  ;;  %4779 = vmax.xlane.f32.xlu0 %v4567_v27  ;;  %v4581_v27 = vld [vmem:[#allocation2 + $0x398] sm:$0xff]  ;;  %v4922_v31 = vld [vmem:[%s8577_s10 + $0x1b8] sm:$0xff] }
 0xa40   : > { %5291 = vst.msk [vmem:[%s6367_s27 + $0x138] sm:$0xff] %vm5251_vm3, %v5162_v54  ;;  %4783 = vmax.xlane.f32.xlu2 %v4569_v57  ;;  %v4921_v54 = vld [vmem:[%s8577_s10 + $0x1b0] sm:$0xff]  ;;  %v4923_v57 = vld [vmem:[%s8577_s10 + $0x1c0] sm:$0xff] }
 0xa41   : > { %5293 = vst.msk [vmem:[%s6367_s27 + $0x148] sm:$0xff] %vm5251_vm3, %v5164_v28 }
 0xa42   : > { %v4698_v42 = vpop.xlane.xlu1 %4697  ;;  %v4696_v43 = vpop.xlane.xlu0 %4695 }
 0xa43   : > { %v5038_v39 = vadd.f32 %v4910_v59, %v4698_v42  ;;  %v5037_v1 = vadd.f32 %v4909_v32, %v4696_v43  ;;  %v4700_v30 = vpop.xlane.xlu2 %4699  ;;  %v4583_v43 = vld [vmem:[#allocation2 + $0x1a0] sm:$0xff] }
 0xa44   : > { %v5039_v2 = vadd.f32 %v4911_v29, %v4700_v30 }
 0xa45   : > { %v5166_v60 = vmax.f32 %v5038_v39, 0.0  ;;  %v5165_v0 = vmax.f32 %v5037_v1, 0.0  ;;  %v4582_v39 = vld [vmem:[#allocation2 + $0x390] sm:$0xff] }
 0xa46   : > { %v5167_v41 = vmax.f32 %v5039_v2, 0.0 }
 0xa47   : > { %5295 = vst.msk [vmem:[%s6367_s27 + $0x158] sm:$0xff] %vm5251_vm3, %v5166_v60  ;;  %4787 = vmax.xlane.f32.xlu1 %v4571_v18  ;;  %4785 = vmax.xlane.f32.xlu0 %v4570_v33  ;;  %v4584_v33 = vld [vmem:[#allocation2 + $0xa8] sm:$0xff] }
 0xa48   : > { %5294 = vst.msk [vmem:[%s6367_s27 + $0x150] sm:$0xff] %vm5251_vm3, %v5165_v0  ;;  %4789 = vmax.xlane.f32.xlu2 %v4572_v3  ;;  %v4925_v60 = vld [vmem:[%s8577_s10 + $0x1d0] sm:$0xff]  ;;  %v4924_v0 = vld [vmem:[%s8577_s10 + $0x1c8] sm:$0xff]  ;;  %v4926_v3 = vld [vmem:[%s8577_s10 + $0x1d8] sm:$0xff] }
 0xa49   : > { %5296 = vst.msk [vmem:[%s6367_s27 + $0x160] sm:$0xff] %vm5251_vm3, %v5167_v41 }
 0xa4a   : > { %v4704_v48 = vpop.xlane.xlu1 %4703  ;;  %v4702_v9 = vpop.xlane.xlu0 %4701 }
 0xa4b   : > { %v5041_v20 = vadd.f32 %v4913_v23, %v4704_v48  ;;  %v5040_v37 = vadd.f32 %v4912_v53, %v4702_v9  ;;  %v4706_v50 = vpop.xlane.xlu2 %4705  ;;  %v4586_v9 = vld [vmem:[#allocation2 + $0x2d8] sm:$0xff] }
 0xa4c   : > { %v5042_v12 = vadd.f32 %v4914_v4, %v4706_v50 }
 0xa4d   : > { %v5169_v8 = vmax.f32 %v5041_v20, 0.0  ;;  %v5168_v24 = vmax.f32 %v5040_v37, 0.0  ;;  %v4585_v20 = vld [vmem:[#allocation2 + $0x258] sm:$0xff] }
 0xa4e   : > { %v5170_v49 = vmax.f32 %v5042_v12, 0.0 }
 0xa4f   : > { %5298 = vst.msk [vmem:[%s6367_s27 + $0x170] sm:$0xff] %vm5251_vm3, %v5169_v8  ;;  %4793 = vmax.xlane.f32.xlu1 %v4574_v34  ;;  %4791 = vmax.xlane.f32.xlu0 %v4573_v19  ;;  %v4587_v19 = vld [vmem:[#allocation2 + $0xf0] sm:$0xff]  ;;  %v4928_v8 = vld [vmem:[%s8577_s10 + $0x1e8] sm:$0xff] }
 0xa50   : > { %5297 = vst.msk [vmem:[%s6367_s27 + $0x168] sm:$0xff] %vm5251_vm3, %v5168_v24  ;;  %4795 = vmax.xlane.f32.xlu2 %v4575_v21  ;;  %v4927_v24 = vld [vmem:[%s8577_s10 + $0x1e0] sm:$0xff]  ;;  %v4929_v21 = vld [vmem:[%s8577_s10 + $0x1f0] sm:$0xff] }
 0xa51   : > { %5299 = vst.msk [vmem:[%s6367_s27 + $0x178] sm:$0xff] %vm5251_vm3, %v5170_v49 }
 0xa52   : > { %v4710_v36 = vpop.xlane.xlu1 %4709  ;;  %v4708_v11 = vpop.xlane.xlu0 %4707 }
 0xa53   : > { %v5044_v61 = vadd.f32 %v4916_v15, %v4710_v36  ;;  %v5043_v38 = vadd.f32 %v4915_v62, %v4708_v11  ;;  %v4712_v44 = vpop.xlane.xlu2 %4711  ;;  %v4589_v11 = vld [vmem:[#allocation2 + $0x170] sm:$0xff] }
 0xa54   : > { %v5045_v55 = vadd.f32 %v4917_v5, %v4712_v44 }
 0xa55   : > { %v5172_v10 = vmax.f32 %v5044_v61, 0.0  ;;  %v5171_v6 = vmax.f32 %v5043_v38, 0.0  ;;  %v4588_v61 = vld [vmem:[#allocation2 + $0x180] sm:$0xff] }
 0xa56   : > { %v5173_v17 = vmax.f32 %v5045_v55, 0.0 }
 0xa57   : > { %5301 = vst.msk [vmem:[%s6367_s27 + $0x188] sm:$0xff] %vm5251_vm3, %v5172_v10  ;;  %4799 = vmax.xlane.f32.xlu1 %v4577_v52  ;;  %4797 = vmax.xlane.f32.xlu0 %v4576_v25  ;;  %v4590_v25 = vld [vmem:[#allocation2 + $0x3d0] sm:$0xff]  ;;  %v4931_v10 = vld [vmem:[%s8577_s10 + $0x200] sm:$0xff] }
 0xa58   : > { %5300 = vst.msk [vmem:[%s6367_s27 + $0x180] sm:$0xff] %vm5251_vm3, %v5171_v6  ;;  %4801 = vmax.xlane.f32.xlu2 %v4578_v13  ;;  %v4930_v6 = vld [vmem:[%s8577_s10 + $0x1f8] sm:$0xff]  ;;  %v4932_v13 = vld [vmem:[%s8577_s10 + $0x208] sm:$0xff] }
 0xa59   : > { %5302 = vst.msk [vmem:[%s6367_s27 + $0x190] sm:$0xff] %vm5251_vm3, %v5173_v17 }
 0xa5a   : > { %v4716_v45 = vpop.xlane.xlu1 %4715  ;;  %v4714_v7 = vpop.xlane.xlu0 %4713 }
 0xa5b   : > { %v5047_v26 = vadd.f32 %v4919_v63, %v4716_v45  ;;  %v5046_v14 = vadd.f32 %v4918_v56, %v4714_v7  ;;  %v4718_v58 = vpop.xlane.xlu2 %4717  ;;  %v4592_v7 = vld [vmem:[#allocation2 + $0x378] sm:$0xff] }
 0xa5c   : > { %v5048_v46 = vadd.f32 %v4920_v22, %v4718_v58 }
 0xa5d   : > { %v5175_v40 = vmax.f32 %v5047_v26, 0.0  ;;  %v5174_v16 = vmax.f32 %v5046_v14, 0.0  ;;  %v4591_v26 = vld [vmem:[#allocation2 + $0x250] sm:$0xff] }
 0xa5e   : > { %v5176_v47 = vmax.f32 %v5048_v46, 0.0 }
 0xa5f   : > { %5304 = vst.msk [vmem:[%s6367_s27 + $0x1a0] sm:$0xff] %vm5251_vm3, %v5175_v40  ;;  %4805 = vmax.xlane.f32.xlu1 %v4580_v51  ;;  %4803 = vmax.xlane.f32.xlu0 %v4579_v35  ;;  %v4593_v35 = vld [vmem:[#allocation2 + $0xb8] sm:$0xff]  ;;  %v4934_v40 = vld [vmem:[%s8577_s10 + $0x218] sm:$0xff] }
 0xa60   : > { %5303 = vst.msk [vmem:[%s6367_s27 + $0x198] sm:$0xff] %vm5251_vm3, %v5174_v16  ;;  %4807 = vmax.xlane.f32.xlu2 %v4581_v27  ;;  %v4933_v16 = vld [vmem:[%s8577_s10 + $0x210] sm:$0xff]  ;;  %v4935_v27 = vld [vmem:[%s8577_s10 + $0x220] sm:$0xff] }
 0xa61   : > { %5305 = vst.msk [vmem:[%s6367_s27 + $0x1a8] sm:$0xff] %vm5251_vm3, %v5176_v47 }
 0xa62   : > { %v4722_v28 = vpop.xlane.xlu1 %4721  ;;  %v4720_v59 = vpop.xlane.xlu0 %4719 }
 0xa63   : > { %v5050_v32 = vadd.f32 %v4922_v31, %v4722_v28  ;;  %v5049_v29 = vadd.f32 %v4921_v54, %v4720_v59  ;;  %v4724_v42 = vpop.xlane.xlu2 %4723  ;;  %v4595_v59 = vld [vmem:[#allocation2 + $0x78] sm:$0xff] }
 0xa64   : > { %v5051_v1 = vadd.f32 %v4923_v57, %v4724_v42 }
 0xa65   : > { %v5178_v30 = vmax.f32 %v5050_v32, 0.0  ;;  %v5177_v18 = vmax.f32 %v5049_v29, 0.0  ;;  %v4594_v32 = vld [vmem:[#allocation2 + $0x38] sm:$0xff] }
 0xa66   : > { %v5179_v2 = vmax.f32 %v5051_v1, 0.0 }
 0xa67   : > { %5307 = vst.msk [vmem:[%s6367_s27 + $0x1b8] sm:$0xff] %vm5251_vm3, %v5178_v30  ;;  %4811 = vmax.xlane.f32.xlu1 %v4583_v43  ;;  %4809 = vmax.xlane.f32.xlu0 %v4582_v39  ;;  %v4596_v39 = vld [vmem:[#allocation2 + $0x308] sm:$0xff] }
 0xa68   : > { %5306 = vst.msk [vmem:[%s6367_s27 + $0x1b0] sm:$0xff] %vm5251_vm3, %v5177_v18  ;;  %4813 = vmax.xlane.f32.xlu2 %v4584_v33  ;;  %v4937_v30 = vld [vmem:[%s8577_s10 + $0x230] sm:$0xff]  ;;  %v4936_v18 = vld [vmem:[%s8577_s10 + $0x228] sm:$0xff]  ;;  %v4938_v33 = vld [vmem:[%s8577_s10 + $0x238] sm:$0xff] }
 0xa69   : > { %5308 = vst.msk [vmem:[%s6367_s27 + $0x1c0] sm:$0xff] %vm5251_vm3, %v5179_v2 }
 0xa6a   : > { %v4728_v41 = vpop.xlane.xlu1 %4727  ;;  %v4726_v23 = vpop.xlane.xlu0 %4725 }
 0xa6b   : > { %v5053_v53 = vadd.f32 %v4925_v60, %v4728_v41  ;;  %v5052_v4 = vadd.f32 %v4924_v0, %v4726_v23  ;;  %v4730_v48 = vpop.xlane.xlu2 %4729  ;;  %v4598_v23 = vld [vmem:[#allocation2 + $0xc8] sm:$0xff] }
 0xa6c   : > { %v5054_v37 = vadd.f32 %v4926_v3, %v4730_v48 }
 0xa6d   : > { %v5181_v50 = vmax.f32 %v5053_v53, 0.0  ;;  %v5180_v34 = vmax.f32 %v5052_v4, 0.0  ;;  %v4597_v53 = vld [vmem:[#allocation2 + $0x370] sm:$0xff] }
 0xa6e   : > { %v5182_v12 = vmax.f32 %v5054_v37, 0.0 }
 0xa6f   : > { %5310 = vst.msk [vmem:[%s6367_s27 + $0x1d0] sm:$0xff] %vm5251_vm3, %v5181_v50  ;;  %4817 = vmax.xlane.f32.xlu1 %v4586_v9  ;;  %4815 = vmax.xlane.f32.xlu0 %v4585_v20  ;;  %v4599_v20 = vld [vmem:[#allocation2 + $0x278] sm:$0xff]  ;;  %v4940_v50 = vld [vmem:[%s8577_s10 + $0x248] sm:$0xff] }
 0xa70   : > { %5309 = vst.msk [vmem:[%s6367_s27 + $0x1c8] sm:$0xff] %vm5251_vm3, %v5180_v34  ;;  %4819 = vmax.xlane.f32.xlu2 %v4587_v19  ;;  %v4939_v34 = vld [vmem:[%s8577_s10 + $0x240] sm:$0xff]  ;;  %v4941_v19 = vld [vmem:[%s8577_s10 + $0x250] sm:$0xff] }
 0xa71   : > { %5311 = vst.msk [vmem:[%s6367_s27 + $0x1d8] sm:$0xff] %vm5251_vm3, %v5182_v12 }
 0xa72   : > { %v4734_v49 = vpop.xlane.xlu1 %4733  ;;  %v4732_v15 = vpop.xlane.xlu0 %4731 }
 0xa73   : > { %v5056_v62 = vadd.f32 %v4928_v8, %v4734_v49  ;;  %v5055_v5 = vadd.f32 %v4927_v24, %v4732_v15  ;;  %v4736_v36 = vpop.xlane.xlu2 %4735  ;;  %v4601_v15 = vld [vmem:[#allocation2 + $0x228] sm:$0xff] }
 0xa74   : > { %v5057_v38 = vadd.f32 %v4929_v21, %v4736_v36 }
 0xa75   : > { %v5184_v44 = vmax.f32 %v5056_v62, 0.0  ;;  %v5183_v52 = vmax.f32 %v5055_v5, 0.0  ;;  %v4600_v62 = vld [vmem:[#allocation2 + $0x360] sm:$0xff] }
 0xa76   : > { %v5185_v55 = vmax.f32 %v5057_v38, 0.0 }
 0xa77   : > { %5313 = vst.msk [vmem:[%s6367_s27 + $0x1e8] sm:$0xff] %vm5251_vm3, %v5184_v44  ;;  %4823 = vmax.xlane.f32.xlu1 %v4589_v11  ;;  %4821 = vmax.xlane.f32.xlu0 %v4588_v61  ;;  %v4602_v61 = vld [vmem:[#allocation2 + $0x348] sm:$0xff]  ;;  %v4943_v44 = vld [vmem:[%s8577_s10 + $0x260] sm:$0xff] }
 0xa78   : > { %5312 = vst.msk [vmem:[%s6367_s27 + $0x1e0] sm:$0xff] %vm5251_vm3, %v5183_v52  ;;  %4825 = vmax.xlane.f32.xlu2 %v4590_v25  ;;  %v4942_v52 = vld [vmem:[%s8577_s10 + $0x258] sm:$0xff]  ;;  %v4944_v25 = vld [vmem:[%s8577_s10 + $0x268] sm:$0xff] }
 0xa79   : > { %5314 = vst.msk [vmem:[%s6367_s27 + $0x1f0] sm:$0xff] %vm5251_vm3, %v5185_v55 }
 0xa7a   : > { %v4740_v17 = vpop.xlane.xlu1 %4739  ;;  %v4738_v63 = vpop.xlane.xlu0 %4737 }
 0xa7b   : > { %v5059_v56 = vadd.f32 %v4931_v10, %v4740_v17  ;;  %v5058_v22 = vadd.f32 %v4930_v6, %v4738_v63  ;;  %v4742_v45 = vpop.xlane.xlu2 %4741  ;;  %v4604_v63 = vld [vmem:[#allocation2 + $0xf8] sm:$0xff] }
 0xa7c   : > { %v5060_v14 = vadd.f32 %v4932_v13, %v4742_v45 }
 0xa7d   : > { %v5187_v58 = vmax.f32 %v5059_v56, 0.0  ;;  %v5186_v51 = vmax.f32 %v5058_v22, 0.0  ;;  %v4603_v56 = vld [vmem:[#allocation2 + $0x148] sm:$0xff] }
 0xa7e   : > { %v5188_v46 = vmax.f32 %v5060_v14, 0.0 }
 0xa7f   : > { %5316 = vst.msk [vmem:[%s6367_s27 + $0x200] sm:$0xff] %vm5251_vm3, %v5187_v58  ;;  %4829 = vmax.xlane.f32.xlu1 %v4592_v7  ;;  %4827 = vmax.xlane.f32.xlu0 %v4591_v26  ;;  %v4605_v26 = vld [vmem:[#allocation2 + $0x68] sm:$0xff]  ;;  %v4946_v58 = vld [vmem:[%s8577_s10 + $0x278] sm:$0xff] }
 0xa80   : > { %5315 = vst.msk [vmem:[%s6367_s27 + $0x1f8] sm:$0xff] %vm5251_vm3, %v5186_v51  ;;  %4831 = vmax.xlane.f32.xlu2 %v4593_v35  ;;  %v4945_v51 = vld [vmem:[%s8577_s10 + $0x270] sm:$0xff]  ;;  %v4947_v35 = vld [vmem:[%s8577_s10 + $0x280] sm:$0xff] }
 0xa81   : > { %5317 = vst.msk [vmem:[%s6367_s27 + $0x208] sm:$0xff] %vm5251_vm3, %v5188_v46 }
 0xa82   : > { %v4746_v47 = vpop.xlane.xlu1 %4745  ;;  %v4744_v31 = vpop.xlane.xlu0 %4743 }
 0xa83   : > { %v5062_v54 = vadd.f32 %v4934_v40, %v4746_v47  ;;  %v5061_v57 = vadd.f32 %v4933_v16, %v4744_v31  ;;  %v4748_v28 = vpop.xlane.xlu2 %4747  ;;  %v4607_v31 = vld [vmem:[#allocation2 + $0x298] sm:$0xff] }
 0xa84   : > { %v5063_v29 = vadd.f32 %v4935_v27, %v4748_v28 }
 0xa85   : > { %v5190_v42 = vmax.f32 %v5062_v54, 0.0  ;;  %v5189_v43 = vmax.f32 %v5061_v57, 0.0  ;;  %v4606_v54 = vld [vmem:[#allocation2] sm:$0xff] }
 0xa86   : > { %v5191_v1 = vmax.f32 %v5063_v29, 0.0 }
 0xa87   : > { %5319 = vst.msk [vmem:[%s6367_s27 + $0x218] sm:$0xff] %vm5251_vm3, %v5190_v42  ;;  %4835 = vmax.xlane.f32.xlu1 %v4595_v59  ;;  %4833 = vmax.xlane.f32.xlu0 %v4594_v32  ;;  %v4608_v32 = vld [vmem:[#allocation2 + $0x270] sm:$0xff]  ;;  %v4949_v42 = vld [vmem:[%s8577_s10 + $0x290] sm:$0xff] }
 0xa88   : > { %5318 = vst.msk [vmem:[%s6367_s27 + $0x210] sm:$0xff] %vm5251_vm3, %v5189_v43  ;;  %4837 = vmax.xlane.f32.xlu2 %v4596_v39  ;;  %v4948_v43 = vld [vmem:[%s8577_s10 + $0x288] sm:$0xff]  ;;  %v4950_v39 = vld [vmem:[%s8577_s10 + $0x298] sm:$0xff] }
 0xa89   : > { %5320 = vst.msk [vmem:[%s6367_s27 + $0x220] sm:$0xff] %vm5251_vm3, %v5191_v1 }
 0xa8a   : > { %v4752_v2 = vpop.xlane.xlu1 %4751  ;;  %v4750_v60 = vpop.xlane.xlu0 %4749 }
 0xa8b   : > { %v5065_v0 = vadd.f32 %v4937_v30, %v4752_v2  ;;  %v5064_v3 = vadd.f32 %v4936_v18, %v4750_v60  ;;  %v4754_v41 = vpop.xlane.xlu2 %4753  ;;  %v4610_v60 = vld [vmem:[#allocation2 + $0x190] sm:$0xff] }
 0xa8c   : > { %v5066_v4 = vadd.f32 %v4938_v33, %v4754_v41 }
 0xa8d   : > { %v5193_v48 = vmax.f32 %v5065_v0, 0.0  ;;  %v5192_v9 = vmax.f32 %v5064_v3, 0.0  ;;  %v4609_v0 = vld [vmem:[#allocation2 + $0x310] sm:$0xff] }
 0xa8e   : > { %v5194_v37 = vmax.f32 %v5066_v4, 0.0  ;;  %v4952_v4 = vld [vmem:[%s8577_s10 + $0x2a8] sm:$0xff] }
 0xa8f   : > { %5322 = vst.msk [vmem:[%s6367_s27 + $0x230] sm:$0xff] %vm5251_vm3, %v5193_v48  ;;  %4841 = vmax.xlane.f32.xlu1 %v4598_v23  ;;  %4839 = vmax.xlane.f32.xlu0 %v4597_v53  ;;  %v4951_v48 = vld [vmem:[%s8577_s10 + $0x2a0] sm:$0xff] }
 0xa90   : > { %5321 = vst.msk [vmem:[%s6367_s27 + $0x228] sm:$0xff] %vm5251_vm3, %v5192_v9  ;;  %4843 = vmax.xlane.f32.xlu2 %v4599_v20  ;;  %v4953_v9 = vld [vmem:[%s8577_s10 + $0x2b0] sm:$0xff] }
 0xa91   : > { %5323 = vst.msk [vmem:[%s6367_s27 + $0x238] sm:$0xff] %vm5251_vm3, %v5194_v37 }
 0xa92   : > { %v4758_v12 = vpop.xlane.xlu1 %4757  ;;  %v4756_v8 = vpop.xlane.xlu0 %4755 }
 0xa93   : > { %v5068_v24 = vadd.f32 %v4940_v50, %v4758_v12  ;;  %v5067_v21 = vadd.f32 %v4939_v34, %v4756_v8  ;;  %v4760_v49 = vpop.xlane.xlu2 %4759 }
 0xa94   : > { %v5069_v5 = vadd.f32 %v4941_v19, %v4760_v49  ;;  %v4955_v49 = vld [vmem:[%s8577_s10 + $0x2c0] sm:$0xff] }
 0xa95   : > { %v5196_v36 = vmax.f32 %v5068_v24, 0.0  ;;  %v5195_v11 = vmax.f32 %v5067_v21, 0.0 }
 0xa96   : > { %v5197_v38 = vmax.f32 %v5069_v5, 0.0 }
 0xa97   : > { %5325 = vst.msk [vmem:[%s6367_s27 + $0x248] sm:$0xff] %vm5251_vm3, %v5196_v36  ;;  %4847 = vmax.xlane.f32.xlu1 %v4601_v15  ;;  %4845 = vmax.xlane.f32.xlu0 %v4600_v62  ;;  %v4954_v15 = vld [vmem:[%s8577_s10 + $0x2b8] sm:$0xff]  ;;  %v4956_v62 = vld [vmem:[%s8577_s10 + $0x2c8] sm:$0xff] }
 0xa98   : > { %5324 = vst.msk [vmem:[%s6367_s27 + $0x240] sm:$0xff] %vm5251_vm3, %v5195_v11  ;;  %4849 = vmax.xlane.f32.xlu2 %v4602_v61 }
 0xa99   : > { %5326 = vst.msk [vmem:[%s6367_s27 + $0x250] sm:$0xff] %vm5251_vm3, %v5197_v38 }
 0xa9a   : > { %v4764_v55 = vpop.xlane.xlu1 %4763  ;;  %v4762_v10 = vpop.xlane.xlu0 %4761 }
 0xa9b   : > { %v5071_v6 = vadd.f32 %v4943_v44, %v4764_v55  ;;  %v5070_v13 = vadd.f32 %v4942_v52, %v4762_v10  ;;  %v4766_v17 = vpop.xlane.xlu2 %4765  ;;  %v4958_v10 = vld [vmem:[%s8577_s10 + $0x2d8] sm:$0xff] }
 0xa9c   : > { %v5072_v22 = vadd.f32 %v4944_v25, %v4766_v17 }
 0xa9d   : > { %v5199_v45 = vmax.f32 %v5071_v6, 0.0  ;;  %v5198_v7 = vmax.f32 %v5070_v13, 0.0  ;;  %v4957_v6 = vld [vmem:[%s8577_s10 + $0x2d0] sm:$0xff]  ;;  %v4959_v13 = vld [vmem:[%s8577_s10 + $0x2e0] sm:$0xff] }
 0xa9e   : > { %v5200_v14 = vmax.f32 %v5072_v22, 0.0 }
 0xa9f   : > { %5328 = vst.msk [vmem:[%s6367_s27 + $0x260] sm:$0xff] %vm5251_vm3, %v5199_v45  ;;  %4853 = vmax.xlane.f32.xlu1 %v4604_v63  ;;  %4851 = vmax.xlane.f32.xlu0 %v4603_v56 }
 0xaa0   : > { %5327 = vst.msk [vmem:[%s6367_s27 + $0x258] sm:$0xff] %vm5251_vm3, %v5198_v7  ;;  %4855 = vmax.xlane.f32.xlu2 %v4605_v26 }
 0xaa1   : > { %5329 = vst.msk [vmem:[%s6367_s27 + $0x268] sm:$0xff] %vm5251_vm3, %v5200_v14 }
 0xaa2   : > { %v4770_v46 = vpop.xlane.xlu1 %4769  ;;  %v4768_v40 = vpop.xlane.xlu0 %4767 }
 0xaa3   : > { %v5074_v16 = vadd.f32 %v4946_v58, %v4770_v46  ;;  %v5073_v27 = vadd.f32 %v4945_v51, %v4768_v40  ;;  %v4772_v47 = vpop.xlane.xlu2 %4771  ;;  %v4961_v51 = vld [vmem:[%s8577_s10 + $0x2f0] sm:$0xff]  ;;  %v4962_v46 = vld [vmem:[%s8577_s10 + $0x2f8] sm:$0xff] }
 0xaa4   : > { %v5075_v57 = vadd.f32 %v4947_v35, %v4772_v47  ;;  %v4960_v35 = vld [vmem:[%s8577_s10 + $0x2e8] sm:$0xff] }
 0xaa5   : > { %v5202_v28 = vmax.f32 %v5074_v16, 0.0  ;;  %v5201_v59 = vmax.f32 %v5073_v27, 0.0 }
 0xaa6   : > { %v5203_v29 = vmax.f32 %v5075_v57, 0.0 }
 0xaa7   : > { %5331 = vst.msk [vmem:[%s6367_s27 + $0x278] sm:$0xff] %vm5251_vm3, %v5202_v28  ;;  %4859 = vmax.xlane.f32.xlu1 %v4607_v31  ;;  %4857 = vmax.xlane.f32.xlu0 %v4606_v54 }
 0xaa8   : > { %5330 = vst.msk [vmem:[%s6367_s27 + $0x270] sm:$0xff] %vm5251_vm3, %v5201_v59  ;;  %4861 = vmax.xlane.f32.xlu2 %v4608_v32  ;;  %v4964_v32 = vld [vmem:[%s8577_s10 + $0x308] sm:$0xff] }
 0xaa9   : > { %5332 = vst.msk [vmem:[%s6367_s27 + $0x280] sm:$0xff] %vm5251_vm3, %v5203_v29  ;;  %v4963_v29 = vld [vmem:[%s8577_s10 + $0x300] sm:$0xff] }
 0xaaa   : > { %v4776_v1 = vpop.xlane.xlu1 %4775  ;;  %v4774_v30 = vpop.xlane.xlu0 %4773 }
 0xaab   : > { %v5077_v18 = vadd.f32 %v4949_v42, %v4776_v1  ;;  %v5076_v33 = vadd.f32 %v4948_v43, %v4774_v30  ;;  %v4778_v2 = vpop.xlane.xlu2 %4777  ;;  %v4965_v42 = vld [vmem:[%s8577_s10 + $0x310] sm:$0xff] }
 0xaac   : > { %v5078_v3 = vadd.f32 %v4950_v39, %v4778_v2 }
 0xaad   : > { %v5205_v41 = vmax.f32 %v5077_v18, 0.0  ;;  %v5204_v23 = vmax.f32 %v5076_v33, 0.0 }
 0xaae   : > { %v5206_v53 = vmax.f32 %v5078_v3, 0.0  ;;  %v4967_v3 = vld [vmem:[%s8577_s10 + $0x320] sm:$0xff] }
 0xaaf   : > { %5334 = vst.msk [vmem:[%s6367_s27 + $0x290] sm:$0xff] %vm5251_vm3, %v5205_v41  ;;  %4865 = vmax.xlane.f32.xlu1 %v4610_v60  ;;  %4863 = vmax.xlane.f32.xlu0 %v4609_v0  ;;  %v4966_v41 = vld [vmem:[%s8577_s10 + $0x318] sm:$0xff] }
 0xab0   : > { %5333 = vst.msk [vmem:[%s6367_s27 + $0x288] sm:$0xff] %vm5251_vm3, %v5204_v23  ;;  %v4968_v23 = vld [vmem:[%s8577_s10 + $0x328] sm:$0xff] }
 0xab1   : > { %5335 = vst.msk [vmem:[%s6367_s27 + $0x298] sm:$0xff] %vm5251_vm3, %v5206_v53 }
 0xab2   : > { %v4782_v20 = vpop.xlane.xlu1 %4781  ;;  %v4780_v37 = vpop.xlane.xlu0 %4779 }
 0xab3   : > { %v5080_v50 = vadd.f32 %v4952_v4, %v4782_v20  ;;  %v5079_v34 = vadd.f32 %v4951_v48, %v4780_v37  ;;  %v4784_v19 = vpop.xlane.xlu2 %4783 }
 0xab4   : > { %v5081_v12 = vadd.f32 %v4953_v9, %v4784_v19 }
 0xab5   : > { %v5208_v8 = vmax.f32 %v5080_v50, 0.0  ;;  %v5207_v24 = vmax.f32 %v5079_v34, 0.0 }
 0xab6   : > { %v5209_v21 = vmax.f32 %v5081_v12, 0.0  ;;  %v4970_v12 = vld [vmem:[%s8577_s10 + $0x338] sm:$0xff] }
 0xab7   : > { %5337 = vst.msk [vmem:[%s6367_s27 + $0x2a8] sm:$0xff] %vm5251_vm3, %v5208_v8  ;;  %v4969_v8 = vld [vmem:[%s8577_s10 + $0x330] sm:$0xff] }
 0xab8   : > { %5336 = vst.msk [vmem:[%s6367_s27 + $0x2a0] sm:$0xff] %vm5251_vm3, %v5207_v24  ;;  %v4971_v24 = vld [vmem:[%s8577_s10 + $0x340] sm:$0xff] }
 0xab9   : > { %5338 = vst.msk [vmem:[%s6367_s27 + $0x2b0] sm:$0xff] %vm5251_vm3, %v5209_v21 }
 0xaba   : > { %v4788_v5 = vpop.xlane.xlu1 %4787  ;;  %v4786_v36 = vpop.xlane.xlu0 %4785 }
 0xabb   : > { %v5083_v11 = vadd.f32 %v4955_v49, %v4788_v5  ;;  %v5082_v61 = vadd.f32 %v4954_v15, %v4786_v36  ;;  %v4790_v38 = vpop.xlane.xlu2 %4789 }
 0xabc   : > { %v5084_v44 = vadd.f32 %v4956_v62, %v4790_v38 }
 0xabd   : > { %v5211_v52 = vmax.f32 %v5083_v11, 0.0  ;;  %v5210_v25 = vmax.f32 %v5082_v61, 0.0 }
 0xabe   : > { %v5212_v55 = vmax.f32 %v5084_v44, 0.0  ;;  %v4973_v44 = vld [vmem:[%s8577_s10 + $0x350] sm:$0xff] }
 0xabf   : > { %5340 = vst.msk [vmem:[%s6367_s27 + $0x2c0] sm:$0xff] %vm5251_vm3, %v5211_v52  ;;  %v4972_v52 = vld [vmem:[%s8577_s10 + $0x348] sm:$0xff] }
 0xac0   : > { %5339 = vst.msk [vmem:[%s6367_s27 + $0x2b8] sm:$0xff] %vm5251_vm3, %v5210_v25  ;;  %v4974_v25 = vld [vmem:[%s8577_s10 + $0x358] sm:$0xff] }
 0xac1   : > { %5341 = vst.msk [vmem:[%s6367_s27 + $0x2c8] sm:$0xff] %vm5251_vm3, %v5212_v55 }
 0xac2   : > { %v4794_v17 = vpop.xlane.xlu1 %4793  ;;  %v4792_v63 = vpop.xlane.xlu0 %4791 }
 0xac3   : > { %v5086_v56 = vadd.f32 %v4958_v10, %v4794_v17  ;;  %v5085_v22 = vadd.f32 %v4957_v6, %v4792_v63  ;;  %v4796_v45 = vpop.xlane.xlu2 %4795 }
 0xac4   : > { %v5087_v7 = vadd.f32 %v4959_v13, %v4796_v45 }
 0xac5   : > { %v5214_v26 = vmax.f32 %v5086_v56, 0.0  ;;  %v5213_v14 = vmax.f32 %v5085_v22, 0.0 }
 0xac6   : > { %v5215_v58 = vmax.f32 %v5087_v7, 0.0  ;;  %v4976_v7 = vld [vmem:[%s8577_s10 + $0x368] sm:$0xff] }
 0xac7   : > { %5343 = vst.msk [vmem:[%s6367_s27 + $0x2d8] sm:$0xff] %vm5251_vm3, %v5214_v26  ;;  %v4975_v26 = vld [vmem:[%s8577_s10 + $0x360] sm:$0xff] }
 0xac8   : > { %5342 = vst.msk [vmem:[%s6367_s27 + $0x2d0] sm:$0xff] %vm5251_vm3, %v5213_v14  ;;  %v4977_v14 = vld [vmem:[%s8577_s10 + $0x370] sm:$0xff] }
 0xac9   : > { %5344 = vst.msk [vmem:[%s6367_s27 + $0x2e0] sm:$0xff] %vm5251_vm3, %v5215_v58 }
 0xaca   : > { %v4800_v40 = vpop.xlane.xlu1 %4799  ;;  %v4798_v16 = vpop.xlane.xlu0 %4797 }
 0xacb   : > { %v5089_v27 = vadd.f32 %v4961_v51, %v4800_v40  ;;  %v5088_v47 = vadd.f32 %v4960_v35, %v4798_v16  ;;  %v4802_v31 = vpop.xlane.xlu2 %4801 }
 0xacc   : > { %v5090_v54 = vadd.f32 %v4962_v46, %v4802_v31 }
 0xacd   : > { %v5217_v57 = vmax.f32 %v5089_v27, 0.0  ;;  %v5216_v28 = vmax.f32 %v5088_v47, 0.0 }
 0xace   : > { %v5218_v59 = vmax.f32 %v5090_v54, 0.0  ;;  %v4979_v54 = vld [vmem:[%s8577_s10 + $0x380] sm:$0xff] }
 0xacf   : > { %5346 = vst.msk [vmem:[%s6367_s27 + $0x2f0] sm:$0xff] %vm5251_vm3, %v5217_v57  ;;  %v4978_v57 = vld [vmem:[%s8577_s10 + $0x378] sm:$0xff] }
 0xad0   : > { %5345 = vst.msk [vmem:[%s6367_s27 + $0x2e8] sm:$0xff] %vm5251_vm3, %v5216_v28  ;;  %v4980_v28 = vld [vmem:[%s8577_s10 + $0x388] sm:$0xff] }
 0xad1   : > { %5347 = vst.msk [vmem:[%s6367_s27 + $0x2f8] sm:$0xff] %vm5251_vm3, %v5218_v59 }
 0xad2   : > { %v4806_v43 = vpop.xlane.xlu1 %4805  ;;  %v4804_v39 = vpop.xlane.xlu0 %4803 }
 0xad3   : > { %v5092_v1 = vadd.f32 %v4964_v32, %v4806_v43  ;;  %v5091_v30 = vadd.f32 %v4963_v29, %v4804_v39  ;;  %v4808_v18 = vpop.xlane.xlu2 %4807 }
 0xad4   : > { %v5093_v33 = vadd.f32 %v4965_v42, %v4808_v18 }
 0xad5   : > { %v5220_v2 = vmax.f32 %v5092_v1, 0.0  ;;  %v5219_v60 = vmax.f32 %v5091_v30, 0.0 }
 0xad6   : > { %v5221_v0 = vmax.f32 %v5093_v33, 0.0  ;;  %v4982_v33 = vld [vmem:[%s8577_s10 + $0x398] sm:$0xff] }
 0xad7   : > { %5349 = vst.msk [vmem:[%s6367_s27 + $0x308] sm:$0xff] %vm5251_vm3, %v5220_v2  ;;  %v4981_v2 = vld [vmem:[%s8577_s10 + $0x390] sm:$0xff] }
 0xad8   : > { %5348 = vst.msk [vmem:[%s6367_s27 + $0x300] sm:$0xff] %vm5251_vm3, %v5219_v60  ;;  %v4983_v60 = vld [vmem:[%s8577_s10 + $0x3a0] sm:$0xff] }
 0xad9   : > { %5350 = vst.msk [vmem:[%s6367_s27 + $0x310] sm:$0xff] %vm5251_vm3, %v5221_v0 }
 0xada   : > { %v4812_v53 = vpop.xlane.xlu1 %4811  ;;  %v4810_v4 = vpop.xlane.xlu0 %4809 }
 0xadb   : > { %v5095_v48 = vadd.f32 %v4967_v3, %v4812_v53  ;;  %v5094_v9 = vadd.f32 %v4966_v41, %v4810_v4  ;;  %v4814_v20 = vpop.xlane.xlu2 %4813 }
 0xadc   : > { %v5096_v37 = vadd.f32 %v4968_v23, %v4814_v20 }
 0xadd   : > { %v5223_v50 = vmax.f32 %v5095_v48, 0.0  ;;  %v5222_v34 = vmax.f32 %v5094_v9, 0.0 }
 0xade   : > { %v5224_v19 = vmax.f32 %v5096_v37, 0.0  ;;  %v4985_v37 = vld [vmem:[%s8577_s10 + $0x3b0] sm:$0xff] }
 0xadf   : > { %5352 = vst.msk [vmem:[%s6367_s27 + $0x320] sm:$0xff] %vm5251_vm3, %v5223_v50  ;;  %v4984_v50 = vld [vmem:[%s8577_s10 + $0x3a8] sm:$0xff] }
 0xae0   : > { %5351 = vst.msk [vmem:[%s6367_s27 + $0x318] sm:$0xff] %vm5251_vm3, %v5222_v34  ;;  %v4986_v34 = vld [vmem:[%s8577_s10 + $0x3b8] sm:$0xff] }
 0xae1   : > { %5353 = vst.msk [vmem:[%s6367_s27 + $0x328] sm:$0xff] %vm5251_vm3, %v5224_v19 }
 0xae2   : > { %v4818_v21 = vpop.xlane.xlu1 %4817  ;;  %v4816_v49 = vpop.xlane.xlu0 %4815 }
 0xae3   : > { %v5098_v15 = vadd.f32 %v4970_v12, %v4818_v21  ;;  %v5097_v62 = vadd.f32 %v4969_v8, %v4816_v49  ;;  %v4820_v5 = vpop.xlane.xlu2 %4819 }
 0xae4   : > { %v5099_v36 = vadd.f32 %v4971_v24, %v4820_v5 }
 0xae5   : > { %v5226_v11 = vmax.f32 %v5098_v15, 0.0  ;;  %v5225_v61 = vmax.f32 %v5097_v62, 0.0 }
 0xae6   : > { %v5227_v38 = vmax.f32 %v5099_v36, 0.0  ;;  %v4988_v36 = vld [vmem:[%s8577_s10 + $0x3c8] sm:$0xff] }
 0xae7   : > { %5355 = vst.msk [vmem:[%s6367_s27 + $0x338] sm:$0xff] %vm5251_vm3, %v5226_v11  ;;  %v4987_v11 = vld [vmem:[%s8577_s10 + $0x3c0] sm:$0xff] }
 0xae8   : > { %5354 = vst.msk [vmem:[%s6367_s27 + $0x330] sm:$0xff] %vm5251_vm3, %v5225_v61  ;;  %v4989_v61 = vld [vmem:[%s8577_s10 + $0x3d0] sm:$0xff] }
 0xae9   : > { %5356 = vst.msk [vmem:[%s6367_s27 + $0x340] sm:$0xff] %vm5251_vm3, %v5227_v38 }
 0xaea   : > { %v4824_v55 = vpop.xlane.xlu1 %4823  ;;  %v4822_v10 = vpop.xlane.xlu0 %4821 }
 0xaeb   : > { %v5101_v6 = vadd.f32 %v4973_v44, %v4824_v55  ;;  %v5100_v13 = vadd.f32 %v4972_v52, %v4822_v10  ;;  %v4826_v17 = vpop.xlane.xlu2 %4825 }
 0xaec   : > { %v5102_v63 = vadd.f32 %v4974_v25, %v4826_v17 }
 0xaed   : > { %v5229_v56 = vmax.f32 %v5101_v6, 0.0  ;;  %v5228_v22 = vmax.f32 %v5100_v13, 0.0 }
 0xaee   : > { %v5230_v45 = vmax.f32 %v5102_v63, 0.0  ;;  %v4991_v63 = vld [vmem:[%s8577_s10 + $0x3e0] sm:$0xff] }
 0xaef   : > { %5358 = vst.msk [vmem:[%s6367_s27 + $0x350] sm:$0xff] %vm5251_vm3, %v5229_v56  ;;  %v4990_v56 = vld [vmem:[%s8577_s10 + $0x3d8] sm:$0xff] }
 0xaf0   : > { %5357 = vst.msk [vmem:[%s6367_s27 + $0x348] sm:$0xff] %vm5251_vm3, %v5228_v22  ;;  %v4992_v22 = vld [vmem:[%s8577_s10 + $0x3e8] sm:$0xff] }
 0xaf1   : > { %5359 = vst.msk [vmem:[%s6367_s27 + $0x358] sm:$0xff] %vm5251_vm3, %v5230_v45 }
 0xaf2   : > { %v4830_v58 = vpop.xlane.xlu1 %4829  ;;  %v4828_v51 = vpop.xlane.xlu0 %4827 }
 0xaf3   : > { %v5104_v35 = vadd.f32 %v4976_v7, %v4830_v58  ;;  %v5103_v46 = vadd.f32 %v4975_v26, %v4828_v51  ;;  %v4832_v40 = vpop.xlane.xlu2 %4831 }
 0xaf4   : > { %v5105_v16 = vadd.f32 %v4977_v14, %v4832_v40 }
 0xaf5   : > { %v5232_v27 = vmax.f32 %v5104_v35, 0.0  ;;  %v5231_v47 = vmax.f32 %v5103_v46, 0.0 }
 0xaf6   : > { %v5233_v31 = vmax.f32 %v5105_v16, 0.0  ;;  %v4994_v16 = vld [vmem:[%s8577_s10 + $0x3f8] sm:$0xff] }
 0xaf7   : > { %5361 = vst.msk [vmem:[%s6367_s27 + $0x368] sm:$0xff] %vm5251_vm3, %v5232_v27  ;;  %v4993_v27 = vld [vmem:[%s8577_s10 + $0x3f0] sm:$0xff] }
 0xaf8   : > { %5360 = vst.msk [vmem:[%s6367_s27 + $0x360] sm:$0xff] %vm5251_vm3, %v5231_v47 }
 0xaf9   : > { %5362 = vst.msk [vmem:[%s6367_s27 + $0x370] sm:$0xff] %vm5251_vm3, %v5233_v31 }
 0xafa   : > { %v4836_v59 = vpop.xlane.xlu1 %4835  ;;  %v4834_v32 = vpop.xlane.xlu0 %4833 }
 0xafb   : > { %v5107_v29 = vadd.f32 %v4979_v54, %v4836_v59  ;;  %v5106_v42 = vadd.f32 %v4978_v57, %v4834_v32  ;;  %v4838_v43 = vpop.xlane.xlu2 %4837 }
 0xafc   : > { %v5108_v39 = vadd.f32 %v4980_v28, %v4838_v43 }
 0xafd   : > { %v5235_v1 = vmax.f32 %v5107_v29, 0.0  ;;  %v5234_v30 = vmax.f32 %v5106_v42, 0.0 }
 0xafe   : > { %v5236_v18 = vmax.f32 %v5108_v39, 0.0 }
 0xaff   : > { %5364 = vst.msk [vmem:[%s6367_s27 + $0x380] sm:$0xff] %vm5251_vm3, %v5235_v1 }
 0xb00   : > { %5363 = vst.msk [vmem:[%s6367_s27 + $0x378] sm:$0xff] %vm5251_vm3, %v5234_v30 }
 0xb01   : > { %5365 = vst.msk [vmem:[%s6367_s27 + $0x388] sm:$0xff] %vm5251_vm3, %v5236_v18 }
 0xb02   : > { %v4842_v0 = vpop.xlane.xlu1 %4841  ;;  %v4840_v3 = vpop.xlane.xlu0 %4839 }
 0xb03   : > { %v5110_v41 = vadd.f32 %v4982_v33, %v4842_v0  ;;  %v5109_v23 = vadd.f32 %v4981_v2, %v4840_v3  ;;  %v4844_v53 = vpop.xlane.xlu2 %4843 }
 0xb04   : > { %v5111_v4 = vadd.f32 %v4983_v60, %v4844_v53 }
 0xb05   : > { %v5238_v48 = vmax.f32 %v5110_v41, 0.0  ;;  %v5237_v9 = vmax.f32 %v5109_v23, 0.0 }
 0xb06   : > { %v5239_v20 = vmax.f32 %v5111_v4, 0.0 }
 0xb07   : > { %5367 = vst.msk [vmem:[%s6367_s27 + $0x398] sm:$0xff] %vm5251_vm3, %v5238_v48 }
 0xb08   : > { %5366 = vst.msk [vmem:[%s6367_s27 + $0x390] sm:$0xff] %vm5251_vm3, %v5237_v9 }
 0xb09   : > { %5368 = vst.msk [vmem:[%s6367_s27 + $0x3a0] sm:$0xff] %vm5251_vm3, %v5239_v20 }
 0xb0a   : > { %v4848_v19 = vpop.xlane.xlu1 %4847  ;;  %v4846_v12 = vpop.xlane.xlu0 %4845 }
 0xb0b   : > { %v5113_v8 = vadd.f32 %v4985_v37, %v4848_v19  ;;  %v5112_v24 = vadd.f32 %v4984_v50, %v4846_v12  ;;  %v4850_v21 = vpop.xlane.xlu2 %4849 }
 0xb0c   : > { %v5114_v49 = vadd.f32 %v4986_v34, %v4850_v21 }
 0xb0d   : > { %v5241_v15 = vmax.f32 %v5113_v8, 0.0  ;;  %v5240_v62 = vmax.f32 %v5112_v24, 0.0 }
 0xb0e   : > { %v5242_v5 = vmax.f32 %v5114_v49, 0.0 }
 0xb0f   : > { %5370 = vst.msk [vmem:[%s6367_s27 + $0x3b0] sm:$0xff] %vm5251_vm3, %v5241_v15 }
 0xb10   : > { %5369 = vst.msk [vmem:[%s6367_s27 + $0x3a8] sm:$0xff] %vm5251_vm3, %v5240_v62 }
 0xb11   : > { %5371 = vst.msk [vmem:[%s6367_s27 + $0x3b8] sm:$0xff] %vm5251_vm3, %v5242_v5 }
 0xb12   : > { %v4854_v38 = vpop.xlane.xlu1 %4853  ;;  %v4852_v44 = vpop.xlane.xlu0 %4851 }
 0xb13   : > { %v5116_v52 = vadd.f32 %v4988_v36, %v4854_v38  ;;  %v5115_v25 = vadd.f32 %v4987_v11, %v4852_v44  ;;  %v4856_v55 = vpop.xlane.xlu2 %4855 }
 0xb14   : > { %v5117_v10 = vadd.f32 %v4989_v61, %v4856_v55 }
 0xb15   : > { %v5244_v6 = vmax.f32 %v5116_v52, 0.0  ;;  %v5243_v13 = vmax.f32 %v5115_v25, 0.0 }
 0xb16   : > { %v5245_v17 = vmax.f32 %v5117_v10, 0.0 }
 0xb17   : > { %5373 = vst.msk [vmem:[%s6367_s27 + $0x3c8] sm:$0xff] %vm5251_vm3, %v5244_v6 }
 0xb18   : > { %5372 = vst.msk [vmem:[%s6367_s27 + $0x3c0] sm:$0xff] %vm5251_vm3, %v5243_v13 }
 0xb19   : > { %5374 = vst.msk [vmem:[%s6367_s27 + $0x3d0] sm:$0xff] %vm5251_vm3, %v5245_v17 }
 0xb1a   : > { %v4860_v45 = vpop.xlane.xlu1 %4859  ;;  %v4858_v7 = vpop.xlane.xlu0 %4857 }
 0xb1b   : > { %v5119_v26 = vadd.f32 %v4991_v63, %v4860_v45  ;;  %v5118_v14 = vadd.f32 %v4990_v56, %v4858_v7  ;;  %v4862_v58 = vpop.xlane.xlu2 %4861 }
 0xb1c   : > { %v5120_v51 = vadd.f32 %v4992_v22, %v4862_v58 }
 0xb1d   : > { %v5247_v35 = vmax.f32 %v5119_v26, 0.0  ;;  %v5246_v46 = vmax.f32 %v5118_v14, 0.0 }
 0xb1e   : > { %v5248_v40 = vmax.f32 %v5120_v51, 0.0 }
 0xb1f   : > { %5376 = vst.msk [vmem:[%s6367_s27 + $0x3e0] sm:$0xff] %vm5251_vm3, %v5247_v35 }
 0xb20   : > { %5375 = vst.msk [vmem:[%s6367_s27 + $0x3d8] sm:$0xff] %vm5251_vm3, %v5246_v46 }
 0xb21   : > { %5377 = vst.msk [vmem:[%s6367_s27 + $0x3e8] sm:$0xff] %vm5251_vm3, %v5248_v40 }
 0xb22   : > { %v4866_v47 = vpop.xlane.xlu1 %4865  ;;  %v4864_v31 = vpop.xlane.xlu0 %4863 }
 0xb23   : > { %v5122_v54 = vadd.f32 %v4994_v16, %v4866_v47  ;;  %v5121_v57 = vadd.f32 %v4993_v27, %v4864_v31 }
 0xb25   : > { %v5250_v28 = vmax.f32 %v5122_v54, 0.0  ;;  %v5249_v59 = vmax.f32 %v5121_v57, 0.0 }
 0xb27   : > { %5379 = vst.msk [vmem:[%s6367_s27 + $0x3f8] sm:$0xff] %vm5251_vm3, %v5250_v28 }
 0xb28   : > { %5378 = vst.msk [vmem:[%s6367_s27 + $0x3f0] sm:$0xff] %vm5251_vm3, %v5249_v59 }
 0xb29 PF: > { %s5945_s19 = sshll.u32 %s6194_s25, 6  ;;  %s5400_s13 = sshll.u32 %s6690_s15, 4  ;;  %s5401_s13 = int_to_ptr.vmem [resolvable:$true] %s5400_s13 }
 0xb2a   : > { %s5397_s20 = sadd.s32 %s5945_s19, %s6355_s17  ;;  %s8890_s14 = sld [smem:[#allocation98_spill]] }
 0xb2b   : > { %s5946_s24 = sshll.u32 %s5397_s20, 3  ;;  %s5381_s11 = scalar_lea.sflag [#allocation4], %s430_s30 }
 0xb30   : > { %s5399_s23 = scalar_lea.hbm %s8890_s14, %s5946_s24  ;;  %s6132_s15 = scalar_lea.hbm %s8890_s14, 1024 }
 0xb31   : > { %s5402_s28 = sshll.u32 %s5399_s23, 4  ;;  %s5403_s28 = int_to_ptr.hbm [resolvable:$true] %s5402_s28 }
 0xb32   : > { %s6126_s27 = sshra.s32 %s5403_s28, 4  ;;  %s6127_s27 = int_to_ptr.hbm [resolvable:$true] %s6126_s27 }
 0xb33   : > { %s6128_s16 = scalar_lea.hbm %s6127_s27, 256  ;;  %p6133_p7 = scmp.lt.s32.totalorder %s6127_s27, %s8890_s14 }
 0xb34   : > { %p6129_p4 = scmp.ne.s32.totalorder %s6127_s27, %s6128_s16  ;;  %p6134_p9 = scmp.lt.s32.totalorder %s6132_s15, %s6128_s16 }
 0xb36   : > { %p6130_p5 = pnand %p6129_p4, %p6328_p3  ;;  %p6135_p10 = por %p6134_p9, %p6133_p7 }
 0xb38   : > { %p6131_p6 = pneg %p6130_p5 }
 0xb3a   : > { %p6136_p11 = pnand %p6135_p10, %p6131_p6 }
 0xb3c   : > { %6139 = shalt.err (!%p6136_p11)
}
 0xb3d   : > { %s6209_s30 = smov 512   ;;  %s6210_s20 = smov 1024  }
 0xb3e   : > { %s6211_s24 = smov 32  }
 0xb3f   : > { %6034 = dma.vmem_to_hbm [thread:$0]  (%p6328_p3), %s5401_s13, 4096, %s5403_s28, %s5381_s11, %s6209_s30, %s6210_s20, %s6211_s24  }
 0xb40 PF: > { %s8891_s26 = sld [smem:[#allocation10_spill]] }
 0xb41   : > { %s8892_s18 = sld [smem:[#allocation6_spill]] }
 0xb46   : > { %p6040_p12 = scmp.ge.s32.totalorder %s8891_s26, 2 }
 0xb47   : > { %s5420_s25 = sand.u32 1, %s8892_s18  }
 0xb48   : > { %p6037_p13 = pnand %p6040_p12, %p6337_p8  ;;  %s5421_s27 = scalar_lea.sflag [#allocation4], %s5420_s25 }
 0xb4a   : > { %p6038_p0 = pneg %p6037_p13 }
 0xb4c   : > { %6173 = dma.done.wait (%p6038_p0), %s5421_s27, 4096  }
 0xb4d   : > { %6175 = vsyncadd (%p6038_p0), %s5421_s27, 4294963200  ;;  %s26_s28 = sadd.s32 1, %s8891_s26   ;;  %s8894_s16 = sld [smem:[#allocation7_spill]] }
 0xb4e   : > { %p23_p1 = scmp.ge.s32.totalorder %s26_s28, 6   ;;  %s8895_s23 = sld [smem:[#allocation15_spill]] }
 0xb4f   : > { %s8896_s24 = sld [smem:[#allocation8_spill]]  ;;  %s8900_s21 = smov %s6182_s22 }
 0xb50   : > { %s8897_s25 = sld [smem:[#allocation9_spill]]  ;;  %25 = sbr.rel (!%p23_p1) target bundleno = 7 (0x7), region = 124 }
 0xb51   : > { %s8898_s26 = sld [smem:[#allocation11_spill]] }
 0xb52   : > { %s8899_s27 = sld [smem:[#allocation13_spill]] }
 0xb53   : > { %s8901_s22 = smov %s8894_s16 }
 0xb55   :  { %5435 = vsyncpa [#allocation4], 1 }
 0xb56   :  { %5437 = vsyncpa [#allocation4 + $0x1], 1 }

</bundles_post_ra>
